<compile_context>
chip_gen: v6e
topology: v6e:2x2x1
jax: 0.10.0
libtpu: 0.0.40
codegen_flags: <defaults>
</compile_context>

<pallas_src>
import math
import functools

import jax
import jax.numpy as jnp
from jax.experimental import pallas as pl
from jax.experimental.pallas import tpu as pltpu


# ----------------------------------------------------------------------------
# Small helpers
# ----------------------------------------------------------------------------
def _round_up(x, m):
    return ((x + m - 1) // m) * m


def _full_spec(shape):
    nd = len(shape)
    return pl.BlockSpec(shape, lambda i, _nd=nd: (0,) * _nd)


def _pcall(kernel, inputs, out_shape):
    return pl.pallas_call(
        kernel,
        grid=(1,),
        in_specs=[_full_spec(a.shape) for a in inputs],
        out_specs=_full_spec(out_shape.shape),
        out_shape=out_shape,
        compiler_params=pltpu.CompilerParams(dimension_semantics=("arbitrary",)),
    )(*inputs)


# ----------------------------------------------------------------------------
# Single fused model kernel
# ----------------------------------------------------------------------------
def _model_kernel(*refs, E, H, dh, eps, scale, N, n_enc, n_dec, causal):
    (src_ref, tgt_ref,
     e_wqkv, e_bqkv, e_wo, e_bo, e_ln1g, e_ln1b,
     e_w1, e_b1, e_w2, e_b2, e_ln2g, e_ln2b,
     enc_ng, enc_nb,
     d_wqkv, d_bqkv, d_wo, d_bo, d_ln1g, d_ln1b,
     d_cwq, d_cbq, d_cwkv, d_cbkv, d_cwo, d_cbo, d_ln2g, d_ln2b,
     d_w1, d_b1, d_w2, d_b2, d_ln3g, d_ln3b,
     dec_ng, dec_nb, fc_w, fc_b,
     o_ref) = refs

    src = src_ref[...]
    tgt = tgt_ref[...]
    Ms, Ep = src.shape
    Mt = tgt.shape[0]

    # Lane masks, computed once.
    lane = jax.lax.broadcasted_iota(jnp.int32, (1, Ep), 1)
    lane_f = (lane < E).astype(jnp.float32)
    hmasks = [((lane >= h * dh) & (lane < (h + 1) * dh)).astype(jnp.float32)
              for h in range(H)]

    # In-kernel attention bias (batch separation + optional causal), generated
    # directly at the head-stacked shape [H*Mq, Mk]; row = h*Mq + seq*N + batch
    # so (row % N) is the batch index for every head block.
    def stacked_bias(Mq, Mk, causal_):
        r = jax.lax.broadcasted_iota(jnp.int32, (H * Mq, Mk), 0)
        c = jax.lax.broadcasted_iota(jnp.int32, (H * Mq, Mk), 1)
        bias = jnp.where((r % N) == (c % N), 0.0, -1e30).astype(jnp.float32)
        if causal_:
            lq = (r % Mq) // N
            lk = c // N
            bias = bias + jnp.where(lk > lq, -1e30, 0.0).astype(jnp.float32)
        return bias

    enc_bias = stacked_bias(Ms, Ms, False)
    self_bias = stacked_bias(Mt, Mt, causal)
    cross_bias = stacked_bias(Mt, Ms, False)

    def lin(x, w_bf16, b_f32):
        y = jax.lax.dot_general(
            x.astype(jnp.bfloat16), w_bf16,
            (((1,), (0,)), ((), ())),
            preferred_element_type=jnp.float32)
        return y + b_f32

    def ln(y, g, b):
        # Padded lanes of `y` are zero by construction at every call site, so
        # no pre-mask is needed; only re-mask after subtracting the mean.
        inv_e = 1.0 / float(E)
        mean = jnp.sum(y, axis=-1, keepdims=True) * inv_e
        d = (y - mean) * lane_f
        var = jnp.sum(d * d, axis=-1, keepdims=True) * inv_e
        return d * jax.lax.rsqrt(var + eps) * g + b

    def mha(q, k, v, bias):
        # Heads batched along the sublane axis: one QK^T, one softmax, one PV.
        Mq = q.shape[0]
        q_stk = jnp.concatenate([q * hmasks[h] for h in range(H)], axis=0)
        s = jax.lax.dot_general(
            q_stk.astype(jnp.bfloat16), k.astype(jnp.bfloat16),
            (((1,), (1,)), ((), ())),
            preferred_element_type=jnp.float32)
        s = s * scale + bias
        m = jnp.max(s, axis=-1, keepdims=True)
        p = jnp.exp(s - m)
        p = p * pl.reciprocal(jnp.sum(p, axis=-1, keepdims=True), approx=True)
        o_stk = jax.lax.dot_general(
            p.astype(jnp.bfloat16), v.astype(jnp.bfloat16),
            (((1,), (0,)), ((), ())),
            preferred_element_type=jnp.float32)
        out = o_stk[0:Mq, :] * hmasks[0]
        for h in range(1, H):
            out = out + o_stk[h * Mq:(h + 1) * Mq, :] * hmasks[h]
        return out

    # ---------------- encoder stack ----------------
    x = src
    for l in range(n_enc):
        qkv = lin(x, e_wqkv[l], e_bqkv[l])
        q = qkv[:, 0:Ep]
        k = qkv[:, Ep:2 * Ep]
        v = qkv[:, 2 * Ep:3 * Ep]
        sa = lin(mha(q, k, v, enc_bias), e_wo[l], e_bo[l])
        x1 = ln(x + sa, e_ln1g[l], e_ln1b[l])
        hdn = jnp.maximum(lin(x1, e_w1[l], e_b1[l]), 0.0)
        ff = lin(hdn, e_w2[l], e_b2[l])
        x = ln(x1 + ff, e_ln2g[l], e_ln2b[l])
    memory = ln(x, enc_ng[...], enc_nb[...])

    # ---------------- decoder stack ----------------
    y = tgt
    for l in range(n_dec):
        qkv = lin(y, d_wqkv[l], d_bqkv[l])
        q = qkv[:, 0:Ep]
        k = qkv[:, Ep:2 * Ep]
        v = qkv[:, 2 * Ep:3 * Ep]
        sa = lin(mha(q, k, v, self_bias), d_wo[l], d_bo[l])
        y1 = ln(y + sa, d_ln1g[l], d_ln1b[l])

        cq = lin(y1, d_cwq[l], d_cbq[l])
        ckv = lin(memory, d_cwkv[l], d_cbkv[l])
        ck = ckv[:, 0:Ep]
        cv = ckv[:, Ep:2 * Ep]
        ca = lin(mha(cq, ck, cv, cross_bias), d_cwo[l], d_cbo[l])
        y2 = ln(y1 + ca, d_ln2g[l], d_ln2b[l])

        hdn = jnp.maximum(lin(y2, d_w1[l], d_b1[l]), 0.0)
        ff = lin(hdn, d_w2[l], d_b2[l])
        y = ln(y2 + ff, d_ln3g[l], d_ln3b[l])

    # ---------------- final norm + vocab projection ----------------
    yn = ln(y, dec_ng[...], dec_nb[...])
    o_ref[...] = lin(yn, fc_w[...], fc_b[...])


# ----------------------------------------------------------------------------
# Model glue (embedding gather, positional encoding, padding, the one call)
# ----------------------------------------------------------------------------
def positional_encoding_table(d_model, max_len=5000):
    position = jnp.arange(max_len, dtype=jnp.float32)[:, None]
    div_term = jnp.exp(
        jnp.arange(0, d_model, 2, dtype=jnp.float32) * (-math.log(10000.0) / d_model)
    )
    pe = jnp.zeros((max_len, 1, d_model), dtype=jnp.float32)
    pe = pe.at[:, 0, 0::2].set(jnp.sin(position * div_term))
    pe = pe.at[:, 0, 1::2].set(jnp.cos(position * div_term))
    return pe


def transformer_forward(params, src_tokens, tgt_tokens, *, d_model, nhead,
                        eps=1e-5, tgt_causal=False):
    E = d_model
    Ep = params["enc_norm_g"].shape[1]
    Vp = params["fc_w"].shape[1]
    ntoken = params["embedding"].shape[0]
    emb = params["embedding"]
    pe = params["pe"]
    emb_scale = math.sqrt(d_model)

    Ls, N = src_tokens.shape
    Lt, _ = tgt_tokens.shape

    src = emb[src_tokens] * emb_scale + pe[:Ls]          # [Ls, N, E]
    tgt = emb[tgt_tokens] * emb_scale + pe[:Lt]          # [Lt, N, E]

    pad = Ep - E
    src = jnp.pad(src, ((0, 0), (0, 0), (0, pad))).reshape(Ls * N, Ep)
    tgt = jnp.pad(tgt, ((0, 0), (0, 0), (0, pad))).reshape(Lt * N, Ep)
    src = src.astype(jnp.float32)
    tgt = tgt.astype(jnp.float32)

    enc = params["enc"]
    dec = params["dec"]
    n_enc = enc["wqkv"].shape[0]
    n_dec = dec["wqkv"].shape[0]
    dh = E // nhead

    kernel = functools.partial(
        _model_kernel, E=E, H=nhead, dh=dh, eps=eps, scale=1.0 / math.sqrt(dh),
        N=N, n_enc=n_enc, n_dec=n_dec, causal=tgt_causal)

    inputs = [src, tgt,
              enc["wqkv"], enc["bqkv"], enc["wo"], enc["bo"],
              enc["ln1g"], enc["ln1b"],
              enc["w1"], enc["b1"], enc["w2"], enc["b2"],
              enc["ln2g"], enc["ln2b"],
              params["enc_norm_g"], params["enc_norm_b"],
              dec["wqkv"], dec["bqkv"], dec["wo"], dec["bo"],
              dec["ln1g"], dec["ln1b"],
              dec["cwq"], dec["cbq"], dec["cwkv"], dec["cbkv"],
              dec["cwo"], dec["cbo"],
              dec["ln2g"], dec["ln2b"],
              dec["w1"], dec["b1"], dec["w2"], dec["b2"],
              dec["ln3g"], dec["ln3b"],
              params["dec_norm_g"], params["dec_norm_b"],
              params["fc_w"], params["fc_b"]]

    logits = _pcall(kernel, inputs,
                    jax.ShapeDtypeStruct((Lt * N, Vp), jnp.float32))
    return logits[:, :ntoken].reshape(Lt, N, ntoken)


# ----------------------------------------------------------------------------
# Deterministic parameter init (padded, layer-stacked, kernel-ready layout)
# ----------------------------------------------------------------------------
def _xavier(key, fan_in, fan_out):
    a = math.sqrt(6.0 / (fan_in + fan_out))
    return jax.random.uniform(key, (fan_in, fan_out), jnp.float32, -a, a)


def _pad_w(w, rows, cols):
    return jnp.pad(w, ((0, rows - w.shape[0]), (0, cols - w.shape[1]))
                   ).astype(jnp.bfloat16)


def _pad_b(b, n):
    return jnp.pad(b, (0, n - b.shape[0])).reshape(1, n).astype(jnp.float32)


def init_params(key, ntoken, d_model, nhead, dff, n_enc, n_dec):
    E = d_model
    Ep = _round_up(E, 128)
    Fp = _round_up(dff, 128)
    Vp = _round_up(ntoken, 128)

    keys = jax.random.split(key, 2 + n_enc + n_dec)
    params = {}
    params["embedding"] = _xavier(keys[0], ntoken, E)
    params["fc_w"] = _pad_w(_xavier(keys[1], E, ntoken), Ep, Vp)
    params["fc_b"] = _pad_b(jnp.zeros((ntoken,), jnp.float32), Vp)
    params["pe"] = positional_encoding_table(E)

    ones_e = _pad_b(jnp.ones((E,), jnp.float32), Ep)
    zeros_e = _pad_b(jnp.zeros((E,), jnp.float32), Ep)
    zeros_f = _pad_b(jnp.zeros((dff,), jnp.float32), Fp)
    zeros_3e = jnp.zeros((1, 3 * Ep), jnp.float32)
    zeros_2e = jnp.zeros((1, 2 * Ep), jnp.float32)

    def attn_weights(k):
        ks = jax.random.split(k, 4)
        return tuple(_xavier(ki, E, E) for ki in ks)   # wq, wk, wv, wo

    enc = {k: [] for k in ["wqkv", "bqkv", "wo", "bo", "ln1g", "ln1b",
                           "w1", "b1", "w2", "b2", "ln2g", "ln2b"]}
    for i in range(n_enc):
        ks = jax.random.split(keys[2 + i], 3)
        wq, wk, wv, wo = attn_weights(ks[0])
        wqkv = jnp.concatenate(
            [_pad_w(wq, Ep, Ep), _pad_w(wk, Ep, Ep), _pad_w(wv, Ep, Ep)], axis=1)
        enc["wqkv"].append(wqkv)
        enc["bqkv"].append(zeros_3e)
        enc["wo"].append(_pad_w(wo, Ep, Ep))
        enc["bo"].append(zeros_e)
        enc["ln1g"].append(ones_e)
        enc["ln1b"].append(zeros_e)
        enc["w1"].append(_pad_w(_xavier(ks[1], E, dff), Ep, Fp))
        enc["b1"].append(zeros_f)
        enc["w2"].append(_pad_w(_xavier(ks[2], dff, E), Fp, Ep))
        enc["b2"].append(zeros_e)
        enc["ln2g"].append(ones_e)
        enc["ln2b"].append(zeros_e)
    params["enc"] = {k: jnp.stack(v) for k, v in enc.items()}
    params["enc_norm_g"] = ones_e
    params["enc_norm_b"] = zeros_e

    dec = {k: [] for k in ["wqkv", "bqkv", "wo", "bo", "ln1g", "ln1b",
                           "cwq", "cbq", "cwkv", "cbkv", "cwo", "cbo",
                           "ln2g", "ln2b",
                           "w1", "b1", "w2", "b2", "ln3g", "ln3b"]}
    for i in range(n_dec):
        ks = jax.random.split(keys[2 + n_enc + i], 4)
        wq, wk, wv, wo = attn_weights(ks[0])
        wqkv = jnp.concatenate(
            [_pad_w(wq, Ep, Ep), _pad_w(wk, Ep, Ep), _pad_w(wv, Ep, Ep)], axis=1)
        cwq, cwk, cwv, cwo = attn_weights(ks[1])
        cwkv = jnp.concatenate([_pad_w(cwk, Ep, Ep), _pad_w(cwv, Ep, Ep)], axis=1)
        dec["wqkv"].append(wqkv)
        dec["bqkv"].append(zeros_3e)
        dec["wo"].append(_pad_w(wo, Ep, Ep))
        dec["bo"].append(zeros_e)
        dec["ln1g"].append(ones_e)
        dec["ln1b"].append(zeros_e)
        dec["cwq"].append(_pad_w(cwq, Ep, Ep))
        dec["cbq"].append(zeros_e)
        dec["cwkv"].append(cwkv)
        dec["cbkv"].append(zeros_2e)
        dec["cwo"].append(_pad_w(cwo, Ep, Ep))
        dec["cbo"].append(zeros_e)
        dec["ln2g"].append(ones_e)
        dec["ln2b"].append(zeros_e)
        dec["w1"].append(_pad_w(_xavier(ks[2], E, dff), Ep, Fp))
        dec["b1"].append(zeros_f)
        dec["w2"].append(_pad_w(_xavier(ks[3], dff, E), Fp, Ep))
        dec["b2"].append(zeros_e)
        dec["ln3g"].append(ones_e)
        dec["ln3b"].append(zeros_e)
    params["dec"] = {k: jnp.stack(v) for k, v in dec.items()}
    params["dec_norm_g"] = ones_e
    params["dec_norm_b"] = zeros_e
    return params


# ----------------------------------------------------------------------------
# Main
# ----------------------------------------------------------------------------
if __name__ == "__main__":
    ntoken = 50
    d_model = 32
    nhead = 4
    dim_feedforward = 64
    num_encoder_layers = 2
    num_decoder_layers = 2
    src_len, tgt_len, batch = 8, 8, 2

    key = jax.random.PRNGKey(0)
    pkey, skey, tkey = jax.random.split(key, 3)

    params = init_params(
        pkey, ntoken, d_model, nhead, dim_feedforward,
        num_encoder_layers, num_decoder_layers,
    )

    src_tokens = jax.random.randint(skey, (src_len, batch), 0, ntoken, dtype=jnp.int32)
    tgt_tokens = jax.random.randint(tkey, (tgt_len, batch), 0, ntoken, dtype=jnp.int32)

    fwd = jax.jit(functools.partial(transformer_forward,
                                    d_model=d_model, nhead=nhead))
    out = fwd(params, src_tokens, tgt_tokens)
    out = jax.block_until_ready(out)

    assert out.shape == (tgt_len, batch, ntoken), out.shape
    assert out.dtype == jnp.float32
    assert bool(jnp.all(jnp.isfinite(out)))
    print("KERNEL_OK")
</pallas_src>

<mosaic_0001>
module attributes {stable_mosaic.version = 11 : i64} {
  func.func @_model_kernel(%arg0: i32, %arg1: memref<16x128xf32, #tpu.memory_space<vmem>>, %arg2: memref<16x128xf32, #tpu.memory_space<vmem>>, %arg3: memref<2x128x384xbf16, #tpu.memory_space<vmem>>, %arg4: memref<2x1x384xf32, #tpu.memory_space<vmem>>, %arg5: memref<2x128x128xbf16, #tpu.memory_space<vmem>>, %arg6: memref<2x1x128xf32, #tpu.memory_space<vmem>>, %arg7: memref<2x1x128xf32, #tpu.memory_space<vmem>>, %arg8: memref<2x1x128xf32, #tpu.memory_space<vmem>>, %arg9: memref<2x128x128xbf16, #tpu.memory_space<vmem>>, %arg10: memref<2x1x128xf32, #tpu.memory_space<vmem>>, %arg11: memref<2x128x128xbf16, #tpu.memory_space<vmem>>, %arg12: memref<2x1x128xf32, #tpu.memory_space<vmem>>, %arg13: memref<2x1x128xf32, #tpu.memory_space<vmem>>, %arg14: memref<2x1x128xf32, #tpu.memory_space<vmem>>, %arg15: memref<1x128xf32, #tpu.memory_space<vmem>>, %arg16: memref<1x128xf32, #tpu.memory_space<vmem>>, %arg17: memref<2x128x384xbf16, #tpu.memory_space<vmem>>, %arg18: memref<2x1x384xf32, #tpu.memory_space<vmem>>, %arg19: memref<2x128x128xbf16, #tpu.memory_space<vmem>>, %arg20: memref<2x1x128xf32, #tpu.memory_space<vmem>>, %arg21: memref<2x1x128xf32, #tpu.memory_space<vmem>>, %arg22: memref<2x1x128xf32, #tpu.memory_space<vmem>>, %arg23: memref<2x128x128xbf16, #tpu.memory_space<vmem>>, %arg24: memref<2x1x128xf32, #tpu.memory_space<vmem>>, %arg25: memref<2x128x256xbf16, #tpu.memory_space<vmem>>, %arg26: memref<2x1x256xf32, #tpu.memory_space<vmem>>, %arg27: memref<2x128x128xbf16, #tpu.memory_space<vmem>>, %arg28: memref<2x1x128xf32, #tpu.memory_space<vmem>>, %arg29: memref<2x1x128xf32, #tpu.memory_space<vmem>>, %arg30: memref<2x1x128xf32, #tpu.memory_space<vmem>>, %arg31: memref<2x128x128xbf16, #tpu.memory_space<vmem>>, %arg32: memref<2x1x128xf32, #tpu.memory_space<vmem>>, %arg33: memref<2x128x128xbf16, #tpu.memory_space<vmem>>, %arg34: memref<2x1x128xf32, #tpu.memory_space<vmem>>, %arg35: memref<2x1x128xf32, #tpu.memory_space<vmem>>, %arg36: memref<2x1x128xf32, #tpu.memory_space<vmem>>, %arg37: memref<1x128xf32, #tpu.memory_space<vmem>>, %arg38: memref<1x128xf32, #tpu.memory_space<vmem>>, %arg39: memref<128x128xbf16, #tpu.memory_space<vmem>>, %arg40: memref<1x128xf32, #tpu.memory_space<vmem>>, %arg41: memref<16x128xf32, #tpu.memory_space<vmem>>) attributes {dimension_semantics = [#tpu.dimension_semantics<arbitrary>], iteration_bounds = array<i64: 1>, scalar_prefetch = 0 : i64, scratch_operands = 0 : i64, tpu.core_type = #tpu.core_type<tc>, window_params = [{pipeline_mode = #tpu.pipeline_mode<synchronous>, transform_indices = @transform_0, window_bounds = array<i64: 16, 128>}, {pipeline_mode = #tpu.pipeline_mode<synchronous>, transform_indices = @transform_1, window_bounds = array<i64: 16, 128>}, {pipeline_mode = #tpu.pipeline_mode<synchronous>, transform_indices = @transform_2, window_bounds = array<i64: 2, 128, 384>}, {pipeline_mode = #tpu.pipeline_mode<synchronous>, transform_indices = @transform_3, window_bounds = array<i64: 2, 1, 384>}, {pipeline_mode = #tpu.pipeline_mode<synchronous>, transform_indices = @transform_4, window_bounds = array<i64: 2, 128, 128>}, {pipeline_mode = #tpu.pipeline_mode<synchronous>, transform_indices = @transform_5, window_bounds = array<i64: 2, 1, 128>}, {pipeline_mode = #tpu.pipeline_mode<synchronous>, transform_indices = @transform_6, window_bounds = array<i64: 2, 1, 128>}, {pipeline_mode = #tpu.pipeline_mode<synchronous>, transform_indices = @transform_7, window_bounds = array<i64: 2, 1, 128>}, {pipeline_mode = #tpu.pipeline_mode<synchronous>, transform_indices = @transform_8, window_bounds = array<i64: 2, 128, 128>}, {pipeline_mode = #tpu.pipeline_mode<synchronous>, transform_indices = @transform_9, window_bounds = array<i64: 2, 1, 128>}, {pipeline_mode = #tpu.pipeline_mode<synchronous>, transform_indices = @transform_10, window_bounds = array<i64: 2, 128, 128>}, {pipeline_mode = #tpu.pipeline_mode<synchronous>, transform_indices = @transform_11, window_bounds = array<i64: 2, 1, 128>}, {pipeline_mode = #tpu.pipeline_mode<synchronous>, transform_indices = @transform_12, window_bounds = array<i64: 2, 1, 128>}, {pipeline_mode = #tpu.pipeline_mode<synchronous>, transform_indices = @transform_13, window_bounds = array<i64: 2, 1, 128>}, {pipeline_mode = #tpu.pipeline_mode<synchronous>, transform_indices = @transform_14, window_bounds = array<i64: 1, 128>}, {pipeline_mode = #tpu.pipeline_mode<synchronous>, transform_indices = @transform_15, window_bounds = array<i64: 1, 128>}, {pipeline_mode = #tpu.pipeline_mode<synchronous>, transform_indices = @transform_16, window_bounds = array<i64: 2, 128, 384>}, {pipeline_mode = #tpu.pipeline_mode<synchronous>, transform_indices = @transform_17, window_bounds = array<i64: 2, 1, 384>}, {pipeline_mode = #tpu.pipeline_mode<synchronous>, transform_indices = @transform_18, window_bounds = array<i64: 2, 128, 128>}, {pipeline_mode = #tpu.pipeline_mode<synchronous>, transform_indices = @transform_19, window_bounds = array<i64: 2, 1, 128>}, {pipeline_mode = #tpu.pipeline_mode<synchronous>, transform_indices = @transform_20, window_bounds = array<i64: 2, 1, 128>}, {pipeline_mode = #tpu.pipeline_mode<synchronous>, transform_indices = @transform_21, window_bounds = array<i64: 2, 1, 128>}, {pipeline_mode = #tpu.pipeline_mode<synchronous>, transform_indices = @transform_22, window_bounds = array<i64: 2, 128, 128>}, {pipeline_mode = #tpu.pipeline_mode<synchronous>, transform_indices = @transform_23, window_bounds = array<i64: 2, 1, 128>}, {pipeline_mode = #tpu.pipeline_mode<synchronous>, transform_indices = @transform_24, window_bounds = array<i64: 2, 128, 256>}, {pipeline_mode = #tpu.pipeline_mode<synchronous>, transform_indices = @transform_25, window_bounds = array<i64: 2, 1, 256>}, {pipeline_mode = #tpu.pipeline_mode<synchronous>, transform_indices = @transform_26, window_bounds = array<i64: 2, 128, 128>}, {pipeline_mode = #tpu.pipeline_mode<synchronous>, transform_indices = @transform_27, window_bounds = array<i64: 2, 1, 128>}, {pipeline_mode = #tpu.pipeline_mode<synchronous>, transform_indices = @transform_28, window_bounds = array<i64: 2, 1, 128>}, {pipeline_mode = #tpu.pipeline_mode<synchronous>, transform_indices = @transform_29, window_bounds = array<i64: 2, 1, 128>}, {pipeline_mode = #tpu.pipeline_mode<synchronous>, transform_indices = @transform_30, window_bounds = array<i64: 2, 128, 128>}, {pipeline_mode = #tpu.pipeline_mode<synchronous>, transform_indices = @transform_31, window_bounds = array<i64: 2, 1, 128>}, {pipeline_mode = #tpu.pipeline_mode<synchronous>, transform_indices = @transform_32, window_bounds = array<i64: 2, 128, 128>}, {pipeline_mode = #tpu.pipeline_mode<synchronous>, transform_indices = @transform_33, window_bounds = array<i64: 2, 1, 128>}, {pipeline_mode = #tpu.pipeline_mode<synchronous>, transform_indices = @transform_34, window_bounds = array<i64: 2, 1, 128>}, {pipeline_mode = #tpu.pipeline_mode<synchronous>, transform_indices = @transform_35, window_bounds = array<i64: 2, 1, 128>}, {pipeline_mode = #tpu.pipeline_mode<synchronous>, transform_indices = @transform_36, window_bounds = array<i64: 1, 128>}, {pipeline_mode = #tpu.pipeline_mode<synchronous>, transform_indices = @transform_37, window_bounds = array<i64: 1, 128>}, {pipeline_mode = #tpu.pipeline_mode<synchronous>, transform_indices = @transform_38, window_bounds = array<i64: 128, 128>}, {pipeline_mode = #tpu.pipeline_mode<synchronous>, transform_indices = @transform_39, window_bounds = array<i64: 1, 128>}, {pipeline_mode = #tpu.pipeline_mode<synchronous>, transform_indices = @transform_40, window_bounds = array<i64: 16, 128>}]} {
    %c0 = arith.constant 0 : index
    %c0_0 = arith.constant 0 : index
    %0 = vector.load %arg1[%c0, %c0_0] : memref<16x128xf32, #tpu.memory_space<vmem>>, vector<16x128xf32>
    %c0_1 = arith.constant 0 : index
    %c0_2 = arith.constant 0 : index
    %1 = vector.load %arg2[%c0_1, %c0_2] : memref<16x128xf32, #tpu.memory_space<vmem>>, vector<16x128xf32>
    %2 = tpu.iota {dimensions = array<i32: 1>} : vector<1x128xi32>
    %c32_i32 = arith.constant 32 : i32
    %3 = vector.broadcast %c32_i32 : i32 to vector<1x128xi32>
    %4 = arith.cmpi slt, %2, %3 : vector<1x128xi32>
    %5 = arith.extui %4 : vector<1x128xi1> to vector<1x128xi32>
    %6 = arith.sitofp %5 : vector<1x128xi32> to vector<1x128xf32>
    %c0_i32 = arith.constant 0 : i32
    %7 = vector.broadcast %c0_i32 : i32 to vector<1x128xi32>
    %8 = arith.cmpi sge, %2, %7 : vector<1x128xi32>
    %c8_i32 = arith.constant 8 : i32
    %9 = vector.broadcast %c8_i32 : i32 to vector<1x128xi32>
    %10 = arith.cmpi slt, %2, %9 : vector<1x128xi32>
    %11 = arith.andi %8, %10 : vector<1x128xi1>
    %12 = arith.extui %11 : vector<1x128xi1> to vector<1x128xi32>
    %13 = arith.sitofp %12 : vector<1x128xi32> to vector<1x128xf32>
    %c8_i32_3 = arith.constant 8 : i32
    %14 = vector.broadcast %c8_i32_3 : i32 to vector<1x128xi32>
    %15 = arith.cmpi sge, %2, %14 : vector<1x128xi32>
    %c16_i32 = arith.constant 16 : i32
    %16 = vector.broadcast %c16_i32 : i32 to vector<1x128xi32>
    %17 = arith.cmpi slt, %2, %16 : vector<1x128xi32>
    %18 = arith.andi %15, %17 : vector<1x128xi1>
    %19 = arith.extui %18 : vector<1x128xi1> to vector<1x128xi32>
    %20 = arith.sitofp %19 : vector<1x128xi32> to vector<1x128xf32>
    %c16_i32_4 = arith.constant 16 : i32
    %21 = vector.broadcast %c16_i32_4 : i32 to vector<1x128xi32>
    %22 = arith.cmpi sge, %2, %21 : vector<1x128xi32>
    %c24_i32 = arith.constant 24 : i32
    %23 = vector.broadcast %c24_i32 : i32 to vector<1x128xi32>
    %24 = arith.cmpi slt, %2, %23 : vector<1x128xi32>
    %25 = arith.andi %22, %24 : vector<1x128xi1>
    %26 = arith.extui %25 : vector<1x128xi1> to vector<1x128xi32>
    %27 = arith.sitofp %26 : vector<1x128xi32> to vector<1x128xf32>
    %c24_i32_5 = arith.constant 24 : i32
    %28 = vector.broadcast %c24_i32_5 : i32 to vector<1x128xi32>
    %29 = arith.cmpi sge, %2, %28 : vector<1x128xi32>
    %c32_i32_6 = arith.constant 32 : i32
    %30 = vector.broadcast %c32_i32_6 : i32 to vector<1x128xi32>
    %31 = arith.cmpi slt, %2, %30 : vector<1x128xi32>
    %32 = arith.andi %29, %31 : vector<1x128xi1>
    %33 = arith.extui %32 : vector<1x128xi1> to vector<1x128xi32>
    %34 = arith.sitofp %33 : vector<1x128xi32> to vector<1x128xf32>
    %35 = tpu.iota {dimensions = array<i32: 0>} : vector<64x16xi32>
    %36 = tpu.iota {dimensions = array<i32: 1>} : vector<64x16xi32>
    %c2_i32 = arith.constant 2 : i32
    %c0_i32_7 = arith.constant 0 : i32
    %37 = arith.cmpi eq, %c2_i32, %c0_i32_7 : i32
    %c1_i32 = arith.constant 1 : i32
    %38 = arith.select %37, %c1_i32, %c2_i32 : i32
    %39 = vector.broadcast %38 : i32 to vector<64x16xi32>
    %40 = arith.remsi %35, %39 : vector<64x16xi32>
    %c0_i32_8 = arith.constant 0 : i32
    %41 = vector.broadcast %c0_i32_8 : i32 to vector<64x16xi32>
    %42 = arith.cmpi ne, %40, %41 : vector<64x16xi32>
    %c0_i32_9 = arith.constant 0 : i32
    %43 = vector.broadcast %c0_i32_9 : i32 to vector<64x16xi32>
    %44 = arith.cmpi slt, %40, %43 : vector<64x16xi32>
    %c0_i32_10 = arith.constant 0 : i32
    %45 = arith.cmpi slt, %38, %c0_i32_10 : i32
    %46 = vector.broadcast %45 : i1 to vector<64x16xi1>
    %47 = vector.broadcast %46 : vector<64x16xi1> to vector<64x16xi1>
    %48 = arith.xori %44, %47 : vector<64x16xi1>
    %49 = arith.andi %48, %42 : vector<64x16xi1>
    %50 = vector.broadcast %38 : i32 to vector<64x16xi32>
    %51 = arith.addi %40, %50 : vector<64x16xi32>
    %52 = arith.select %49, %51, %40 : vector<64x16xi1>, vector<64x16xi32>
    %c2_i32_11 = arith.constant 2 : i32
    %c0_i32_12 = arith.constant 0 : i32
    %53 = arith.cmpi eq, %c2_i32_11, %c0_i32_12 : i32
    %c1_i32_13 = arith.constant 1 : i32
    %54 = arith.select %53, %c1_i32_13, %c2_i32_11 : i32
    %55 = vector.broadcast %54 : i32 to vector<64x16xi32>
    %56 = arith.remsi %36, %55 : vector<64x16xi32>
    %c0_i32_14 = arith.constant 0 : i32
    %57 = vector.broadcast %c0_i32_14 : i32 to vector<64x16xi32>
    %58 = arith.cmpi ne, %56, %57 : vector<64x16xi32>
    %c0_i32_15 = arith.constant 0 : i32
    %59 = vector.broadcast %c0_i32_15 : i32 to vector<64x16xi32>
    %60 = arith.cmpi slt, %56, %59 : vector<64x16xi32>
    %c0_i32_16 = arith.constant 0 : i32
    %61 = arith.cmpi slt, %54, %c0_i32_16 : i32
    %62 = vector.broadcast %61 : i1 to vector<64x16xi1>
    %63 = vector.broadcast %62 : vector<64x16xi1> to vector<64x16xi1>
    %64 = arith.xori %60, %63 : vector<64x16xi1>
    %65 = arith.andi %64, %58 : vector<64x16xi1>
    %66 = vector.broadcast %54 : i32 to vector<64x16xi32>
    %67 = arith.addi %56, %66 : vector<64x16xi32>
    %68 = arith.select %65, %67, %56 : vector<64x16xi1>, vector<64x16xi32>
    %69 = arith.cmpi eq, %52, %68 : vector<64x16xi32>
    %cst = arith.constant 0.000000e+00 : f32
    %cst_17 = arith.constant -1.000000e+30 : f32
    %70 = vector.broadcast %cst : f32 to vector<64x16xf32>
    %71 = vector.broadcast %cst_17 : f32 to vector<64x16xf32>
    %72 = arith.select %69, %70, %71 : vector<64x16xi1>, vector<64x16xf32>
    %73 = tpu.iota {dimensions = array<i32: 0>} : vector<64x16xi32>
    %74 = tpu.iota {dimensions = array<i32: 1>} : vector<64x16xi32>
    %c2_i32_18 = arith.constant 2 : i32
    %c0_i32_19 = arith.constant 0 : i32
    %75 = arith.cmpi eq, %c2_i32_18, %c0_i32_19 : i32
    %c1_i32_20 = arith.constant 1 : i32
    %76 = arith.select %75, %c1_i32_20, %c2_i32_18 : i32
    %77 = vector.broadcast %76 : i32 to vector<64x16xi32>
    %78 = arith.remsi %73, %77 : vector<64x16xi32>
    %c0_i32_21 = arith.constant 0 : i32
    %79 = vector.broadcast %c0_i32_21 : i32 to vector<64x16xi32>
    %80 = arith.cmpi ne, %78, %79 : vector<64x16xi32>
    %c0_i32_22 = arith.constant 0 : i32
    %81 = vector.broadcast %c0_i32_22 : i32 to vector<64x16xi32>
    %82 = arith.cmpi slt, %78, %81 : vector<64x16xi32>
    %c0_i32_23 = arith.constant 0 : i32
    %83 = arith.cmpi slt, %76, %c0_i32_23 : i32
    %84 = vector.broadcast %83 : i1 to vector<64x16xi1>
    %85 = vector.broadcast %84 : vector<64x16xi1> to vector<64x16xi1>
    %86 = arith.xori %82, %85 : vector<64x16xi1>
    %87 = arith.andi %86, %80 : vector<64x16xi1>
    %88 = vector.broadcast %76 : i32 to vector<64x16xi32>
    %89 = arith.addi %78, %88 : vector<64x16xi32>
    %90 = arith.select %87, %89, %78 : vector<64x16xi1>, vector<64x16xi32>
    %c2_i32_24 = arith.constant 2 : i32
    %c0_i32_25 = arith.constant 0 : i32
    %91 = arith.cmpi eq, %c2_i32_24, %c0_i32_25 : i32
    %c1_i32_26 = arith.constant 1 : i32
    %92 = arith.select %91, %c1_i32_26, %c2_i32_24 : i32
    %93 = vector.broadcast %92 : i32 to vector<64x16xi32>
    %94 = arith.remsi %74, %93 : vector<64x16xi32>
    %c0_i32_27 = arith.constant 0 : i32
    %95 = vector.broadcast %c0_i32_27 : i32 to vector<64x16xi32>
    %96 = arith.cmpi ne, %94, %95 : vector<64x16xi32>
    %c0_i32_28 = arith.constant 0 : i32
    %97 = vector.broadcast %c0_i32_28 : i32 to vector<64x16xi32>
    %98 = arith.cmpi slt, %94, %97 : vector<64x16xi32>
    %c0_i32_29 = arith.constant 0 : i32
    %99 = arith.cmpi slt, %92, %c0_i32_29 : i32
    %100 = vector.broadcast %99 : i1 to vector<64x16xi1>
    %101 = vector.broadcast %100 : vector<64x16xi1> to vector<64x16xi1>
    %102 = arith.xori %98, %101 : vector<64x16xi1>
    %103 = arith.andi %102, %96 : vector<64x16xi1>
    %104 = vector.broadcast %92 : i32 to vector<64x16xi32>
    %105 = arith.addi %94, %104 : vector<64x16xi32>
    %106 = arith.select %103, %105, %94 : vector<64x16xi1>, vector<64x16xi32>
    %107 = arith.cmpi eq, %90, %106 : vector<64x16xi32>
    %cst_30 = arith.constant 0.000000e+00 : f32
    %cst_31 = arith.constant -1.000000e+30 : f32
    %108 = vector.broadcast %cst_30 : f32 to vector<64x16xf32>
    %109 = vector.broadcast %cst_31 : f32 to vector<64x16xf32>
    %110 = arith.select %107, %108, %109 : vector<64x16xi1>, vector<64x16xf32>
    %111 = tpu.iota {dimensions = array<i32: 0>} : vector<64x16xi32>
    %112 = tpu.iota {dimensions = array<i32: 1>} : vector<64x16xi32>
    %c2_i32_32 = arith.constant 2 : i32
    %c0_i32_33 = arith.constant 0 : i32
    %113 = arith.cmpi eq, %c2_i32_32, %c0_i32_33 : i32
    %c1_i32_34 = arith.constant 1 : i32
    %114 = arith.select %113, %c1_i32_34, %c2_i32_32 : i32
    %115 = vector.broadcast %114 : i32 to vector<64x16xi32>
    %116 = arith.remsi %111, %115 : vector<64x16xi32>
    %c0_i32_35 = arith.constant 0 : i32
    %117 = vector.broadcast %c0_i32_35 : i32 to vector<64x16xi32>
    %118 = arith.cmpi ne, %116, %117 : vector<64x16xi32>
    %c0_i32_36 = arith.constant 0 : i32
    %119 = vector.broadcast %c0_i32_36 : i32 to vector<64x16xi32>
    %120 = arith.cmpi slt, %116, %119 : vector<64x16xi32>
    %c0_i32_37 = arith.constant 0 : i32
    %121 = arith.cmpi slt, %114, %c0_i32_37 : i32
    %122 = vector.broadcast %121 : i1 to vector<64x16xi1>
    %123 = vector.broadcast %122 : vector<64x16xi1> to vector<64x16xi1>
    %124 = arith.xori %120, %123 : vector<64x16xi1>
    %125 = arith.andi %124, %118 : vector<64x16xi1>
    %126 = vector.broadcast %114 : i32 to vector<64x16xi32>
    %127 = arith.addi %116, %126 : vector<64x16xi32>
    %128 = arith.select %125, %127, %116 : vector<64x16xi1>, vector<64x16xi32>
    %c2_i32_38 = arith.constant 2 : i32
    %c0_i32_39 = arith.constant 0 : i32
    %129 = arith.cmpi eq, %c2_i32_38, %c0_i32_39 : i32
    %c1_i32_40 = arith.constant 1 : i32
    %130 = arith.select %129, %c1_i32_40, %c2_i32_38 : i32
    %131 = vector.broadcast %130 : i32 to vector<64x16xi32>
    %132 = arith.remsi %112, %131 : vector<64x16xi32>
    %c0_i32_41 = arith.constant 0 : i32
    %133 = vector.broadcast %c0_i32_41 : i32 to vector<64x16xi32>
    %134 = arith.cmpi ne, %132, %133 : vector<64x16xi32>
    %c0_i32_42 = arith.constant 0 : i32
    %135 = vector.broadcast %c0_i32_42 : i32 to vector<64x16xi32>
    %136 = arith.cmpi slt, %132, %135 : vector<64x16xi32>
    %c0_i32_43 = arith.constant 0 : i32
    %137 = arith.cmpi slt, %130, %c0_i32_43 : i32
    %138 = vector.broadcast %137 : i1 to vector<64x16xi1>
    %139 = vector.broadcast %138 : vector<64x16xi1> to vector<64x16xi1>
    %140 = arith.xori %136, %139 : vector<64x16xi1>
    %141 = arith.andi %140, %134 : vector<64x16xi1>
    %142 = vector.broadcast %130 : i32 to vector<64x16xi32>
    %143 = arith.addi %132, %142 : vector<64x16xi32>
    %144 = arith.select %141, %143, %132 : vector<64x16xi1>, vector<64x16xi32>
    %145 = arith.cmpi eq, %128, %144 : vector<64x16xi32>
    %cst_44 = arith.constant 0.000000e+00 : f32
    %cst_45 = arith.constant -1.000000e+30 : f32
    %146 = vector.broadcast %cst_44 : f32 to vector<64x16xf32>
    %147 = vector.broadcast %cst_45 : f32 to vector<64x16xf32>
    %148 = arith.select %145, %146, %147 : vector<64x16xi1>, vector<64x16xf32>
    %c0_46 = arith.constant 0 : index
    %c0_47 = arith.constant 0 : index
    %c0_48 = arith.constant 0 : index
    %149 = vector.load %arg3[%c0_46, %c0_47, %c0_48] : memref<2x128x384xbf16, #tpu.memory_space<vmem>>, vector<1x128x384xbf16>
    %150 = vector.shape_cast %149 : vector<1x128x384xbf16> to vector<128x384xbf16>
    %c0_49 = arith.constant 0 : index
    %c0_50 = arith.constant 0 : index
    %c0_51 = arith.constant 0 : index
    %151 = vector.load %arg4[%c0_49, %c0_50, %c0_51] : memref<2x1x384xf32, #tpu.memory_space<vmem>>, vector<1x1x384xf32>
    %152 = vector.shape_cast %151 : vector<1x1x384xf32> to vector<1x384xf32>
    %153 = arith.truncf %0 : vector<16x128xf32> to vector<16x128xbf16>
    %cst_52 = arith.constant dense<0.000000e+00> : vector<16x384xf32>
    %154 = tpu.matmul %153, %150, %cst_52 {dimension_numbers = #tpu.dot_dimension_numbers<[1], [0], [0], [1], [0, 0, 1, 1], [], []>} : vector<16x128xbf16>, vector<128x384xbf16>, vector<16x384xf32> -> vector<16x384xf32>
    %155 = vector.broadcast %152 : vector<1x384xf32> to vector<16x384xf32>
    %156 = arith.addf %154, %155 : vector<16x384xf32>
    %157 = vector.extract_strided_slice %156 {offsets = [0, 0], sizes = [16, 128], strides = [1, 1]} : vector<16x384xf32> to vector<16x128xf32>
    %158 = vector.extract_strided_slice %156 {offsets = [0, 128], sizes = [16, 128], strides = [1, 1]} : vector<16x384xf32> to vector<16x128xf32>
    %159 = vector.extract_strided_slice %156 {offsets = [0, 256], sizes = [16, 128], strides = [1, 1]} : vector<16x384xf32> to vector<16x128xf32>
    %160 = vector.broadcast %13 : vector<1x128xf32> to vector<16x128xf32>
    %161 = arith.mulf %157, %160 : vector<16x128xf32>
    %162 = vector.broadcast %20 : vector<1x128xf32> to vector<16x128xf32>
    %163 = arith.mulf %157, %162 : vector<16x128xf32>
    %164 = vector.broadcast %27 : vector<1x128xf32> to vector<16x128xf32>
    %165 = arith.mulf %157, %164 : vector<16x128xf32>
    %166 = vector.broadcast %34 : vector<1x128xf32> to vector<16x128xf32>
    %167 = arith.mulf %157, %166 : vector<16x128xf32>
    %168 = tpu.concatenate %161, %163, %165, %167 in 0 : vector<16x128xf32>, vector<16x128xf32>, vector<16x128xf32>, vector<16x128xf32> -> vector<64x128xf32>
    %169 = arith.truncf %168 : vector<64x128xf32> to vector<64x128xbf16>
    %170 = arith.truncf %158 : vector<16x128xf32> to vector<16x128xbf16>
    %cst_53 = arith.constant dense<0.000000e+00> : vector<64x16xf32>
    %171 = tpu.matmul %169, %170, %cst_53 {dimension_numbers = #tpu.dot_dimension_numbers<[1], [1], [0], [0], [0, 0, 1, 0], [], []>} : vector<64x128xbf16>, vector<16x128xbf16>, vector<64x16xf32> -> vector<64x16xf32>
    %cst_54 = arith.constant 0.353553385 : f32
    %172 = vector.broadcast %cst_54 : f32 to vector<64x16xf32>
    %173 = arith.mulf %171, %172 : vector<64x16xf32>
    %174 = arith.addf %173, %72 : vector<64x16xf32>
    %cst_55 = arith.constant dense<0xFF800000> : vector<64xf32>
    %175 = vector.multi_reduction <maximumf>, %174, %cst_55 [1] : vector<64x16xf32> to vector<64xf32>
    %176 = vector.shape_cast %175 : vector<64xf32> to vector<64x1xf32>
    %177 = vector.broadcast %176 : vector<64x1xf32> to vector<64x16xf32>
    %178 = arith.subf %174, %177 : vector<64x16xf32>
    %179 = math.exp %178 : vector<64x16xf32>
    %cst_56 = arith.constant dense<0.000000e+00> : vector<64xf32>
    %180 = vector.multi_reduction <add>, %179, %cst_56 [1] : vector<64x16xf32> to vector<64xf32>
    %181 = vector.shape_cast %180 : vector<64xf32> to vector<64x1xf32>
    %182 = tpu.reciprocal %181 {approx = true} : vector<64x1xf32> -> vector<64x1xf32>
    %183 = vector.broadcast %182 : vector<64x1xf32> to vector<64x16xf32>
    %184 = arith.mulf %179, %183 : vector<64x16xf32>
    %185 = arith.truncf %184 : vector<64x16xf32> to vector<64x16xbf16>
    %186 = arith.truncf %159 : vector<16x128xf32> to vector<16x128xbf16>
    %cst_57 = arith.constant dense<0.000000e+00> : vector<64x128xf32>
    %187 = tpu.matmul %185, %186, %cst_57 {dimension_numbers = #tpu.dot_dimension_numbers<[1], [0], [0], [1], [0, 0, 1, 1], [], []>} : vector<64x16xbf16>, vector<16x128xbf16>, vector<64x128xf32> -> vector<64x128xf32>
    %188 = vector.extract_strided_slice %187 {offsets = [0, 0], sizes = [16, 128], strides = [1, 1]} : vector<64x128xf32> to vector<16x128xf32>
    %189 = vector.broadcast %13 : vector<1x128xf32> to vector<16x128xf32>
    %190 = arith.mulf %188, %189 : vector<16x128xf32>
    %191 = vector.extract_strided_slice %187 {offsets = [16, 0], sizes = [16, 128], strides = [1, 1]} : vector<64x128xf32> to vector<16x128xf32>
    %192 = vector.broadcast %20 : vector<1x128xf32> to vector<16x128xf32>
    %193 = arith.mulf %191, %192 : vector<16x128xf32>
    %194 = arith.addf %190, %193 : vector<16x128xf32>
    %195 = vector.extract_strided_slice %187 {offsets = [32, 0], sizes = [16, 128], strides = [1, 1]} : vector<64x128xf32> to vector<16x128xf32>
    %196 = vector.broadcast %27 : vector<1x128xf32> to vector<16x128xf32>
    %197 = arith.mulf %195, %196 : vector<16x128xf32>
    %198 = arith.addf %194, %197 : vector<16x128xf32>
    %199 = vector.extract_strided_slice %187 {offsets = [48, 0], sizes = [16, 128], strides = [1, 1]} : vector<64x128xf32> to vector<16x128xf32>
    %200 = vector.broadcast %34 : vector<1x128xf32> to vector<16x128xf32>
    %201 = arith.mulf %199, %200 : vector<16x128xf32>
    %202 = arith.addf %198, %201 : vector<16x128xf32>
    %c0_58 = arith.constant 0 : index
    %c0_59 = arith.constant 0 : index
    %c0_60 = arith.constant 0 : index
    %203 = vector.load %arg5[%c0_58, %c0_59, %c0_60] : memref<2x128x128xbf16, #tpu.memory_space<vmem>>, vector<1x128x128xbf16>
    %204 = vector.shape_cast %203 : vector<1x128x128xbf16> to vector<128x128xbf16>
    %c0_61 = arith.constant 0 : index
    %c0_62 = arith.constant 0 : index
    %c0_63 = arith.constant 0 : index
    %205 = vector.load %arg6[%c0_61, %c0_62, %c0_63] : memref<2x1x128xf32, #tpu.memory_space<vmem>>, vector<1x1x128xf32>
    %206 = vector.shape_cast %205 : vector<1x1x128xf32> to vector<1x128xf32>
    %207 = arith.truncf %202 : vector<16x128xf32> to vector<16x128xbf16>
    %cst_64 = arith.constant dense<0.000000e+00> : vector<16x128xf32>
    %208 = tpu.matmul %207, %204, %cst_64 {dimension_numbers = #tpu.dot_dimension_numbers<[1], [0], [0], [1], [0, 0, 1, 1], [], []>} : vector<16x128xbf16>, vector<128x128xbf16>, vector<16x128xf32> -> vector<16x128xf32>
    %209 = vector.broadcast %206 : vector<1x128xf32> to vector<16x128xf32>
    %210 = arith.addf %208, %209 : vector<16x128xf32>
    %211 = arith.addf %0, %210 : vector<16x128xf32>
    %c0_65 = arith.constant 0 : index
    %c0_66 = arith.constant 0 : index
    %c0_67 = arith.constant 0 : index
    %212 = vector.load %arg7[%c0_65, %c0_66, %c0_67] : memref<2x1x128xf32, #tpu.memory_space<vmem>>, vector<1x1x128xf32>
    %213 = vector.shape_cast %212 : vector<1x1x128xf32> to vector<1x128xf32>
    %c0_68 = arith.constant 0 : index
    %c0_69 = arith.constant 0 : index
    %c0_70 = arith.constant 0 : index
    %214 = vector.load %arg8[%c0_68, %c0_69, %c0_70] : memref<2x1x128xf32, #tpu.memory_space<vmem>>, vector<1x1x128xf32>
    %215 = vector.shape_cast %214 : vector<1x1x128xf32> to vector<1x128xf32>
    %cst_71 = arith.constant dense<0.000000e+00> : vector<16xf32>
    %216 = vector.multi_reduction <add>, %211, %cst_71 [1] : vector<16x128xf32> to vector<16xf32>
    %217 = vector.shape_cast %216 : vector<16xf32> to vector<16x1xf32>
    %cst_72 = arith.constant 3.125000e-02 : f32
    %218 = vector.broadcast %cst_72 : f32 to vector<16x1xf32>
    %219 = arith.mulf %217, %218 : vector<16x1xf32>
    %220 = vector.broadcast %219 : vector<16x1xf32> to vector<16x128xf32>
    %221 = arith.subf %211, %220 : vector<16x128xf32>
    %222 = vector.broadcast %6 : vector<1x128xf32> to vector<16x128xf32>
    %223 = arith.mulf %221, %222 : vector<16x128xf32>
    %224 = arith.mulf %223, %223 : vector<16x128xf32>
    %cst_73 = arith.constant dense<0.000000e+00> : vector<16xf32>
    %225 = vector.multi_reduction <add>, %224, %cst_73 [1] : vector<16x128xf32> to vector<16xf32>
    %226 = vector.shape_cast %225 : vector<16xf32> to vector<16x1xf32>
    %cst_74 = arith.constant 3.125000e-02 : f32
    %227 = vector.broadcast %cst_74 : f32 to vector<16x1xf32>
    %228 = arith.mulf %226, %227 : vector<16x1xf32>
    %cst_75 = arith.constant 9.99999974E-6 : f32
    %229 = vector.broadcast %cst_75 : f32 to vector<16x1xf32>
    %230 = arith.addf %228, %229 : vector<16x1xf32>
    %231 = math.rsqrt %230 : vector<16x1xf32>
    %232 = vector.broadcast %231 : vector<16x1xf32> to vector<16x128xf32>
    %233 = arith.mulf %223, %232 : vector<16x128xf32>
    %234 = vector.broadcast %213 : vector<1x128xf32> to vector<16x128xf32>
    %235 = arith.mulf %233, %234 : vector<16x128xf32>
    %236 = vector.broadcast %215 : vector<1x128xf32> to vector<16x128xf32>
    %237 = arith.addf %235, %236 : vector<16x128xf32>
    %c0_76 = arith.constant 0 : index
    %c0_77 = arith.constant 0 : index
    %c0_78 = arith.constant 0 : index
    %238 = vector.load %arg9[%c0_76, %c0_77, %c0_78] : memref<2x128x128xbf16, #tpu.memory_space<vmem>>, vector<1x128x128xbf16>
    %239 = vector.shape_cast %238 : vector<1x128x128xbf16> to vector<128x128xbf16>
    %c0_79 = arith.constant 0 : index
    %c0_80 = arith.constant 0 : index
    %c0_81 = arith.constant 0 : index
    %240 = vector.load %arg10[%c0_79, %c0_80, %c0_81] : memref<2x1x128xf32, #tpu.memory_space<vmem>>, vector<1x1x128xf32>
    %241 = vector.shape_cast %240 : vector<1x1x128xf32> to vector<1x128xf32>
    %242 = arith.truncf %237 : vector<16x128xf32> to vector<16x128xbf16>
    %cst_82 = arith.constant dense<0.000000e+00> : vector<16x128xf32>
    %243 = tpu.matmul %242, %239, %cst_82 {dimension_numbers = #tpu.dot_dimension_numbers<[1], [0], [0], [1], [0, 0, 1, 1], [], []>} : vector<16x128xbf16>, vector<128x128xbf16>, vector<16x128xf32> -> vector<16x128xf32>
    %244 = vector.broadcast %241 : vector<1x128xf32> to vector<16x128xf32>
    %245 = arith.addf %243, %244 : vector<16x128xf32>
    %cst_83 = arith.constant 0.000000e+00 : f32
    %246 = vector.broadcast %cst_83 : f32 to vector<16x128xf32>
    %247 = arith.maximumf %245, %246 : vector<16x128xf32>
    %c0_84 = arith.constant 0 : index
    %c0_85 = arith.constant 0 : index
    %c0_86 = arith.constant 0 : index
    %248 = vector.load %arg11[%c0_84, %c0_85, %c0_86] : memref<2x128x128xbf16, #tpu.memory_space<vmem>>, vector<1x128x128xbf16>
    %249 = vector.shape_cast %248 : vector<1x128x128xbf16> to vector<128x128xbf16>
    %c0_87 = arith.constant 0 : index
    %c0_88 = arith.constant 0 : index
    %c0_89 = arith.constant 0 : index
    %250 = vector.load %arg12[%c0_87, %c0_88, %c0_89] : memref<2x1x128xf32, #tpu.memory_space<vmem>>, vector<1x1x128xf32>
    %251 = vector.shape_cast %250 : vector<1x1x128xf32> to vector<1x128xf32>
    %252 = arith.truncf %247 : vector<16x128xf32> to vector<16x128xbf16>
    %cst_90 = arith.constant dense<0.000000e+00> : vector<16x128xf32>
    %253 = tpu.matmul %252, %249, %cst_90 {dimension_numbers = #tpu.dot_dimension_numbers<[1], [0], [0], [1], [0, 0, 1, 1], [], []>} : vector<16x128xbf16>, vector<128x128xbf16>, vector<16x128xf32> -> vector<16x128xf32>
    %254 = vector.broadcast %251 : vector<1x128xf32> to vector<16x128xf32>
    %255 = arith.addf %253, %254 : vector<16x128xf32>
    %256 = arith.addf %237, %255 : vector<16x128xf32>
    %c0_91 = arith.constant 0 : index
    %c0_92 = arith.constant 0 : index
    %c0_93 = arith.constant 0 : index
    %257 = vector.load %arg13[%c0_91, %c0_92, %c0_93] : memref<2x1x128xf32, #tpu.memory_space<vmem>>, vector<1x1x128xf32>
    %258 = vector.shape_cast %257 : vector<1x1x128xf32> to vector<1x128xf32>
    %c0_94 = arith.constant 0 : index
    %c0_95 = arith.constant 0 : index
    %c0_96 = arith.constant 0 : index
    %259 = vector.load %arg14[%c0_94, %c0_95, %c0_96] : memref<2x1x128xf32, #tpu.memory_space<vmem>>, vector<1x1x128xf32>
    %260 = vector.shape_cast %259 : vector<1x1x128xf32> to vector<1x128xf32>
    %cst_97 = arith.constant dense<0.000000e+00> : vector<16xf32>
    %261 = vector.multi_reduction <add>, %256, %cst_97 [1] : vector<16x128xf32> to vector<16xf32>
    %262 = vector.shape_cast %261 : vector<16xf32> to vector<16x1xf32>
    %cst_98 = arith.constant 3.125000e-02 : f32
    %263 = vector.broadcast %cst_98 : f32 to vector<16x1xf32>
    %264 = arith.mulf %262, %263 : vector<16x1xf32>
    %265 = vector.broadcast %264 : vector<16x1xf32> to vector<16x128xf32>
    %266 = arith.subf %256, %265 : vector<16x128xf32>
    %267 = vector.broadcast %6 : vector<1x128xf32> to vector<16x128xf32>
    %268 = arith.mulf %266, %267 : vector<16x128xf32>
    %269 = arith.mulf %268, %268 : vector<16x128xf32>
    %cst_99 = arith.constant dense<0.000000e+00> : vector<16xf32>
    %270 = vector.multi_reduction <add>, %269, %cst_99 [1] : vector<16x128xf32> to vector<16xf32>
    %271 = vector.shape_cast %270 : vector<16xf32> to vector<16x1xf32>
    %cst_100 = arith.constant 3.125000e-02 : f32
    %272 = vector.broadcast %cst_100 : f32 to vector<16x1xf32>
    %273 = arith.mulf %271, %272 : vector<16x1xf32>
    %cst_101 = arith.constant 9.99999974E-6 : f32
    %274 = vector.broadcast %cst_101 : f32 to vector<16x1xf32>
    %275 = arith.addf %273, %274 : vector<16x1xf32>
    %276 = math.rsqrt %275 : vector<16x1xf32>
    %277 = vector.broadcast %276 : vector<16x1xf32> to vector<16x128xf32>
    %278 = arith.mulf %268, %277 : vector<16x128xf32>
    %279 = vector.broadcast %258 : vector<1x128xf32> to vector<16x128xf32>
    %280 = arith.mulf %278, %279 : vector<16x128xf32>
    %281 = vector.broadcast %260 : vector<1x128xf32> to vector<16x128xf32>
    %282 = arith.addf %280, %281 : vector<16x128xf32>
    %c1 = arith.constant 1 : index
    %c0_102 = arith.constant 0 : index
    %c0_103 = arith.constant 0 : index
    %283 = vector.load %arg3[%c1, %c0_102, %c0_103] : memref<2x128x384xbf16, #tpu.memory_space<vmem>>, vector<1x128x384xbf16>
    %284 = vector.shape_cast %283 : vector<1x128x384xbf16> to vector<128x384xbf16>
    %c1_104 = arith.constant 1 : index
    %c0_105 = arith.constant 0 : index
    %c0_106 = arith.constant 0 : index
    %285 = vector.load %arg4[%c1_104, %c0_105, %c0_106] : memref<2x1x384xf32, #tpu.memory_space<vmem>>, vector<1x1x384xf32>
    %286 = vector.shape_cast %285 : vector<1x1x384xf32> to vector<1x384xf32>
    %287 = arith.truncf %282 : vector<16x128xf32> to vector<16x128xbf16>
    %cst_107 = arith.constant dense<0.000000e+00> : vector<16x384xf32>
    %288 = tpu.matmul %287, %284, %cst_107 {dimension_numbers = #tpu.dot_dimension_numbers<[1], [0], [0], [1], [0, 0, 1, 1], [], []>} : vector<16x128xbf16>, vector<128x384xbf16>, vector<16x384xf32> -> vector<16x384xf32>
    %289 = vector.broadcast %286 : vector<1x384xf32> to vector<16x384xf32>
    %290 = arith.addf %288, %289 : vector<16x384xf32>
    %291 = vector.extract_strided_slice %290 {offsets = [0, 0], sizes = [16, 128], strides = [1, 1]} : vector<16x384xf32> to vector<16x128xf32>
    %292 = vector.extract_strided_slice %290 {offsets = [0, 128], sizes = [16, 128], strides = [1, 1]} : vector<16x384xf32> to vector<16x128xf32>
    %293 = vector.extract_strided_slice %290 {offsets = [0, 256], sizes = [16, 128], strides = [1, 1]} : vector<16x384xf32> to vector<16x128xf32>
    %294 = vector.broadcast %13 : vector<1x128xf32> to vector<16x128xf32>
    %295 = arith.mulf %291, %294 : vector<16x128xf32>
    %296 = vector.broadcast %20 : vector<1x128xf32> to vector<16x128xf32>
    %297 = arith.mulf %291, %296 : vector<16x128xf32>
    %298 = vector.broadcast %27 : vector<1x128xf32> to vector<16x128xf32>
    %299 = arith.mulf %291, %298 : vector<16x128xf32>
    %300 = vector.broadcast %34 : vector<1x128xf32> to vector<16x128xf32>
    %301 = arith.mulf %291, %300 : vector<16x128xf32>
    %302 = tpu.concatenate %295, %297, %299, %301 in 0 : vector<16x128xf32>, vector<16x128xf32>, vector<16x128xf32>, vector<16x128xf32> -> vector<64x128xf32>
    %303 = arith.truncf %302 : vector<64x128xf32> to vector<64x128xbf16>
    %304 = arith.truncf %292 : vector<16x128xf32> to vector<16x128xbf16>
    %cst_108 = arith.constant dense<0.000000e+00> : vector<64x16xf32>
    %305 = tpu.matmul %303, %304, %cst_108 {dimension_numbers = #tpu.dot_dimension_numbers<[1], [1], [0], [0], [0, 0, 1, 0], [], []>} : vector<64x128xbf16>, vector<16x128xbf16>, vector<64x16xf32> -> vector<64x16xf32>
    %cst_109 = arith.constant 0.353553385 : f32
    %306 = vector.broadcast %cst_109 : f32 to vector<64x16xf32>
    %307 = arith.mulf %305, %306 : vector<64x16xf32>
    %308 = arith.addf %307, %72 : vector<64x16xf32>
    %cst_110 = arith.constant dense<0xFF800000> : vector<64xf32>
    %309 = vector.multi_reduction <maximumf>, %308, %cst_110 [1] : vector<64x16xf32> to vector<64xf32>
    %310 = vector.shape_cast %309 : vector<64xf32> to vector<64x1xf32>
    %311 = vector.broadcast %310 : vector<64x1xf32> to vector<64x16xf32>
    %312 = arith.subf %308, %311 : vector<64x16xf32>
    %313 = math.exp %312 : vector<64x16xf32>
    %cst_111 = arith.constant dense<0.000000e+00> : vector<64xf32>
    %314 = vector.multi_reduction <add>, %313, %cst_111 [1] : vector<64x16xf32> to vector<64xf32>
    %315 = vector.shape_cast %314 : vector<64xf32> to vector<64x1xf32>
    %316 = tpu.reciprocal %315 {approx = true} : vector<64x1xf32> -> vector<64x1xf32>
    %317 = vector.broadcast %316 : vector<64x1xf32> to vector<64x16xf32>
    %318 = arith.mulf %313, %317 : vector<64x16xf32>
    %319 = arith.truncf %318 : vector<64x16xf32> to vector<64x16xbf16>
    %320 = arith.truncf %293 : vector<16x128xf32> to vector<16x128xbf16>
    %cst_112 = arith.constant dense<0.000000e+00> : vector<64x128xf32>
    %321 = tpu.matmul %319, %320, %cst_112 {dimension_numbers = #tpu.dot_dimension_numbers<[1], [0], [0], [1], [0, 0, 1, 1], [], []>} : vector<64x16xbf16>, vector<16x128xbf16>, vector<64x128xf32> -> vector<64x128xf32>
    %322 = vector.extract_strided_slice %321 {offsets = [0, 0], sizes = [16, 128], strides = [1, 1]} : vector<64x128xf32> to vector<16x128xf32>
    %323 = vector.broadcast %13 : vector<1x128xf32> to vector<16x128xf32>
    %324 = arith.mulf %322, %323 : vector<16x128xf32>
    %325 = vector.extract_strided_slice %321 {offsets = [16, 0], sizes = [16, 128], strides = [1, 1]} : vector<64x128xf32> to vector<16x128xf32>
    %326 = vector.broadcast %20 : vector<1x128xf32> to vector<16x128xf32>
    %327 = arith.mulf %325, %326 : vector<16x128xf32>
    %328 = arith.addf %324, %327 : vector<16x128xf32>
    %329 = vector.extract_strided_slice %321 {offsets = [32, 0], sizes = [16, 128], strides = [1, 1]} : vector<64x128xf32> to vector<16x128xf32>
    %330 = vector.broadcast %27 : vector<1x128xf32> to vector<16x128xf32>
    %331 = arith.mulf %329, %330 : vector<16x128xf32>
    %332 = arith.addf %328, %331 : vector<16x128xf32>
    %333 = vector.extract_strided_slice %321 {offsets = [48, 0], sizes = [16, 128], strides = [1, 1]} : vector<64x128xf32> to vector<16x128xf32>
    %334 = vector.broadcast %34 : vector<1x128xf32> to vector<16x128xf32>
    %335 = arith.mulf %333, %334 : vector<16x128xf32>
    %336 = arith.addf %332, %335 : vector<16x128xf32>
    %c1_113 = arith.constant 1 : index
    %c0_114 = arith.constant 0 : index
    %c0_115 = arith.constant 0 : index
    %337 = vector.load %arg5[%c1_113, %c0_114, %c0_115] : memref<2x128x128xbf16, #tpu.memory_space<vmem>>, vector<1x128x128xbf16>
    %338 = vector.shape_cast %337 : vector<1x128x128xbf16> to vector<128x128xbf16>
    %c1_116 = arith.constant 1 : index
    %c0_117 = arith.constant 0 : index
    %c0_118 = arith.constant 0 : index
    %339 = vector.load %arg6[%c1_116, %c0_117, %c0_118] : memref<2x1x128xf32, #tpu.memory_space<vmem>>, vector<1x1x128xf32>
    %340 = vector.shape_cast %339 : vector<1x1x128xf32> to vector<1x128xf32>
    %341 = arith.truncf %336 : vector<16x128xf32> to vector<16x128xbf16>
    %cst_119 = arith.constant dense<0.000000e+00> : vector<16x128xf32>
    %342 = tpu.matmul %341, %338, %cst_119 {dimension_numbers = #tpu.dot_dimension_numbers<[1], [0], [0], [1], [0, 0, 1, 1], [], []>} : vector<16x128xbf16>, vector<128x128xbf16>, vector<16x128xf32> -> vector<16x128xf32>
    %343 = vector.broadcast %340 : vector<1x128xf32> to vector<16x128xf32>
    %344 = arith.addf %342, %343 : vector<16x128xf32>
    %345 = arith.addf %282, %344 : vector<16x128xf32>
    %c1_120 = arith.constant 1 : index
    %c0_121 = arith.constant 0 : index
    %c0_122 = arith.constant 0 : index
    %346 = vector.load %arg7[%c1_120, %c0_121, %c0_122] : memref<2x1x128xf32, #tpu.memory_space<vmem>>, vector<1x1x128xf32>
    %347 = vector.shape_cast %346 : vector<1x1x128xf32> to vector<1x128xf32>
    %c1_123 = arith.constant 1 : index
    %c0_124 = arith.constant 0 : index
    %c0_125 = arith.constant 0 : index
    %348 = vector.load %arg8[%c1_123, %c0_124, %c0_125] : memref<2x1x128xf32, #tpu.memory_space<vmem>>, vector<1x1x128xf32>
    %349 = vector.shape_cast %348 : vector<1x1x128xf32> to vector<1x128xf32>
    %cst_126 = arith.constant dense<0.000000e+00> : vector<16xf32>
    %350 = vector.multi_reduction <add>, %345, %cst_126 [1] : vector<16x128xf32> to vector<16xf32>
    %351 = vector.shape_cast %350 : vector<16xf32> to vector<16x1xf32>
    %cst_127 = arith.constant 3.125000e-02 : f32
    %352 = vector.broadcast %cst_127 : f32 to vector<16x1xf32>
    %353 = arith.mulf %351, %352 : vector<16x1xf32>
    %354 = vector.broadcast %353 : vector<16x1xf32> to vector<16x128xf32>
    %355 = arith.subf %345, %354 : vector<16x128xf32>
    %356 = vector.broadcast %6 : vector<1x128xf32> to vector<16x128xf32>
    %357 = arith.mulf %355, %356 : vector<16x128xf32>
    %358 = arith.mulf %357, %357 : vector<16x128xf32>
    %cst_128 = arith.constant dense<0.000000e+00> : vector<16xf32>
    %359 = vector.multi_reduction <add>, %358, %cst_128 [1] : vector<16x128xf32> to vector<16xf32>
    %360 = vector.shape_cast %359 : vector<16xf32> to vector<16x1xf32>
    %cst_129 = arith.constant 3.125000e-02 : f32
    %361 = vector.broadcast %cst_129 : f32 to vector<16x1xf32>
    %362 = arith.mulf %360, %361 : vector<16x1xf32>
    %cst_130 = arith.constant 9.99999974E-6 : f32
    %363 = vector.broadcast %cst_130 : f32 to vector<16x1xf32>
    %364 = arith.addf %362, %363 : vector<16x1xf32>
    %365 = math.rsqrt %364 : vector<16x1xf32>
    %366 = vector.broadcast %365 : vector<16x1xf32> to vector<16x128xf32>
    %367 = arith.mulf %357, %366 : vector<16x128xf32>
    %368 = vector.broadcast %347 : vector<1x128xf32> to vector<16x128xf32>
    %369 = arith.mulf %367, %368 : vector<16x128xf32>
    %370 = vector.broadcast %349 : vector<1x128xf32> to vector<16x128xf32>
    %371 = arith.addf %369, %370 : vector<16x128xf32>
    %c1_131 = arith.constant 1 : index
    %c0_132 = arith.constant 0 : index
    %c0_133 = arith.constant 0 : index
    %372 = vector.load %arg9[%c1_131, %c0_132, %c0_133] : memref<2x128x128xbf16, #tpu.memory_space<vmem>>, vector<1x128x128xbf16>
    %373 = vector.shape_cast %372 : vector<1x128x128xbf16> to vector<128x128xbf16>
    %c1_134 = arith.constant 1 : index
    %c0_135 = arith.constant 0 : index
    %c0_136 = arith.constant 0 : index
    %374 = vector.load %arg10[%c1_134, %c0_135, %c0_136] : memref<2x1x128xf32, #tpu.memory_space<vmem>>, vector<1x1x128xf32>
    %375 = vector.shape_cast %374 : vector<1x1x128xf32> to vector<1x128xf32>
    %376 = arith.truncf %371 : vector<16x128xf32> to vector<16x128xbf16>
    %cst_137 = arith.constant dense<0.000000e+00> : vector<16x128xf32>
    %377 = tpu.matmul %376, %373, %cst_137 {dimension_numbers = #tpu.dot_dimension_numbers<[1], [0], [0], [1], [0, 0, 1, 1], [], []>} : vector<16x128xbf16>, vector<128x128xbf16>, vector<16x128xf32> -> vector<16x128xf32>
    %378 = vector.broadcast %375 : vector<1x128xf32> to vector<16x128xf32>
    %379 = arith.addf %377, %378 : vector<16x128xf32>
    %cst_138 = arith.constant 0.000000e+00 : f32
    %380 = vector.broadcast %cst_138 : f32 to vector<16x128xf32>
    %381 = arith.maximumf %379, %380 : vector<16x128xf32>
    %c1_139 = arith.constant 1 : index
    %c0_140 = arith.constant 0 : index
    %c0_141 = arith.constant 0 : index
    %382 = vector.load %arg11[%c1_139, %c0_140, %c0_141] : memref<2x128x128xbf16, #tpu.memory_space<vmem>>, vector<1x128x128xbf16>
    %383 = vector.shape_cast %382 : vector<1x128x128xbf16> to vector<128x128xbf16>
    %c1_142 = arith.constant 1 : index
    %c0_143 = arith.constant 0 : index
    %c0_144 = arith.constant 0 : index
    %384 = vector.load %arg12[%c1_142, %c0_143, %c0_144] : memref<2x1x128xf32, #tpu.memory_space<vmem>>, vector<1x1x128xf32>
    %385 = vector.shape_cast %384 : vector<1x1x128xf32> to vector<1x128xf32>
    %386 = arith.truncf %381 : vector<16x128xf32> to vector<16x128xbf16>
    %cst_145 = arith.constant dense<0.000000e+00> : vector<16x128xf32>
    %387 = tpu.matmul %386, %383, %cst_145 {dimension_numbers = #tpu.dot_dimension_numbers<[1], [0], [0], [1], [0, 0, 1, 1], [], []>} : vector<16x128xbf16>, vector<128x128xbf16>, vector<16x128xf32> -> vector<16x128xf32>
    %388 = vector.broadcast %385 : vector<1x128xf32> to vector<16x128xf32>
    %389 = arith.addf %387, %388 : vector<16x128xf32>
    %390 = arith.addf %371, %389 : vector<16x128xf32>
    %c1_146 = arith.constant 1 : index
    %c0_147 = arith.constant 0 : index
    %c0_148 = arith.constant 0 : index
    %391 = vector.load %arg13[%c1_146, %c0_147, %c0_148] : memref<2x1x128xf32, #tpu.memory_space<vmem>>, vector<1x1x128xf32>
    %392 = vector.shape_cast %391 : vector<1x1x128xf32> to vector<1x128xf32>
    %c1_149 = arith.constant 1 : index
    %c0_150 = arith.constant 0 : index
    %c0_151 = arith.constant 0 : index
    %393 = vector.load %arg14[%c1_149, %c0_150, %c0_151] : memref<2x1x128xf32, #tpu.memory_space<vmem>>, vector<1x1x128xf32>
    %394 = vector.shape_cast %393 : vector<1x1x128xf32> to vector<1x128xf32>
    %cst_152 = arith.constant dense<0.000000e+00> : vector<16xf32>
    %395 = vector.multi_reduction <add>, %390, %cst_152 [1] : vector<16x128xf32> to vector<16xf32>
    %396 = vector.shape_cast %395 : vector<16xf32> to vector<16x1xf32>
    %cst_153 = arith.constant 3.125000e-02 : f32
    %397 = vector.broadcast %cst_153 : f32 to vector<16x1xf32>
    %398 = arith.mulf %396, %397 : vector<16x1xf32>
    %399 = vector.broadcast %398 : vector<16x1xf32> to vector<16x128xf32>
    %400 = arith.subf %390, %399 : vector<16x128xf32>
    %401 = vector.broadcast %6 : vector<1x128xf32> to vector<16x128xf32>
    %402 = arith.mulf %400, %401 : vector<16x128xf32>
    %403 = arith.mulf %402, %402 : vector<16x128xf32>
    %cst_154 = arith.constant dense<0.000000e+00> : vector<16xf32>
    %404 = vector.multi_reduction <add>, %403, %cst_154 [1] : vector<16x128xf32> to vector<16xf32>
    %405 = vector.shape_cast %404 : vector<16xf32> to vector<16x1xf32>
    %cst_155 = arith.constant 3.125000e-02 : f32
    %406 = vector.broadcast %cst_155 : f32 to vector<16x1xf32>
    %407 = arith.mulf %405, %406 : vector<16x1xf32>
    %cst_156 = arith.constant 9.99999974E-6 : f32
    %408 = vector.broadcast %cst_156 : f32 to vector<16x1xf32>
    %409 = arith.addf %407, %408 : vector<16x1xf32>
    %410 = math.rsqrt %409 : vector<16x1xf32>
    %411 = vector.broadcast %410 : vector<16x1xf32> to vector<16x128xf32>
    %412 = arith.mulf %402, %411 : vector<16x128xf32>
    %413 = vector.broadcast %392 : vector<1x128xf32> to vector<16x128xf32>
    %414 = arith.mulf %412, %413 : vector<16x128xf32>
    %415 = vector.broadcast %394 : vector<1x128xf32> to vector<16x128xf32>
    %416 = arith.addf %414, %415 : vector<16x128xf32>
    %c0_157 = arith.constant 0 : index
    %c0_158 = arith.constant 0 : index
    %417 = vector.load %arg15[%c0_157, %c0_158] : memref<1x128xf32, #tpu.memory_space<vmem>>, vector<1x128xf32>
    %c0_159 = arith.constant 0 : index
    %c0_160 = arith.constant 0 : index
    %418 = vector.load %arg16[%c0_159, %c0_160] : memref<1x128xf32, #tpu.memory_space<vmem>>, vector<1x128xf32>
    %cst_161 = arith.constant dense<0.000000e+00> : vector<16xf32>
    %419 = vector.multi_reduction <add>, %416, %cst_161 [1] : vector<16x128xf32> to vector<16xf32>
    %420 = vector.shape_cast %419 : vector<16xf32> to vector<16x1xf32>
    %cst_162 = arith.constant 3.125000e-02 : f32
    %421 = vector.broadcast %cst_162 : f32 to vector<16x1xf32>
    %422 = arith.mulf %420, %421 : vector<16x1xf32>
    %423 = vector.broadcast %422 : vector<16x1xf32> to vector<16x128xf32>
    %424 = arith.subf %416, %423 : vector<16x128xf32>
    %425 = vector.broadcast %6 : vector<1x128xf32> to vector<16x128xf32>
    %426 = arith.mulf %424, %425 : vector<16x128xf32>
    %427 = arith.mulf %426, %426 : vector<16x128xf32>
    %cst_163 = arith.constant dense<0.000000e+00> : vector<16xf32>
    %428 = vector.multi_reduction <add>, %427, %cst_163 [1] : vector<16x128xf32> to vector<16xf32>
    %429 = vector.shape_cast %428 : vector<16xf32> to vector<16x1xf32>
    %cst_164 = arith.constant 3.125000e-02 : f32
    %430 = vector.broadcast %cst_164 : f32 to vector<16x1xf32>
    %431 = arith.mulf %429, %430 : vector<16x1xf32>
    %cst_165 = arith.constant 9.99999974E-6 : f32
    %432 = vector.broadcast %cst_165 : f32 to vector<16x1xf32>
    %433 = arith.addf %431, %432 : vector<16x1xf32>
    %434 = math.rsqrt %433 : vector<16x1xf32>
    %435 = vector.broadcast %434 : vector<16x1xf32> to vector<16x128xf32>
    %436 = arith.mulf %426, %435 : vector<16x128xf32>
    %437 = vector.broadcast %417 : vector<1x128xf32> to vector<16x128xf32>
    %438 = arith.mulf %436, %437 : vector<16x128xf32>
    %439 = vector.broadcast %418 : vector<1x128xf32> to vector<16x128xf32>
    %440 = arith.addf %438, %439 : vector<16x128xf32>
    %c0_166 = arith.constant 0 : index
    %c0_167 = arith.constant 0 : index
    %c0_168 = arith.constant 0 : index
    %441 = vector.load %arg17[%c0_166, %c0_167, %c0_168] : memref<2x128x384xbf16, #tpu.memory_space<vmem>>, vector<1x128x384xbf16>
    %442 = vector.shape_cast %441 : vector<1x128x384xbf16> to vector<128x384xbf16>
    %c0_169 = arith.constant 0 : index
    %c0_170 = arith.constant 0 : index
    %c0_171 = arith.constant 0 : index
    %443 = vector.load %arg18[%c0_169, %c0_170, %c0_171] : memref<2x1x384xf32, #tpu.memory_space<vmem>>, vector<1x1x384xf32>
    %444 = vector.shape_cast %443 : vector<1x1x384xf32> to vector<1x384xf32>
    %445 = arith.truncf %1 : vector<16x128xf32> to vector<16x128xbf16>
    %cst_172 = arith.constant dense<0.000000e+00> : vector<16x384xf32>
    %446 = tpu.matmul %445, %442, %cst_172 {dimension_numbers = #tpu.dot_dimension_numbers<[1], [0], [0], [1], [0, 0, 1, 1], [], []>} : vector<16x128xbf16>, vector<128x384xbf16>, vector<16x384xf32> -> vector<16x384xf32>
    %447 = vector.broadcast %444 : vector<1x384xf32> to vector<16x384xf32>
    %448 = arith.addf %446, %447 : vector<16x384xf32>
    %449 = vector.extract_strided_slice %448 {offsets = [0, 0], sizes = [16, 128], strides = [1, 1]} : vector<16x384xf32> to vector<16x128xf32>
    %450 = vector.extract_strided_slice %448 {offsets = [0, 128], sizes = [16, 128], strides = [1, 1]} : vector<16x384xf32> to vector<16x128xf32>
    %451 = vector.extract_strided_slice %448 {offsets = [0, 256], sizes = [16, 128], strides = [1, 1]} : vector<16x384xf32> to vector<16x128xf32>
    %452 = vector.broadcast %13 : vector<1x128xf32> to vector<16x128xf32>
    %453 = arith.mulf %449, %452 : vector<16x128xf32>
    %454 = vector.broadcast %20 : vector<1x128xf32> to vector<16x128xf32>
    %455 = arith.mulf %449, %454 : vector<16x128xf32>
    %456 = vector.broadcast %27 : vector<1x128xf32> to vector<16x128xf32>
    %457 = arith.mulf %449, %456 : vector<16x128xf32>
    %458 = vector.broadcast %34 : vector<1x128xf32> to vector<16x128xf32>
    %459 = arith.mulf %449, %458 : vector<16x128xf32>
    %460 = tpu.concatenate %453, %455, %457, %459 in 0 : vector<16x128xf32>, vector<16x128xf32>, vector<16x128xf32>, vector<16x128xf32> -> vector<64x128xf32>
    %461 = arith.truncf %460 : vector<64x128xf32> to vector<64x128xbf16>
    %462 = arith.truncf %450 : vector<16x128xf32> to vector<16x128xbf16>
    %cst_173 = arith.constant dense<0.000000e+00> : vector<64x16xf32>
    %463 = tpu.matmul %461, %462, %cst_173 {dimension_numbers = #tpu.dot_dimension_numbers<[1], [1], [0], [0], [0, 0, 1, 0], [], []>} : vector<64x128xbf16>, vector<16x128xbf16>, vector<64x16xf32> -> vector<64x16xf32>
    %cst_174 = arith.constant 0.353553385 : f32
    %464 = vector.broadcast %cst_174 : f32 to vector<64x16xf32>
    %465 = arith.mulf %463, %464 : vector<64x16xf32>
    %466 = arith.addf %465, %110 : vector<64x16xf32>
    %cst_175 = arith.constant dense<0xFF800000> : vector<64xf32>
    %467 = vector.multi_reduction <maximumf>, %466, %cst_175 [1] : vector<64x16xf32> to vector<64xf32>
    %468 = vector.shape_cast %467 : vector<64xf32> to vector<64x1xf32>
    %469 = vector.broadcast %468 : vector<64x1xf32> to vector<64x16xf32>
    %470 = arith.subf %466, %469 : vector<64x16xf32>
    %471 = math.exp %470 : vector<64x16xf32>
    %cst_176 = arith.constant dense<0.000000e+00> : vector<64xf32>
    %472 = vector.multi_reduction <add>, %471, %cst_176 [1] : vector<64x16xf32> to vector<64xf32>
    %473 = vector.shape_cast %472 : vector<64xf32> to vector<64x1xf32>
    %474 = tpu.reciprocal %473 {approx = true} : vector<64x1xf32> -> vector<64x1xf32>
    %475 = vector.broadcast %474 : vector<64x1xf32> to vector<64x16xf32>
    %476 = arith.mulf %471, %475 : vector<64x16xf32>
    %477 = arith.truncf %476 : vector<64x16xf32> to vector<64x16xbf16>
    %478 = arith.truncf %451 : vector<16x128xf32> to vector<16x128xbf16>
    %cst_177 = arith.constant dense<0.000000e+00> : vector<64x128xf32>
    %479 = tpu.matmul %477, %478, %cst_177 {dimension_numbers = #tpu.dot_dimension_numbers<[1], [0], [0], [1], [0, 0, 1, 1], [], []>} : vector<64x16xbf16>, vector<16x128xbf16>, vector<64x128xf32> -> vector<64x128xf32>
    %480 = vector.extract_strided_slice %479 {offsets = [0, 0], sizes = [16, 128], strides = [1, 1]} : vector<64x128xf32> to vector<16x128xf32>
    %481 = vector.broadcast %13 : vector<1x128xf32> to vector<16x128xf32>
    %482 = arith.mulf %480, %481 : vector<16x128xf32>
    %483 = vector.extract_strided_slice %479 {offsets = [16, 0], sizes = [16, 128], strides = [1, 1]} : vector<64x128xf32> to vector<16x128xf32>
    %484 = vector.broadcast %20 : vector<1x128xf32> to vector<16x128xf32>
    %485 = arith.mulf %483, %484 : vector<16x128xf32>
    %486 = arith.addf %482, %485 : vector<16x128xf32>
    %487 = vector.extract_strided_slice %479 {offsets = [32, 0], sizes = [16, 128], strides = [1, 1]} : vector<64x128xf32> to vector<16x128xf32>
    %488 = vector.broadcast %27 : vector<1x128xf32> to vector<16x128xf32>
    %489 = arith.mulf %487, %488 : vector<16x128xf32>
    %490 = arith.addf %486, %489 : vector<16x128xf32>
    %491 = vector.extract_strided_slice %479 {offsets = [48, 0], sizes = [16, 128], strides = [1, 1]} : vector<64x128xf32> to vector<16x128xf32>
    %492 = vector.broadcast %34 : vector<1x128xf32> to vector<16x128xf32>
    %493 = arith.mulf %491, %492 : vector<16x128xf32>
    %494 = arith.addf %490, %493 : vector<16x128xf32>
    %c0_178 = arith.constant 0 : index
    %c0_179 = arith.constant 0 : index
    %c0_180 = arith.constant 0 : index
    %495 = vector.load %arg19[%c0_178, %c0_179, %c0_180] : memref<2x128x128xbf16, #tpu.memory_space<vmem>>, vector<1x128x128xbf16>
    %496 = vector.shape_cast %495 : vector<1x128x128xbf16> to vector<128x128xbf16>
    %c0_181 = arith.constant 0 : index
    %c0_182 = arith.constant 0 : index
    %c0_183 = arith.constant 0 : index
    %497 = vector.load %arg20[%c0_181, %c0_182, %c0_183] : memref<2x1x128xf32, #tpu.memory_space<vmem>>, vector<1x1x128xf32>
    %498 = vector.shape_cast %497 : vector<1x1x128xf32> to vector<1x128xf32>
    %499 = arith.truncf %494 : vector<16x128xf32> to vector<16x128xbf16>
    %cst_184 = arith.constant dense<0.000000e+00> : vector<16x128xf32>
    %500 = tpu.matmul %499, %496, %cst_184 {dimension_numbers = #tpu.dot_dimension_numbers<[1], [0], [0], [1], [0, 0, 1, 1], [], []>} : vector<16x128xbf16>, vector<128x128xbf16>, vector<16x128xf32> -> vector<16x128xf32>
    %501 = vector.broadcast %498 : vector<1x128xf32> to vector<16x128xf32>
    %502 = arith.addf %500, %501 : vector<16x128xf32>
    %503 = arith.addf %1, %502 : vector<16x128xf32>
    %c0_185 = arith.constant 0 : index
    %c0_186 = arith.constant 0 : index
    %c0_187 = arith.constant 0 : index
    %504 = vector.load %arg21[%c0_185, %c0_186, %c0_187] : memref<2x1x128xf32, #tpu.memory_space<vmem>>, vector<1x1x128xf32>
    %505 = vector.shape_cast %504 : vector<1x1x128xf32> to vector<1x128xf32>
    %c0_188 = arith.constant 0 : index
    %c0_189 = arith.constant 0 : index
    %c0_190 = arith.constant 0 : index
    %506 = vector.load %arg22[%c0_188, %c0_189, %c0_190] : memref<2x1x128xf32, #tpu.memory_space<vmem>>, vector<1x1x128xf32>
    %507 = vector.shape_cast %506 : vector<1x1x128xf32> to vector<1x128xf32>
    %cst_191 = arith.constant dense<0.000000e+00> : vector<16xf32>
    %508 = vector.multi_reduction <add>, %503, %cst_191 [1] : vector<16x128xf32> to vector<16xf32>
    %509 = vector.shape_cast %508 : vector<16xf32> to vector<16x1xf32>
    %cst_192 = arith.constant 3.125000e-02 : f32
    %510 = vector.broadcast %cst_192 : f32 to vector<16x1xf32>
    %511 = arith.mulf %509, %510 : vector<16x1xf32>
    %512 = vector.broadcast %511 : vector<16x1xf32> to vector<16x128xf32>
    %513 = arith.subf %503, %512 : vector<16x128xf32>
    %514 = vector.broadcast %6 : vector<1x128xf32> to vector<16x128xf32>
    %515 = arith.mulf %513, %514 : vector<16x128xf32>
    %516 = arith.mulf %515, %515 : vector<16x128xf32>
    %cst_193 = arith.constant dense<0.000000e+00> : vector<16xf32>
    %517 = vector.multi_reduction <add>, %516, %cst_193 [1] : vector<16x128xf32> to vector<16xf32>
    %518 = vector.shape_cast %517 : vector<16xf32> to vector<16x1xf32>
    %cst_194 = arith.constant 3.125000e-02 : f32
    %519 = vector.broadcast %cst_194 : f32 to vector<16x1xf32>
    %520 = arith.mulf %518, %519 : vector<16x1xf32>
    %cst_195 = arith.constant 9.99999974E-6 : f32
    %521 = vector.broadcast %cst_195 : f32 to vector<16x1xf32>
    %522 = arith.addf %520, %521 : vector<16x1xf32>
    %523 = math.rsqrt %522 : vector<16x1xf32>
    %524 = vector.broadcast %523 : vector<16x1xf32> to vector<16x128xf32>
    %525 = arith.mulf %515, %524 : vector<16x128xf32>
    %526 = vector.broadcast %505 : vector<1x128xf32> to vector<16x128xf32>
    %527 = arith.mulf %525, %526 : vector<16x128xf32>
    %528 = vector.broadcast %507 : vector<1x128xf32> to vector<16x128xf32>
    %529 = arith.addf %527, %528 : vector<16x128xf32>
    %c0_196 = arith.constant 0 : index
    %c0_197 = arith.constant 0 : index
    %c0_198 = arith.constant 0 : index
    %530 = vector.load %arg23[%c0_196, %c0_197, %c0_198] : memref<2x128x128xbf16, #tpu.memory_space<vmem>>, vector<1x128x128xbf16>
    %531 = vector.shape_cast %530 : vector<1x128x128xbf16> to vector<128x128xbf16>
    %c0_199 = arith.constant 0 : index
    %c0_200 = arith.constant 0 : index
    %c0_201 = arith.constant 0 : index
    %532 = vector.load %arg24[%c0_199, %c0_200, %c0_201] : memref<2x1x128xf32, #tpu.memory_space<vmem>>, vector<1x1x128xf32>
    %533 = vector.shape_cast %532 : vector<1x1x128xf32> to vector<1x128xf32>
    %534 = arith.truncf %529 : vector<16x128xf32> to vector<16x128xbf16>
    %cst_202 = arith.constant dense<0.000000e+00> : vector<16x128xf32>
    %535 = tpu.matmul %534, %531, %cst_202 {dimension_numbers = #tpu.dot_dimension_numbers<[1], [0], [0], [1], [0, 0, 1, 1], [], []>} : vector<16x128xbf16>, vector<128x128xbf16>, vector<16x128xf32> -> vector<16x128xf32>
    %536 = vector.broadcast %533 : vector<1x128xf32> to vector<16x128xf32>
    %537 = arith.addf %535, %536 : vector<16x128xf32>
    %c0_203 = arith.constant 0 : index
    %c0_204 = arith.constant 0 : index
    %c0_205 = arith.constant 0 : index
    %538 = vector.load %arg25[%c0_203, %c0_204, %c0_205] : memref<2x128x256xbf16, #tpu.memory_space<vmem>>, vector<1x128x256xbf16>
    %539 = vector.shape_cast %538 : vector<1x128x256xbf16> to vector<128x256xbf16>
    %c0_206 = arith.constant 0 : index
    %c0_207 = arith.constant 0 : index
    %c0_208 = arith.constant 0 : index
    %540 = vector.load %arg26[%c0_206, %c0_207, %c0_208] : memref<2x1x256xf32, #tpu.memory_space<vmem>>, vector<1x1x256xf32>
    %541 = vector.shape_cast %540 : vector<1x1x256xf32> to vector<1x256xf32>
    %542 = arith.truncf %440 : vector<16x128xf32> to vector<16x128xbf16>
    %cst_209 = arith.constant dense<0.000000e+00> : vector<16x256xf32>
    %543 = tpu.matmul %542, %539, %cst_209 {dimension_numbers = #tpu.dot_dimension_numbers<[1], [0], [0], [1], [0, 0, 1, 1], [], []>} : vector<16x128xbf16>, vector<128x256xbf16>, vector<16x256xf32> -> vector<16x256xf32>
    %544 = vector.broadcast %541 : vector<1x256xf32> to vector<16x256xf32>
    %545 = arith.addf %543, %544 : vector<16x256xf32>
    %546 = vector.extract_strided_slice %545 {offsets = [0, 0], sizes = [16, 128], strides = [1, 1]} : vector<16x256xf32> to vector<16x128xf32>
    %547 = vector.extract_strided_slice %545 {offsets = [0, 128], sizes = [16, 128], strides = [1, 1]} : vector<16x256xf32> to vector<16x128xf32>
    %548 = vector.broadcast %13 : vector<1x128xf32> to vector<16x128xf32>
    %549 = arith.mulf %537, %548 : vector<16x128xf32>
    %550 = vector.broadcast %20 : vector<1x128xf32> to vector<16x128xf32>
    %551 = arith.mulf %537, %550 : vector<16x128xf32>
    %552 = vector.broadcast %27 : vector<1x128xf32> to vector<16x128xf32>
    %553 = arith.mulf %537, %552 : vector<16x128xf32>
    %554 = vector.broadcast %34 : vector<1x128xf32> to vector<16x128xf32>
    %555 = arith.mulf %537, %554 : vector<16x128xf32>
    %556 = tpu.concatenate %549, %551, %553, %555 in 0 : vector<16x128xf32>, vector<16x128xf32>, vector<16x128xf32>, vector<16x128xf32> -> vector<64x128xf32>
    %557 = arith.truncf %556 : vector<64x128xf32> to vector<64x128xbf16>
    %558 = arith.truncf %546 : vector<16x128xf32> to vector<16x128xbf16>
    %cst_210 = arith.constant dense<0.000000e+00> : vector<64x16xf32>
    %559 = tpu.matmul %557, %558, %cst_210 {dimension_numbers = #tpu.dot_dimension_numbers<[1], [1], [0], [0], [0, 0, 1, 0], [], []>} : vector<64x128xbf16>, vector<16x128xbf16>, vector<64x16xf32> -> vector<64x16xf32>
    %cst_211 = arith.constant 0.353553385 : f32
    %560 = vector.broadcast %cst_211 : f32 to vector<64x16xf32>
    %561 = arith.mulf %559, %560 : vector<64x16xf32>
    %562 = arith.addf %561, %148 : vector<64x16xf32>
    %cst_212 = arith.constant dense<0xFF800000> : vector<64xf32>
    %563 = vector.multi_reduction <maximumf>, %562, %cst_212 [1] : vector<64x16xf32> to vector<64xf32>
    %564 = vector.shape_cast %563 : vector<64xf32> to vector<64x1xf32>
    %565 = vector.broadcast %564 : vector<64x1xf32> to vector<64x16xf32>
    %566 = arith.subf %562, %565 : vector<64x16xf32>
    %567 = math.exp %566 : vector<64x16xf32>
    %cst_213 = arith.constant dense<0.000000e+00> : vector<64xf32>
    %568 = vector.multi_reduction <add>, %567, %cst_213 [1] : vector<64x16xf32> to vector<64xf32>
    %569 = vector.shape_cast %568 : vector<64xf32> to vector<64x1xf32>
    %570 = tpu.reciprocal %569 {approx = true} : vector<64x1xf32> -> vector<64x1xf32>
    %571 = vector.broadcast %570 : vector<64x1xf32> to vector<64x16xf32>
    %572 = arith.mulf %567, %571 : vector<64x16xf32>
    %573 = arith.truncf %572 : vector<64x16xf32> to vector<64x16xbf16>
    %574 = arith.truncf %547 : vector<16x128xf32> to vector<16x128xbf16>
    %cst_214 = arith.constant dense<0.000000e+00> : vector<64x128xf32>
    %575 = tpu.matmul %573, %574, %cst_214 {dimension_numbers = #tpu.dot_dimension_numbers<[1], [0], [0], [1], [0, 0, 1, 1], [], []>} : vector<64x16xbf16>, vector<16x128xbf16>, vector<64x128xf32> -> vector<64x128xf32>
    %576 = vector.extract_strided_slice %575 {offsets = [0, 0], sizes = [16, 128], strides = [1, 1]} : vector<64x128xf32> to vector<16x128xf32>
    %577 = vector.broadcast %13 : vector<1x128xf32> to vector<16x128xf32>
    %578 = arith.mulf %576, %577 : vector<16x128xf32>
    %579 = vector.extract_strided_slice %575 {offsets = [16, 0], sizes = [16, 128], strides = [1, 1]} : vector<64x128xf32> to vector<16x128xf32>
    %580 = vector.broadcast %20 : vector<1x128xf32> to vector<16x128xf32>
    %581 = arith.mulf %579, %580 : vector<16x128xf32>
    %582 = arith.addf %578, %581 : vector<16x128xf32>
    %583 = vector.extract_strided_slice %575 {offsets = [32, 0], sizes = [16, 128], strides = [1, 1]} : vector<64x128xf32> to vector<16x128xf32>
    %584 = vector.broadcast %27 : vector<1x128xf32> to vector<16x128xf32>
    %585 = arith.mulf %583, %584 : vector<16x128xf32>
    %586 = arith.addf %582, %585 : vector<16x128xf32>
    %587 = vector.extract_strided_slice %575 {offsets = [48, 0], sizes = [16, 128], strides = [1, 1]} : vector<64x128xf32> to vector<16x128xf32>
    %588 = vector.broadcast %34 : vector<1x128xf32> to vector<16x128xf32>
    %589 = arith.mulf %587, %588 : vector<16x128xf32>
    %590 = arith.addf %586, %589 : vector<16x128xf32>
    %c0_215 = arith.constant 0 : index
    %c0_216 = arith.constant 0 : index
    %c0_217 = arith.constant 0 : index
    %591 = vector.load %arg27[%c0_215, %c0_216, %c0_217] : memref<2x128x128xbf16, #tpu.memory_space<vmem>>, vector<1x128x128xbf16>
    %592 = vector.shape_cast %591 : vector<1x128x128xbf16> to vector<128x128xbf16>
    %c0_218 = arith.constant 0 : index
    %c0_219 = arith.constant 0 : index
    %c0_220 = arith.constant 0 : index
    %593 = vector.load %arg28[%c0_218, %c0_219, %c0_220] : memref<2x1x128xf32, #tpu.memory_space<vmem>>, vector<1x1x128xf32>
    %594 = vector.shape_cast %593 : vector<1x1x128xf32> to vector<1x128xf32>
    %595 = arith.truncf %590 : vector<16x128xf32> to vector<16x128xbf16>
    %cst_221 = arith.constant dense<0.000000e+00> : vector<16x128xf32>
    %596 = tpu.matmul %595, %592, %cst_221 {dimension_numbers = #tpu.dot_dimension_numbers<[1], [0], [0], [1], [0, 0, 1, 1], [], []>} : vector<16x128xbf16>, vector<128x128xbf16>, vector<16x128xf32> -> vector<16x128xf32>
    %597 = vector.broadcast %594 : vector<1x128xf32> to vector<16x128xf32>
    %598 = arith.addf %596, %597 : vector<16x128xf32>
    %599 = arith.addf %529, %598 : vector<16x128xf32>
    %c0_222 = arith.constant 0 : index
    %c0_223 = arith.constant 0 : index
    %c0_224 = arith.constant 0 : index
    %600 = vector.load %arg29[%c0_222, %c0_223, %c0_224] : memref<2x1x128xf32, #tpu.memory_space<vmem>>, vector<1x1x128xf32>
    %601 = vector.shape_cast %600 : vector<1x1x128xf32> to vector<1x128xf32>
    %c0_225 = arith.constant 0 : index
    %c0_226 = arith.constant 0 : index
    %c0_227 = arith.constant 0 : index
    %602 = vector.load %arg30[%c0_225, %c0_226, %c0_227] : memref<2x1x128xf32, #tpu.memory_space<vmem>>, vector<1x1x128xf32>
    %603 = vector.shape_cast %602 : vector<1x1x128xf32> to vector<1x128xf32>
    %cst_228 = arith.constant dense<0.000000e+00> : vector<16xf32>
    %604 = vector.multi_reduction <add>, %599, %cst_228 [1] : vector<16x128xf32> to vector<16xf32>
    %605 = vector.shape_cast %604 : vector<16xf32> to vector<16x1xf32>
    %cst_229 = arith.constant 3.125000e-02 : f32
    %606 = vector.broadcast %cst_229 : f32 to vector<16x1xf32>
    %607 = arith.mulf %605, %606 : vector<16x1xf32>
    %608 = vector.broadcast %607 : vector<16x1xf32> to vector<16x128xf32>
    %609 = arith.subf %599, %608 : vector<16x128xf32>
    %610 = vector.broadcast %6 : vector<1x128xf32> to vector<16x128xf32>
    %611 = arith.mulf %609, %610 : vector<16x128xf32>
    %612 = arith.mulf %611, %611 : vector<16x128xf32>
    %cst_230 = arith.constant dense<0.000000e+00> : vector<16xf32>
    %613 = vector.multi_reduction <add>, %612, %cst_230 [1] : vector<16x128xf32> to vector<16xf32>
    %614 = vector.shape_cast %613 : vector<16xf32> to vector<16x1xf32>
    %cst_231 = arith.constant 3.125000e-02 : f32
    %615 = vector.broadcast %cst_231 : f32 to vector<16x1xf32>
    %616 = arith.mulf %614, %615 : vector<16x1xf32>
    %cst_232 = arith.constant 9.99999974E-6 : f32
    %617 = vector.broadcast %cst_232 : f32 to vector<16x1xf32>
    %618 = arith.addf %616, %617 : vector<16x1xf32>
    %619 = math.rsqrt %618 : vector<16x1xf32>
    %620 = vector.broadcast %619 : vector<16x1xf32> to vector<16x128xf32>
    %621 = arith.mulf %611, %620 : vector<16x128xf32>
    %622 = vector.broadcast %601 : vector<1x128xf32> to vector<16x128xf32>
    %623 = arith.mulf %621, %622 : vector<16x128xf32>
    %624 = vector.broadcast %603 : vector<1x128xf32> to vector<16x128xf32>
    %625 = arith.addf %623, %624 : vector<16x128xf32>
    %c0_233 = arith.constant 0 : index
    %c0_234 = arith.constant 0 : index
    %c0_235 = arith.constant 0 : index
    %626 = vector.load %arg31[%c0_233, %c0_234, %c0_235] : memref<2x128x128xbf16, #tpu.memory_space<vmem>>, vector<1x128x128xbf16>
    %627 = vector.shape_cast %626 : vector<1x128x128xbf16> to vector<128x128xbf16>
    %c0_236 = arith.constant 0 : index
    %c0_237 = arith.constant 0 : index
    %c0_238 = arith.constant 0 : index
    %628 = vector.load %arg32[%c0_236, %c0_237, %c0_238] : memref<2x1x128xf32, #tpu.memory_space<vmem>>, vector<1x1x128xf32>
    %629 = vector.shape_cast %628 : vector<1x1x128xf32> to vector<1x128xf32>
    %630 = arith.truncf %625 : vector<16x128xf32> to vector<16x128xbf16>
    %cst_239 = arith.constant dense<0.000000e+00> : vector<16x128xf32>
    %631 = tpu.matmul %630, %627, %cst_239 {dimension_numbers = #tpu.dot_dimension_numbers<[1], [0], [0], [1], [0, 0, 1, 1], [], []>} : vector<16x128xbf16>, vector<128x128xbf16>, vector<16x128xf32> -> vector<16x128xf32>
    %632 = vector.broadcast %629 : vector<1x128xf32> to vector<16x128xf32>
    %633 = arith.addf %631, %632 : vector<16x128xf32>
    %cst_240 = arith.constant 0.000000e+00 : f32
    %634 = vector.broadcast %cst_240 : f32 to vector<16x128xf32>
    %635 = arith.maximumf %633, %634 : vector<16x128xf32>
    %c0_241 = arith.constant 0 : index
    %c0_242 = arith.constant 0 : index
    %c0_243 = arith.constant 0 : index
    %636 = vector.load %arg33[%c0_241, %c0_242, %c0_243] : memref<2x128x128xbf16, #tpu.memory_space<vmem>>, vector<1x128x128xbf16>
    %637 = vector.shape_cast %636 : vector<1x128x128xbf16> to vector<128x128xbf16>
    %c0_244 = arith.constant 0 : index
    %c0_245 = arith.constant 0 : index
    %c0_246 = arith.constant 0 : index
    %638 = vector.load %arg34[%c0_244, %c0_245, %c0_246] : memref<2x1x128xf32, #tpu.memory_space<vmem>>, vector<1x1x128xf32>
    %639 = vector.shape_cast %638 : vector<1x1x128xf32> to vector<1x128xf32>
    %640 = arith.truncf %635 : vector<16x128xf32> to vector<16x128xbf16>
    %cst_247 = arith.constant dense<0.000000e+00> : vector<16x128xf32>
    %641 = tpu.matmul %640, %637, %cst_247 {dimension_numbers = #tpu.dot_dimension_numbers<[1], [0], [0], [1], [0, 0, 1, 1], [], []>} : vector<16x128xbf16>, vector<128x128xbf16>, vector<16x128xf32> -> vector<16x128xf32>
    %642 = vector.broadcast %639 : vector<1x128xf32> to vector<16x128xf32>
    %643 = arith.addf %641, %642 : vector<16x128xf32>
    %644 = arith.addf %625, %643 : vector<16x128xf32>
    %c0_248 = arith.constant 0 : index
    %c0_249 = arith.constant 0 : index
    %c0_250 = arith.constant 0 : index
    %645 = vector.load %arg35[%c0_248, %c0_249, %c0_250] : memref<2x1x128xf32, #tpu.memory_space<vmem>>, vector<1x1x128xf32>
    %646 = vector.shape_cast %645 : vector<1x1x128xf32> to vector<1x128xf32>
    %c0_251 = arith.constant 0 : index
    %c0_252 = arith.constant 0 : index
    %c0_253 = arith.constant 0 : index
    %647 = vector.load %arg36[%c0_251, %c0_252, %c0_253] : memref<2x1x128xf32, #tpu.memory_space<vmem>>, vector<1x1x128xf32>
    %648 = vector.shape_cast %647 : vector<1x1x128xf32> to vector<1x128xf32>
    %cst_254 = arith.constant dense<0.000000e+00> : vector<16xf32>
    %649 = vector.multi_reduction <add>, %644, %cst_254 [1] : vector<16x128xf32> to vector<16xf32>
    %650 = vector.shape_cast %649 : vector<16xf32> to vector<16x1xf32>
    %cst_255 = arith.constant 3.125000e-02 : f32
    %651 = vector.broadcast %cst_255 : f32 to vector<16x1xf32>
    %652 = arith.mulf %650, %651 : vector<16x1xf32>
    %653 = vector.broadcast %652 : vector<16x1xf32> to vector<16x128xf32>
    %654 = arith.subf %644, %653 : vector<16x128xf32>
    %655 = vector.broadcast %6 : vector<1x128xf32> to vector<16x128xf32>
    %656 = arith.mulf %654, %655 : vector<16x128xf32>
    %657 = arith.mulf %656, %656 : vector<16x128xf32>
    %cst_256 = arith.constant dense<0.000000e+00> : vector<16xf32>
    %658 = vector.multi_reduction <add>, %657, %cst_256 [1] : vector<16x128xf32> to vector<16xf32>
    %659 = vector.shape_cast %658 : vector<16xf32> to vector<16x1xf32>
    %cst_257 = arith.constant 3.125000e-02 : f32
    %660 = vector.broadcast %cst_257 : f32 to vector<16x1xf32>
    %661 = arith.mulf %659, %660 : vector<16x1xf32>
    %cst_258 = arith.constant 9.99999974E-6 : f32
    %662 = vector.broadcast %cst_258 : f32 to vector<16x1xf32>
    %663 = arith.addf %661, %662 : vector<16x1xf32>
    %664 = math.rsqrt %663 : vector<16x1xf32>
    %665 = vector.broadcast %664 : vector<16x1xf32> to vector<16x128xf32>
    %666 = arith.mulf %656, %665 : vector<16x128xf32>
    %667 = vector.broadcast %646 : vector<1x128xf32> to vector<16x128xf32>
    %668 = arith.mulf %666, %667 : vector<16x128xf32>
    %669 = vector.broadcast %648 : vector<1x128xf32> to vector<16x128xf32>
    %670 = arith.addf %668, %669 : vector<16x128xf32>
    %c1_259 = arith.constant 1 : index
    %c0_260 = arith.constant 0 : index
    %c0_261 = arith.constant 0 : index
    %671 = vector.load %arg17[%c1_259, %c0_260, %c0_261] : memref<2x128x384xbf16, #tpu.memory_space<vmem>>, vector<1x128x384xbf16>
    %672 = vector.shape_cast %671 : vector<1x128x384xbf16> to vector<128x384xbf16>
    %c1_262 = arith.constant 1 : index
    %c0_263 = arith.constant 0 : index
    %c0_264 = arith.constant 0 : index
    %673 = vector.load %arg18[%c1_262, %c0_263, %c0_264] : memref<2x1x384xf32, #tpu.memory_space<vmem>>, vector<1x1x384xf32>
    %674 = vector.shape_cast %673 : vector<1x1x384xf32> to vector<1x384xf32>
    %675 = arith.truncf %670 : vector<16x128xf32> to vector<16x128xbf16>
    %cst_265 = arith.constant dense<0.000000e+00> : vector<16x384xf32>
    %676 = tpu.matmul %675, %672, %cst_265 {dimension_numbers = #tpu.dot_dimension_numbers<[1], [0], [0], [1], [0, 0, 1, 1], [], []>} : vector<16x128xbf16>, vector<128x384xbf16>, vector<16x384xf32> -> vector<16x384xf32>
    %677 = vector.broadcast %674 : vector<1x384xf32> to vector<16x384xf32>
    %678 = arith.addf %676, %677 : vector<16x384xf32>
    %679 = vector.extract_strided_slice %678 {offsets = [0, 0], sizes = [16, 128], strides = [1, 1]} : vector<16x384xf32> to vector<16x128xf32>
    %680 = vector.extract_strided_slice %678 {offsets = [0, 128], sizes = [16, 128], strides = [1, 1]} : vector<16x384xf32> to vector<16x128xf32>
    %681 = vector.extract_strided_slice %678 {offsets = [0, 256], sizes = [16, 128], strides = [1, 1]} : vector<16x384xf32> to vector<16x128xf32>
    %682 = vector.broadcast %13 : vector<1x128xf32> to vector<16x128xf32>
    %683 = arith.mulf %679, %682 : vector<16x128xf32>
    %684 = vector.broadcast %20 : vector<1x128xf32> to vector<16x128xf32>
    %685 = arith.mulf %679, %684 : vector<16x128xf32>
    %686 = vector.broadcast %27 : vector<1x128xf32> to vector<16x128xf32>
    %687 = arith.mulf %679, %686 : vector<16x128xf32>
    %688 = vector.broadcast %34 : vector<1x128xf32> to vector<16x128xf32>
    %689 = arith.mulf %679, %688 : vector<16x128xf32>
    %690 = tpu.concatenate %683, %685, %687, %689 in 0 : vector<16x128xf32>, vector<16x128xf32>, vector<16x128xf32>, vector<16x128xf32> -> vector<64x128xf32>
    %691 = arith.truncf %690 : vector<64x128xf32> to vector<64x128xbf16>
    %692 = arith.truncf %680 : vector<16x128xf32> to vector<16x128xbf16>
    %cst_266 = arith.constant dense<0.000000e+00> : vector<64x16xf32>
    %693 = tpu.matmul %691, %692, %cst_266 {dimension_numbers = #tpu.dot_dimension_numbers<[1], [1], [0], [0], [0, 0, 1, 0], [], []>} : vector<64x128xbf16>, vector<16x128xbf16>, vector<64x16xf32> -> vector<64x16xf32>
    %cst_267 = arith.constant 0.353553385 : f32
    %694 = vector.broadcast %cst_267 : f32 to vector<64x16xf32>
    %695 = arith.mulf %693, %694 : vector<64x16xf32>
    %696 = arith.addf %695, %110 : vector<64x16xf32>
    %cst_268 = arith.constant dense<0xFF800000> : vector<64xf32>
    %697 = vector.multi_reduction <maximumf>, %696, %cst_268 [1] : vector<64x16xf32> to vector<64xf32>
    %698 = vector.shape_cast %697 : vector<64xf32> to vector<64x1xf32>
    %699 = vector.broadcast %698 : vector<64x1xf32> to vector<64x16xf32>
    %700 = arith.subf %696, %699 : vector<64x16xf32>
    %701 = math.exp %700 : vector<64x16xf32>
    %cst_269 = arith.constant dense<0.000000e+00> : vector<64xf32>
    %702 = vector.multi_reduction <add>, %701, %cst_269 [1] : vector<64x16xf32> to vector<64xf32>
    %703 = vector.shape_cast %702 : vector<64xf32> to vector<64x1xf32>
    %704 = tpu.reciprocal %703 {approx = true} : vector<64x1xf32> -> vector<64x1xf32>
    %705 = vector.broadcast %704 : vector<64x1xf32> to vector<64x16xf32>
    %706 = arith.mulf %701, %705 : vector<64x16xf32>
    %707 = arith.truncf %706 : vector<64x16xf32> to vector<64x16xbf16>
    %708 = arith.truncf %681 : vector<16x128xf32> to vector<16x128xbf16>
    %cst_270 = arith.constant dense<0.000000e+00> : vector<64x128xf32>
    %709 = tpu.matmul %707, %708, %cst_270 {dimension_numbers = #tpu.dot_dimension_numbers<[1], [0], [0], [1], [0, 0, 1, 1], [], []>} : vector<64x16xbf16>, vector<16x128xbf16>, vector<64x128xf32> -> vector<64x128xf32>
    %710 = vector.extract_strided_slice %709 {offsets = [0, 0], sizes = [16, 128], strides = [1, 1]} : vector<64x128xf32> to vector<16x128xf32>
    %711 = vector.broadcast %13 : vector<1x128xf32> to vector<16x128xf32>
    %712 = arith.mulf %710, %711 : vector<16x128xf32>
    %713 = vector.extract_strided_slice %709 {offsets = [16, 0], sizes = [16, 128], strides = [1, 1]} : vector<64x128xf32> to vector<16x128xf32>
    %714 = vector.broadcast %20 : vector<1x128xf32> to vector<16x128xf32>
    %715 = arith.mulf %713, %714 : vector<16x128xf32>
    %716 = arith.addf %712, %715 : vector<16x128xf32>
    %717 = vector.extract_strided_slice %709 {offsets = [32, 0], sizes = [16, 128], strides = [1, 1]} : vector<64x128xf32> to vector<16x128xf32>
    %718 = vector.broadcast %27 : vector<1x128xf32> to vector<16x128xf32>
    %719 = arith.mulf %717, %718 : vector<16x128xf32>
    %720 = arith.addf %716, %719 : vector<16x128xf32>
    %721 = vector.extract_strided_slice %709 {offsets = [48, 0], sizes = [16, 128], strides = [1, 1]} : vector<64x128xf32> to vector<16x128xf32>
    %722 = vector.broadcast %34 : vector<1x128xf32> to vector<16x128xf32>
    %723 = arith.mulf %721, %722 : vector<16x128xf32>
    %724 = arith.addf %720, %723 : vector<16x128xf32>
    %c1_271 = arith.constant 1 : index
    %c0_272 = arith.constant 0 : index
    %c0_273 = arith.constant 0 : index
    %725 = vector.load %arg19[%c1_271, %c0_272, %c0_273] : memref<2x128x128xbf16, #tpu.memory_space<vmem>>, vector<1x128x128xbf16>
    %726 = vector.shape_cast %725 : vector<1x128x128xbf16> to vector<128x128xbf16>
    %c1_274 = arith.constant 1 : index
    %c0_275 = arith.constant 0 : index
    %c0_276 = arith.constant 0 : index
    %727 = vector.load %arg20[%c1_274, %c0_275, %c0_276] : memref<2x1x128xf32, #tpu.memory_space<vmem>>, vector<1x1x128xf32>
    %728 = vector.shape_cast %727 : vector<1x1x128xf32> to vector<1x128xf32>
    %729 = arith.truncf %724 : vector<16x128xf32> to vector<16x128xbf16>
    %cst_277 = arith.constant dense<0.000000e+00> : vector<16x128xf32>
    %730 = tpu.matmul %729, %726, %cst_277 {dimension_numbers = #tpu.dot_dimension_numbers<[1], [0], [0], [1], [0, 0, 1, 1], [], []>} : vector<16x128xbf16>, vector<128x128xbf16>, vector<16x128xf32> -> vector<16x128xf32>
    %731 = vector.broadcast %728 : vector<1x128xf32> to vector<16x128xf32>
    %732 = arith.addf %730, %731 : vector<16x128xf32>
    %733 = arith.addf %670, %732 : vector<16x128xf32>
    %c1_278 = arith.constant 1 : index
    %c0_279 = arith.constant 0 : index
    %c0_280 = arith.constant 0 : index
    %734 = vector.load %arg21[%c1_278, %c0_279, %c0_280] : memref<2x1x128xf32, #tpu.memory_space<vmem>>, vector<1x1x128xf32>
    %735 = vector.shape_cast %734 : vector<1x1x128xf32> to vector<1x128xf32>
    %c1_281 = arith.constant 1 : index
    %c0_282 = arith.constant 0 : index
    %c0_283 = arith.constant 0 : index
    %736 = vector.load %arg22[%c1_281, %c0_282, %c0_283] : memref<2x1x128xf32, #tpu.memory_space<vmem>>, vector<1x1x128xf32>
    %737 = vector.shape_cast %736 : vector<1x1x128xf32> to vector<1x128xf32>
    %cst_284 = arith.constant dense<0.000000e+00> : vector<16xf32>
    %738 = vector.multi_reduction <add>, %733, %cst_284 [1] : vector<16x128xf32> to vector<16xf32>
    %739 = vector.shape_cast %738 : vector<16xf32> to vector<16x1xf32>
    %cst_285 = arith.constant 3.125000e-02 : f32
    %740 = vector.broadcast %cst_285 : f32 to vector<16x1xf32>
    %741 = arith.mulf %739, %740 : vector<16x1xf32>
    %742 = vector.broadcast %741 : vector<16x1xf32> to vector<16x128xf32>
    %743 = arith.subf %733, %742 : vector<16x128xf32>
    %744 = vector.broadcast %6 : vector<1x128xf32> to vector<16x128xf32>
    %745 = arith.mulf %743, %744 : vector<16x128xf32>
    %746 = arith.mulf %745, %745 : vector<16x128xf32>
    %cst_286 = arith.constant dense<0.000000e+00> : vector<16xf32>
    %747 = vector.multi_reduction <add>, %746, %cst_286 [1] : vector<16x128xf32> to vector<16xf32>
    %748 = vector.shape_cast %747 : vector<16xf32> to vector<16x1xf32>
    %cst_287 = arith.constant 3.125000e-02 : f32
    %749 = vector.broadcast %cst_287 : f32 to vector<16x1xf32>
    %750 = arith.mulf %748, %749 : vector<16x1xf32>
    %cst_288 = arith.constant 9.99999974E-6 : f32
    %751 = vector.broadcast %cst_288 : f32 to vector<16x1xf32>
    %752 = arith.addf %750, %751 : vector<16x1xf32>
    %753 = math.rsqrt %752 : vector<16x1xf32>
    %754 = vector.broadcast %753 : vector<16x1xf32> to vector<16x128xf32>
    %755 = arith.mulf %745, %754 : vector<16x128xf32>
    %756 = vector.broadcast %735 : vector<1x128xf32> to vector<16x128xf32>
    %757 = arith.mulf %755, %756 : vector<16x128xf32>
    %758 = vector.broadcast %737 : vector<1x128xf32> to vector<16x128xf32>
    %759 = arith.addf %757, %758 : vector<16x128xf32>
    %c1_289 = arith.constant 1 : index
    %c0_290 = arith.constant 0 : index
    %c0_291 = arith.constant 0 : index
    %760 = vector.load %arg23[%c1_289, %c0_290, %c0_291] : memref<2x128x128xbf16, #tpu.memory_space<vmem>>, vector<1x128x128xbf16>
    %761 = vector.shape_cast %760 : vector<1x128x128xbf16> to vector<128x128xbf16>
    %c1_292 = arith.constant 1 : index
    %c0_293 = arith.constant 0 : index
    %c0_294 = arith.constant 0 : index
    %762 = vector.load %arg24[%c1_292, %c0_293, %c0_294] : memref<2x1x128xf32, #tpu.memory_space<vmem>>, vector<1x1x128xf32>
    %763 = vector.shape_cast %762 : vector<1x1x128xf32> to vector<1x128xf32>
    %764 = arith.truncf %759 : vector<16x128xf32> to vector<16x128xbf16>
    %cst_295 = arith.constant dense<0.000000e+00> : vector<16x128xf32>
    %765 = tpu.matmul %764, %761, %cst_295 {dimension_numbers = #tpu.dot_dimension_numbers<[1], [0], [0], [1], [0, 0, 1, 1], [], []>} : vector<16x128xbf16>, vector<128x128xbf16>, vector<16x128xf32> -> vector<16x128xf32>
    %766 = vector.broadcast %763 : vector<1x128xf32> to vector<16x128xf32>
    %767 = arith.addf %765, %766 : vector<16x128xf32>
    %c1_296 = arith.constant 1 : index
    %c0_297 = arith.constant 0 : index
    %c0_298 = arith.constant 0 : index
    %768 = vector.load %arg25[%c1_296, %c0_297, %c0_298] : memref<2x128x256xbf16, #tpu.memory_space<vmem>>, vector<1x128x256xbf16>
    %769 = vector.shape_cast %768 : vector<1x128x256xbf16> to vector<128x256xbf16>
    %c1_299 = arith.constant 1 : index
    %c0_300 = arith.constant 0 : index
    %c0_301 = arith.constant 0 : index
    %770 = vector.load %arg26[%c1_299, %c0_300, %c0_301] : memref<2x1x256xf32, #tpu.memory_space<vmem>>, vector<1x1x256xf32>
    %771 = vector.shape_cast %770 : vector<1x1x256xf32> to vector<1x256xf32>
    %772 = arith.truncf %440 : vector<16x128xf32> to vector<16x128xbf16>
    %cst_302 = arith.constant dense<0.000000e+00> : vector<16x256xf32>
    %773 = tpu.matmul %772, %769, %cst_302 {dimension_numbers = #tpu.dot_dimension_numbers<[1], [0], [0], [1], [0, 0, 1, 1], [], []>} : vector<16x128xbf16>, vector<128x256xbf16>, vector<16x256xf32> -> vector<16x256xf32>
    %774 = vector.broadcast %771 : vector<1x256xf32> to vector<16x256xf32>
    %775 = arith.addf %773, %774 : vector<16x256xf32>
    %776 = vector.extract_strided_slice %775 {offsets = [0, 0], sizes = [16, 128], strides = [1, 1]} : vector<16x256xf32> to vector<16x128xf32>
    %777 = vector.extract_strided_slice %775 {offsets = [0, 128], sizes = [16, 128], strides = [1, 1]} : vector<16x256xf32> to vector<16x128xf32>
    %778 = vector.broadcast %13 : vector<1x128xf32> to vector<16x128xf32>
    %779 = arith.mulf %767, %778 : vector<16x128xf32>
    %780 = vector.broadcast %20 : vector<1x128xf32> to vector<16x128xf32>
    %781 = arith.mulf %767, %780 : vector<16x128xf32>
    %782 = vector.broadcast %27 : vector<1x128xf32> to vector<16x128xf32>
    %783 = arith.mulf %767, %782 : vector<16x128xf32>
    %784 = vector.broadcast %34 : vector<1x128xf32> to vector<16x128xf32>
    %785 = arith.mulf %767, %784 : vector<16x128xf32>
    %786 = tpu.concatenate %779, %781, %783, %785 in 0 : vector<16x128xf32>, vector<16x128xf32>, vector<16x128xf32>, vector<16x128xf32> -> vector<64x128xf32>
    %787 = arith.truncf %786 : vector<64x128xf32> to vector<64x128xbf16>
    %788 = arith.truncf %776 : vector<16x128xf32> to vector<16x128xbf16>
    %cst_303 = arith.constant dense<0.000000e+00> : vector<64x16xf32>
    %789 = tpu.matmul %787, %788, %cst_303 {dimension_numbers = #tpu.dot_dimension_numbers<[1], [1], [0], [0], [0, 0, 1, 0], [], []>} : vector<64x128xbf16>, vector<16x128xbf16>, vector<64x16xf32> -> vector<64x16xf32>
    %cst_304 = arith.constant 0.353553385 : f32
    %790 = vector.broadcast %cst_304 : f32 to vector<64x16xf32>
    %791 = arith.mulf %789, %790 : vector<64x16xf32>
    %792 = arith.addf %791, %148 : vector<64x16xf32>
    %cst_305 = arith.constant dense<0xFF800000> : vector<64xf32>
    %793 = vector.multi_reduction <maximumf>, %792, %cst_305 [1] : vector<64x16xf32> to vector<64xf32>
    %794 = vector.shape_cast %793 : vector<64xf32> to vector<64x1xf32>
    %795 = vector.broadcast %794 : vector<64x1xf32> to vector<64x16xf32>
    %796 = arith.subf %792, %795 : vector<64x16xf32>
    %797 = math.exp %796 : vector<64x16xf32>
    %cst_306 = arith.constant dense<0.000000e+00> : vector<64xf32>
    %798 = vector.multi_reduction <add>, %797, %cst_306 [1] : vector<64x16xf32> to vector<64xf32>
    %799 = vector.shape_cast %798 : vector<64xf32> to vector<64x1xf32>
    %800 = tpu.reciprocal %799 {approx = true} : vector<64x1xf32> -> vector<64x1xf32>
    %801 = vector.broadcast %800 : vector<64x1xf32> to vector<64x16xf32>
    %802 = arith.mulf %797, %801 : vector<64x16xf32>
    %803 = arith.truncf %802 : vector<64x16xf32> to vector<64x16xbf16>
    %804 = arith.truncf %777 : vector<16x128xf32> to vector<16x128xbf16>
    %cst_307 = arith.constant dense<0.000000e+00> : vector<64x128xf32>
    %805 = tpu.matmul %803, %804, %cst_307 {dimension_numbers = #tpu.dot_dimension_numbers<[1], [0], [0], [1], [0, 0, 1, 1], [], []>} : vector<64x16xbf16>, vector<16x128xbf16>, vector<64x128xf32> -> vector<64x128xf32>
    %806 = vector.extract_strided_slice %805 {offsets = [0, 0], sizes = [16, 128], strides = [1, 1]} : vector<64x128xf32> to vector<16x128xf32>
    %807 = vector.broadcast %13 : vector<1x128xf32> to vector<16x128xf32>
    %808 = arith.mulf %806, %807 : vector<16x128xf32>
    %809 = vector.extract_strided_slice %805 {offsets = [16, 0], sizes = [16, 128], strides = [1, 1]} : vector<64x128xf32> to vector<16x128xf32>
    %810 = vector.broadcast %20 : vector<1x128xf32> to vector<16x128xf32>
    %811 = arith.mulf %809, %810 : vector<16x128xf32>
    %812 = arith.addf %808, %811 : vector<16x128xf32>
    %813 = vector.extract_strided_slice %805 {offsets = [32, 0], sizes = [16, 128], strides = [1, 1]} : vector<64x128xf32> to vector<16x128xf32>
    %814 = vector.broadcast %27 : vector<1x128xf32> to vector<16x128xf32>
    %815 = arith.mulf %813, %814 : vector<16x128xf32>
    %816 = arith.addf %812, %815 : vector<16x128xf32>
    %817 = vector.extract_strided_slice %805 {offsets = [48, 0], sizes = [16, 128], strides = [1, 1]} : vector<64x128xf32> to vector<16x128xf32>
    %818 = vector.broadcast %34 : vector<1x128xf32> to vector<16x128xf32>
    %819 = arith.mulf %817, %818 : vector<16x128xf32>
    %820 = arith.addf %816, %819 : vector<16x128xf32>
    %c1_308 = arith.constant 1 : index
    %c0_309 = arith.constant 0 : index
    %c0_310 = arith.constant 0 : index
    %821 = vector.load %arg27[%c1_308, %c0_309, %c0_310] : memref<2x128x128xbf16, #tpu.memory_space<vmem>>, vector<1x128x128xbf16>
    %822 = vector.shape_cast %821 : vector<1x128x128xbf16> to vector<128x128xbf16>
    %c1_311 = arith.constant 1 : index
    %c0_312 = arith.constant 0 : index
    %c0_313 = arith.constant 0 : index
    %823 = vector.load %arg28[%c1_311, %c0_312, %c0_313] : memref<2x1x128xf32, #tpu.memory_space<vmem>>, vector<1x1x128xf32>
    %824 = vector.shape_cast %823 : vector<1x1x128xf32> to vector<1x128xf32>
    %825 = arith.truncf %820 : vector<16x128xf32> to vector<16x128xbf16>
    %cst_314 = arith.constant dense<0.000000e+00> : vector<16x128xf32>
    %826 = tpu.matmul %825, %822, %cst_314 {dimension_numbers = #tpu.dot_dimension_numbers<[1], [0], [0], [1], [0, 0, 1, 1], [], []>} : vector<16x128xbf16>, vector<128x128xbf16>, vector<16x128xf32> -> vector<16x128xf32>
    %827 = vector.broadcast %824 : vector<1x128xf32> to vector<16x128xf32>
    %828 = arith.addf %826, %827 : vector<16x128xf32>
    %829 = arith.addf %759, %828 : vector<16x128xf32>
    %c1_315 = arith.constant 1 : index
    %c0_316 = arith.constant 0 : index
    %c0_317 = arith.constant 0 : index
    %830 = vector.load %arg29[%c1_315, %c0_316, %c0_317] : memref<2x1x128xf32, #tpu.memory_space<vmem>>, vector<1x1x128xf32>
    %831 = vector.shape_cast %830 : vector<1x1x128xf32> to vector<1x128xf32>
    %c1_318 = arith.constant 1 : index
    %c0_319 = arith.constant 0 : index
    %c0_320 = arith.constant 0 : index
    %832 = vector.load %arg30[%c1_318, %c0_319, %c0_320] : memref<2x1x128xf32, #tpu.memory_space<vmem>>, vector<1x1x128xf32>
    %833 = vector.shape_cast %832 : vector<1x1x128xf32> to vector<1x128xf32>
    %cst_321 = arith.constant dense<0.000000e+00> : vector<16xf32>
    %834 = vector.multi_reduction <add>, %829, %cst_321 [1] : vector<16x128xf32> to vector<16xf32>
    %835 = vector.shape_cast %834 : vector<16xf32> to vector<16x1xf32>
    %cst_322 = arith.constant 3.125000e-02 : f32
    %836 = vector.broadcast %cst_322 : f32 to vector<16x1xf32>
    %837 = arith.mulf %835, %836 : vector<16x1xf32>
    %838 = vector.broadcast %837 : vector<16x1xf32> to vector<16x128xf32>
    %839 = arith.subf %829, %838 : vector<16x128xf32>
    %840 = vector.broadcast %6 : vector<1x128xf32> to vector<16x128xf32>
    %841 = arith.mulf %839, %840 : vector<16x128xf32>
    %842 = arith.mulf %841, %841 : vector<16x128xf32>
    %cst_323 = arith.constant dense<0.000000e+00> : vector<16xf32>
    %843 = vector.multi_reduction <add>, %842, %cst_323 [1] : vector<16x128xf32> to vector<16xf32>
    %844 = vector.shape_cast %843 : vector<16xf32> to vector<16x1xf32>
    %cst_324 = arith.constant 3.125000e-02 : f32
    %845 = vector.broadcast %cst_324 : f32 to vector<16x1xf32>
    %846 = arith.mulf %844, %845 : vector<16x1xf32>
    %cst_325 = arith.constant 9.99999974E-6 : f32
    %847 = vector.broadcast %cst_325 : f32 to vector<16x1xf32>
    %848 = arith.addf %846, %847 : vector<16x1xf32>
    %849 = math.rsqrt %848 : vector<16x1xf32>
    %850 = vector.broadcast %849 : vector<16x1xf32> to vector<16x128xf32>
    %851 = arith.mulf %841, %850 : vector<16x128xf32>
    %852 = vector.broadcast %831 : vector<1x128xf32> to vector<16x128xf32>
    %853 = arith.mulf %851, %852 : vector<16x128xf32>
    %854 = vector.broadcast %833 : vector<1x128xf32> to vector<16x128xf32>
    %855 = arith.addf %853, %854 : vector<16x128xf32>
    %c1_326 = arith.constant 1 : index
    %c0_327 = arith.constant 0 : index
    %c0_328 = arith.constant 0 : index
    %856 = vector.load %arg31[%c1_326, %c0_327, %c0_328] : memref<2x128x128xbf16, #tpu.memory_space<vmem>>, vector<1x128x128xbf16>
    %857 = vector.shape_cast %856 : vector<1x128x128xbf16> to vector<128x128xbf16>
    %c1_329 = arith.constant 1 : index
    %c0_330 = arith.constant 0 : index
    %c0_331 = arith.constant 0 : index
    %858 = vector.load %arg32[%c1_329, %c0_330, %c0_331] : memref<2x1x128xf32, #tpu.memory_space<vmem>>, vector<1x1x128xf32>
    %859 = vector.shape_cast %858 : vector<1x1x128xf32> to vector<1x128xf32>
    %860 = arith.truncf %855 : vector<16x128xf32> to vector<16x128xbf16>
    %cst_332 = arith.constant dense<0.000000e+00> : vector<16x128xf32>
    %861 = tpu.matmul %860, %857, %cst_332 {dimension_numbers = #tpu.dot_dimension_numbers<[1], [0], [0], [1], [0, 0, 1, 1], [], []>} : vector<16x128xbf16>, vector<128x128xbf16>, vector<16x128xf32> -> vector<16x128xf32>
    %862 = vector.broadcast %859 : vector<1x128xf32> to vector<16x128xf32>
    %863 = arith.addf %861, %862 : vector<16x128xf32>
    %cst_333 = arith.constant 0.000000e+00 : f32
    %864 = vector.broadcast %cst_333 : f32 to vector<16x128xf32>
    %865 = arith.maximumf %863, %864 : vector<16x128xf32>
    %c1_334 = arith.constant 1 : index
    %c0_335 = arith.constant 0 : index
    %c0_336 = arith.constant 0 : index
    %866 = vector.load %arg33[%c1_334, %c0_335, %c0_336] : memref<2x128x128xbf16, #tpu.memory_space<vmem>>, vector<1x128x128xbf16>
    %867 = vector.shape_cast %866 : vector<1x128x128xbf16> to vector<128x128xbf16>
    %c1_337 = arith.constant 1 : index
    %c0_338 = arith.constant 0 : index
    %c0_339 = arith.constant 0 : index
    %868 = vector.load %arg34[%c1_337, %c0_338, %c0_339] : memref<2x1x128xf32, #tpu.memory_space<vmem>>, vector<1x1x128xf32>
    %869 = vector.shape_cast %868 : vector<1x1x128xf32> to vector<1x128xf32>
    %870 = arith.truncf %865 : vector<16x128xf32> to vector<16x128xbf16>
    %cst_340 = arith.constant dense<0.000000e+00> : vector<16x128xf32>
    %871 = tpu.matmul %870, %867, %cst_340 {dimension_numbers = #tpu.dot_dimension_numbers<[1], [0], [0], [1], [0, 0, 1, 1], [], []>} : vector<16x128xbf16>, vector<128x128xbf16>, vector<16x128xf32> -> vector<16x128xf32>
    %872 = vector.broadcast %869 : vector<1x128xf32> to vector<16x128xf32>
    %873 = arith.addf %871, %872 : vector<16x128xf32>
    %874 = arith.addf %855, %873 : vector<16x128xf32>
    %c1_341 = arith.constant 1 : index
    %c0_342 = arith.constant 0 : index
    %c0_343 = arith.constant 0 : index
    %875 = vector.load %arg35[%c1_341, %c0_342, %c0_343] : memref<2x1x128xf32, #tpu.memory_space<vmem>>, vector<1x1x128xf32>
    %876 = vector.shape_cast %875 : vector<1x1x128xf32> to vector<1x128xf32>
    %c1_344 = arith.constant 1 : index
    %c0_345 = arith.constant 0 : index
    %c0_346 = arith.constant 0 : index
    %877 = vector.load %arg36[%c1_344, %c0_345, %c0_346] : memref<2x1x128xf32, #tpu.memory_space<vmem>>, vector<1x1x128xf32>
    %878 = vector.shape_cast %877 : vector<1x1x128xf32> to vector<1x128xf32>
    %cst_347 = arith.constant dense<0.000000e+00> : vector<16xf32>
    %879 = vector.multi_reduction <add>, %874, %cst_347 [1] : vector<16x128xf32> to vector<16xf32>
    %880 = vector.shape_cast %879 : vector<16xf32> to vector<16x1xf32>
    %cst_348 = arith.constant 3.125000e-02 : f32
    %881 = vector.broadcast %cst_348 : f32 to vector<16x1xf32>
    %882 = arith.mulf %880, %881 : vector<16x1xf32>
    %883 = vector.broadcast %882 : vector<16x1xf32> to vector<16x128xf32>
    %884 = arith.subf %874, %883 : vector<16x128xf32>
    %885 = vector.broadcast %6 : vector<1x128xf32> to vector<16x128xf32>
    %886 = arith.mulf %884, %885 : vector<16x128xf32>
    %887 = arith.mulf %886, %886 : vector<16x128xf32>
    %cst_349 = arith.constant dense<0.000000e+00> : vector<16xf32>
    %888 = vector.multi_reduction <add>, %887, %cst_349 [1] : vector<16x128xf32> to vector<16xf32>
    %889 = vector.shape_cast %888 : vector<16xf32> to vector<16x1xf32>
    %cst_350 = arith.constant 3.125000e-02 : f32
    %890 = vector.broadcast %cst_350 : f32 to vector<16x1xf32>
    %891 = arith.mulf %889, %890 : vector<16x1xf32>
    %cst_351 = arith.constant 9.99999974E-6 : f32
    %892 = vector.broadcast %cst_351 : f32 to vector<16x1xf32>
    %893 = arith.addf %891, %892 : vector<16x1xf32>
    %894 = math.rsqrt %893 : vector<16x1xf32>
    %895 = vector.broadcast %894 : vector<16x1xf32> to vector<16x128xf32>
    %896 = arith.mulf %886, %895 : vector<16x128xf32>
    %897 = vector.broadcast %876 : vector<1x128xf32> to vector<16x128xf32>
    %898 = arith.mulf %896, %897 : vector<16x128xf32>
    %899 = vector.broadcast %878 : vector<1x128xf32> to vector<16x128xf32>
    %900 = arith.addf %898, %899 : vector<16x128xf32>
    %c0_352 = arith.constant 0 : index
    %c0_353 = arith.constant 0 : index
    %901 = vector.load %arg37[%c0_352, %c0_353] : memref<1x128xf32, #tpu.memory_space<vmem>>, vector<1x128xf32>
    %c0_354 = arith.constant 0 : index
    %c0_355 = arith.constant 0 : index
    %902 = vector.load %arg38[%c0_354, %c0_355] : memref<1x128xf32, #tpu.memory_space<vmem>>, vector<1x128xf32>
    %cst_356 = arith.constant dense<0.000000e+00> : vector<16xf32>
    %903 = vector.multi_reduction <add>, %900, %cst_356 [1] : vector<16x128xf32> to vector<16xf32>
    %904 = vector.shape_cast %903 : vector<16xf32> to vector<16x1xf32>
    %cst_357 = arith.constant 3.125000e-02 : f32
    %905 = vector.broadcast %cst_357 : f32 to vector<16x1xf32>
    %906 = arith.mulf %904, %905 : vector<16x1xf32>
    %907 = vector.broadcast %906 : vector<16x1xf32> to vector<16x128xf32>
    %908 = arith.subf %900, %907 : vector<16x128xf32>
    %909 = vector.broadcast %6 : vector<1x128xf32> to vector<16x128xf32>
    %910 = arith.mulf %908, %909 : vector<16x128xf32>
    %911 = arith.mulf %910, %910 : vector<16x128xf32>
    %cst_358 = arith.constant dense<0.000000e+00> : vector<16xf32>
    %912 = vector.multi_reduction <add>, %911, %cst_358 [1] : vector<16x128xf32> to vector<16xf32>
    %913 = vector.shape_cast %912 : vector<16xf32> to vector<16x1xf32>
    %cst_359 = arith.constant 3.125000e-02 : f32
    %914 = vector.broadcast %cst_359 : f32 to vector<16x1xf32>
    %915 = arith.mulf %913, %914 : vector<16x1xf32>
    %cst_360 = arith.constant 9.99999974E-6 : f32
    %916 = vector.broadcast %cst_360 : f32 to vector<16x1xf32>
    %917 = arith.addf %915, %916 : vector<16x1xf32>
    %918 = math.rsqrt %917 : vector<16x1xf32>
    %919 = vector.broadcast %918 : vector<16x1xf32> to vector<16x128xf32>
    %920 = arith.mulf %910, %919 : vector<16x128xf32>
    %921 = vector.broadcast %901 : vector<1x128xf32> to vector<16x128xf32>
    %922 = arith.mulf %920, %921 : vector<16x128xf32>
    %923 = vector.broadcast %902 : vector<1x128xf32> to vector<16x128xf32>
    %924 = arith.addf %922, %923 : vector<16x128xf32>
    %c0_361 = arith.constant 0 : index
    %c0_362 = arith.constant 0 : index
    %925 = vector.load %arg39[%c0_361, %c0_362] : memref<128x128xbf16, #tpu.memory_space<vmem>>, vector<128x128xbf16>
    %c0_363 = arith.constant 0 : index
    %c0_364 = arith.constant 0 : index
    %926 = vector.load %arg40[%c0_363, %c0_364] : memref<1x128xf32, #tpu.memory_space<vmem>>, vector<1x128xf32>
    %927 = arith.truncf %924 : vector<16x128xf32> to vector<16x128xbf16>
    %cst_365 = arith.constant dense<0.000000e+00> : vector<16x128xf32>
    %928 = tpu.matmul %927, %925, %cst_365 {dimension_numbers = #tpu.dot_dimension_numbers<[1], [0], [0], [1], [0, 0, 1, 1], [], []>} : vector<16x128xbf16>, vector<128x128xbf16>, vector<16x128xf32> -> vector<16x128xf32>
    %929 = vector.broadcast %926 : vector<1x128xf32> to vector<16x128xf32>
    %930 = arith.addf %928, %929 : vector<16x128xf32>
    %c0_366 = arith.constant 0 : index
    %c0_367 = arith.constant 0 : index
    %931 = vector.load %arg41[%c0_366, %c0_367] : memref<16x128xf32, #tpu.memory_space<vmem>>, vector<16x128xf32>
    tpu.vector_store %arg41[%c0_366, %c0_367], %930 {strides = array<i32>} : memref<16x128xf32, #tpu.memory_space<vmem>>, vector<16x128xf32>,
    return
  }
  func.func @transform_0(%arg0: i32) -> (i32, i32) {
    %c0_i32 = arith.constant 0 : i32
    %c0_i32_0 = arith.constant 0 : i32
    %c0_i32_1 = arith.constant 0 : i32
    return %c0_i32, %c0_i32_0 : i32, i32
  }
  func.func @transform_1(%arg0: i32) -> (i32, i32) {
    %c0_i32 = arith.constant 0 : i32
    %c0_i32_0 = arith.constant 0 : i32
    %c0_i32_1 = arith.constant 0 : i32
    return %c0_i32, %c0_i32_0 : i32, i32
  }
  func.func @transform_2(%arg0: i32) -> (i32, i32, i32) {
    %c0_i32 = arith.constant 0 : i32
    %c0_i32_0 = arith.constant 0 : i32
    %c0_i32_1 = arith.constant 0 : i32
    %c0_i32_2 = arith.constant 0 : i32
    return %c0_i32, %c0_i32_0, %c0_i32_1 : i32, i32, i32
  }
  func.func @transform_3(%arg0: i32) -> (i32, i32, i32) {
    %c0_i32 = arith.constant 0 : i32
    %c0_i32_0 = arith.constant 0 : i32
    %c0_i32_1 = arith.constant 0 : i32
    %c0_i32_2 = arith.constant 0 : i32
    return %c0_i32, %c0_i32_0, %c0_i32_1 : i32, i32, i32
  }
  func.func @transform_4(%arg0: i32) -> (i32, i32, i32) {
    %c0_i32 = arith.constant 0 : i32
    %c0_i32_0 = arith.constant 0 : i32
    %c0_i32_1 = arith.constant 0 : i32
    %c0_i32_2 = arith.constant 0 : i32
    return %c0_i32, %c0_i32_0, %c0_i32_1 : i32, i32, i32
  }
  func.func @transform_5(%arg0: i32) -> (i32, i32, i32) {
    %c0_i32 = arith.constant 0 : i32
    %c0_i32_0 = arith.constant 0 : i32
    %c0_i32_1 = arith.constant 0 : i32
    %c0_i32_2 = arith.constant 0 : i32
    return %c0_i32, %c0_i32_0, %c0_i32_1 : i32, i32, i32
  }
  func.func @transform_6(%arg0: i32) -> (i32, i32, i32) {
    %c0_i32 = arith.constant 0 : i32
    %c0_i32_0 = arith.constant 0 : i32
    %c0_i32_1 = arith.constant 0 : i32
    %c0_i32_2 = arith.constant 0 : i32
    return %c0_i32, %c0_i32_0, %c0_i32_1 : i32, i32, i32
  }
  func.func @transform_7(%arg0: i32) -> (i32, i32, i32) {
    %c0_i32 = arith.constant 0 : i32
    %c0_i32_0 = arith.constant 0 : i32
    %c0_i32_1 = arith.constant 0 : i32
    %c0_i32_2 = arith.constant 0 : i32
    return %c0_i32, %c0_i32_0, %c0_i32_1 : i32, i32, i32
  }
  func.func @transform_8(%arg0: i32) -> (i32, i32, i32) {
    %c0_i32 = arith.constant 0 : i32
    %c0_i32_0 = arith.constant 0 : i32
    %c0_i32_1 = arith.constant 0 : i32
    %c0_i32_2 = arith.constant 0 : i32
    return %c0_i32, %c0_i32_0, %c0_i32_1 : i32, i32, i32
  }
  func.func @transform_9(%arg0: i32) -> (i32, i32, i32) {
    %c0_i32 = arith.constant 0 : i32
    %c0_i32_0 = arith.constant 0 : i32
    %c0_i32_1 = arith.constant 0 : i32
    %c0_i32_2 = arith.constant 0 : i32
    return %c0_i32, %c0_i32_0, %c0_i32_1 : i32, i32, i32
  }
  func.func @transform_10(%arg0: i32) -> (i32, i32, i32) {
    %c0_i32 = arith.constant 0 : i32
    %c0_i32_0 = arith.constant 0 : i32
    %c0_i32_1 = arith.constant 0 : i32
    %c0_i32_2 = arith.constant 0 : i32
    return %c0_i32, %c0_i32_0, %c0_i32_1 : i32, i32, i32
  }
  func.func @transform_11(%arg0: i32) -> (i32, i32, i32) {
    %c0_i32 = arith.constant 0 : i32
    %c0_i32_0 = arith.constant 0 : i32
    %c0_i32_1 = arith.constant 0 : i32
    %c0_i32_2 = arith.constant 0 : i32
    return %c0_i32, %c0_i32_0, %c0_i32_1 : i32, i32, i32
  }
  func.func @transform_12(%arg0: i32) -> (i32, i32, i32) {
    %c0_i32 = arith.constant 0 : i32
    %c0_i32_0 = arith.constant 0 : i32
    %c0_i32_1 = arith.constant 0 : i32
    %c0_i32_2 = arith.constant 0 : i32
    return %c0_i32, %c0_i32_0, %c0_i32_1 : i32, i32, i32
  }
  func.func @transform_13(%arg0: i32) -> (i32, i32, i32) {
    %c0_i32 = arith.constant 0 : i32
    %c0_i32_0 = arith.constant 0 : i32
    %c0_i32_1 = arith.constant 0 : i32
    %c0_i32_2 = arith.constant 0 : i32
    return %c0_i32, %c0_i32_0, %c0_i32_1 : i32, i32, i32
  }
  func.func @transform_14(%arg0: i32) -> (i32, i32) {
    %c0_i32 = arith.constant 0 : i32
    %c0_i32_0 = arith.constant 0 : i32
    %c0_i32_1 = arith.constant 0 : i32
    return %c0_i32, %c0_i32_0 : i32, i32
  }
  func.func @transform_15(%arg0: i32) -> (i32, i32) {
    %c0_i32 = arith.constant 0 : i32
    %c0_i32_0 = arith.constant 0 : i32
    %c0_i32_1 = arith.constant 0 : i32
    return %c0_i32, %c0_i32_0 : i32, i32
  }
  func.func @transform_16(%arg0: i32) -> (i32, i32, i32) {
    %c0_i32 = arith.constant 0 : i32
    %c0_i32_0 = arith.constant 0 : i32
    %c0_i32_1 = arith.constant 0 : i32
    %c0_i32_2 = arith.constant 0 : i32
    return %c0_i32, %c0_i32_0, %c0_i32_1 : i32, i32, i32
  }
  func.func @transform_17(%arg0: i32) -> (i32, i32, i32) {
    %c0_i32 = arith.constant 0 : i32
    %c0_i32_0 = arith.constant 0 : i32
    %c0_i32_1 = arith.constant 0 : i32
    %c0_i32_2 = arith.constant 0 : i32
    return %c0_i32, %c0_i32_0, %c0_i32_1 : i32, i32, i32
  }
  func.func @transform_18(%arg0: i32) -> (i32, i32, i32) {
    %c0_i32 = arith.constant 0 : i32
    %c0_i32_0 = arith.constant 0 : i32
    %c0_i32_1 = arith.constant 0 : i32
    %c0_i32_2 = arith.constant 0 : i32
    return %c0_i32, %c0_i32_0, %c0_i32_1 : i32, i32, i32
  }
  func.func @transform_19(%arg0: i32) -> (i32, i32, i32) {
    %c0_i32 = arith.constant 0 : i32
    %c0_i32_0 = arith.constant 0 : i32
    %c0_i32_1 = arith.constant 0 : i32
    %c0_i32_2 = arith.constant 0 : i32
    return %c0_i32, %c0_i32_0, %c0_i32_1 : i32, i32, i32
  }
  func.func @transform_20(%arg0: i32) -> (i32, i32, i32) {
    %c0_i32 = arith.constant 0 : i32
    %c0_i32_0 = arith.constant 0 : i32
    %c0_i32_1 = arith.constant 0 : i32
    %c0_i32_2 = arith.constant 0 : i32
    return %c0_i32, %c0_i32_0, %c0_i32_1 : i32, i32, i32
  }
  func.func @transform_21(%arg0: i32) -> (i32, i32, i32) {
    %c0_i32 = arith.constant 0 : i32
    %c0_i32_0 = arith.constant 0 : i32
    %c0_i32_1 = arith.constant 0 : i32
    %c0_i32_2 = arith.constant 0 : i32
    return %c0_i32, %c0_i32_0, %c0_i32_1 : i32, i32, i32
  }
  func.func @transform_22(%arg0: i32) -> (i32, i32, i32) {
    %c0_i32 = arith.constant 0 : i32
    %c0_i32_0 = arith.constant 0 : i32
    %c0_i32_1 = arith.constant 0 : i32
    %c0_i32_2 = arith.constant 0 : i32
    return %c0_i32, %c0_i32_0, %c0_i32_1 : i32, i32, i32
  }
  func.func @transform_23(%arg0: i32) -> (i32, i32, i32) {
    %c0_i32 = arith.constant 0 : i32
    %c0_i32_0 = arith.constant 0 : i32
    %c0_i32_1 = arith.constant 0 : i32
    %c0_i32_2 = arith.constant 0 : i32
    return %c0_i32, %c0_i32_0, %c0_i32_1 : i32, i32, i32
  }
  func.func @transform_24(%arg0: i32) -> (i32, i32, i32) {
    %c0_i32 = arith.constant 0 : i32
    %c0_i32_0 = arith.constant 0 : i32
    %c0_i32_1 = arith.constant 0 : i32
    %c0_i32_2 = arith.constant 0 : i32
    return %c0_i32, %c0_i32_0, %c0_i32_1 : i32, i32, i32
  }
  func.func @transform_25(%arg0: i32) -> (i32, i32, i32) {
    %c0_i32 = arith.constant 0 : i32
    %c0_i32_0 = arith.constant 0 : i32
    %c0_i32_1 = arith.constant 0 : i32
    %c0_i32_2 = arith.constant 0 : i32
    return %c0_i32, %c0_i32_0, %c0_i32_1 : i32, i32, i32
  }
  func.func @transform_26(%arg0: i32) -> (i32, i32, i32) {
    %c0_i32 = arith.constant 0 : i32
    %c0_i32_0 = arith.constant 0 : i32
    %c0_i32_1 = arith.constant 0 : i32
    %c0_i32_2 = arith.constant 0 : i32
    return %c0_i32, %c0_i32_0, %c0_i32_1 : i32, i32, i32
  }
  func.func @transform_27(%arg0: i32) -> (i32, i32, i32) {
    %c0_i32 = arith.constant 0 : i32
    %c0_i32_0 = arith.constant 0 : i32
    %c0_i32_1 = arith.constant 0 : i32
    %c0_i32_2 = arith.constant 0 : i32
    return %c0_i32, %c0_i32_0, %c0_i32_1 : i32, i32, i32
  }
  func.func @transform_28(%arg0: i32) -> (i32, i32, i32) {
    %c0_i32 = arith.constant 0 : i32
    %c0_i32_0 = arith.constant 0 : i32
    %c0_i32_1 = arith.constant 0 : i32
    %c0_i32_2 = arith.constant 0 : i32
    return %c0_i32, %c0_i32_0, %c0_i32_1 : i32, i32, i32
  }
  func.func @transform_29(%arg0: i32) -> (i32, i32, i32) {
    %c0_i32 = arith.constant 0 : i32
    %c0_i32_0 = arith.constant 0 : i32
    %c0_i32_1 = arith.constant 0 : i32
    %c0_i32_2 = arith.constant 0 : i32
    return %c0_i32, %c0_i32_0, %c0_i32_1 : i32, i32, i32
  }
  func.func @transform_30(%arg0: i32) -> (i32, i32, i32) {
    %c0_i32 = arith.constant 0 : i32
    %c0_i32_0 = arith.constant 0 : i32
    %c0_i32_1 = arith.constant 0 : i32
    %c0_i32_2 = arith.constant 0 : i32
    return %c0_i32, %c0_i32_0, %c0_i32_1 : i32, i32, i32
  }
  func.func @transform_31(%arg0: i32) -> (i32, i32, i32) {
    %c0_i32 = arith.constant 0 : i32
    %c0_i32_0 = arith.constant 0 : i32
    %c0_i32_1 = arith.constant 0 : i32
    %c0_i32_2 = arith.constant 0 : i32
    return %c0_i32, %c0_i32_0, %c0_i32_1 : i32, i32, i32
  }
  func.func @transform_32(%arg0: i32) -> (i32, i32, i32) {
    %c0_i32 = arith.constant 0 : i32
    %c0_i32_0 = arith.constant 0 : i32
    %c0_i32_1 = arith.constant 0 : i32
    %c0_i32_2 = arith.constant 0 : i32
    return %c0_i32, %c0_i32_0, %c0_i32_1 : i32, i32, i32
  }
  func.func @transform_33(%arg0: i32) -> (i32, i32, i32) {
    %c0_i32 = arith.constant 0 : i32
    %c0_i32_0 = arith.constant 0 : i32
    %c0_i32_1 = arith.constant 0 : i32
    %c0_i32_2 = arith.constant 0 : i32
    return %c0_i32, %c0_i32_0, %c0_i32_1 : i32, i32, i32
  }
  func.func @transform_34(%arg0: i32) -> (i32, i32, i32) {
    %c0_i32 = arith.constant 0 : i32
    %c0_i32_0 = arith.constant 0 : i32
    %c0_i32_1 = arith.constant 0 : i32
    %c0_i32_2 = arith.constant 0 : i32
    return %c0_i32, %c0_i32_0, %c0_i32_1 : i32, i32, i32
  }
  func.func @transform_35(%arg0: i32) -> (i32, i32, i32) {
    %c0_i32 = arith.constant 0 : i32
    %c0_i32_0 = arith.constant 0 : i32
    %c0_i32_1 = arith.constant 0 : i32
    %c0_i32_2 = arith.constant 0 : i32
    return %c0_i32, %c0_i32_0, %c0_i32_1 : i32, i32, i32
  }
  func.func @transform_36(%arg0: i32) -> (i32, i32) {
    %c0_i32 = arith.constant 0 : i32
    %c0_i32_0 = arith.constant 0 : i32
    %c0_i32_1 = arith.constant 0 : i32
    return %c0_i32, %c0_i32_0 : i32, i32
  }
  func.func @transform_37(%arg0: i32) -> (i32, i32) {
    %c0_i32 = arith.constant 0 : i32
    %c0_i32_0 = arith.constant 0 : i32
    %c0_i32_1 = arith.constant 0 : i32
    return %c0_i32, %c0_i32_0 : i32, i32
  }
  func.func @transform_38(%arg0: i32) -> (i32, i32) {
    %c0_i32 = arith.constant 0 : i32
    %c0_i32_0 = arith.constant 0 : i32
    %c0_i32_1 = arith.constant 0 : i32
    return %c0_i32, %c0_i32_0 : i32, i32
  }
  func.func @transform_39(%arg0: i32) -> (i32, i32) {
    %c0_i32 = arith.constant 0 : i32
    %c0_i32_0 = arith.constant 0 : i32
    %c0_i32_1 = arith.constant 0 : i32
    return %c0_i32, %c0_i32_0 : i32, i32
  }
  func.func @transform_40(%arg0: i32) -> (i32, i32) {
    %c0_i32 = arith.constant 0 : i32
    %c0_i32_0 = arith.constant 0 : i32
    %c0_i32_1 = arith.constant 0 : i32
    return %c0_i32, %c0_i32_0 : i32, i32
  }
}

</mosaic_0001>

<bundles_post_ra>
// kernel: transformer_forward.1
= control target key start
LH: loop header
LB: loop body
LE: loop exit
PB: predicated region body
PF: predicated region fallthrough
CT: control target
= control target key end

     0   :  { %s8539_s6 = smov 1   ;;  %s8540_s10 = smov 2   ;;  %s9738_s0 = inlined_call_operand.smem [shape: u32[41], index: -1, kind: input, shape index: {}] }
   0x1   :  { %s8621_s5 = sld [smem:[%s9738_s0]]   ;;  %s8541_s14 = smov 3  }
   0x2   :  { %s8626_s9 = sld [smem:[%s9738_s0 + %s8539_s6]]   ;;  %s8542_s18 = smov 4  }
   0x3   :  { %s8631_s13 = sld [smem:[%s9738_s0 + %s8540_s10]]   ;;  %s8543_s22 = smov 5  }
   0x4   :  { %s8636_s17 = sld [smem:[%s9738_s0 + %s8541_s14]]   ;;  %s8544_s26 = smov 6  }
   0x5   :  { %s8641_s21 = sld [smem:[%s9738_s0 + %s8542_s18]]   ;;  %s8545_s30 = smov 7  }
   0x6   :  { %s8646_s25 = sld [smem:[%s9738_s0 + %s8543_s22]]   ;;  %s8546_s4 = smov 8  }
   0x7   :  { %9756 = sst [smem:[#allocation52_spill]] %s8621_s5  ;;  %s8547_s10 = smov 9  }
   0x8   :  { %9757 = sst [smem:[#allocation53_spill]] %s8626_s9  ;;  %s8548_s15 = smov 10  }
   0x9   :  { %9758 = sst [smem:[#allocation54_spill]] %s8631_s13  ;;  %s8549_s20 = smov 11  }
   0xa   :  { %9759 = sst [smem:[#allocation55_spill]] %s8636_s17  ;;  %s8551_s1 = smov 13  }
   0xb   :  { %s8651_s29 = sld [smem:[%s9738_s0 + %s8544_s26]]   ;;  %s8550_s26 = smov 12  }
   0xc   :  { %9760 = sst [smem:[#allocation56_spill]] %s8646_s25  ;;  %s8552_s7 = smov 14  }
   0xd   :  { %s8656_s3 = sld [smem:[%s9738_s0 + %s8545_s30]]   ;;  %s8554_s22 = smov 16  }
   0xe   :  { %s8661_s8 = sld [smem:[%s9738_s0 + %s8546_s4]]   ;;  %s8555_s28 = smov 17  }
   0xf   :  { %s8666_s14 = sld [smem:[%s9738_s0 + %s8547_s10]]  }
  0x10   :  { %s8671_s19 = sld [smem:[%s9738_s0 + %s8548_s15]]   ;;  %s8553_s15 = smov 15  }
  0x11   :  { %9761 = sst [smem:[#allocation57_spill]] %s8651_s29 }
  0x12   :  { %s8676_s24 = sld [smem:[%s9738_s0 + %s8549_s20]]  }
  0x13   :  { %9762 = sst [smem:[#allocation58_spill]] %s8656_s3 }
  0x14   :  { %s8681_s30 = sld [smem:[%s9738_s0 + %s8550_s26]]  }
  0x15   :  { %9763 = sst [smem:[#allocation59_spill]] %s8666_s14 }
  0x16   :  { %s8686_s6 = sld [smem:[%s9738_s0 + %s8551_s1]]  }
  0x17   :  { %s8691_s12 = sld [smem:[%s9738_s0 + %s8552_s7]]   ;;  %s8556_s7 = smov 18  }
  0x18   :  { %s8696_s20 = sld [smem:[%s9738_s0 + %s8553_s15]]   ;;  %s8557_s15 = smov 19  }
  0x19   :  { %s8701_s27 = sld [smem:[%s9738_s0 + %s8554_s22]]   ;;  %s8558_s22 = smov 20  }
  0x1a   :  { %s8706_s4 = sld [smem:[%s9738_s0 + %s8555_s28]]   ;;  %s8559_s28 = smov 21  }
  0x1b   :  { %s8711_s9 = sld [smem:[%s9738_s0 + %s8556_s7]]   ;;  %s8560_s7 = smov 22  }
  0x1c   :  { %s8716_s14 = sld [smem:[%s9738_s0 + %s8557_s15]]   ;;  %s8561_s15 = smov 23  }
  0x1d   :  { %s8731_s3 = sld [smem:[%s9738_s0 + %s8560_s7]]   ;;  %s8564_s7 = smov 26  }
  0x1e   :  { %s8751_s29 = sld [smem:[%s9738_s0 + %s8564_s7]]   ;;  %s8568_s7 = smov 30  }
  0x1f   :  { %9764 = sst [smem:[#allocation60_spill]] %s8701_s27 }
  0x20   :  { %9765 = sst [smem:[#allocation61_spill]] %s8706_s4 }
  0x21   :  { %9766 = sst [smem:[#allocation62_spill]] %s8711_s9 }
  0x22   :  { %9767 = sst [smem:[#allocation63_spill]] %s8716_s14 }
  0x23   :  { %s8721_s27 = sld [smem:[%s9738_s0 + %s8558_s22]]   ;;  %s8562_s22 = smov 24  }
  0x24   :  { %s8726_s4 = sld [smem:[%s9738_s0 + %s8559_s28]]   ;;  %s8563_s28 = smov 25  }
  0x25   :  { %s8736_s14 = sld [smem:[%s9738_s0 + %s8561_s15]]   ;;  %s8565_s15 = smov 27  }
  0x26   :  { %s8771_s17 = sld [smem:[%s9738_s0 + %s8568_s7]]   ;;  %s8572_s7 = smov 34  }
  0x27   :  { %s8791_s13 = sld [smem:[%s9738_s0 + %s8572_s7]]   ;;  %s8576_s7 = smov 38  }
  0x29   :  { %9768 = sst [smem:[#allocation64_spill]] %s8721_s27 }
  0x2a   :  { %9769 = sst [smem:[#allocation65_spill]] %s8726_s4 }
  0x2b   :  { %9770 = sst [smem:[#allocation66_spill]] %s8736_s14 }
  0x2c   :  { %s8741_s27 = sld [smem:[%s9738_s0 + %s8562_s22]]   ;;  %s8566_s22 = smov 28  }
  0x2d   :  { %s8746_s4 = sld [smem:[%s9738_s0 + %s8563_s28]]   ;;  %s8567_s28 = smov 29  }
  0x2e   :  { %s8756_s14 = sld [smem:[%s9738_s0 + %s8565_s15]]   ;;  %s8569_s15 = smov 31  }
  0x2f   :  { %s8761_s25 = sld [smem:[%s9738_s0 + %s8566_s22]]   ;;  %s8570_s22 = smov 32  }
  0x32   :  { %9771 = sst [smem:[#allocation67_spill]] %s8741_s27 }
  0x33   :  { %9772 = sst [smem:[#allocation68_spill]] %s8746_s4 }
  0x34   :  { %9773 = sst [smem:[#allocation69_spill]] %s8756_s14 }
  0x35   :  { %9774 = sst [smem:[#allocation70_spill]] %s8761_s25 }
  0x36   :  { %s8766_s4 = sld [smem:[%s9738_s0 + %s8567_s28]]   ;;  %s8571_s28 = smov 33  }
  0x37   :  { %s8776_s14 = sld [smem:[%s9738_s0 + %s8569_s15]]   ;;  %s8573_s15 = smov 35  }
  0x38   :  { %s8781_s25 = sld [smem:[%s9738_s0 + %s8570_s22]]   ;;  %s8574_s22 = smov 36  }
  0x39   :  { %s8786_s5 = sld [smem:[%s9738_s0 + %s8571_s28]]   ;;  %s8575_s28 = smov 37  }
  0x3a   :  { %s8811_s27 = sld [smem:[%s9738_s0 + %s8576_s7]]  }
  0x3c   :  { %9775 = sst [smem:[#allocation71_spill]] %s8766_s4 }
  0x3d   :  { %9776 = sst [smem:[#allocation72_spill]] %s8776_s14 }
  0x3e   :  { %s8796_s14 = sld [smem:[%s9738_s0 + %s8573_s15]]   ;;  %s8577_s15 = smov 39  }
  0x3f   :  { %9777 = sst [smem:[#allocation73_spill]] %s8786_s5 }
  0x40   :  { %s8801_s4 = sld [smem:[%s9738_s0 + %s8574_s22]]   ;;  %s8578_s22 = smov 40  }
  0x41   :  { %s8806_s5 = sld [smem:[%s9738_s0 + %s8575_s28]]  }
  0x42   :  { %s8821_s9 = sld [smem:[%s9738_s0 + %s8578_s22]]  }
  0x44   :  { %9778 = sst [smem:[#allocation74_spill]] %s8796_s14 }
  0x45   :  { %s8816_s14 = sld [smem:[%s9738_s0 + %s8577_s15]]  }
  0x46   :  { %86 = vsyncpa [#allocation3], 0 }
  0x47   :  { %87 = vsyncpa [#allocation6], 0 }
  0x48   :  { %88 = vsyncpa [#allocation9], 0 }
  0x49   :  { %89 = vsyncpa [#allocation12], 0 }
  0x4a   :  { %90 = vsyncpa [#allocation15], 0 }
  0x4b   :  { %91 = vsyncpa [#allocation18], 0 }
  0x4c   :  { %92 = vsyncpa [#allocation21], 0 }
  0x4d   :  { %93 = vsyncpa [#allocation24], 0 }
  0x4e   :  { %94 = vsyncpa [#allocation27], 0 }
  0x4f   :  { %95 = vsyncpa [#allocation30], 0 }
  0x50   :  { %96 = vsyncpa [#allocation33], 0 }
  0x51   :  { %97 = vsyncpa [#allocation36], 0 }
  0x52   :  { %98 = vsyncpa [#allocation4], 0  ;;  %s8579_s28 = smov [#allocation5]   ;;  %s8580_s2 = smov [#allocation8]  }
  0x53   :  { %s130_s1 = sshll.u32 %s8579_s28, 4  ;;  %s156_s7 = sshll.u32 %s8580_s2, 4  ;;  %s131_s1 = int_to_ptr.vmem [resolvable:$true] %s130_s1  ;;  %s157_s7 = int_to_ptr.vmem [resolvable:$true] %s156_s7 }
  0x54   :  { %s8041_s0 = scalar_lea.vmem %s131_s1, 2048  ;;  %p8046_p1 = scmp.lt.s32.totalorder %s131_s1, %s131_s1 }
  0x55   :  { %p8042_p0 = scmp.ne.s32.totalorder %s131_s1, %s8041_s0  ;;  %p8047_p2 = scmp.lt.s32.totalorder %s8041_s0, %s8041_s0 }
  0x57   :  { %p8048_p3 = por %p8047_p2, %p8046_p1 }
  0x59   :  { %p8049_p4 = pnand %p8048_p3, %p8042_p0 }
  0x5b   :  { %8052 = shalt.err (!%p8049_p4)
}
  0x5c   :  { %s8581_s10 = smov 64   ;;  %s8582_s11 = smov 4  }
  0x5d   :  { %136 = dma.hbm_to_vmem [thread:$0]  %s8661_s8, 2048, %s131_s1, [#allocation6], %s8581_s10, %s8581_s10, %s8582_s11  }
  0x5e   :  { %s8061_s15 = scalar_lea.vmem %s157_s7, 32  ;;  %p8066_p6 = scmp.lt.s32.totalorder %s157_s7, %s157_s7 }
  0x5f   :  { %p8062_p5 = scmp.ne.s32.totalorder %s157_s7, %s8061_s15  ;;  %p8067_p7 = scmp.lt.s32.totalorder %s8061_s15, %s8061_s15 }
  0x61   :  { %p8068_p8 = por %p8067_p7, %p8066_p6 }
  0x63   :  { %p8069_p9 = pnand %p8068_p8, %p8062_p5 }
  0x65   :  { %8072 = shalt.err (!%p8069_p9)
}
  0x66   :  { %s8583_s16 = smov 16   ;;  %s8584_s18 = smov 1  }
  0x67   :  { %162 = dma.hbm_to_vmem [thread:$0]  %s8676_s24, 32, %s157_s7, [#allocation9], %s8583_s16, %s8583_s16, %s8584_s18  }
  0x68   :  { %s8585_s22 = smov [#allocation11]   ;;  %s8586_s26 = smov [#allocation14]  }
  0x69   :  { %s180_s23 = sshll.u32 %s8585_s22, 4  ;;  %s203_s28 = sshll.u32 %s8586_s26, 4  ;;  %s181_s23 = int_to_ptr.vmem [resolvable:$true] %s180_s23  ;;  %s204_s28 = int_to_ptr.vmem [resolvable:$true] %s203_s28 }
  0x6a   :  { %s8081_s8 = scalar_lea.vmem %s181_s23, 32  ;;  %p8086_p11 = scmp.lt.s32.totalorder %s181_s23, %s181_s23 }
  0x6b   :  { %p8082_p10 = scmp.ne.s32.totalorder %s181_s23, %s8081_s8  ;;  %p8087_p12 = scmp.lt.s32.totalorder %s8081_s8, %s8081_s8 }
  0x6d   :  { %p8088_p13 = por %p8087_p12, %p8086_p11 }
  0x6f   :  { %p8089_p0 = pnand %p8088_p13, %p8082_p10 }
  0x71   :  { %8092 = shalt.err (!%p8089_p0)
}
  0x72   :  { %186 = dma.hbm_to_vmem [thread:$0]  %s8686_s6, 32, %s181_s23, [#allocation12], %s8583_s16, %s8583_s16, %s8584_s18  }
  0x73   :  { %s8101_s1 = scalar_lea.vmem %s204_s28, 16  ;;  %s8105_s24 = scalar_lea.vmem %s204_s28, 32 }
  0x74   :  { %p8102_p1 = scmp.ne.s32.totalorder %s204_s28, %s8101_s1  ;;  %p8106_p2 = scmp.lt.s32.totalorder %s204_s28, %s204_s28 }
  0x75   :  { %p8107_p3 = scmp.lt.s32.totalorder %s8105_s24, %s8101_s1 }
  0x77   :  { %p8108_p4 = por %p8107_p3, %p8106_p2 }
  0x79   :  { %p8109_p5 = pnand %p8108_p4, %p8102_p1 }
  0x7b   :  { %8112 = shalt.err (!%p8109_p5)
}
  0x7c   :  { %206 = dma.hbm_to_vmem [thread:$0]  %s8696_s20, 16, %s204_s28, [#allocation15]  }
  0x7d   :  { %s8587_s2 = smov [#allocation17]   ;;  %s8588_s0 = smov [#allocation20]  }
  0x7e   :  { %s234_s7 = sshll.u32 %s8587_s2, 4  ;;  %s262_s15 = sshll.u32 %s8588_s0, 4  ;;  %s235_s7 = int_to_ptr.vmem [resolvable:$true] %s234_s7  ;;  %s263_s15 = int_to_ptr.vmem [resolvable:$true] %s262_s15 }
  0x7f   :  { %s8121_s22 = scalar_lea.vmem %s235_s7, 2048  ;;  %p8126_p7 = scmp.lt.s32.totalorder %s235_s7, %s235_s7 }
  0x80   :  { %p8122_p6 = scmp.ne.s32.totalorder %s235_s7, %s8121_s22  ;;  %p8127_p8 = scmp.lt.s32.totalorder %s8121_s22, %s8121_s22 }
  0x82   :  { %p8128_p9 = por %p8127_p8, %p8126_p7 }
  0x84   :  { %p8129_p10 = pnand %p8128_p9, %p8122_p6 }
  0x86   :  { %8132 = shalt.err (!%p8129_p10)
}
  0x87   :  { %240 = dma.hbm_to_vmem [thread:$0]  %s8731_s3, 2048, %s235_s7, [#allocation18], %s8581_s10, %s8581_s10, %s8582_s11  }
  0x88   :  { %s8141_s6 = scalar_lea.vmem %s263_s15, 2048  ;;  %p8146_p12 = scmp.lt.s32.totalorder %s263_s15, %s263_s15 }
  0x89   :  { %p8142_p11 = scmp.ne.s32.totalorder %s263_s15, %s8141_s6  ;;  %p8147_p13 = scmp.lt.s32.totalorder %s8141_s6, %s8141_s6 }
  0x8b   :  { %p8148_p0 = por %p8147_p13, %p8146_p12 }
  0x8d   :  { %p8149_p1 = pnand %p8148_p0, %p8142_p11 }
  0x8f   :  { %8152 = shalt.err (!%p8149_p1)
}
  0x90   :  { %268 = dma.hbm_to_vmem [thread:$0]  %s8751_s29, 2048, %s263_s15, [#allocation21], %s8581_s10, %s8581_s10, %s8582_s11  }
  0x91   :  { %s8589_s20 = smov [#allocation23]   ;;  %s8590_s26 = smov [#allocation26]  }
  0x92   :  { %s290_s23 = sshll.u32 %s8589_s20, 4  ;;  %s314_s28 = sshll.u32 %s8590_s26, 4  ;;  %s291_s23 = int_to_ptr.vmem [resolvable:$true] %s290_s23  ;;  %s315_s28 = int_to_ptr.vmem [resolvable:$true] %s314_s28 }
  0x93   :  { %s8161_s8 = scalar_lea.vmem %s291_s23, 2048  ;;  %p8166_p3 = scmp.lt.s32.totalorder %s291_s23, %s291_s23 }
  0x94   :  { %p8162_p2 = scmp.ne.s32.totalorder %s291_s23, %s8161_s8  ;;  %p8167_p4 = scmp.lt.s32.totalorder %s8161_s8, %s8161_s8 }
  0x96   :  { %p8168_p5 = por %p8167_p4, %p8166_p3 }
  0x98   :  { %p8169_p6 = pnand %p8168_p5, %p8162_p2 }
  0x9a   :  { %8172 = shalt.err (!%p8169_p6)
}
  0x9b   :  { %296 = dma.hbm_to_vmem [thread:$0]  %s8771_s17, 2048, %s291_s23, [#allocation24], %s8581_s10, %s8581_s10, %s8582_s11  }
  0x9c   :  { %s8181_s3 = scalar_lea.vmem %s315_s28, 2048  ;;  %p8186_p8 = scmp.lt.s32.totalorder %s315_s28, %s315_s28 }
  0x9d   :  { %p8182_p7 = scmp.ne.s32.totalorder %s315_s28, %s8181_s3  ;;  %p8187_p9 = scmp.lt.s32.totalorder %s8181_s3, %s8181_s3 }
  0x9f   :  { %p8188_p10 = por %p8187_p9, %p8186_p8 }
  0xa1   :  { %p8189_p11 = pnand %p8188_p10, %p8182_p7 }
  0xa3   :  { %8192 = shalt.err (!%p8189_p11)
}
  0xa4   :  { %320 = dma.hbm_to_vmem [thread:$0]  %s8781_s25, 2048, %s315_s28, [#allocation27], %s8581_s10, %s8581_s10, %s8582_s11  }
  0xa5   :  { %s8591_s29 = smov [#allocation29]   ;;  %s8592_s24 = smov [#allocation32]  }
  0xa6   :  { %s338_s1 = sshll.u32 %s8591_s29, 4  ;;  %s363_s2 = sshll.u32 %s8592_s24, 4  ;;  %s339_s1 = int_to_ptr.vmem [resolvable:$true] %s338_s1  ;;  %s364_s2 = int_to_ptr.vmem [resolvable:$true] %s363_s2 }
  0xa7   :  { %s8201_s7 = scalar_lea.vmem %s339_s1, 32  ;;  %p8206_p13 = scmp.lt.s32.totalorder %s339_s1, %s339_s1 }
  0xa8   :  { %p8202_p12 = scmp.ne.s32.totalorder %s339_s1, %s8201_s7  ;;  %p8207_p0 = scmp.lt.s32.totalorder %s8201_s7, %s8201_s7 }
  0xaa   :  { %p8208_p1 = por %p8207_p0, %p8206_p13 }
  0xac   :  { %p8209_p2 = pnand %p8208_p1, %p8202_p12 }
  0xae   :  { %8212 = shalt.err (!%p8209_p2)
}
  0xaf   :  { %344 = dma.hbm_to_vmem [thread:$0]  %s8791_s13, 32, %s339_s1, [#allocation30], %s8583_s16, %s8583_s16, %s8584_s18  }
  0xb0   :  { %s8221_s17 = scalar_lea.vmem %s364_s2, 16  ;;  %s8225_s25 = scalar_lea.vmem %s364_s2, 32 }
  0xb1   :  { %p8222_p3 = scmp.ne.s32.totalorder %s364_s2, %s8221_s17  ;;  %p8226_p4 = scmp.lt.s32.totalorder %s364_s2, %s364_s2 }
  0xb2   :  { %p8227_p5 = scmp.lt.s32.totalorder %s8225_s25, %s8221_s17 }
  0xb4   :  { %p8228_p6 = por %p8227_p5, %p8226_p4 }
  0xb6   :  { %p8229_p7 = pnand %p8228_p6, %p8222_p3 }
  0xb8   :  { %8232 = shalt.err (!%p8229_p7)
}
  0xb9   :  { %366 = dma.hbm_to_vmem [thread:$0]  %s8801_s4, 16, %s364_s2, [#allocation33]  }
  0xba   :  { %s8593_s0 = smov [#allocation35]   ;;  %s8594_s22 = smov [#allocation2]  }
  0xbb   :  { %s382_s15 = sshll.u32 %s8593_s0, 4  ;;  %s112_s6 = sshll.u32 %s8594_s22, 4  ;;  %s383_s15 = int_to_ptr.vmem [resolvable:$true] %s382_s15  ;;  %s113_s6 = int_to_ptr.vmem [resolvable:$true] %s112_s6 }
  0xbc   :  { %s8241_s20 = scalar_lea.vmem %s383_s15, 1024  ;;  %p8246_p9 = scmp.lt.s32.totalorder %s383_s15, %s383_s15 }
  0xbd   :  { %p8242_p8 = scmp.ne.s32.totalorder %s383_s15, %s8241_s20  ;;  %p8247_p10 = scmp.lt.s32.totalorder %s8241_s20, %s8241_s20 }
  0xbf   :  { %p8248_p11 = por %p8247_p10, %p8246_p9 }
  0xc1   :  { %p8249_p12 = pnand %p8248_p11, %p8242_p8 }
  0xc3   :  { %8252 = shalt.err (!%p8249_p12)
}
  0xc4   :  { %388 = dma.hbm_to_vmem [thread:$0]  %s8811_s27, 1024, %s383_s15, [#allocation36], %s8581_s10, %s8581_s10, %s8582_s11  }
  0xc5   :  { %s8261_s13 = scalar_lea.vmem %s113_s6, 2048  ;;  %p8266_p0 = scmp.lt.s32.totalorder %s113_s6, %s113_s6 }
  0xc6   :  { %p8262_p13 = scmp.ne.s32.totalorder %s113_s6, %s8261_s13  ;;  %p8267_p1 = scmp.lt.s32.totalorder %s8261_s13, %s8261_s13 }
  0xc8   :  { %p8268_p2 = por %p8267_p1, %p8266_p0 }
  0xca   :  { %p8269_p3 = pnand %p8268_p2, %p8262_p13 }
  0xcc   :  { %8272 = shalt.err (!%p8269_p3)
}
  0xcd   :  { %118 = dma.hbm_to_vmem [thread:$0]  %s8641_s21, 2048, %s113_s6, [#allocation3], %s8581_s10, %s8581_s10, %s8582_s11  }
  0xce   :  { %s8595_s4 = smov [#allocation7]   ;;  %s8596_s26 = smov [#allocation10]  }
  0xcf   :  { %s144_s23 = sshll.u32 %s8595_s4, 4  ;;  %s168_s28 = sshll.u32 %s8596_s26, 4  ;;  %s145_s23 = int_to_ptr.vmem [resolvable:$true] %s144_s23  ;;  %s169_s28 = int_to_ptr.vmem [resolvable:$true] %s168_s28 }
  0xd0   :  { %s8281_s8 = scalar_lea.vmem %s145_s23, 2048  ;;  %p8286_p5 = scmp.lt.s32.totalorder %s145_s23, %s145_s23 }
  0xd1   :  { %p8282_p4 = scmp.ne.s32.totalorder %s145_s23, %s8281_s8  ;;  %p8287_p6 = scmp.lt.s32.totalorder %s8281_s8, %s8281_s8 }
  0xd3   :  { %p8288_p7 = por %p8287_p6, %p8286_p5 }
  0xd5   :  { %p8289_p8 = pnand %p8288_p7, %p8282_p4 }
  0xd7   :  { %8292 = shalt.err (!%p8289_p8)
}
  0xd8   :  { %150 = dma.hbm_to_vmem [thread:$0]  %s8671_s19, 2048, %s145_s23, [#allocation6], %s8581_s10, %s8581_s10, %s8582_s11  }
  0xd9   :  { %s8301_s27 = scalar_lea.vmem %s169_s28, 32  ;;  %p8306_p10 = scmp.lt.s32.totalorder %s169_s28, %s169_s28 }
  0xda   :  { %p8302_p9 = scmp.ne.s32.totalorder %s169_s28, %s8301_s27  ;;  %p8307_p11 = scmp.lt.s32.totalorder %s8301_s27, %s8301_s27 }
  0xdc   :  { %p8308_p12 = por %p8307_p11, %p8306_p10 }
  0xde   :  { %p8309_p13 = pnand %p8308_p12, %p8302_p9 }
  0xe0   :  { %8312 = shalt.err (!%p8309_p13)
}
  0xe1   :  { %174 = dma.hbm_to_vmem [thread:$0]  %s8681_s30, 32, %s169_s28, [#allocation9], %s8583_s16, %s8583_s16, %s8584_s18  }
  0xe2   :  { %s8597_s21 = smov [#allocation13]   ;;  %s8598_s29 = smov [#allocation16]  }
  0xe3   :  { %s193_s3 = sshll.u32 %s8597_s21, 4  ;;  %s216_s1 = sshll.u32 %s8598_s29, 4  ;;  %s194_s3 = int_to_ptr.vmem [resolvable:$true] %s193_s3  ;;  %s217_s1 = int_to_ptr.vmem [resolvable:$true] %s216_s1 }
  0xe4   :  { %s8321_s24 = scalar_lea.vmem %s194_s3, 16  ;;  %s8325_s19 = scalar_lea.vmem %s194_s3, 32 }
  0xe5   :  { %p8322_p0 = scmp.ne.s32.totalorder %s194_s3, %s8321_s24  ;;  %p8326_p1 = scmp.lt.s32.totalorder %s194_s3, %s194_s3 }
  0xe6   :  { %p8327_p2 = scmp.lt.s32.totalorder %s8325_s19, %s8321_s24 }
  0xe8   :  { %p8328_p3 = por %p8327_p2, %p8326_p1 }
  0xea   :  { %p8329_p4 = pnand %p8328_p3, %p8322_p0 }
  0xec   :  { %8332 = shalt.err (!%p8329_p4)
}
  0xed   :  { %196 = dma.hbm_to_vmem [thread:$0]  %s8691_s12, 16, %s194_s3, [#allocation12]  }
  0xee   :  { %s8341_s2 = scalar_lea.vmem %s217_s1, 2048  ;;  %p8346_p6 = scmp.lt.s32.totalorder %s217_s1, %s217_s1 }
  0xef   :  { %p8342_p5 = scmp.ne.s32.totalorder %s217_s1, %s8341_s2  ;;  %p8347_p7 = scmp.lt.s32.totalorder %s8341_s2, %s8341_s2 }
  0xf1   :  { %p8348_p8 = por %p8347_p7, %p8346_p6 }
  0xf3   :  { %p8349_p9 = pnand %p8348_p8, %p8342_p5 }
  0xf5   :  { %8352 = shalt.err (!%p8349_p9)
}
  0xf6   :  { %s9779_s30 = sld [smem:[#allocation62_spill]]  ;;  %s8599_s7 = smov [#allocation19]  }
  0xf7   :  { %s248_s17 = sshll.u32 %s8599_s7, 4  ;;  %s249_s17 = int_to_ptr.vmem [resolvable:$true] %s248_s17 }
  0xf8   :  { %s8361_s25 = scalar_lea.vmem %s249_s17, 4096  ;;  %p8366_p11 = scmp.lt.s32.totalorder %s249_s17, %s249_s17 }
  0xf9   :  { %p8362_p10 = scmp.ne.s32.totalorder %s249_s17, %s8361_s25  ;;  %p8367_p12 = scmp.lt.s32.totalorder %s8361_s25, %s8361_s25 }
  0xfb   :  { %p8368_p13 = por %p8367_p12, %p8366_p11 }
  0xfc   :  { %222 = dma.hbm_to_vmem [thread:$0]  %s9779_s30, 2048, %s217_s1, [#allocation15], %s8581_s10, %s8581_s10, %s8582_s11  }
  0xfd   :  { %p8369_p0 = pnand %p8368_p13, %p8362_p10 }
  0xff   :  { %8372 = shalt.err (!%p8369_p0)
}
 0x100   :  { %s8600_s12 = smov 128   ;;  %s9780_s0 = sld [smem:[#allocation67_spill]] }
 0x101   :  { %s8601_s15 = smov 8   ;;  %s8602_s22 = smov [#allocation22]  }
 0x102   :  { %s278_s6 = sshll.u32 %s8602_s22, 4  ;;  %s8603_s10 = smov [#allocation25]   ;;  %s279_s6 = int_to_ptr.vmem [resolvable:$true] %s278_s6 }
 0x103   :  { %s302_s11 = sshll.u32 %s8603_s10, 4  ;;  %s8381_s20 = scalar_lea.vmem %s279_s6, 32  ;;  %s303_s11 = int_to_ptr.vmem [resolvable:$true] %s302_s11 }
 0x104   :  { %p8382_p1 = scmp.ne.s32.totalorder %s279_s6, %s8381_s20  ;;  %p8386_p2 = scmp.lt.s32.totalorder %s279_s6, %s279_s6 }
 0x105   :  { %p8387_p3 = scmp.lt.s32.totalorder %s8381_s20, %s8381_s20 }
 0x106   :  { %254 = dma.hbm_to_vmem [thread:$0]  %s9780_s0, 4096, %s249_s17, [#allocation18], %s8600_s12, %s8600_s12, %s8601_s15  }
 0x107   :  { %p8388_p4 = por %p8387_p3, %p8386_p2 }
 0x109   :  { %p8389_p5 = pnand %p8388_p4, %p8382_p1 }
 0x10b   :  { %8392 = shalt.err (!%p8389_p5)
}
 0x10c   :  { %s9781_s13 = sld [smem:[#allocation71_spill]]  ;;  %s8401_s4 = scalar_lea.vmem %s303_s11, 32 }
 0x10d   :  { %p8402_p6 = scmp.ne.s32.totalorder %s303_s11, %s8401_s4  ;;  %p8406_p7 = scmp.lt.s32.totalorder %s303_s11, %s303_s11 }
 0x10e   :  { %p8407_p8 = scmp.lt.s32.totalorder %s8401_s4, %s8401_s4 }
 0x110   :  { %p8408_p9 = por %p8407_p8, %p8406_p7 }
 0x112   :  { %284 = dma.hbm_to_vmem [thread:$0]  %s9781_s13, 32, %s279_s6, [#allocation21], %s8583_s16, %s8583_s16, %s8584_s18  }
 0x113   :  { %p8409_p10 = pnand %p8408_p9, %p8402_p6 }
 0x115   :  { %8412 = shalt.err (!%p8409_p10)
}
 0x116   :  { %s9782_s23 = sld [smem:[#allocation72_spill]]  ;;  %s8604_s26 = smov [#allocation28]  }
 0x117   :  { %s326_s28 = sshll.u32 %s8604_s26, 4  ;;  %s8605_s8 = smov [#allocation31]   ;;  %s327_s28 = int_to_ptr.vmem [resolvable:$true] %s326_s28 }
 0x118   :  { %s350_s27 = sshll.u32 %s8605_s8, 4  ;;  %s8421_s21 = scalar_lea.vmem %s327_s28, 32  ;;  %s351_s27 = int_to_ptr.vmem [resolvable:$true] %s350_s27 }
 0x119   :  { %p8422_p11 = scmp.ne.s32.totalorder %s327_s28, %s8421_s21  ;;  %p8426_p12 = scmp.lt.s32.totalorder %s327_s28, %s327_s28 }
 0x11a   :  { %p8427_p13 = scmp.lt.s32.totalorder %s8421_s21, %s8421_s21 }
 0x11c   :  { %308 = dma.hbm_to_vmem [thread:$0]  %s9782_s23, 32, %s303_s11, [#allocation24], %s8583_s16, %s8583_s16, %s8584_s18  }
 0x11d   :  { %p8428_p0 = por %p8427_p13, %p8426_p12 }
 0x11f   :  { %p8429_p1 = pnand %p8428_p0, %p8422_p11 }
 0x121   :  { %8432 = shalt.err (!%p8429_p1)
}
 0x122   :  { %s9783_s3 = sld [smem:[#allocation73_spill]]  ;;  %s8441_s29 = scalar_lea.vmem %s351_s27, 32 }
 0x123   :  { %p8442_p2 = scmp.ne.s32.totalorder %s351_s27, %s8441_s29  ;;  %p8446_p3 = scmp.lt.s32.totalorder %s351_s27, %s351_s27 }
 0x124   :  { %p8447_p4 = scmp.lt.s32.totalorder %s8441_s29, %s8441_s29 }
 0x126   :  { %p8448_p5 = por %p8447_p4, %p8446_p3 }
 0x128   :  { %332 = dma.hbm_to_vmem [thread:$0]  %s9783_s3, 32, %s327_s28, [#allocation27], %s8583_s16, %s8583_s16, %s8584_s18  }
 0x129   :  { %p8449_p6 = pnand %p8448_p5, %p8442_p2 }
 0x12b   :  { %8452 = shalt.err (!%p8449_p6)
}
 0x12c   :  { %s9784_s1 = sld [smem:[#allocation74_spill]]  ;;  %s8606_s24 = smov [#allocation34]  }
 0x12d   :  { %s373_s19 = sshll.u32 %s8606_s24, 4  ;;  %s8607_s2 = smov [#allocation37]   ;;  %s374_s19 = int_to_ptr.vmem [resolvable:$true] %s373_s19 }
 0x12e   :  { %s395_s30 = sshll.u32 %s8607_s2, 4  ;;  %s8461_s7 = scalar_lea.vmem %s374_s19, 16  ;;  %s396_s30 = int_to_ptr.vmem [resolvable:$true] %s395_s30 }
 0x12f   :  { %p8462_p7 = scmp.ne.s32.totalorder %s374_s19, %s8461_s7  ;;  %s8465_s17 = scalar_lea.vmem %s374_s19, 32 }
 0x130   :  { %p8466_p8 = scmp.lt.s32.totalorder %s374_s19, %s374_s19  ;;  %p8467_p9 = scmp.lt.s32.totalorder %s8465_s17, %s8461_s7 }
 0x132   :  { %356 = dma.hbm_to_vmem [thread:$0]  %s9784_s1, 32, %s351_s27, [#allocation30], %s8583_s16, %s8583_s16, %s8584_s18  }
 0x133   :  { %p8468_p10 = por %p8467_p9, %p8466_p8 }
 0x135   :  { %p8469_p11 = pnand %p8468_p10, %p8462_p7 }
 0x137   :  { %8472 = shalt.err (!%p8469_p11)
}
 0x138   :  { %376 = dma.hbm_to_vmem [thread:$0]  %s8806_s5, 16, %s374_s19, [#allocation33]  }
 0x139   :  { %s8481_s25 = scalar_lea.vmem %s396_s30, 16  ;;  %s8485_s0 = scalar_lea.vmem %s396_s30, 32 }
 0x13a   :  { %p8482_p12 = scmp.ne.s32.totalorder %s396_s30, %s8481_s25  ;;  %p8486_p13 = scmp.lt.s32.totalorder %s396_s30, %s396_s30 }
 0x13b   :  { %p8487_p0 = scmp.lt.s32.totalorder %s8485_s0, %s8481_s25 }
 0x13d   :  { %p8488_p1 = por %p8487_p0, %p8486_p13 }
 0x13f   :  { %p8489_p2 = pnand %p8488_p1, %p8482_p12 }
 0x141   :  { %8492 = shalt.err (!%p8489_p2)
}
 0x142   :  { %398 = dma.hbm_to_vmem [thread:$0]  %s8816_s14, 16, %s396_s30, [#allocation36]  }
 0x143   :  { %8513 = dma.done.wait [#allocation3], 2048  }
 0x144   :  { %8514 = vsyncadd [#allocation3], 4294965248 }
 0x145   :  { %8515 = dma.done.wait [#allocation6], 4096  }
 0x146   :  { %8516 = vsyncadd [#allocation6], 4294963200 }
 0x147   :  { %8517 = dma.done.wait [#allocation9], 64  }
 0x148   :  { %8518 = vsyncadd [#allocation9], 4294967232 }
 0x149   :  { %8519 = dma.done.wait [#allocation12], 48  }
 0x14a   :  { %8520 = vsyncadd [#allocation12], 4294967248 }
 0x14b   :  { %8521 = dma.done.wait [#allocation15], 2064  }
 0x14c   :  { %8522 = vsyncadd [#allocation15], 4294965232 }
 0x14d   :  { %8523 = dma.done.wait [#allocation18], 6144  }
 0x14e   :  { %8524 = vsyncadd [#allocation18], 4294961152 }
 0x14f   :  { %8525 = dma.done.wait [#allocation21], 2080  }
 0x150   :  { %8526 = vsyncadd [#allocation21], 4294965216 }
 0x151   :  { %8527 = dma.done.wait [#allocation24], 2080  }
 0x152   :  { %8528 = vsyncadd [#allocation24], 4294965216 }
 0x153   :  { %8529 = dma.done.wait [#allocation27], 2080  }
 0x154   :  { %8530 = vsyncadd [#allocation27], 4294965216 }
 0x155   :  { %8531 = dma.done.wait [#allocation30], 64  }
 0x156   :  { %8532 = vsyncadd [#allocation30], 4294967232 }
 0x157   :  { %8533 = dma.done.wait [#allocation33], 32  }
 0x158   :  { %8534 = vsyncadd [#allocation33], 4294967264 }
 0x159   :  { %8535 = dma.done.wait [#allocation36], 1040  }
 0x15a   :  { %8536 = vsyncadd [#allocation36], 4294966256  ;;  %s9785_s5 = sld [smem:[#allocation54_spill]]  ;;  %v8608_v0 = vmov 0   ;;  %v8609_v1 = vmov 0.0   ;;  %v473_v21 = vlaneseq  ;;  %vm8610_vm10 = vmmov 0  }
 0x15b   :  { %840 = vmatprep.mubr.bf16.mxu0 %v8608_v0  ;;  %6865 = vmatprep.subr.bf16.mxu1 %v8609_v1  ;;  %s9786_s14 = sld [smem:[#allocation52_spill]]  ;;  %vm986_vm14 = vcmask 130048   ;;  %s8612_s3 = smov [#allocation38]  }
 0x15c   :  { %s9787_s16 = sld [smem:[#allocation55_spill]]  ;;  %v8923_v22 = vshrl.u32 %v473_v21, 7  ;;  %v8931_v25 = vand.u32 127, %v473_v21  ;;  %6881 = vmatprep.mubr.msk.bf16.mxu1 %vm8610_vm10, %v8609_v1  ;;  %s6142_s29 = sshll.u32 %s8612_s3, 4  ;;  %s6143_s29 = int_to_ptr.vmem [resolvable:$true] %s6142_s29 }
 0x15d   :  { %s9788_s18 = sld [smem:[#allocation56_spill]]  ;;  %s8493_s1 = scalar_lea.vmem %s6143_s29, 256 }
 0x15e   :  { %v8926_v23 = vsub.s32 0, %v8923_v22  ;;  %v8936_v27 = vsub.s32 1, %v8923_v22  ;;  %vm479_vm0 = vcmp.lt.s32.totalorder %v8931_v25, 8  ;;  %vm483_vm1 = vcmp.ge.s32.totalorder %v8931_v25, 8  ;;  %s9789_s22 = sld [smem:[#allocation57_spill]]  ;;  %p8494_p3 = scmp.ne.s32.totalorder %s6143_s29, %s8493_s1 }
 0x15f   :  { %v8942_v32 = vsel %vm479_vm0, 1.0, %v8609_v1  ;;  %vm484_vm2 = vcmp.lt.s32.totalorder %v8931_v25, 16  ;;  %vm488_vm3 = vcmp.ge.s32.totalorder %v8931_v25, 16  ;;  %vm489_vm4 = vcmp.lt.s32.totalorder %v8931_v25, 24  ;;  %s9790_s6 = sld [smem:[#allocation58_spill]]  ;;  %p8498_p4 = scmp.lt.s32.totalorder %s6143_s29, %s6143_s29 }
 0x160   :  { %v7479_v2 = vld [vmem:[%s9785_s5 + $0xac] ss:$12 sps:$4 sm:$0xff]   ;;  %v7481_v3 = vld [vmem:[%s9785_s5 + $0xa8] ss:$12 sps:$4 sm:$0xff]   ;;  %v7484_v5 = vld [vmem:[%s9785_s5 + $0x90] ss:$12 sps:$4 sm:$0xff]   ;;  %p8499_p5 = scmp.lt.s32.totalorder %s8493_s1, %s8493_s1 }
 0x161   :  { %808 = vmatprep.subr.bf16.mxu0 %v7479_v2  ;;  %v7482_v4 = vld [vmem:[%s9785_s5 + $0x94] ss:$12 sps:$4 sm:$0xff]   ;;  %v7485_v6 = vld [vmem:[%s9785_s5 + $0x7c] ss:$12 sps:$4 sm:$0xff]   ;;  %v7487_v7 = vld [vmem:[%s9785_s5 + $0x78] ss:$12 sps:$4 sm:$0xff]  }
 0x162   :  { %809 = vmatpush1.bf16.msra.mxu0 %v7481_v3  ;;  %v7488_v8 = vld [vmem:[%s9785_s5 + $0x64] ss:$12 sps:$4 sm:$0xff]   ;;  %v7490_v9 = vld [vmem:[%s9785_s5 + $0x60] ss:$12 sps:$4 sm:$0xff]   ;;  %v7493_v11 = vld [vmem:[%s9785_s5 + $0x48] ss:$12 sps:$4 sm:$0xff]   ;;  %p8500_p6 = por %p8499_p5, %p8498_p4 }
 0x163   :  { %810 = vmatprep.subr.bf16.mxu0 %v7482_v4  ;;  %v7491_v10 = vld [vmem:[%s9785_s5 + $0x4c] ss:$12 sps:$4 sm:$0xff]   ;;  %v7494_v12 = vld [vmem:[%s9785_s5 + $0x34] ss:$12 sps:$4 sm:$0xff]   ;;  %v7496_v13 = vld [vmem:[%s9785_s5 + $0x30] ss:$12 sps:$4 sm:$0xff]  }
 0x164   :  { %v7497_v14 = vld [vmem:[%s9785_s5 + $0x1c] ss:$12 sps:$4 sm:$0xff]   ;;  %v7499_v15 = vld [vmem:[%s9785_s5 + $0x18] ss:$12 sps:$4 sm:$0xff]   ;;  %v7502_v17 = vld [vmem:[%s9785_s5] ss:$12 sps:$4 sm:$0xff]   ;;  %p8501_p7 = pnand %p8500_p6, %p8494_p3 }
 0x165   :  { %v7500_v16 = vld [vmem:[%s9785_s5 + $0x4] ss:$12 sps:$4 sm:$0xff]   ;;  %v470_v19 = vld [vmem:[%s9786_s14 + $0x8] sm:$0xff]  ;;  %v8929_v24 = vld [vmem:[%s9787_s16] sm:$0x7]  ;;  %vm475_vm7 = vcmp.lt.s32.totalorder %v8931_v25, 32 }
 0x166   :  { %811 = vmatpush1.bf16.msra.mxu0 %v7484_v5  ;;  %v469_v18 = vld [vmem:[%s9786_s14] sm:$0xff]  ;;  %v668_v26 = vrot.slane %v8929_v24, %v8926_v23  ;;  %v672_v31 = vrot.slane %v8929_v24, %v8936_v27  ;;  %vm485_vm5 = vmand %vm483_vm1, %vm484_vm2  ;;  %vm493_vm8 = vcmp.ge.s32.totalorder %v8931_v25, 24  ;;  %v7503_v54 = vld [vmem:[%s9785_s5 + $0xb0] ss:$12 sps:$4 sm:$0xff]   ;;  %v500_v62 = vadd.s32 16, %v8923_v22  ;;  %s9791_s10 = sld [smem:[#allocation59_spill]] }
 0x167   :  { %812 = vmatprep.subr.bf16.mxu0 %v7485_v6  ;;  %v8920_v20 = vpack.c.bf16 %v470_v19, %v469_v18  ;;  %vm490_vm6 = vmand %vm488_vm3, %vm489_vm4  ;;  %v8951_v42 = vsel %vm485_vm5, 1.0, %v8609_v1  ;;  %6866 = vmatpush3.bf16.msra.mxu1 %v7503_v54  ;;  %v7504_v55 = vld [vmem:[%s9785_s5 + $0x98] ss:$12 sps:$4 sm:$0xff]   ;;  %v7505_v56 = vld [vmem:[%s9785_s5 + $0x80] ss:$12 sps:$4 sm:$0xff]   ;;  %v606_v2 = vand.u32 1, %v8931_v25 }
 0x168   :  { %v8954_v43 = vsel %vm490_vm6, 1.0, %v8609_v1  ;;  %vm494_vm9 = vmand %vm493_vm8, %vm475_vm7  ;;  %6867 = vmatprep.subr.bf16.mxu1 %v8609_v1  ;;  %v7506_v57 = vld [vmem:[%s9785_s5 + $0x68] ss:$12 sps:$4 sm:$0xff]   ;;  %v7507_v58 = vld [vmem:[%s9785_s5 + $0x50] ss:$12 sps:$4 sm:$0xff]   ;;  %v524_v63 = vand.u32 1, %v500_v62 }
 0x169   :  { %v8966_v50 = vsel %vm494_vm9, 1.0, %v8609_v1  ;;  %v7508_v59 = vld [vmem:[%s9785_s5 + $0x38] ss:$12 sps:$4 sm:$0xff]   ;;  %v7509_v60 = vld [vmem:[%s9785_s5 + $0x20] ss:$12 sps:$4 sm:$0xff]   ;;  %v501_v3 = vadd.s32 24, %v8923_v22 }
 0x16a   :  { %813 = vmatpush1.bf16.msra.mxu0 %v7487_v7  ;;  %v7510_v61 = vld [vmem:[%s9785_s5 + $0x8] ss:$12 sps:$4 sm:$0xff]   ;;  %v510_v4 = vand.u32 1, %v8923_v22  ;;  %v499_v5 = vadd.s32 8, %v8923_v22  ;;  %vm616_vm11 = vcmp.eq.s32.totalorder %v524_v63, %v606_v2  ;;  %v502_v7 = vadd.s32 32, %v8923_v22  ;;  %v7522_v25 = vld [vmem:[#allocation5 + $0x20] sm:$0xff]  }
 0x16b   :  { %814 = vmatprep.subr.bf16.mxu0 %v7488_v8  ;;  %6868 = vmatpush3.bf16.msra.mxu1 %v7504_v55  ;;  %v531_v6 = vand.u32 1, %v501_v3  ;;  %v503_v19 = vadd.s32 40, %v8923_v22  ;;  %s9792_s11 = sld [smem:[#allocation60_spill]] }
 0x16c   :  { %6869 = vmatprep.subr.bf16.mxu1 %v8609_v1  ;;  %vm614_vm12 = vcmp.eq.s32.totalorder %v510_v4, %v606_v2  ;;  %v517_v8 = vand.u32 1, %v499_v5  ;;  %s9793_s20 = sld [smem:[#allocation53_spill]] }
 0x16d   :  { %vm617_vm13 = vcmp.eq.s32.totalorder %v531_v6, %v606_v2  ;;  %s9794_s13 = sld [smem:[#allocation61_spill]] }
 0x16e   :  { %815 = vmatpush1.bf16.msra.mxu0 %v7490_v9  ;;  %vm615_vm15 = vcmp.eq.s32.totalorder %v517_v8, %v606_v2  ;;  %s9795_s4 = sld [smem:[#allocation63_spill]] }
 0x16f   :  { %816 = vmatprep.subr.bf16.mxu0 %v7491_v10  ;;  %6870 = vmatpush3.bf16.msra.mxu1 %v7505_v56  ;;  %v8611_v10 = vmov -1e+30   ;;  %s9796_s23 = sld [smem:[#allocation64_spill]] }
 0x170   :  { %6871 = vmatprep.subr.bf16.mxu1 %v8609_v1  ;;  %v9003_v21 = vsel %vm617_vm13, 0.0, %v8611_v10  ;;  %s9797_s26 = sld [smem:[#allocation65_spill]] }
 0x171   :  { %s9798_s28 = sld [smem:[#allocation68_spill]] }
 0x172   :  { %817 = vmatpush1.bf16.msra.mxu0 %v7493_v11  ;;  %v8996_v11 = vsel %vm616_vm11, 0.0, %v8611_v10  ;;  %s9799_s8 = sld [smem:[#allocation66_spill]] }
 0x173   :  { %818 = vmatprep.subr.bf16.mxu0 %v7494_v12  ;;  %6872 = vmatpush3.bf16.msra.mxu1 %v7506_v57  ;;  %v504_v12 = vadd.s32 48, %v8923_v22  ;;  %s9800_s27 = sld [smem:[#allocation69_spill]] }
 0x174   :  { %6873 = vmatprep.subr.bf16.mxu1 %v8609_v1  ;;  %s9801_s21 = sld [smem:[#allocation70_spill]] }
 0x176   :  { %819 = vmatpush1.bf16.msra.mxu0 %v7496_v13 }
 0x177   :  { %820 = vmatprep.subr.bf16.mxu0 %v7497_v14  ;;  %6874 = vmatpush3.bf16.msra.mxu1 %v7507_v58 }
 0x178   :  { %6875 = vmatprep.subr.bf16.mxu1 %v8609_v1 }
 0x17a   :  { %821 = vmatpush1.bf16.msra.mxu0 %v7499_v15  ;;  %v8999_v15 = vsel %vm614_vm12, 0.0, %v8611_v10 }
 0x17b   :  { %822 = vmatprep.subr.bf16.mxu0 %v7500_v16  ;;  %6876 = vmatpush3.bf16.msra.mxu1 %v7508_v59  ;;  %v538_v16 = vand.u32 1, %v502_v7 }
 0x17c   :  { %6877 = vmatprep.subr.bf16.mxu1 %v8609_v1 }
 0x17d   :  { %vm618_vm0 = vcmp.eq.s32.totalorder %v538_v16, %v606_v2 }
 0x17e   :  { %823 = vmatpush1.bf16.msra.mxu0 %v7502_v17 }
 0x17f   :  { %6878 = vmatpush3.bf16.msra.mxu1 %v7509_v60 }
 0x180   :  { %6879 = vmatprep.subr.bf16.mxu1 %v8609_v1 }
 0x181   :  { %841 = vmatmul.mubr.bf16.vlgmr.msra.gmra.mxu0 %v8920_v20 }
 0x183   :  { %6880 = vmatpush3.bf16.msra.mxu1 %v7510_v61 }
 0x186   :  { %6882 = vmatmul.mubr.bf16.vlgmr.msra.gmra.mxu1 %v8920_v20 }
 0x241   :  { %v842_v28 = vpop.f32.mrf.mxu0 }
 0x242   :  { %v843_v30 = vadd.f32 %v842_v28, %v668_v26 }
 0x243   :  { %v844_v29 = vpop.f32.mrf.mxu0 }
 0x244   :  { %v845_v36 = vadd.f32 %v844_v29, %v672_v31  ;;  %v892_v38 = vmul.f32 %v8942_v32, %v843_v30  ;;  %v894_v46 = vmul.f32 %v8951_v42, %v843_v30  ;;  %v896_v47 = vmul.f32 %v8954_v43, %v843_v30 }
 0x245   :  { %v846_v33 = vpop.f32.mrf.mxu0  ;;  %v898_v52 = vmul.f32 %v8966_v50, %v843_v30 }
 0x246   :  { %v847_v34 = vadd.f32 %v846_v33, %v668_v26  ;;  %v552_v26 = vand.u32 1, %v504_v12 }
 0x247   :  { %v848_v35 = vpop.f32.mrf.mxu0 }
 0x248   :  { %v849_v37 = vadd.f32 %v848_v35, %v672_v31  ;;  %v893_v39 = vmul.f32 %v8942_v32, %v847_v34  ;;  %v895_v44 = vmul.f32 %v8951_v42, %v847_v34  ;;  %v897_v45 = vmul.f32 %v8954_v43, %v847_v34 }
 0x249   :  { %v899_v51 = vmul.f32 %v8966_v50, %v847_v34  ;;  %v505_v31 = vadd.s32 56, %v8923_v22  ;;  %v9008_v34 = vsel %vm615_vm15, 0.0, %v8611_v10  ;;  %vm620_vm1 = vcmp.eq.s32.totalorder %v552_v26, %v606_v2 }
 0x24a   :  { %v904_v40 = vpack.c.bf16 %v849_v37, %v845_v36  ;;  %v900_v41 = vpack.c.bf16 %v893_v39, %v892_v38  ;;  %v901_v48 = vpack.c.bf16 %v895_v44, %v894_v46  ;;  %v902_v49 = vpack.c.bf16 %v897_v45, %v896_v47 }
 0x24b   :  { %v903_v53 = vpack.c.bf16 %v899_v51, %v898_v52  ;;  %v545_v38 = vand.u32 1, %v503_v19  ;;  %v559_v44 = vand.u32 1, %v505_v31  ;;  %v9014_v46 = vsel %vm618_vm0, 0.0, %v8611_v10 }
 0x24c   :  { %6885 = vmatprep.subr.bf16.mxu0 %v904_v40  ;;  %6887 = vmatprep.mubr.bf16.mxu0 %v900_v41  ;;  %v9017_v52 = vsel %vm620_vm1, 0.0, %v8611_v10 }
 0x24d   :  { %6886 = vmatpush3.bf16.xpose.msra.mxu0 %v904_v40  ;;  %vm619_vm2 = vcmp.eq.s32.totalorder %v545_v38, %v606_v2  ;;  %vm621_vm3 = vcmp.eq.s32.totalorder %v559_v44, %v606_v2 }
 0x24e   :  { %6905 = vmatprep.subr.bf16.mxu0 %v8609_v1  ;;  %v9020_v55 = vsel %vm619_vm2, 0.0, %v8611_v10  ;;  %v9024_v60 = vsel %vm621_vm3, 0.0, %v8611_v10 }
 0x254   :  { %6888 = vmatmul.mubr.bf16.vlgmr.msra.gmra.mxu0 %v901_v48 }
 0x255   :  { %6891 = vmatprep.mubr.bf16.mxu0 %v902_v49 }
 0x25c   :  { %6892 = vmatmul.mubr.bf16.gmra.mxu0 %v903_v53 }
 0x25d   :  { %6921 = vmatprep.mubr.msk.bf16.mxu0 %vm8610_vm10, %v8609_v1 }
 0x314   :  { %v6889_v9 = vpop.f32.mrf.mxu0 }
 0x315   :  { %v972_v13 = vmul.f32 0.35355338, %v6889_v9 }
 0x316   :  { %v939_v14 = vpop.f32.mrf.mxu0 }
 0x317   :  { %v970_v17 = vmul.f32 0.35355338, %v939_v14  ;;  %v980_v18 = vadd.f32 %v972_v13, %v8996_v11 }
 0x318   :  { %v6890_v20 = vpop.f32.mrf.mxu0 }
 0x319   :  { %v973_v28 = vmul.f32 0.35355338, %v6890_v20  ;;  %v993_v29 = vsel %vm986_vm14, %v980_v18, -inf  ;;  %v978_v30 = vadd.f32 %v970_v17, %v8999_v15 }
 0x31a   :  { %994 = vmax.xlane.f32.xlu1 %v993_v29  ;;  %v942_v33 = vpop.f32.mrf.mxu0 }
 0x31b   :  { %v971_v35 = vmul.f32 0.35355338, %v942_v33  ;;  %v987_v36 = vsel %vm986_vm14, %v978_v30, -inf  ;;  %v981_v37 = vadd.f32 %v973_v28, %v9003_v21 }
 0x31c   :  { %988 = vmax.xlane.f32.xlu0 %v987_v36  ;;  %v6893_v39 = vpop.f32.mrf.mxu0 }
 0x31d   :  { %v996_v40 = vsel %vm986_vm14, %v981_v37, -inf  ;;  %v979_v41 = vadd.f32 %v971_v35, %v9008_v34  ;;  %v976_v47 = vmul.f32 0.35355338, %v6893_v39 }
 0x31e   :  { %997 = vmax.xlane.f32.xlu1 %v996_v40  ;;  %v955_v45 = vpop.f32.mrf.mxu0 }
 0x31f   :  { %v974_v48 = vmul.f32 0.35355338, %v955_v45  ;;  %v990_v49 = vsel %vm986_vm14, %v979_v41, -inf  ;;  %v984_v59 = vadd.f32 %v976_v47, %v9017_v52 }
 0x320   :  { %991 = vmax.xlane.f32.xlu0 %v990_v49  ;;  %v6894_v51 = vpop.f32.mrf.mxu0 }
 0x321   :  { %v982_v53 = vadd.f32 %v974_v48, %v9014_v46  ;;  %v977_v56 = vmul.f32 0.35355338, %v6894_v51  ;;  %v1005_v62 = vsel %vm986_vm14, %v984_v59, -inf }
 0x322   :  { %v958_v54 = vpop.f32.mrf.mxu0 }
 0x323   :  { %v975_v57 = vmul.f32 0.35355338, %v958_v54  ;;  %v999_v58 = vsel %vm986_vm14, %v982_v53, -inf  ;;  %v985_v2 = vadd.f32 %v977_v56, %v9024_v60  ;;  %v9045_v54 = vsub.s32 2, %v8923_v22  ;;  %v885_v56 = vpop.f32.mrf.mxu1 }
 0x324   :  { %1000 = vmax.xlane.f32.xlu0 %v999_v58 }
 0x325   :  { %v983_v61 = vadd.f32 %v975_v57, %v9020_v55  ;;  %v1008_v3 = vsel %vm986_vm14, %v985_v2, -inf }
 0x327   :  { %v1002_v63 = vsel %vm986_vm14, %v983_v61, -inf }
 0x328   :  { %1006 = vmax.xlane.f32.xlu0 %v1005_v62  ;;  %1003 = vmax.xlane.f32.xlu1 %v1002_v63  ;;  %v6883_v62 = vpop.f32.mrf.mxu1 }
 0x32c   :  { %1009 = vmax.xlane.f32.xlu1 %v1008_v3 }
 0x3a3   :  { %v995_v4 = vpop.xlane.xlu1 %994 }
 0x3a4   :  { %v1013_v5 = vsub.f32 %v980_v18, %v995_v4  ;;  %v888_v4 = vpop.f32.mrf.mxu1 }
 0x3a5   :  { %v989_v6 = vpop.xlane.xlu0 %988 }
 0x3a6   :  { %v1011_v7 = vsub.f32 %v978_v30, %v989_v6  ;;  %v1023_v9 = vmul.f32 1.442695, %v1013_v5  ;;  %v6884_v5 = vpop.f32.mrf.mxu1 }
 0x3a7   :  { %v998_v8 = vpop.xlane.xlu1 %997 }
 0x3a8   :  { %v1019_v10 = vmul.f32 1.442695, %v1011_v7  ;;  %v1014_v12 = vsub.f32 %v981_v37, %v998_v8  ;;  %v7511_v7 = vld [vmem:[#allocation2 + $0x38] sm:$0xff]   ;;  %v7512_v8 = vld [vmem:[#allocation2 + $0x30] sm:$0xff]  }
 0x3a9   :  { %v992_v13 = vpop.xlane.xlu0 %991  ;;  %6906 = vmatpush3.bf16.msra.mxu0 %v7511_v7 }
 0x3aa   :  { %7791 = vpow2.f32 %v1019_v10  ;;  %v1012_v14 = vsub.f32 %v979_v41, %v992_v13  ;;  %v1025_v16 = vmul.f32 1.442695, %v1014_v12  ;;  %6907 = vmatprep.subr.bf16.mxu0 %v8609_v1 }
 0x3ab   :  { %7793 = vpow2.f32 %v1023_v9 }
 0x3ac   :  { %v1021_v17 = vmul.f32 1.442695, %v1012_v14 }
 0x3ad   :  { %v1001_v19 = vpop.xlane.xlu0 %1000  ;;  %6908 = vmatpush3.bf16.msra.mxu0 %v7512_v8 }
 0x3ae   :  { %7795 = vpow2.f32 %v1021_v17  ;;  %v1015_v20 = vsub.f32 %v982_v53, %v1001_v19  ;;  %6909 = vmatprep.subr.bf16.mxu0 %v8609_v1 }
 0x3af   :  { %7797 = vpow2.f32 %v1025_v16 }
 0x3b0   :  { %v1027_v26 = vmul.f32 1.442695, %v1015_v20 }
 0x3b1   :  { %v1007_v28 = vpop.xlane.xlu0 %1006  ;;  %v1004_v29 = vpop.xlane.xlu1 %1003 }
 0x3b2   :  { %7799 = vpow2.f32 %v1027_v26  ;;  %v1017_v18 = vsub.f32 %v984_v59, %v1007_v28  ;;  %v1016_v30 = vsub.f32 %v983_v61, %v1004_v29  ;;  %v676_v61 = vrot.slane %v8929_v24, %v9045_v54 }
 0x3b4   :  { %v1031_v31 = vmul.f32 1.442695, %v1017_v18  ;;  %v1029_v33 = vmul.f32 1.442695, %v1016_v30  ;;  %v889_v22 = vadd.f32 %v888_v4, %v676_v61 }
 0x3b5   :  { %v1010_v35 = vpop.xlane.xlu1 %1009 }
 0x3b6   :  { %7801 = vpow2.f32 %v1031_v31  ;;  %v1018_v36 = vsub.f32 %v985_v2, %v1010_v35  ;;  %v886_v2 = vadd.f32 %v885_v56, %v676_v61 }
 0x3b7   :  { %v9031_v37 = vpop.eup %7791  ;;  %7803 = vpow2.f32 %v1029_v33 }
 0x3b8   :  { %v1033_v38 = vmul.f32 1.442695, %v1018_v36  ;;  %v1035_v39 = vsel %vm986_vm14, %v9031_v37, 0.0  ;;  %v9035_v40 = vpop.eup %7793  ;;  %v1079_v6 = vpack.c.bf16 %v889_v22, %v886_v2 }
 0x3b9   :  { %1036 = vadd.xlane.f32.xlu0 %v1035_v39  ;;  %v1041_v44 = vsel %vm986_vm14, %v9035_v40, 0.0 }
 0x3ba   :  { %7805 = vpow2.f32 %v1033_v38  ;;  %6895 = vmatprep.subr.bf16.mxu1 %v1079_v6 }
 0x3bb   :  { %v7796_v41 = vpop.eup %7795  ;;  %6896 = vmatpush3.bf16.msra.mxu1 %v1079_v6 }
 0x3bc   :  { %v1038_v45 = vsel %vm986_vm14, %v7796_v41, 0.0  ;;  %v7798_v47 = vpop.eup %7797  ;;  %6925 = vmatprep.subr.bf16.mxu1 %v8609_v1 }
 0x3bd   :  { %1042 = vadd.xlane.f32.xlu0 %v1041_v44  ;;  %1039 = vadd.xlane.f32.xlu1 %v1038_v45  ;;  %v1044_v51 = vsel %vm986_vm14, %v7798_v47, 0.0 }
 0x3bf   :  { %v7800_v48 = vpop.eup %7799 }
 0x3c0   :  { %v1047_v49 = vsel %vm986_vm14, %v7800_v48, 0.0 }
 0x3c1   :  { %1048 = vadd.xlane.f32.xlu0 %v1047_v49  ;;  %1045 = vadd.xlane.f32.xlu1 %v1044_v51 }
 0x3c3   :  { %v9042_v53 = vpop.eup %7801 }
 0x3c4   :  { %v7804_v57 = vpop.eup %7803  ;;  %v1053_v58 = vsel %vm986_vm14, %v9042_v53, 0.0 }
 0x3c5   :  { %1054 = vadd.xlane.f32.xlu0 %v1053_v58  ;;  %v1050_v59 = vsel %vm986_vm14, %v7804_v57, 0.0  ;;  %v7518_v58 = vld [vmem:[#allocation2] sm:$0xff]  }
 0x3c6   :  { %1051 = vadd.xlane.f32.xlu1 %v1050_v59 }
 0x3c7   :  { %v7806_v63 = vpop.eup %7805 }
 0x3c8   :  { %v1056_v3 = vsel %vm986_vm14, %v7806_v63, 0.0 }
 0x3ca   :  { %1057 = vadd.xlane.f32.xlu1 %v1056_v3 }
 0x442   :  { %v1037_v24 = vpop.xlane.xlu0 %1036 }
 0x443   :  { %7807 = vrcp.f32 %v1037_v24 }
 0x446   :  { %v1043_v9 = vpop.xlane.xlu0 %1042  ;;  %v1040_v10 = vpop.xlane.xlu1 %1039 }
 0x447   :  { %7809 = vrcp.f32 %v1040_v10 }
 0x448   :  { %7811 = vrcp.f32 %v1043_v9 }
 0x44a   :  { %v1049_v12 = vpop.xlane.xlu0 %1048  ;;  %v1046_v13 = vpop.xlane.xlu1 %1045 }
 0x44b   :  { %7813 = vrcp.f32 %v1046_v13 }
 0x44c   :  { %7815 = vrcp.f32 %v1049_v12 }
 0x44e   :  { %v1055_v14 = vpop.xlane.xlu0 %1054 }
 0x44f   :  { %v1052_v16 = vpop.xlane.xlu1 %1051 }
 0x450   :  { %7817 = vrcp.f32 %v1052_v16  ;;  %v7808_v17 = vpop.eup %7807 }
 0x451   :  { %7819 = vrcp.f32 %v1055_v14  ;;  %v1067_v26 = vmul.f32 %v7808_v17, %v9031_v37 }
 0x453   :  { %v1058_v19 = vpop.xlane.xlu1 %1057 }
 0x454   :  { %7821 = vrcp.f32 %v1058_v19  ;;  %v7810_v20 = vpop.eup %7809 }
 0x455   :  { %v1068_v28 = vmul.f32 %v7810_v20, %v7796_v41  ;;  %v7812_v29 = vpop.eup %7811 }
 0x456   :  { %v1069_v31 = vmul.f32 %v7812_v29, %v9035_v40  ;;  %v7513_v40 = vld [vmem:[#allocation2 + $0x28] sm:$0xff]  }
 0x457   :  { %v1075_v18 = vpack.c.bf16 %v1068_v28, %v1067_v26  ;;  %6910 = vmatpush3.bf16.msra.mxu0 %v7513_v40  ;;  %v6238_v28 = vld [vmem:[%s9788_s18] ss:$0 sm:$0xff] }
 0x458   :  { %v7814_v30 = vpop.eup %7813  ;;  %6911 = vmatprep.subr.bf16.mxu0 %v8609_v1 }
 0x459   :  { %6897 = vmatprep.mubr.msk.bf16.mxu1 %vm986_vm14, %v1075_v18  ;;  %v1070_v33 = vmul.f32 %v7814_v30, %v7798_v47  ;;  %v7816_v35 = vpop.eup %7815  ;;  %v7514_v47 = vld [vmem:[#allocation2 + $0x20] sm:$0xff]  }
 0x45a   :  { %v1071_v39 = vmul.f32 %v7816_v35, %v7800_v48  ;;  %v7515_v48 = vld [vmem:[#allocation2 + $0x18] sm:$0xff]  }
 0x45b   :  { %v1076_v36 = vpack.c.bf16 %v1070_v33, %v1069_v31  ;;  %6912 = vmatpush3.bf16.msra.mxu0 %v7514_v47  ;;  %v8031_v31 = vld [vmem:[%s9786_s14] sm:$0xff] }
 0x45c   :  { %6913 = vmatprep.subr.bf16.mxu0 %v8609_v1 }
 0x45d   :  { %v7818_v38 = vpop.eup %7817  ;;  %6898 = vmatmul.mubr.msk.bf16.vlgmr.msra.gmra.mxu1 %vm986_vm14, %v1076_v36 }
 0x45e   :  { %v1072_v44 = vmul.f32 %v7818_v38, %v7804_v57  ;;  %v7820_v45 = vpop.eup %7819  ;;  %v7517_v57 = vld [vmem:[#allocation2 + $0x8] sm:$0xff]  }
 0x45f   :  { %v1073_v37 = vmul.f32 %v7820_v45, %v9042_v53  ;;  %6914 = vmatpush3.bf16.msra.mxu0 %v7515_v48  ;;  %v7516_v53 = vld [vmem:[#allocation2 + $0x10] sm:$0xff]   ;;  %v7519_v45 = vld [vmem:[#allocation5 + $0x38] sm:$0xff]  }
 0x460   :  { %v1077_v49 = vpack.c.bf16 %v1072_v44, %v1071_v39  ;;  %6915 = vmatprep.subr.bf16.mxu0 %v8609_v1  ;;  %v8032_v39 = vld [vmem:[%s9786_s14 + $0x8] sm:$0xff]  ;;  %6926 = vmatpush3.bf16.msra.mxu1 %v7519_v45 }
 0x461   :  { %v7822_v51 = vpop.eup %7821  ;;  %6927 = vmatprep.subr.bf16.mxu1 %v8609_v1 }
 0x462   :  { %6901 = vmatprep.mubr.msk.bf16.mxu1 %vm986_vm14, %v1077_v49  ;;  %v1074_v41 = vmul.f32 %v7822_v51, %v7806_v63 }
 0x463   :  { %6916 = vmatpush3.bf16.msra.mxu0 %v7516_v53 }
 0x464   :  { %v1078_v56 = vpack.c.bf16 %v1074_v41, %v1073_v37  ;;  %6917 = vmatprep.subr.bf16.mxu0 %v8609_v1  ;;  %v9088_v37 = vsel %vm475_vm7, 1.0, %v8609_v1 }
 0x466   :  { %6902 = vmatmul.mubr.msk.bf16.gmra.mxu1 %vm986_vm14, %v1078_v56 }
 0x467   :  { %6941 = vmatprep.mubr.msk.bf16.mxu1 %vm8610_vm10, %v8609_v1  ;;  %6918 = vmatpush3.bf16.msra.mxu0 %v7517_v57 }
 0x468   :  { %6919 = vmatprep.subr.bf16.mxu0 %v8609_v1 }
 0x46b   :  { %6920 = vmatpush3.bf16.msra.mxu0 %v7518_v58 }
 0x46c   :  { %6945 = vmatprep.subr.bf16.mxu0 %v8609_v1 }
 0x51d   :  { %v6899_v59 = vpop.f32.mrf.mxu1 }
 0x51e   :  { %v1159_v22 = vmul.f32 %v6899_v59, %v8951_v42  ;;  %v7520_v59 = vld [vmem:[#allocation5 + $0x30] sm:$0xff]  }
 0x51f   :  { %v1126_v61 = vpop.f32.mrf.mxu1  ;;  %6928 = vmatpush3.bf16.msra.mxu1 %v7520_v59 }
 0x520   :  { %v1157_v3 = vmul.f32 %v8942_v32, %v1126_v61  ;;  %6929 = vmatprep.subr.bf16.mxu1 %v8609_v1  ;;  %v7521_v61 = vld [vmem:[#allocation5 + $0x28] sm:$0xff]  }
 0x521   :  { %v6900_v62 = vpop.f32.mrf.mxu1 }
 0x522   :  { %v1161_v8 = vadd.f32 %v1159_v22, %v1157_v3  ;;  %v1160_v24 = vmul.f32 %v6900_v62, %v8951_v42  ;;  %v7523_v62 = vld [vmem:[#allocation5 + $0x18] sm:$0xff]   ;;  %v7526_v3 = vld [vmem:[#allocation5] sm:$0xff]   ;;  %v7528_v22 = vld [vmem:[#allocation7 + $0x30] sm:$0xff]  }
 0x523   :  { %v1129_v63 = vpop.f32.mrf.mxu1  ;;  %6930 = vmatpush3.bf16.msra.mxu1 %v7521_v61 }
 0x524   :  { %v1158_v5 = vmul.f32 %v8942_v32, %v1129_v63  ;;  %6931 = vmatprep.subr.bf16.mxu1 %v8609_v1  ;;  %v7524_v63 = vld [vmem:[#allocation5 + $0x10] sm:$0xff]  }
 0x526   :  { %v6903_v2 = vpop.f32.mrf.mxu1  ;;  %v1162_v10 = vadd.f32 %v1160_v24, %v1158_v5  ;;  %v7529_v5 = vld [vmem:[#allocation7 + $0x28] sm:$0xff]  }
 0x527   :  { %v1167_v14 = vmul.f32 %v6903_v2, %v8966_v50  ;;  %6932 = vmatpush3.bf16.msra.mxu1 %v7522_v25  ;;  %v7525_v2 = vld [vmem:[#allocation5 + $0x8] sm:$0xff]  }
 0x528   :  { %v1142_v4 = vpop.f32.mrf.mxu1  ;;  %6933 = vmatprep.subr.bf16.mxu1 %v8609_v1 }
 0x529   :  { %v1163_v6 = vmul.f32 %v8954_v43, %v1142_v4  ;;  %v7527_v4 = vld [vmem:[#allocation7 + $0x38] sm:$0xff]  }
 0x52a   :  { %v6904_v7 = vpop.f32.mrf.mxu1 }
 0x52b   :  { %v1165_v12 = vadd.f32 %v1163_v6, %v1161_v8  ;;  %v1168_v16 = vmul.f32 %v6904_v7, %v8966_v50  ;;  %6934 = vmatpush3.bf16.msra.mxu1 %v7523_v62  ;;  %v7530_v6 = vld [vmem:[#allocation7 + $0x20] sm:$0xff]   ;;  %v7531_v7 = vld [vmem:[#allocation7 + $0x18] sm:$0xff]  }
 0x52c   :  { %v1145_v9 = vpop.f32.mrf.mxu1  ;;  %6935 = vmatprep.subr.bf16.mxu1 %v8609_v1 }
 0x52d   :  { %v1164_v13 = vmul.f32 %v8954_v43, %v1145_v9  ;;  %v1169_v19 = vadd.f32 %v1167_v14, %v1165_v12 }
 0x52f   :  { %v1166_v17 = vadd.f32 %v1164_v13, %v1162_v10  ;;  %6936 = vmatpush3.bf16.msra.mxu1 %v7524_v63 }
 0x530   :  { %6937 = vmatprep.subr.bf16.mxu1 %v8609_v1 }
 0x531   :  { %v1170_v20 = vadd.f32 %v1168_v16, %v1166_v17  ;;  %v6247_v17 = vld [vmem:[%s9789_s22] ss:$0 sm:$0xff] }
 0x533   :  { %v1188_v26 = vpack.c.bf16 %v1170_v20, %v1169_v19  ;;  %6938 = vmatpush3.bf16.msra.mxu1 %v7525_v2  ;;  %v7535_v2 = vld [vmem:[%s9785_s5 + $0x168] ss:$12 sps:$4 sm:$0xff]  }
 0x534   :  { %6939 = vmatprep.subr.bf16.mxu1 %v8609_v1 }
 0x535   :  { %6922 = vmatmul.mubr.bf16.vlgmr.msra.gmra.mxu0 %v1188_v26 }
 0x536   :  { %6961 = vmatprep.mubr.msk.bf16.mxu0 %vm8610_vm10, %v8609_v1  ;;  %6946 = vmatpush3.bf16.msra.mxu0 %v7527_v4  ;;  %v7538_v4 = vld [vmem:[%s9785_s5 + $0x170] ss:$12 sps:$4 sm:$0xff]  }
 0x537   :  { %6940 = vmatpush3.bf16.msra.mxu1 %v7526_v3  ;;  %6947 = vmatprep.subr.bf16.mxu0 %v8609_v1  ;;  %v7537_v3 = vld [vmem:[%s9785_s5 + $0x16c] ss:$12 sps:$4 sm:$0xff]  }
 0x538   :  { %1780 = vmatprep.subr.bf16.mxu1 %v7537_v3 }
 0x53a   :  { %6948 = vmatpush3.bf16.msra.mxu0 %v7528_v22 }
 0x53b   :  { %6949 = vmatprep.subr.bf16.mxu0 %v8609_v1 }
 0x53e   :  { %6950 = vmatpush3.bf16.msra.mxu0 %v7529_v5 }
 0x53f   :  { %6951 = vmatprep.subr.bf16.mxu0 %v8609_v1 }
 0x542   :  { %6952 = vmatpush3.bf16.msra.mxu0 %v7530_v6 }
 0x543   :  { %6953 = vmatprep.subr.bf16.mxu0 %v8609_v1 }
 0x546   :  { %6954 = vmatpush3.bf16.msra.mxu0 %v7531_v7 }
 0x547   :  { %6955 = vmatprep.subr.bf16.mxu0 %v8609_v1 }
 0x5f5   :  { %v1277_v29 = vpop.f32.mrf.mxu0 }
 0x5f6   :  { %v1278_v18 = vadd.f32 %v6238_v28, %v1277_v29 }
 0x5f7   :  { %v6923_v30 = vpop.f32.mrf.mxu0 }
 0x5f8   :  { %v1284_v33 = vadd.f32 %v8031_v31, %v1278_v18 }
 0x5f9   :  { %v1280_v35 = vpop.f32.mrf.mxu0 }
 0x5fa   :  { %v1281_v36 = vadd.f32 %v6238_v28, %v1280_v35  ;;  %1288 = vadd.xlane.f32.xlu0 %v1284_v33  ;;  %v6248_v28 = vld [vmem:[%s9790_s6] ss:$0 sm:$0xff]  ;;  %v7533_v35 = vld [vmem:[#allocation7 + $0x8] sm:$0xff]  }
 0x5fb   :  { %v6924_v38 = vpop.f32.mrf.mxu0 }
 0x5fc   :  { %v1285_v44 = vadd.f32 %v8032_v39, %v1281_v36  ;;  %v7534_v36 = vld [vmem:[#allocation7] sm:$0xff]  }
 0x5fd   :  { %v6249_v38 = vld [vmem:[%s9791_s10] ss:$0 sm:$0xff] }
 0x5fe   :  { %1290 = vadd.xlane.f32.xlu1 %v1285_v44 }
 0x683   :  { %v1289_v49 = vpop.xlane.xlu0 %1288 }
 0x684   :  { %v1292_v51 = vmul.f32 0.03125, %v1289_v49 }
 0x686   :  { %v1294_v41 = vsub.f32 %v1284_v33, %v1292_v51  ;;  %v7532_v33 = vld [vmem:[#allocation7 + $0x10] sm:$0xff]  }
 0x687   :  { %v1291_v56 = vpop.xlane.xlu1 %1290  ;;  %6956 = vmatpush3.bf16.msra.mxu0 %v7532_v33  ;;  %v7554_v33 = vld [vmem:[%s9785_s5 + $0x110] ss:$12 sps:$4 sm:$0xff]  }
 0x688   :  { %v1293_v40 = vmul.f32 0.03125, %v1291_v56  ;;  %v1296_v47 = vmul.f32 %v9088_v37, %v1294_v41  ;;  %6957 = vmatprep.subr.bf16.mxu0 %v8609_v1 }
 0x68a   :  { %v1295_v48 = vsub.f32 %v1285_v44, %v1293_v40  ;;  %v1298_v53 = vmul.f32 %v1296_v47, %v1296_v47 }
 0x68b   :  { %6958 = vmatpush3.bf16.msra.mxu0 %v7533_v35  ;;  %v7557_v35 = vld [vmem:[%s9785_s5 + $0xf4] ss:$12 sps:$4 sm:$0xff]  }
 0x68c   :  { %1300 = vadd.xlane.f32.xlu0 %v1298_v53  ;;  %v1297_v57 = vmul.f32 %v9088_v37, %v1295_v48  ;;  %6959 = vmatprep.subr.bf16.mxu0 %v8609_v1  ;;  %v6258_v48 = vld [vmem:[#allocation8] ss:$0 sm:$0xff] }
 0x68e   :  { %v1299_v58 = vmul.f32 %v1297_v57, %v1297_v57 }
 0x68f   :  { %6960 = vmatpush3.bf16.msra.mxu0 %v7534_v36  ;;  %v7555_v36 = vld [vmem:[%s9785_s5 + $0xf0] ss:$12 sps:$4 sm:$0xff]  }
 0x690   :  { %1302 = vadd.xlane.f32.xlu1 %v1299_v58  ;;  %6965 = vmatprep.subr.bf16.mxu0 %v8609_v1 }
 0x715   :  { %v1301_v8 = vpop.xlane.xlu0 %1300 }
 0x716   :  { %v1304_v24 = vmul.f32 0.03125, %v1301_v8 }
 0x718   :  { %v1306_v9 = vadd.f32 1e-05, %v1304_v24 }
 0x719   :  { %v1303_v10 = vpop.xlane.xlu1 %1302 }
 0x71a   :  { %7823 = vrsqrt.f32 %v1306_v9  ;;  %v1305_v12 = vmul.f32 0.03125, %v1303_v10 }
 0x71c   :  { %v1307_v13 = vadd.f32 1e-05, %v1305_v12 }
 0x71e   :  { %7825 = vrsqrt.f32 %v1307_v13 }
 0x727   :  { %v7824_v14 = vpop.eup %7823 }
 0x728   :  { %v1310_v16 = vmul.f32 %v7824_v14, %v1296_v47  ;;  %v7541_v14 = vld [vmem:[%s9785_s5 + $0x154] ss:$12 sps:$4 sm:$0xff]  }
 0x72a   :  { %v1318_v26 = vmul.f32 %v6247_v17, %v1310_v16  ;;  %v7539_v16 = vld [vmem:[%s9785_s5 + $0x150] ss:$12 sps:$4 sm:$0xff]  }
 0x72b   :  { %v7826_v19 = vpop.eup %7825 }
 0x72c   :  { %v1311_v20 = vmul.f32 %v7826_v19, %v1297_v57  ;;  %v1326_v18 = vadd.f32 %v6248_v28, %v1318_v26  ;;  %v7545_v19 = vld [vmem:[%s9785_s5 + $0x13c] ss:$12 sps:$4 sm:$0xff]   ;;  %v7546_v26 = vld [vmem:[%s9785_s5 + $0x140] ss:$12 sps:$4 sm:$0xff]  }
 0x72e   :  { %v1319_v29 = vmul.f32 %v6247_v17, %v1311_v20  ;;  %v7542_v17 = vld [vmem:[%s9785_s5 + $0x158] ss:$12 sps:$4 sm:$0xff]  }
 0x72f   :  { %v7543_v20 = vld [vmem:[%s9785_s5 + $0x138] ss:$12 sps:$4 sm:$0xff]  }
 0x730   :  { %v1327_v30 = vadd.f32 %v6248_v28, %v1319_v29  ;;  %v7547_v28 = vld [vmem:[%s9785_s5 + $0x120] ss:$12 sps:$4 sm:$0xff]   ;;  %v7549_v29 = vld [vmem:[%s9785_s5 + $0x124] ss:$12 sps:$4 sm:$0xff]  }
 0x732   :  { %v1345_v31 = vpack.c.bf16 %v1327_v30, %v1326_v18 }
 0x734   :  { %6942 = vmatmul.mubr.bf16.vlgmr.msra.gmra.mxu1 %v1345_v31  ;;  %v7551_v31 = vld [vmem:[%s9785_s5 + $0x108] ss:$12 sps:$4 sm:$0xff]  }
 0x735   :  { %1812 = vmatprep.mubr.bf16.mxu1 %v8608_v0  ;;  %1781 = vmatpush1.bf16.msra.mxu1 %v7535_v2  ;;  %v6268_v2 = vld [vmem:[#allocation11] ss:$0 sm:$0xff] }
 0x736   :  { %1782 = vmatprep.subr.bf16.mxu1 %v7541_v14 }
 0x739   :  { %1783 = vmatpush1.bf16.msra.mxu1 %v7539_v16 }
 0x73a   :  { %1784 = vmatprep.subr.bf16.mxu1 %v7545_v19 }
 0x73d   :  { %1785 = vmatpush1.bf16.msra.mxu1 %v7543_v20 }
 0x73e   :  { %1786 = vmatprep.subr.bf16.mxu1 %v7549_v29 }
 0x741   :  { %1787 = vmatpush1.bf16.msra.mxu1 %v7547_v28 }
 0x7f4   :  { %v1434_v39 = vpop.f32.mrf.mxu1 }
 0x7f5   :  { %v1435_v45 = vadd.f32 %v6249_v38, %v1434_v39  ;;  %v7561_v39 = vld [vmem:[%s9785_s5 + $0xdc] ss:$12 sps:$4 sm:$0xff]  }
 0x7f6   :  { %v6943_v44 = vpop.f32.mrf.mxu1 }
 0x7f7   :  { %v1441_v56 = vmax.f32 %v1435_v45, 0.0  ;;  %v7559_v44 = vld [vmem:[%s9785_s5 + $0xd8] ss:$12 sps:$4 sm:$0xff]   ;;  %v7562_v45 = vld [vmem:[%s9785_s5 + $0xe0] ss:$12 sps:$4 sm:$0xff]  }
 0x7f8   :  { %v1437_v49 = vpop.f32.mrf.mxu1 }
 0x7f9   :  { %v1438_v51 = vadd.f32 %v6249_v38, %v1437_v49  ;;  %v7558_v38 = vld [vmem:[%s9785_s5 + $0xf8] ss:$12 sps:$4 sm:$0xff]  }
 0x7fa   :  { %v6944_v41 = vpop.f32.mrf.mxu1  ;;  %v7565_v49 = vld [vmem:[%s9785_s5 + $0xc4] ss:$12 sps:$4 sm:$0xff]  }
 0x7fb   :  { %v1442_v40 = vmax.f32 %v1438_v51, 0.0  ;;  %v7563_v51 = vld [vmem:[%s9785_s5 + $0xc0] ss:$12 sps:$4 sm:$0xff]   ;;  %v7566_v41 = vld [vmem:[%s9785_s5 + $0xc8] ss:$12 sps:$4 sm:$0xff]  }
 0x7fd   :  { %v1460_v47 = vpack.c.bf16 %v1442_v40, %v1441_v56 }
 0x7ff   :  { %6962 = vmatmul.mubr.bf16.vlgmr.msra.gmra.mxu0 %v1460_v47 }
 0x800   :  { %6981 = vmatprep.mubr.msk.bf16.mxu0 %vm8610_vm10, %v8609_v1  ;;  %6966 = vmatpush3.bf16.msra.mxu0 %v7538_v4 }
 0x801   :  { %6967 = vmatprep.subr.bf16.mxu0 %v8609_v1 }
 0x804   :  { %6968 = vmatpush3.bf16.msra.mxu0 %v7542_v17 }
 0x805   :  { %6969 = vmatprep.subr.bf16.mxu0 %v8609_v1 }
 0x808   :  { %6970 = vmatpush3.bf16.msra.mxu0 %v7546_v26 }
 0x809   :  { %6971 = vmatprep.subr.bf16.mxu0 %v8609_v1 }
 0x8bf   :  { %v1549_v53 = vpop.f32.mrf.mxu0 }
 0x8c0   :  { %v1550_v57 = vadd.f32 %v6258_v48, %v1549_v53 }
 0x8c1   :  { %v6963_v58 = vpop.f32.mrf.mxu0 }
 0x8c2   :  { %v1556_v59 = vadd.f32 %v1550_v57, %v1326_v18  ;;  %v7550_v18 = vld [vmem:[%s9785_s5 + $0x128] ss:$12 sps:$4 sm:$0xff]  }
 0x8c3   :  { %v1552_v61 = vpop.f32.mrf.mxu0  ;;  %6972 = vmatpush3.bf16.msra.mxu0 %v7550_v18 }
 0x8c4   :  { %v1553_v25 = vadd.f32 %v6258_v48, %v1552_v61  ;;  %1560 = vadd.xlane.f32.xlu0 %v1556_v59  ;;  %6973 = vmatprep.subr.bf16.mxu0 %v8609_v1  ;;  %v6267_v61 = vld [vmem:[#allocation10] ss:$0 sm:$0xff] }
 0x8c5   :  { %v6964_v62 = vpop.f32.mrf.mxu0 }
 0x8c6   :  { %v1557_v63 = vadd.f32 %v1553_v25, %v1327_v30  ;;  %v7553_v30 = vld [vmem:[%s9785_s5 + $0x10c] ss:$12 sps:$4 sm:$0xff]  }
 0x8c7   :  { %1788 = vmatprep.subr.bf16.mxu1 %v7553_v30  ;;  %6974 = vmatpush3.bf16.msra.mxu0 %v7554_v33 }
 0x8c8   :  { %1562 = vadd.xlane.f32.xlu1 %v1557_v63  ;;  %1789 = vmatpush1.bf16.msra.mxu1 %v7551_v31 }
 0x8c9   :  { %1790 = vmatprep.subr.bf16.mxu1 %v7557_v35  ;;  %6975 = vmatprep.subr.bf16.mxu0 %v8609_v1 }
 0x8cb   :  { %6976 = vmatpush3.bf16.msra.mxu0 %v7558_v38 }
 0x8cc   :  { %1791 = vmatpush1.bf16.msra.mxu1 %v7555_v36  ;;  %6977 = vmatprep.subr.bf16.mxu0 %v8609_v1 }
 0x8cd   :  { %1792 = vmatprep.subr.bf16.mxu1 %v7561_v39 }
 0x8cf   :  { %6978 = vmatpush3.bf16.msra.mxu0 %v7562_v45 }
 0x8d0   :  { %1793 = vmatpush1.bf16.msra.mxu1 %v7559_v44  ;;  %6979 = vmatprep.subr.bf16.mxu0 %v8609_v1 }
 0x8d1   :  { %1794 = vmatprep.subr.bf16.mxu1 %v7565_v49 }
 0x8d3   :  { %6980 = vmatpush3.bf16.msra.mxu0 %v7566_v41 }
 0x8d4   :  { %1795 = vmatpush1.bf16.msra.mxu1 %v7563_v51  ;;  %7025 = vmatprep.subr.bf16.mxu0 %v8609_v1 }
 0x94d   :  { %v1561_v22 = vpop.xlane.xlu0 %1560 }
 0x94e   :  { %v1564_v5 = vmul.f32 0.03125, %v1561_v22 }
 0x950   :  { %v1566_v6 = vsub.f32 %v1556_v59, %v1564_v5 }
 0x951   :  { %v1563_v7 = vpop.xlane.xlu1 %1562 }
 0x952   :  { %v1565_v8 = vmul.f32 0.03125, %v1563_v7  ;;  %v9117_v24 = vmul.f32 %v9088_v37, %v1566_v6  ;;  %v6301_v6 = vld [vmem:[%s9787_s16 + $0x3] sm:$0x7] }
 0x953   :  { %v1640_v7 = vrot.slane %v6301_v6, %v8926_v23  ;;  %v1648_v17 = vrot.slane %v6301_v6, %v9045_v54 }
 0x954   :  { %v1567_v9 = vsub.f32 %v1557_v63, %v1565_v8  ;;  %v1570_v10 = vmul.f32 %v9117_v24, %v9117_v24 }
 0x956   :  { %1572 = vadd.xlane.f32.xlu0 %v1570_v10  ;;  %v9122_v12 = vmul.f32 %v9088_v37, %v1567_v9  ;;  %v1644_v9 = vrot.slane %v6301_v6, %v8936_v27 }
 0x958   :  { %v1571_v13 = vmul.f32 %v9122_v12, %v9122_v12 }
 0x95a   :  { %1574 = vadd.xlane.f32.xlu1 %v1571_v13 }
 0x9df   :  { %v1573_v56 = vpop.xlane.xlu0 %1572 }
 0x9e0   :  { %v1576_v40 = vmul.f32 0.03125, %v1573_v56 }
 0x9e2   :  { %v1578_v47 = vadd.f32 1e-05, %v1576_v40 }
 0x9e3   :  { %v1575_v48 = vpop.xlane.xlu1 %1574 }
 0x9e4   :  { %7827 = vrsqrt.f32 %v1578_v47  ;;  %v1577_v53 = vmul.f32 0.03125, %v1575_v48 }
 0x9e6   :  { %v1579_v57 = vadd.f32 1e-05, %v1577_v53 }
 0x9e8   :  { %7829 = vrsqrt.f32 %v1579_v57 }
 0x9f1   :  { %v7828_v58 = vpop.eup %7827 }
 0x9f2   :  { %v1582_v59 = vmul.f32 %v7828_v58, %v9117_v24 }
 0x9f4   :  { %v1590_v63 = vmul.f32 %v6267_v61, %v1582_v59 }
 0x9f5   :  { %v7830_v25 = vpop.eup %7829 }
 0x9f6   :  { %v1583_v62 = vmul.f32 %v7830_v25, %v9122_v12  ;;  %v9156_v4 = vadd.f32 %v6268_v2, %v1590_v63 }
 0x9f8   :  { %v1591_v3 = vmul.f32 %v6267_v61, %v1583_v62 }
 0x9fa   :  { %v9158_v22 = vadd.f32 %v6268_v2, %v1591_v3 }
 0x9fc   :  { %v1635_v5 = vpack.c.bf16 %v9158_v22, %v9156_v4 }
 0x9fe   :  { %1813 = vmatmul.mubr.bf16.vlgmr.msra.gmra.mxu1 %v1635_v5  ;;  %6982 = vmatmul.mubr.bf16.vlgmr.msra.gmra.mxu0 %v1635_v5 }
 0x9ff   :  { %7041 = vmatprep.mubr.msk.bf16.mxu0 %vm8610_vm10, %v8609_v1 }
 0xabe   :  { %v1814_v8 = vpop.f32.mrf.mxu1  ;;  %v1857_v24 = vpop.f32.mrf.mxu0 }
 0xabf   :  { %v1815_v13 = vadd.f32 %v1814_v8, %v1640_v7  ;;  %v1858_v33 = vadd.f32 %v1857_v24, %v1648_v17 }
 0xac0   :  { %v1816_v10 = vpop.f32.mrf.mxu1  ;;  %v6983_v12 = vpop.f32.mrf.mxu0 }
 0xac1   :  { %v1817_v20 = vadd.f32 %v1816_v10, %v1644_v9  ;;  %v1864_v30 = vmul.f32 %v8942_v32, %v1815_v13  ;;  %v1866_v45 = vmul.f32 %v8951_v42, %v1815_v13  ;;  %v1868_v49 = vmul.f32 %v8954_v43, %v1815_v13 }
 0xac2   :  { %v1818_v14 = vpop.f32.mrf.mxu1  ;;  %v1860_v16 = vpop.f32.mrf.mxu0  ;;  %v1870_v40 = vmul.f32 %v8966_v50, %v1815_v13 }
 0xac3   :  { %v1819_v19 = vadd.f32 %v1818_v14, %v1640_v7  ;;  %v1861_v29 = vadd.f32 %v1860_v16, %v1648_v17 }
 0xac4   :  { %v1820_v26 = vpop.f32.mrf.mxu1  ;;  %v6984_v28 = vpop.f32.mrf.mxu0 }
 0xac5   :  { %v1821_v18 = vadd.f32 %v1820_v26, %v1644_v9  ;;  %v1865_v31 = vmul.f32 %v8942_v32, %v1819_v19  ;;  %v2050_v38 = vpack.c.bf16 %v1861_v29, %v1858_v33  ;;  %v1867_v39 = vmul.f32 %v8951_v42, %v1819_v19 }
 0xac6   :  { %v1869_v44 = vmul.f32 %v8954_v43, %v1819_v19  ;;  %v1871_v56 = vmul.f32 %v8966_v50, %v1819_v19 }
 0xac7   :  { %v1876_v35 = vpack.c.bf16 %v1821_v18, %v1817_v20  ;;  %v1872_v36 = vpack.c.bf16 %v1865_v31, %v1864_v30  ;;  %v1873_v51 = vpack.c.bf16 %v1867_v39, %v1866_v45 }
 0xac8   :  { %v1874_v41 = vpack.c.bf16 %v1869_v44, %v1868_v49  ;;  %v1875_v47 = vpack.c.bf16 %v1871_v56, %v1870_v40 }
 0xac9   :  { %6985 = vmatprep.subr.bf16.mxu1 %v1876_v35  ;;  %6987 = vmatprep.mubr.bf16.mxu1 %v1872_v36 }
 0xaca   :  { %6986 = vmatpush3.bf16.xpose.msra.mxu1 %v1876_v35 }
 0xacb   :  { %6995 = vmatprep.subr.bf16.mxu1 %v2050_v38 }
 0xad1   :  { %6988 = vmatmul.mubr.bf16.vlgmr.msra.gmra.mxu1 %v1873_v51 }
 0xad2   :  { %6991 = vmatprep.mubr.bf16.mxu1 %v1874_v41  ;;  %6996 = vmatpush3.bf16.msra.mxu1 %v2050_v38 }
 0xad3   :  { %7005 = vmatprep.subr.bf16.mxu1 %v8609_v1 }
 0xad9   :  { %6992 = vmatmul.mubr.bf16.gmra.mxu1 %v1875_v47 }
 0xb91   :  { %v6989_v48 = vpop.f32.mrf.mxu1 }
 0xb92   :  { %v1944_v57 = vmul.f32 0.35355338, %v6989_v48 }
 0xb93   :  { %v1911_v53 = vpop.f32.mrf.mxu1 }
 0xb94   :  { %v1942_v58 = vmul.f32 0.35355338, %v1911_v53  ;;  %v1952_v3 = vadd.f32 %v1944_v57, %v8996_v11 }
 0xb95   :  { %v6990_v59 = vpop.f32.mrf.mxu1 }
 0xb96   :  { %v1950_v61 = vadd.f32 %v1942_v58, %v8999_v15  ;;  %v1945_v25 = vmul.f32 0.35355338, %v6990_v59  ;;  %v1964_v10 = vsel %vm986_vm14, %v1952_v3, -inf }
 0xb97   :  { %v1914_v62 = vpop.f32.mrf.mxu1 }
 0xb98   :  { %v1943_v63 = vmul.f32 0.35355338, %v1914_v62  ;;  %v1958_v2 = vsel %vm986_vm14, %v1950_v61, -inf  ;;  %v1953_v8 = vadd.f32 %v1945_v25, %v9003_v21 }
 0xb99   :  { %1959 = vmax.xlane.f32.xlu0 %v1958_v2  ;;  %v6993_v5 = vpop.f32.mrf.mxu1 }
 0xb9a   :  { %v1951_v6 = vadd.f32 %v1943_v63, %v9008_v34  ;;  %v1948_v24 = vmul.f32 0.35355338, %v6993_v5  ;;  %v1967_v17 = vsel %vm986_vm14, %v1953_v8, -inf }
 0xb9b   :  { %v1927_v7 = vpop.f32.mrf.mxu1 }
 0xb9c   :  { %v1946_v9 = vmul.f32 0.35355338, %v1927_v7  ;;  %v1961_v12 = vsel %vm986_vm14, %v1951_v6, -inf  ;;  %v1956_v28 = vadd.f32 %v1948_v24, %v9017_v52 }
 0xb9d   :  { %1965 = vmax.xlane.f32.xlu0 %v1964_v10  ;;  %1962 = vmax.xlane.f32.xlu1 %v1961_v12  ;;  %v6994_v13 = vpop.f32.mrf.mxu1 }
 0xb9e   :  { %v1954_v14 = vadd.f32 %v1946_v9, %v9014_v46  ;;  %v1949_v19 = vmul.f32 0.35355338, %v6994_v13  ;;  %v1976_v18 = vsel %vm986_vm14, %v1956_v28, -inf }
 0xb9f   :  { %v1930_v16 = vpop.f32.mrf.mxu1 }
 0xba0   :  { %v1947_v20 = vmul.f32 0.35355338, %v1930_v16  ;;  %v1970_v26 = vsel %vm986_vm14, %v1954_v14, -inf  ;;  %v1957_v31 = vadd.f32 %v1949_v19, %v9024_v60 }
 0xba1   :  { %1968 = vmax.xlane.f32.xlu1 %v1967_v17  ;;  %1971 = vmax.xlane.f32.xlu0 %v1970_v26 }
 0xba2   :  { %v1955_v29 = vadd.f32 %v1947_v20, %v9020_v55  ;;  %v1979_v33 = vsel %vm986_vm14, %v1957_v31, -inf }
 0xba4   :  { %v1973_v30 = vsel %vm986_vm14, %v1955_v29, -inf }
 0xba5   :  { %1977 = vmax.xlane.f32.xlu0 %v1976_v18  ;;  %1974 = vmax.xlane.f32.xlu1 %v1973_v30 }
 0xba9   :  { %1980 = vmax.xlane.f32.xlu1 %v1979_v33 }
 0xc22   :  { %v1960_v35 = vpop.xlane.xlu0 %1959 }
 0xc23   :  { %v1982_v36 = vsub.f32 %v1950_v61, %v1960_v35 }
 0xc25   :  { %v1990_v38 = vmul.f32 1.442695, %v1982_v36 }
 0xc26   :  { %v1966_v39 = vpop.xlane.xlu0 %1965  ;;  %v1963_v44 = vpop.xlane.xlu1 %1962 }
 0xc27   :  { %7831 = vpow2.f32 %v1990_v38  ;;  %v1984_v45 = vsub.f32 %v1952_v3, %v1966_v39  ;;  %v1983_v49 = vsub.f32 %v1951_v6, %v1963_v44 }
 0xc29   :  { %v1994_v51 = vmul.f32 1.442695, %v1984_v45  ;;  %v1992_v41 = vmul.f32 1.442695, %v1983_v49 }
 0xc2a   :  { %v1969_v56 = vpop.xlane.xlu1 %1968  ;;  %v1972_v40 = vpop.xlane.xlu0 %1971 }
 0xc2b   :  { %7833 = vpow2.f32 %v1994_v51  ;;  %v1985_v47 = vsub.f32 %v1953_v8, %v1969_v56  ;;  %v1986_v48 = vsub.f32 %v1954_v14, %v1972_v40 }
 0xc2c   :  { %7835 = vpow2.f32 %v1992_v41 }
 0xc2d   :  { %v1996_v53 = vmul.f32 1.442695, %v1985_v47  ;;  %v1998_v57 = vmul.f32 1.442695, %v1986_v48 }
 0xc2e   :  { %v1978_v58 = vpop.xlane.xlu0 %1977  ;;  %v1975_v59 = vpop.xlane.xlu1 %1974 }
 0xc2f   :  { %7837 = vpow2.f32 %v1996_v53  ;;  %v1988_v61 = vsub.f32 %v1956_v28, %v1978_v58  ;;  %v1987_v25 = vsub.f32 %v1955_v29, %v1975_v59 }
 0xc30   :  { %7839 = vpow2.f32 %v1998_v57  ;;  %v7567_v57 = vld [vmem:[#allocation2 + $0x78] sm:$0xff]  }
 0xc31   :  { %v2002_v62 = vmul.f32 1.442695, %v1988_v61  ;;  %v2000_v63 = vmul.f32 1.442695, %v1987_v25 }
 0xc32   :  { %v1981_v2 = vpop.xlane.xlu1 %1980 }
 0xc33   :  { %7841 = vpow2.f32 %v2002_v62  ;;  %v1989_v3 = vsub.f32 %v1957_v31, %v1981_v2 }
 0xc34   :  { %v7832_v5 = vpop.eup %7831  ;;  %7843 = vpow2.f32 %v2000_v63  ;;  %v7568_v63 = vld [vmem:[#allocation2 + $0x70] sm:$0xff]  }
 0xc35   :  { %v2004_v6 = vmul.f32 1.442695, %v1989_v3  ;;  %v2006_v7 = vsel %vm986_vm14, %v7832_v5, 0.0 }
 0xc36   :  { %2007 = vadd.xlane.f32.xlu0 %v2006_v7 }
 0xc37   :  { %7845 = vpow2.f32 %v2004_v6 }
 0xc38   :  { %v7834_v8 = vpop.eup %7833 }
 0xc39   :  { %v7836_v24 = vpop.eup %7835  ;;  %v2012_v9 = vsel %vm986_vm14, %v7834_v8, 0.0 }
 0xc3a   :  { %2013 = vadd.xlane.f32.xlu0 %v2012_v9  ;;  %v2009_v10 = vsel %vm986_vm14, %v7836_v24, 0.0  ;;  %v7571_v9 = vld [vmem:[#allocation2 + $0x58] sm:$0xff]  }
 0xc3b   :  { %2010 = vadd.xlane.f32.xlu1 %v2009_v10  ;;  %v7572_v10 = vld [vmem:[#allocation2 + $0x50] sm:$0xff]  }
 0xc3c   :  { %v7838_v12 = vpop.eup %7837 }
 0xc3d   :  { %v7840_v13 = vpop.eup %7839  ;;  %v2015_v14 = vsel %vm986_vm14, %v7838_v12, 0.0 }
 0xc3e   :  { %v2018_v16 = vsel %vm986_vm14, %v7840_v13, 0.0 }
 0xc3f   :  { %2019 = vadd.xlane.f32.xlu0 %v2018_v16  ;;  %2016 = vadd.xlane.f32.xlu1 %v2015_v14 }
 0xc40   :  { %v7842_v17 = vpop.eup %7841 }
 0xc41   :  { %v7844_v19 = vpop.eup %7843  ;;  %v2024_v20 = vsel %vm986_vm14, %v7842_v17, 0.0 }
 0xc42   :  { %v2021_v26 = vsel %vm986_vm14, %v7844_v19, 0.0 }
 0xc43   :  { %2025 = vadd.xlane.f32.xlu0 %v2024_v20  ;;  %2022 = vadd.xlane.f32.xlu1 %v2021_v26 }
 0xc44   :  { %v7846_v28 = vpop.eup %7845 }
 0xc45   :  { %v2027_v29 = vsel %vm986_vm14, %v7846_v28, 0.0 }
 0xc47   :  { %2028 = vadd.xlane.f32.xlu1 %v2027_v29 }
 0xcbf   :  { %v2008_v18 = vpop.xlane.xlu0 %2007 }
 0xcc0   :  { %7847 = vrcp.f32 %v2008_v18 }
 0xcc3   :  { %v2014_v30 = vpop.xlane.xlu0 %2013 }
 0xcc4   :  { %v2011_v31 = vpop.xlane.xlu1 %2010 }
 0xcc5   :  { %7849 = vrcp.f32 %v2011_v31 }
 0xcc6   :  { %7851 = vrcp.f32 %v2014_v30 }
 0xcc8   :  { %v2020_v33 = vpop.xlane.xlu0 %2019  ;;  %v2017_v35 = vpop.xlane.xlu1 %2016 }
 0xcc9   :  { %7853 = vrcp.f32 %v2017_v35 }
 0xcca   :  { %7855 = vrcp.f32 %v2020_v33 }
 0xccc   :  { %v2026_v36 = vpop.xlane.xlu0 %2025  ;;  %v2023_v38 = vpop.xlane.xlu1 %2022 }
 0xccd   :  { %7857 = vrcp.f32 %v2023_v38  ;;  %v7848_v39 = vpop.eup %7847 }
 0xcce   :  { %7859 = vrcp.f32 %v2026_v36  ;;  %v2038_v49 = vmul.f32 %v7848_v39, %v7832_v5 }
 0xcd0   :  { %v2029_v44 = vpop.xlane.xlu1 %2028 }
 0xcd1   :  { %7861 = vrcp.f32 %v2029_v44 }
 0xcd2   :  { %v7850_v45 = vpop.eup %7849 }
 0xcd3   :  { %v2039_v51 = vmul.f32 %v7850_v45, %v7836_v24  ;;  %v7852_v41 = vpop.eup %7851  ;;  %v7570_v24 = vld [vmem:[#allocation2 + $0x60] sm:$0xff]  }
 0xcd4   :  { %v2040_v47 = vmul.f32 %v7852_v41, %v7834_v8  ;;  %v7569_v8 = vld [vmem:[#allocation2 + $0x68] sm:$0xff]  }
 0xcd5   :  { %v2046_v56 = vpack.c.bf16 %v2039_v51, %v2038_v49 }
 0xcd6   :  { %v7854_v40 = vpop.eup %7853 }
 0xcd7   :  { %6997 = vmatprep.mubr.msk.bf16.mxu1 %vm986_vm14, %v2046_v56  ;;  %v2041_v48 = vmul.f32 %v7854_v40, %v7838_v12  ;;  %v7856_v53 = vpop.eup %7855  ;;  %v7573_v12 = vld [vmem:[#allocation2 + $0x48] sm:$0xff]  }
 0xcd8   :  { %v2042_v25 = vmul.f32 %v7856_v53, %v7840_v13  ;;  %v7574_v13 = vld [vmem:[#allocation2 + $0x40] sm:$0xff]  }
 0xcd9   :  { %v2047_v58 = vpack.c.bf16 %v2041_v48, %v2040_v47  ;;  %v6331_v47 = vld [vmem:[%s9788_s18 + $0x1] ss:$0 sm:$0xff] }
 0xcda   :  { %v7858_v59 = vpop.eup %7857 }
 0xcdb   :  { %v7860_v61 = vpop.eup %7859  ;;  %6998 = vmatmul.mubr.msk.bf16.vlgmr.msra.gmra.mxu1 %vm986_vm14, %v2047_v58  ;;  %v2043_v62 = vmul.f32 %v7858_v59, %v7844_v19 }
 0xcdc   :  { %7006 = vmatpush3.bf16.msra.mxu1 %v7567_v57  ;;  %v2044_v5 = vmul.f32 %v7860_v61, %v7842_v17 }
 0xcdd   :  { %v2048_v3 = vpack.c.bf16 %v2043_v62, %v2042_v25  ;;  %7007 = vmatprep.subr.bf16.mxu1 %v8609_v1 }
 0xcde   :  { %v7862_v2 = vpop.eup %7861 }
 0xcdf   :  { %v2045_v6 = vmul.f32 %v7862_v2, %v7846_v28  ;;  %7001 = vmatprep.mubr.msk.bf16.mxu1 %vm986_vm14, %v2048_v3 }
 0xce0   :  { %7008 = vmatpush3.bf16.msra.mxu1 %v7568_v63  ;;  %v7575_v63 = vld [vmem:[#allocation5 + $0x78] sm:$0xff]  }
 0xce1   :  { %v2049_v7 = vpack.c.bf16 %v2045_v6, %v2044_v5  ;;  %7009 = vmatprep.subr.bf16.mxu1 %v8609_v1  ;;  %7026 = vmatpush3.bf16.msra.mxu0 %v7575_v63  ;;  %v7594_v63 = vld [vmem:[%s9792_s11 + $0x64] ss:$12 sps:$4 sm:$0xff]  }
 0xce2   :  { %7027 = vmatprep.subr.bf16.mxu0 %v8609_v1 }
 0xce3   :  { %7002 = vmatmul.mubr.msk.bf16.gmra.mxu1 %vm986_vm14, %v2049_v7 }
 0xce4   :  { %7021 = vmatprep.mubr.msk.bf16.mxu1 %vm8610_vm10, %v8609_v1  ;;  %7010 = vmatpush3.bf16.msra.mxu1 %v7569_v8 }
 0xce5   :  { %7011 = vmatprep.subr.bf16.mxu1 %v8609_v1 }
 0xce8   :  { %7012 = vmatpush3.bf16.msra.mxu1 %v7570_v24 }
 0xce9   :  { %7013 = vmatprep.subr.bf16.mxu1 %v8609_v1 }
 0xcec   :  { %7014 = vmatpush3.bf16.msra.mxu1 %v7571_v9 }
 0xced   :  { %7015 = vmatprep.subr.bf16.mxu1 %v8609_v1 }
 0xcf0   :  { %7016 = vmatpush3.bf16.msra.mxu1 %v7572_v10 }
 0xcf1   :  { %7017 = vmatprep.subr.bf16.mxu1 %v8609_v1 }
 0xcf4   :  { %7018 = vmatpush3.bf16.msra.mxu1 %v7573_v12  ;;  %v7577_v12 = vld [vmem:[#allocation5 + $0x68] sm:$0xff]  }
 0xcf5   :  { %7019 = vmatprep.subr.bf16.mxu1 %v8609_v1 }
 0xcf8   :  { %7020 = vmatpush3.bf16.msra.mxu1 %v7574_v13  ;;  %v7578_v13 = vld [vmem:[#allocation5 + $0x60] sm:$0xff]  }
 0xcf9   :  { %7045 = vmatprep.subr.bf16.mxu1 %v8609_v1 }
 0xd9b   :  { %v6999_v14 = vpop.f32.mrf.mxu1 }
 0xd9c   :  { %v2130_v29 = vmul.f32 %v6999_v14, %v8951_v42  ;;  %v7579_v14 = vld [vmem:[#allocation5 + $0x58] sm:$0xff]  }
 0xd9d   :  { %v2097_v16 = vpop.f32.mrf.mxu1 }
 0xd9e   :  { %v2128_v26 = vmul.f32 %v8942_v32, %v2097_v16  ;;  %v7580_v16 = vld [vmem:[#allocation5 + $0x50] sm:$0xff]  }
 0xd9f   :  { %v7000_v17 = vpop.f32.mrf.mxu1 }
 0xda0   :  { %v2132_v33 = vadd.f32 %v2130_v29, %v2128_v26  ;;  %v2131_v35 = vmul.f32 %v7000_v17, %v8951_v42  ;;  %v7581_v17 = vld [vmem:[#allocation5 + $0x48] sm:$0xff]   ;;  %v7607_v26 = vld [vmem:[#allocation7 + $0x78] sm:$0xff]  }
 0xda1   :  { %v2100_v19 = vpop.f32.mrf.mxu1  ;;  %v7609_v29 = vld [vmem:[#allocation7 + $0x68] sm:$0xff]  }
 0xda2   :  { %v2129_v18 = vmul.f32 %v8942_v32, %v2100_v19  ;;  %v7582_v19 = vld [vmem:[#allocation5 + $0x40] sm:$0xff]  }
 0xda3   :  { %v7003_v20 = vpop.f32.mrf.mxu1 }
 0xda4   :  { %v2133_v38 = vadd.f32 %v2131_v35, %v2129_v18  ;;  %v2138_v45 = vmul.f32 %v7003_v20, %v8966_v50  ;;  %v7585_v20 = vld [vmem:[%s9792_s11 + $0xac] ss:$12 sps:$4 sm:$0xff]   ;;  %v7610_v18 = vld [vmem:[#allocation7 + $0x60] sm:$0xff]  }
 0xda5   :  { %v2113_v28 = vpop.f32.mrf.mxu1 }
 0xda6   :  { %v2134_v30 = vmul.f32 %v8954_v43, %v2113_v28  ;;  %v7608_v28 = vld [vmem:[#allocation7 + $0x70] sm:$0xff]  }
 0xda7   :  { %v7004_v31 = vpop.f32.mrf.mxu1 }
 0xda8   :  { %v2136_v39 = vadd.f32 %v2134_v30, %v2132_v33  ;;  %v2139_v49 = vmul.f32 %v7004_v31, %v8966_v50  ;;  %v7611_v30 = vld [vmem:[#allocation7 + $0x58] sm:$0xff]  }
 0xda9   :  { %v2116_v36 = vpop.f32.mrf.mxu1 }
 0xdaa   :  { %v2135_v44 = vmul.f32 %v8954_v43, %v2116_v36  ;;  %v2140_v41 = vadd.f32 %v2138_v45, %v2136_v39 }
 0xdac   :  { %v2137_v51 = vadd.f32 %v2135_v44, %v2133_v38 }
 0xdae   :  { %v2141_v56 = vadd.f32 %v2139_v49, %v2137_v51  ;;  %v6342_v49 = vld [vmem:[%s9789_s22 + $0x1] ss:$0 sm:$0xff] }
 0xdb0   :  { %v2161_v40 = vpack.c.bf16 %v2141_v56, %v2140_v41 }
 0xdb2   :  { %7022 = vmatmul.mubr.bf16.vlgmr.msra.gmra.mxu1 %v2161_v40  ;;  %v6343_v40 = vld [vmem:[%s9790_s6 + $0x1] ss:$0 sm:$0xff] }
 0xdb3   :  { %7061 = vmatprep.mubr.msk.bf16.mxu1 %vm8610_vm10, %v8609_v1  ;;  %7046 = vmatpush3.bf16.msra.mxu1 %v7607_v26 }
 0xdb4   :  { %7047 = vmatprep.subr.bf16.mxu1 %v8609_v1 }
 0xdb7   :  { %7048 = vmatpush3.bf16.msra.mxu1 %v7608_v28 }
 0xdb8   :  { %7049 = vmatprep.subr.bf16.mxu1 %v8609_v1 }
 0xdbb   :  { %7050 = vmatpush3.bf16.msra.mxu1 %v7609_v29 }
 0xdbc   :  { %7051 = vmatprep.subr.bf16.mxu1 %v8609_v1 }
 0xdbf   :  { %7052 = vmatpush3.bf16.msra.mxu1 %v7610_v18 }
 0xdc0   :  { %7053 = vmatprep.subr.bf16.mxu1 %v8609_v1 }
 0xdc3   :  { %7054 = vmatpush3.bf16.msra.mxu1 %v7611_v30 }
 0xdc4   :  { %7055 = vmatprep.subr.bf16.mxu1 %v8609_v1 }
 0xe72   :  { %v2250_v48 = vpop.f32.mrf.mxu1 }
 0xe73   :  { %v2251_v53 = vadd.f32 %v6331_v47, %v2250_v48 }
 0xe74   :  { %v7023_v57 = vpop.f32.mrf.mxu1 }
 0xe75   :  { %v2257_v58 = vadd.f32 %v2251_v53, %v9156_v4  ;;  %v7583_v57 = vld [vmem:[%s9792_s11 + $0xa8] ss:$12 sps:$4 sm:$0xff]  }
 0xe76   :  { %v2253_v59 = vpop.f32.mrf.mxu1 }
 0xe77   :  { %v2254_v61 = vadd.f32 %v6331_v47, %v2253_v59  ;;  %2263 = vadd.xlane.f32.xlu0 %v2257_v58  ;;  %v7588_v59 = vld [vmem:[%s9792_s11 + $0x94] ss:$12 sps:$4 sm:$0xff]  }
 0xe78   :  { %v7024_v25 = vpop.f32.mrf.mxu1 }
 0xe79   :  { %v2258_v62 = vadd.f32 %v2254_v61, %v9158_v22  ;;  %v7576_v22 = vld [vmem:[#allocation5 + $0x70] sm:$0xff]   ;;  %v7591_v25 = vld [vmem:[%s9792_s11 + $0x7c] ss:$12 sps:$4 sm:$0xff]  }
 0xe7a   :  { %7028 = vmatpush3.bf16.msra.mxu0 %v7576_v22  ;;  %v7586_v61 = vld [vmem:[%s9792_s11 + $0x90] ss:$12 sps:$4 sm:$0xff]   ;;  %v9271_v22 = vld [vmem:[%s9793_s20 + $0x8] sm:$0xff] }
 0xe7b   :  { %2265 = vadd.xlane.f32.xlu1 %v2258_v62  ;;  %7029 = vmatprep.subr.bf16.mxu0 %v8609_v1 }
 0xe7e   :  { %7030 = vmatpush3.bf16.msra.mxu0 %v7577_v12 }
 0xe7f   :  { %7031 = vmatprep.subr.bf16.mxu0 %v8609_v1 }
 0xe82   :  { %7032 = vmatpush3.bf16.msra.mxu0 %v7578_v13  ;;  %v7612_v13 = vld [vmem:[#allocation7 + $0x50] sm:$0xff]  }
 0xe83   :  { %7033 = vmatprep.subr.bf16.mxu0 %v8609_v1  ;;  %7056 = vmatpush3.bf16.msra.mxu1 %v7612_v13  ;;  %v7619_v13 = vld [vmem:[%s9792_s11 + $0x50] ss:$12 sps:$4 sm:$0xff]  }
 0xe84   :  { %7057 = vmatprep.subr.bf16.mxu1 %v8609_v1 }
 0xe86   :  { %7034 = vmatpush3.bf16.msra.mxu0 %v7579_v14  ;;  %v7613_v14 = vld [vmem:[#allocation7 + $0x48] sm:$0xff]  }
 0xe87   :  { %7035 = vmatprep.subr.bf16.mxu0 %v8609_v1  ;;  %7058 = vmatpush3.bf16.msra.mxu1 %v7613_v14  ;;  %v7620_v14 = vld [vmem:[%s9792_s11 + $0x38] ss:$12 sps:$4 sm:$0xff]  }
 0xe88   :  { %7059 = vmatprep.subr.bf16.mxu1 %v8609_v1 }
 0xe8a   :  { %7036 = vmatpush3.bf16.msra.mxu0 %v7580_v16  ;;  %v7614_v16 = vld [vmem:[#allocation7 + $0x40] sm:$0xff]  }
 0xe8b   :  { %7037 = vmatprep.subr.bf16.mxu0 %v8609_v1  ;;  %7060 = vmatpush3.bf16.msra.mxu1 %v7614_v16  ;;  %v7621_v16 = vld [vmem:[%s9792_s11 + $0x20] ss:$12 sps:$4 sm:$0xff]  }
 0xe8c   :  { %7065 = vmatprep.subr.bf16.mxu1 %v8609_v1 }
 0xe8e   :  { %7038 = vmatpush3.bf16.msra.mxu0 %v7581_v17  ;;  %v6345_v17 = vld [vmem:[%s9791_s10 + $0x1] ss:$0 sm:$0xff] }
 0xe8f   :  { %7039 = vmatprep.subr.bf16.mxu0 %v8609_v1 }
 0xe92   :  { %7040 = vmatpush3.bf16.msra.mxu0 %v7582_v19 }
 0xe93   :  { %2801 = vmatprep.subr.bf16.mxu0 %v7585_v20 }
 0xf00   :  { %v2264_v2 = vpop.xlane.xlu0 %2263 }
 0xf01   :  { %v2267_v3 = vmul.f32 0.03125, %v2264_v2  ;;  %v7592_v2 = vld [vmem:[%s9792_s11 + $0x60] ss:$12 sps:$4 sm:$0xff]  }
 0xf03   :  { %v2269_v5 = vsub.f32 %v2257_v58, %v2267_v3  ;;  %v7597_v3 = vld [vmem:[%s9792_s11 + $0x4c] ss:$12 sps:$4 sm:$0xff]  }
 0xf04   :  { %v2266_v6 = vpop.xlane.xlu1 %2265 }
 0xf05   :  { %v2268_v7 = vmul.f32 0.03125, %v2266_v6  ;;  %v2271_v8 = vmul.f32 %v9088_v37, %v2269_v5  ;;  %v7595_v5 = vld [vmem:[%s9792_s11 + $0x48] ss:$12 sps:$4 sm:$0xff]  }
 0xf06   :  { %v7600_v6 = vld [vmem:[%s9792_s11 + $0x34] ss:$12 sps:$4 sm:$0xff]  }
 0xf07   :  { %v2270_v24 = vsub.f32 %v2258_v62, %v2268_v7  ;;  %v2273_v4 = vmul.f32 %v2271_v8, %v2271_v8  ;;  %v7589_v62 = vld [vmem:[%s9792_s11 + $0x78] ss:$12 sps:$4 sm:$0xff]   ;;  %v7598_v7 = vld [vmem:[%s9792_s11 + $0x30] ss:$12 sps:$4 sm:$0xff]  }
 0xf09   :  { %2275 = vadd.xlane.f32.xlu0 %v2273_v4  ;;  %v2272_v9 = vmul.f32 %v9088_v37, %v2270_v24  ;;  %v7601_v24 = vld [vmem:[%s9792_s11 + $0x18] ss:$12 sps:$4 sm:$0xff]  }
 0xf0a   :  { %v7606_v4 = vld [vmem:[%s9792_s11 + $0x4] ss:$12 sps:$4 sm:$0xff]  }
 0xf0b   :  { %v2274_v10 = vmul.f32 %v2272_v9, %v2272_v9 }
 0xf0d   :  { %2277 = vadd.xlane.f32.xlu1 %v2274_v10  ;;  %v9268_v10 = vld [vmem:[%s9793_s20] sm:$0xff] }
 0xf0e   :  { %v9275_v12 = vpack.c.bf16 %v9271_v22, %v9268_v10 }
 0xf92   :  { %v2276_v31 = vpop.xlane.xlu0 %2275 }
 0xf93   :  { %v2279_v33 = vmul.f32 0.03125, %v2276_v31 }
 0xf95   :  { %v2281_v35 = vadd.f32 1e-05, %v2279_v33 }
 0xf96   :  { %v2278_v36 = vpop.xlane.xlu1 %2277 }
 0xf97   :  { %7863 = vrsqrt.f32 %v2281_v35  ;;  %v2280_v38 = vmul.f32 0.03125, %v2278_v36  ;;  %v9285_v35 = vld [vmem:[%s9794_s13] sm:$0x7] }
 0xf98   :  { %v2661_v36 = vrot.slane %v9285_v35, %v8926_v23 }
 0xf99   :  { %v2282_v39 = vadd.f32 1e-05, %v2280_v38 }
 0xf9b   :  { %7865 = vrsqrt.f32 %v2282_v39 }
 0xfa4   :  { %v7864_v44 = vpop.eup %7863 }
 0xfa5   :  { %v2285_v45 = vmul.f32 %v7864_v44, %v2271_v8  ;;  %v7603_v8 = vld [vmem:[%s9792_s11 + $0x1c] ss:$12 sps:$4 sm:$0xff]  }
 0xfa7   :  { %v2293_v56 = vmul.f32 %v6342_v49, %v2285_v45  ;;  %v2665_v45 = vrot.slane %v9285_v35, %v8936_v27 }
 0xfa8   :  { %v7866_v51 = vpop.eup %7865 }
 0xfa9   :  { %v2286_v41 = vmul.f32 %v7866_v51, %v2272_v9  ;;  %v9245_v48 = vadd.f32 %v6343_v40, %v2293_v56  ;;  %v7604_v9 = vld [vmem:[%s9792_s11] ss:$12 sps:$4 sm:$0xff]  }
 0xfab   :  { %v2294_v47 = vmul.f32 %v6342_v49, %v2286_v41 }
 0xfad   :  { %v9247_v53 = vadd.f32 %v6343_v40, %v2294_v47 }
 0xfaf   :  { %v2322_v58 = vpack.c.bf16 %v9247_v53, %v9245_v48 }
 0xfb1   :  { %7042 = vmatmul.mubr.bf16.vlgmr.msra.gmra.mxu0 %v2322_v58 }
 0xfb2   :  { %2802 = vmatpush1.bf16.msra.mxu0 %v7583_v57  ;;  %2833 = vmatprep.mubr.bf16.mxu0 %v8608_v0 }
 0xfb3   :  { %2803 = vmatprep.subr.bf16.mxu0 %v7588_v59 }
 0xfb6   :  { %2804 = vmatpush1.bf16.msra.mxu0 %v7586_v61 }
 0xfb7   :  { %2805 = vmatprep.subr.bf16.mxu0 %v7591_v25 }
 0xfba   :  { %2806 = vmatpush1.bf16.msra.mxu0 %v7589_v62 }
 0xfbb   :  { %2807 = vmatprep.subr.bf16.mxu0 %v7594_v63 }
 0xfbe   :  { %2808 = vmatpush1.bf16.msra.mxu0 %v7592_v2 }
 0xfbf   :  { %2809 = vmatprep.subr.bf16.mxu0 %v7597_v3 }
 0xfc2   :  { %2810 = vmatpush1.bf16.msra.mxu0 %v7595_v5 }
 0xfc3   :  { %2811 = vmatprep.subr.bf16.mxu0 %v7600_v6 }
 0xfc6   :  { %2812 = vmatpush1.bf16.msra.mxu0 %v7598_v7 }
 0xfc7   :  { %2813 = vmatprep.subr.bf16.mxu0 %v7603_v8  ;;  %v7615_v8 = vld [vmem:[%s9792_s11 + $0xb0] ss:$12 sps:$4 sm:$0xff]  }
 0xfca   :  { %2814 = vmatpush1.bf16.msra.mxu0 %v7601_v24  ;;  %v7616_v24 = vld [vmem:[%s9792_s11 + $0x98] ss:$12 sps:$4 sm:$0xff]  }
 0xfcb   :  { %2815 = vmatprep.subr.bf16.mxu0 %v7606_v4  ;;  %v7617_v4 = vld [vmem:[%s9792_s11 + $0x80] ss:$12 sps:$4 sm:$0xff]  }
 0xfce   :  { %2816 = vmatpush1.bf16.msra.mxu0 %v7604_v9  ;;  %v7618_v9 = vld [vmem:[%s9792_s11 + $0x68] ss:$12 sps:$4 sm:$0xff]  }
 0xfd1   :  { %2834 = vmatmul.mubr.bf16.vlgmr.msra.gmra.mxu0 %v9275_v12 }
0x1071   :  { %v2411_v19 = vpop.f32.mrf.mxu0 }
0x1072   :  { %v2412_v26 = vadd.f32 %v6345_v17, %v2411_v19 }
0x1073   :  { %v7043_v20 = vpop.f32.mrf.mxu0 }
0x1074   :  { %v2418_v30 = vmax.f32 %v2412_v26, 0.0 }
0x1075   :  { %v2414_v28 = vpop.f32.mrf.mxu0 }
0x1076   :  { %v2415_v29 = vadd.f32 %v6345_v17, %v2414_v28  ;;  %v7622_v17 = vld [vmem:[%s9792_s11 + $0x8] ss:$12 sps:$4 sm:$0xff]  }
0x1077   :  { %v7044_v18 = vpop.f32.mrf.mxu0 }
0x1078   :  { %v2419_v31 = vmax.f32 %v2415_v29, 0.0 }
0x107a   :  { %v2439_v33 = vpack.c.bf16 %v2419_v31, %v2418_v30 }
0x107c   :  { %7062 = vmatmul.mubr.bf16.vlgmr.msra.gmra.mxu1 %v2439_v33 }
0x107d   :  { %7081 = vmatprep.mubr.msk.bf16.mxu1 %vm8610_vm10, %v8609_v1  ;;  %7066 = vmatpush3.bf16.msra.mxu1 %v7615_v8 }
0x107e   :  { %7067 = vmatprep.subr.bf16.mxu1 %v8609_v1 }
0x1081   :  { %7068 = vmatpush3.bf16.msra.mxu1 %v7616_v24 }
0x1082   :  { %7069 = vmatprep.subr.bf16.mxu1 %v8609_v1 }
0x1085   :  { %7070 = vmatpush3.bf16.msra.mxu1 %v7617_v4 }
0x1086   :  { %7071 = vmatprep.subr.bf16.mxu1 %v8609_v1 }
0x1089   :  { %7072 = vmatpush3.bf16.msra.mxu1 %v7618_v9  ;;  %v2669_v9 = vrot.slane %v9285_v35, %v9045_v54 }
0x108a   :  { %7073 = vmatprep.subr.bf16.mxu1 %v8609_v1 }
0x108d   :  { %7074 = vmatpush3.bf16.msra.mxu1 %v7619_v13 }
0x108e   :  { %7075 = vmatprep.subr.bf16.mxu1 %v8609_v1 }
0x1091   :  { %v2835_v38 = vpop.f32.mrf.mxu0  ;;  %7076 = vmatpush3.bf16.msra.mxu1 %v7620_v14 }
0x1092   :  { %v2836_v44 = vadd.f32 %v2835_v38, %v2661_v36  ;;  %7077 = vmatprep.subr.bf16.mxu1 %v8609_v1 }
0x1093   :  { %v2837_v39 = vpop.f32.mrf.mxu0 }
0x1094   :  { %v2838_v56 = vadd.f32 %v2837_v39, %v2665_v45  ;;  %v2885_v47 = vmul.f32 %v8942_v32, %v2836_v44  ;;  %v2887_v62 = vmul.f32 %v8951_v42, %v2836_v44  ;;  %v2889_v63 = vmul.f32 %v8954_v43, %v2836_v44 }
0x1095   :  { %v2839_v49 = vpop.f32.mrf.mxu0  ;;  %v2891_v6 = vmul.f32 %v8966_v50, %v2836_v44  ;;  %7078 = vmatpush3.bf16.msra.mxu1 %v7621_v16 }
0x1096   :  { %v2840_v51 = vadd.f32 %v2839_v49, %v2661_v36  ;;  %7079 = vmatprep.subr.bf16.mxu1 %v8609_v1 }
0x1097   :  { %v2841_v41 = vpop.f32.mrf.mxu0 }
0x1098   :  { %v2842_v40 = vadd.f32 %v2841_v41, %v2665_v45  ;;  %v2886_v57 = vmul.f32 %v8942_v32, %v2840_v51  ;;  %v2888_v61 = vmul.f32 %v8951_v42, %v2840_v51  ;;  %v2890_v25 = vmul.f32 %v8954_v43, %v2840_v51 }
0x1099   :  { %v2892_v5 = vmul.f32 %v8966_v50, %v2840_v51  ;;  %7080 = vmatpush3.bf16.msra.mxu1 %v7622_v17 }
0x109a   :  { %v2897_v58 = vpack.c.bf16 %v2842_v40, %v2838_v56  ;;  %v2893_v59 = vpack.c.bf16 %v2886_v57, %v2885_v47  ;;  %v2894_v2 = vpack.c.bf16 %v2888_v61, %v2887_v62  ;;  %v2895_v3 = vpack.c.bf16 %v2890_v25, %v2889_v63  ;;  %7125 = vmatprep.subr.bf16.mxu1 %v8609_v1 }
0x109b   :  { %v2896_v7 = vpack.c.bf16 %v2892_v5, %v2891_v6 }
0x109c   :  { %7085 = vmatprep.subr.bf16.mxu0 %v2897_v58  ;;  %7087 = vmatprep.mubr.bf16.mxu0 %v2893_v59 }
0x109d   :  { %7086 = vmatpush3.bf16.xpose.msra.mxu0 %v2897_v58  ;;  %7082 = vmatmul.mubr.bf16.vlgmr.msra.gmra.mxu1 %v9275_v12 }
0x109e   :  { %7141 = vmatprep.mubr.msk.bf16.mxu1 %vm8610_vm10, %v8609_v1 }
0x10a4   :  { %7088 = vmatmul.mubr.bf16.vlgmr.msra.gmra.mxu0 %v2894_v2 }
0x10a5   :  { %7091 = vmatprep.mubr.bf16.mxu0 %v2895_v3 }
0x10ac   :  { %7092 = vmatmul.mubr.bf16.gmra.mxu0 %v2896_v7 }
0x113c   :  { %v9318_v19 = vpop.f32.mrf.mxu1 }
0x113e   :  { %v7063_v20 = vpop.f32.mrf.mxu1 }
0x1140   :  { %v9320_v26 = vpop.f32.mrf.mxu1 }
0x1142   :  { %v7064_v28 = vpop.f32.mrf.mxu1 }
0x115d   :  { %v2878_v13 = vpop.f32.mrf.mxu1 }
0x115e   :  { %v2879_v16 = vadd.f32 %v2878_v13, %v2669_v9  ;;  %v6354_v13 = vld [vmem:[#allocation8 + $0x1] ss:$0 sm:$0xff] }
0x115f   :  { %v7083_v14 = vpop.f32.mrf.mxu1 }
0x1161   :  { %v2881_v17 = vpop.f32.mrf.mxu1 }
0x1162   :  { %v2882_v20 = vadd.f32 %v2881_v17, %v2669_v9 }
0x1163   :  { %v7084_v28 = vpop.f32.mrf.mxu1 }
0x1164   :  { %v7089_v29 = vpop.f32.mrf.mxu0 }
0x1165   :  { %v2965_v30 = vmul.f32 0.35355338, %v7089_v29  ;;  %v3071_v29 = vpack.c.bf16 %v2882_v20, %v2879_v16  ;;  %v2529_v20 = vadd.f32 %v6354_v13, %v9318_v19 }
0x1166   :  { %v2932_v18 = vpop.f32.mrf.mxu0 }
0x1167   :  { %v2963_v31 = vmul.f32 0.35355338, %v2932_v18  ;;  %v2973_v45 = vadd.f32 %v2965_v30, %v8996_v11  ;;  %7095 = vmatprep.subr.bf16.mxu0 %v3071_v29 }
0x1168   :  { %v7090_v33 = vpop.f32.mrf.mxu0  ;;  %7096 = vmatpush3.bf16.msra.mxu0 %v3071_v29 }
0x1169   :  { %v2971_v36 = vadd.f32 %v2963_v31, %v8999_v15  ;;  %v2966_v38 = vmul.f32 0.35355338, %v7090_v33  ;;  %v2985_v57 = vsel %vm986_vm14, %v2973_v45, -inf  ;;  %7105 = vmatprep.subr.bf16.mxu0 %v8609_v1 }
0x116a   :  { %v2935_v39 = vpop.f32.mrf.mxu0 }
0x116b   :  { %v2964_v44 = vmul.f32 0.35355338, %v2935_v39  ;;  %v2979_v12 = vsel %vm986_vm14, %v2971_v36, -inf  ;;  %v2974_v56 = vadd.f32 %v2966_v38, %v9003_v21 }
0x116c   :  { %2980 = vmax.xlane.f32.xlu0 %v2979_v12  ;;  %v7093_v49 = vpop.f32.mrf.mxu0 }
0x116d   :  { %v2972_v51 = vadd.f32 %v2964_v44, %v9008_v34  ;;  %v2969_v40 = vmul.f32 0.35355338, %v7093_v49  ;;  %v2988_v62 = vsel %vm986_vm14, %v2974_v56, -inf }
0x116e   :  { %v2948_v41 = vpop.f32.mrf.mxu0 }
0x116f   :  { %v2967_v47 = vmul.f32 0.35355338, %v2948_v41  ;;  %v2982_v58 = vsel %vm986_vm14, %v2972_v51, -inf  ;;  %v2977_v5 = vadd.f32 %v2969_v40, %v9017_v52 }
0x1170   :  { %2986 = vmax.xlane.f32.xlu0 %v2985_v57  ;;  %2983 = vmax.xlane.f32.xlu1 %v2982_v58  ;;  %v7094_v59 = vpop.f32.mrf.mxu0 }
0x1171   :  { %v2975_v61 = vadd.f32 %v2967_v47, %v9014_v46  ;;  %v2970_v63 = vmul.f32 0.35355338, %v7094_v59  ;;  %v2997_v7 = vsel %vm986_vm14, %v2977_v5, -inf }
0x1172   :  { %v2951_v25 = vpop.f32.mrf.mxu0 }
0x1173   :  { %v2968_v2 = vmul.f32 0.35355338, %v2951_v25  ;;  %v2991_v3 = vsel %vm986_vm14, %v2975_v61, -inf  ;;  %v2978_v24 = vadd.f32 %v2970_v63, %v9024_v60 }
0x1174   :  { %2989 = vmax.xlane.f32.xlu1 %v2988_v62  ;;  %2992 = vmax.xlane.f32.xlu0 %v2991_v3 }
0x1175   :  { %v2976_v6 = vadd.f32 %v2968_v2, %v9020_v55  ;;  %v3000_v4 = vsel %vm986_vm14, %v2978_v24, -inf }
0x1177   :  { %v2994_v8 = vsel %vm986_vm14, %v2976_v6, -inf }
0x1178   :  { %2998 = vmax.xlane.f32.xlu0 %v2997_v7  ;;  %2995 = vmax.xlane.f32.xlu1 %v2994_v8 }
0x117c   :  { %3001 = vmax.xlane.f32.xlu1 %v3000_v4 }
0x11f5   :  { %v2981_v18 = vpop.xlane.xlu0 %2980 }
0x11f6   :  { %v3003_v30 = vsub.f32 %v2971_v36, %v2981_v18 }
0x11f8   :  { %v3011_v31 = vmul.f32 1.442695, %v3003_v30  ;;  %v2532_v30 = vadd.f32 %v6354_v13, %v9320_v26 }
0x11f9   :  { %v2987_v33 = vpop.xlane.xlu0 %2986  ;;  %v2984_v38 = vpop.xlane.xlu1 %2983 }
0x11fa   :  { %7867 = vpow2.f32 %v3011_v31  ;;  %v3005_v39 = vsub.f32 %v2973_v45, %v2987_v33  ;;  %v3004_v44 = vsub.f32 %v2972_v51, %v2984_v38  ;;  %v2535_v31 = vadd.f32 %v2529_v20, %v9245_v48 }
0x11fb   :  { %v2536_v38 = vadd.f32 %v2532_v30, %v9247_v53 }
0x11fc   :  { %v3015_v35 = vmul.f32 1.442695, %v3005_v39  ;;  %v3013_v12 = vmul.f32 1.442695, %v3004_v44 }
0x11fd   :  { %v2990_v49 = vpop.xlane.xlu1 %2989  ;;  %v2993_v41 = vpop.xlane.xlu0 %2992 }
0x11fe   :  { %7869 = vpow2.f32 %v3015_v35  ;;  %v3006_v40 = vsub.f32 %v2974_v56, %v2990_v49  ;;  %v3007_v47 = vsub.f32 %v2975_v61, %v2993_v41 }
0x11ff   :  { %7871 = vpow2.f32 %v3013_v12 }
0x1200   :  { %v3017_v57 = vmul.f32 1.442695, %v3006_v40  ;;  %v3019_v58 = vmul.f32 1.442695, %v3007_v47 }
0x1201   :  { %v2999_v59 = vpop.xlane.xlu0 %2998  ;;  %v2996_v25 = vpop.xlane.xlu1 %2995 }
0x1202   :  { %7873 = vpow2.f32 %v3017_v57  ;;  %v3009_v36 = vsub.f32 %v2977_v5, %v2999_v59  ;;  %v3008_v62 = vsub.f32 %v2976_v6, %v2996_v25 }
0x1203   :  { %7875 = vpow2.f32 %v3019_v58 }
0x1204   :  { %v3023_v63 = vmul.f32 1.442695, %v3009_v36  ;;  %v3021_v2 = vmul.f32 1.442695, %v3008_v62 }
0x1205   :  { %v3002_v45 = vpop.xlane.xlu1 %3001 }
0x1206   :  { %7877 = vpow2.f32 %v3023_v63  ;;  %v3010_v51 = vsub.f32 %v2978_v24, %v3002_v45 }
0x1207   :  { %v7868_v3 = vpop.eup %7867  ;;  %7879 = vpow2.f32 %v3021_v2 }
0x1208   :  { %v3025_v7 = vmul.f32 1.442695, %v3010_v51  ;;  %v3027_v56 = vsel %vm986_vm14, %v7868_v3, 0.0 }
0x1209   :  { %3028 = vadd.xlane.f32.xlu0 %v3027_v56 }
0x120a   :  { %7881 = vpow2.f32 %v3025_v7 }
0x120b   :  { %v7870_v61 = vpop.eup %7869 }
0x120c   :  { %v7872_v8 = vpop.eup %7871  ;;  %v3033_v4 = vsel %vm986_vm14, %v7870_v61, 0.0 }
0x120d   :  { %3034 = vadd.xlane.f32.xlu0 %v3033_v4  ;;  %v3030_v5 = vsel %vm986_vm14, %v7872_v8, 0.0 }
0x120e   :  { %3031 = vadd.xlane.f32.xlu1 %v3030_v5 }
0x120f   :  { %v7874_v6 = vpop.eup %7873 }
0x1210   :  { %v9344_v9 = vpop.eup %7875  ;;  %v3036_v24 = vsel %vm986_vm14, %v7874_v6, 0.0 }
0x1211   :  { %v3039_v14 = vsel %vm986_vm14, %v9344_v9, 0.0 }
0x1212   :  { %3040 = vadd.xlane.f32.xlu0 %v3039_v14  ;;  %3037 = vadd.xlane.f32.xlu1 %v3036_v24 }
0x1213   :  { %v7878_v16 = vpop.eup %7877 }
0x1214   :  { %v7880_v17 = vpop.eup %7879  ;;  %v3045_v28 = vsel %vm986_vm14, %v7878_v16, 0.0 }
0x1215   :  { %v3042_v29 = vsel %vm986_vm14, %v7880_v17, 0.0 }
0x1216   :  { %3046 = vadd.xlane.f32.xlu0 %v3045_v28  ;;  %3043 = vadd.xlane.f32.xlu1 %v3042_v29 }
0x1217   :  { %v7882_v18 = vpop.eup %7881 }
0x1218   :  { %v3048_v33 = vsel %vm986_vm14, %v7882_v18, 0.0 }
0x121a   :  { %2541 = vadd.xlane.f32.xlu0 %v2535_v31  ;;  %3049 = vadd.xlane.f32.xlu1 %v3048_v33 }
0x121e   :  { %2543 = vadd.xlane.f32.xlu1 %v2536_v38 }
0x1292   :  { %v3029_v39 = vpop.xlane.xlu0 %3028 }
0x1293   :  { %7883 = vrcp.f32 %v3029_v39  ;;  %v7629_v39 = vld [vmem:[#allocation16 + $0x8] sm:$0xff]  }
0x1296   :  { %v3035_v19 = vpop.xlane.xlu0 %3034 }
0x1297   :  { %v3032_v44 = vpop.xlane.xlu1 %3031 }
0x1298   :  { %7885 = vrcp.f32 %v3032_v44 }
0x1299   :  { %7887 = vrcp.f32 %v3035_v19  ;;  %v7630_v19 = vld [vmem:[#allocation16] sm:$0xff]  }
0x129b   :  { %v3041_v35 = vpop.xlane.xlu0 %3040  ;;  %v3038_v12 = vpop.xlane.xlu1 %3037 }
0x129c   :  { %7889 = vrcp.f32 %v3038_v12 }
0x129d   :  { %7891 = vrcp.f32 %v3041_v35 }
0x129f   :  { %v3047_v26 = vpop.xlane.xlu0 %3046  ;;  %v3044_v49 = vpop.xlane.xlu1 %3043 }
0x12a0   :  { %7893 = vrcp.f32 %v3044_v49  ;;  %v7884_v48 = vpop.eup %7883 }
0x12a1   :  { %7895 = vrcp.f32 %v3047_v26  ;;  %v3059_v58 = vmul.f32 %v7884_v48, %v7868_v3 }
0x12a3   :  { %v2542_v41 = vpop.xlane.xlu0 %2541  ;;  %v3050_v40 = vpop.xlane.xlu1 %3049 }
0x12a4   :  { %v2545_v47 = vmul.f32 0.03125, %v2542_v41  ;;  %7897 = vrcp.f32 %v3050_v40  ;;  %v6363_v40 = vld [vmem:[#allocation10 + $0x1] ss:$0 sm:$0xff] }
0x12a5   :  { %v7886_v53 = vpop.eup %7885 }
0x12a6   :  { %v2547_v57 = vsub.f32 %v2535_v31, %v2545_v47  ;;  %v3060_v59 = vmul.f32 %v7886_v53, %v7872_v8  ;;  %v7888_v36 = vpop.eup %7887  ;;  %v6364_v53 = vld [vmem:[#allocation11 + $0x1] ss:$0 sm:$0xff] }
0x12a7   :  { %v2544_v25 = vpop.xlane.xlu1 %2543  ;;  %v3061_v56 = vmul.f32 %v7888_v36, %v7870_v61 }
0x12a8   :  { %v2546_v62 = vmul.f32 0.03125, %v2544_v25  ;;  %v3067_v63 = vpack.c.bf16 %v3060_v59, %v3059_v58  ;;  %v2549_v2 = vmul.f32 %v9088_v37, %v2547_v57 }
0x12a9   :  { %v7890_v45 = vpop.eup %7889 }
0x12aa   :  { %v2548_v51 = vsub.f32 %v2536_v38, %v2546_v62  ;;  %7097 = vmatprep.mubr.msk.bf16.mxu0 %vm986_vm14, %v3067_v63  ;;  %v2551_v7 = vmul.f32 %v2549_v2, %v2549_v2  ;;  %v3062_v4 = vmul.f32 %v7890_v45, %v7874_v6  ;;  %v7892_v5 = vpop.eup %7891  ;;  %v7623_v6 = vld [vmem:[#allocation16 + $0x38] sm:$0xff]   ;;  %v7624_v38 = vld [vmem:[#allocation16 + $0x30] sm:$0xff]  }
0x12ab   :  { %v3063_v20 = vmul.f32 %v7892_v5, %v9344_v9  ;;  %v7625_v9 = vld [vmem:[#allocation16 + $0x28] sm:$0xff]  }
0x12ac   :  { %2553 = vadd.xlane.f32.xlu0 %v2551_v7  ;;  %v2550_v24 = vmul.f32 %v9088_v37, %v2548_v51  ;;  %v3068_v13 = vpack.c.bf16 %v3062_v4, %v3061_v56 }
0x12ad   :  { %v7894_v3 = vpop.eup %7893 }
0x12ae   :  { %v2552_v8 = vmul.f32 %v2550_v24, %v2550_v24  ;;  %v7896_v14 = vpop.eup %7895  ;;  %7098 = vmatmul.mubr.msk.bf16.vlgmr.msra.gmra.mxu0 %vm986_vm14, %v3068_v13  ;;  %v3064_v28 = vmul.f32 %v7894_v3, %v7880_v17  ;;  %v7627_v17 = vld [vmem:[#allocation16 + $0x18] sm:$0xff]  }
0x12af   :  { %v3065_v31 = vmul.f32 %v7896_v14, %v7878_v16  ;;  %7106 = vmatpush3.bf16.msra.mxu0 %v7623_v6  ;;  %v7626_v16 = vld [vmem:[#allocation16 + $0x20] sm:$0xff]  }
0x12b0   :  { %2555 = vadd.xlane.f32.xlu1 %v2552_v8  ;;  %v3069_v30 = vpack.c.bf16 %v3064_v28, %v3063_v20  ;;  %7107 = vmatprep.subr.bf16.mxu0 %v8609_v1 }
0x12b1   :  { %v7898_v29 = vpop.eup %7897 }
0x12b2   :  { %v3066_v33 = vmul.f32 %v7898_v29, %v7882_v18  ;;  %7101 = vmatprep.mubr.msk.bf16.mxu0 %vm986_vm14, %v3069_v30  ;;  %v7628_v18 = vld [vmem:[#allocation16 + $0x10] sm:$0xff]  }
0x12b3   :  { %7108 = vmatpush3.bf16.msra.mxu0 %v7624_v38 }
0x12b4   :  { %v3070_v61 = vpack.c.bf16 %v3066_v33, %v3065_v31  ;;  %7109 = vmatprep.subr.bf16.mxu0 %v8609_v1 }
0x12b6   :  { %7102 = vmatmul.mubr.msk.bf16.gmra.mxu0 %vm986_vm14, %v3070_v61 }
0x12b7   :  { %7121 = vmatprep.mubr.msk.bf16.mxu0 %vm8610_vm10, %v8609_v1  ;;  %7110 = vmatpush3.bf16.msra.mxu0 %v7625_v9 }
0x12b8   :  { %7111 = vmatprep.subr.bf16.mxu0 %v8609_v1 }
0x12bb   :  { %7112 = vmatpush3.bf16.msra.mxu0 %v7626_v16 }
0x12bc   :  { %7113 = vmatprep.subr.bf16.mxu0 %v8609_v1 }
0x12bf   :  { %7114 = vmatpush3.bf16.msra.mxu0 %v7627_v17 }
0x12c0   :  { %7115 = vmatprep.subr.bf16.mxu0 %v8609_v1 }
0x12c3   :  { %7116 = vmatpush3.bf16.msra.mxu0 %v7628_v18 }
0x12c4   :  { %7117 = vmatprep.subr.bf16.mxu0 %v8609_v1 }
0x12c7   :  { %7118 = vmatpush3.bf16.msra.mxu0 %v7629_v39  ;;  %v6395_v39 = vld [vmem:[%s9795_s4] ss:$0 sm:$0xff] }
0x12c8   :  { %7119 = vmatprep.subr.bf16.mxu0 %v8609_v1 }
0x12cb   :  { %7120 = vmatpush3.bf16.msra.mxu0 %v7630_v19 }
0x1335   :  { %v2554_v44 = vpop.xlane.xlu0 %2553 }
0x1336   :  { %v2557_v35 = vmul.f32 0.03125, %v2554_v44 }
0x1338   :  { %v2559_v12 = vadd.f32 1e-05, %v2557_v35 }
0x1339   :  { %v2556_v26 = vpop.xlane.xlu1 %2555 }
0x133a   :  { %7899 = vrsqrt.f32 %v2559_v12  ;;  %v2558_v49 = vmul.f32 0.03125, %v2556_v26 }
0x133c   :  { %v2560_v48 = vadd.f32 1e-05, %v2558_v49 }
0x133e   :  { %7901 = vrsqrt.f32 %v2560_v48 }
0x1347   :  { %v7900_v41 = vpop.eup %7899 }
0x1348   :  { %v2563_v47 = vmul.f32 %v7900_v41, %v2549_v2 }
0x134a   :  { %v2571_v57 = vmul.f32 %v6363_v40, %v2563_v47 }
0x134b   :  { %v7902_v58 = vpop.eup %7901 }
0x134c   :  { %v2579_v59 = vadd.f32 %v6364_v53, %v2571_v57  ;;  %v2564_v25 = vmul.f32 %v7902_v58, %v2550_v24 }
0x134e   :  { %2583 = vadd.xlane.f32.xlu0 %v2579_v59  ;;  %v2572_v36 = vmul.f32 %v6363_v40, %v2564_v25  ;;  %v7633_v25 = vld [vmem:[#allocation19 + $0x74] ss:$8 sps:$4 sm:$0xff]  }
0x134f   :  { %3542 = vmatprep.subr.bf16.mxu0 %v7633_v25  ;;  %v7659_v25 = vld [vmem:[#allocation17 + $0x18] sm:$0xff]  }
0x1350   :  { %v2580_v62 = vadd.f32 %v6364_v53, %v2572_v36  ;;  %v7631_v36 = vld [vmem:[#allocation19 + $0x70] ss:$8 sps:$4 sm:$0xff]  }
0x1352   :  { %2585 = vadd.xlane.f32.xlu1 %v2580_v62 }
0x136e   :  { %v7099_v63 = vpop.f32.mrf.mxu0 }
0x136f   :  { %v3151_v13 = vmul.f32 %v7099_v63, %v8951_v42  ;;  %v7634_v63 = vld [vmem:[#allocation19 + $0x60] ss:$8 sps:$4 sm:$0xff]  }
0x1370   :  { %v3118_v45 = vpop.f32.mrf.mxu0 }
0x1371   :  { %v3149_v4 = vmul.f32 %v8942_v32, %v3118_v45  ;;  %v7639_v45 = vld [vmem:[#allocation19 + $0x54] ss:$8 sps:$4 sm:$0xff]  }
0x1372   :  { %v7100_v51 = vpop.f32.mrf.mxu0 }
0x1373   :  { %v3153_v24 = vadd.f32 %v3151_v13, %v3149_v4  ;;  %v3152_v14 = vmul.f32 %v7100_v51, %v8951_v42  ;;  %v7637_v51 = vld [vmem:[#allocation19 + $0x50] ss:$8 sps:$4 sm:$0xff]   ;;  %v7646_v13 = vld [vmem:[#allocation19 + $0x20] ss:$8 sps:$4 sm:$0xff]  }
0x1374   :  { %v3121_v7 = vpop.f32.mrf.mxu0  ;;  %v7643_v4 = vld [vmem:[#allocation19 + $0x30] ss:$8 sps:$4 sm:$0xff]  }
0x1375   :  { %v3150_v2 = vmul.f32 %v8942_v32, %v3121_v7  ;;  %v7642_v7 = vld [vmem:[#allocation19 + $0x44] ss:$8 sps:$4 sm:$0xff]  }
0x1376   :  { %v7103_v56 = vpop.f32.mrf.mxu0 }
0x1377   :  { %v3154_v28 = vadd.f32 %v3152_v14, %v3150_v2  ;;  %v3159_v31 = vmul.f32 %v7103_v56, %v8966_v50  ;;  %v7645_v56 = vld [vmem:[#allocation19 + $0x34] ss:$8 sps:$4 sm:$0xff]  }
0x1378   :  { %v3134_v5 = vpop.f32.mrf.mxu0  ;;  %v7651_v2 = vld [vmem:[#allocation19 + $0x14] ss:$8 sps:$4 sm:$0xff]  }
0x1379   :  { %v3155_v3 = vmul.f32 %v8954_v43, %v3134_v5  ;;  %v7648_v5 = vld [vmem:[#allocation19 + $0x24] ss:$8 sps:$4 sm:$0xff]   ;;  %v7655_v14 = vld [vmem:[#allocation17 + $0x38] sm:$0xff]  }
0x137a   :  { %v7104_v8 = vpop.f32.mrf.mxu0  ;;  %7126 = vmatpush3.bf16.msra.mxu1 %v7655_v14 }
0x137b   :  { %v3157_v29 = vadd.f32 %v3155_v3, %v3153_v24  ;;  %v3160_v33 = vmul.f32 %v7104_v8, %v8966_v50  ;;  %v7649_v3 = vld [vmem:[#allocation19 + $0x10] ss:$8 sps:$4 sm:$0xff]   ;;  %v7654_v8 = vld [vmem:[#allocation19 + $0x4] ss:$8 sps:$4 sm:$0xff]   ;;  %v7652_v24 = vld [vmem:[#allocation19] ss:$8 sps:$4 sm:$0xff]   ;;  %7127 = vmatprep.subr.bf16.mxu1 %v8609_v1 }
0x137c   :  { %v3137_v20 = vpop.f32.mrf.mxu0 }
0x137d   :  { %v3156_v30 = vmul.f32 %v8954_v43, %v3137_v20  ;;  %v3161_v6 = vadd.f32 %v3159_v31, %v3157_v29 }
0x137f   :  { %v3158_v61 = vadd.f32 %v3156_v30, %v3154_v28 }
0x1381   :  { %v3162_v38 = vadd.f32 %v3160_v33, %v3158_v61 }
0x1383   :  { %v3180_v9 = vpack.c.bf16 %v3162_v38, %v3161_v6 }
0x1385   :  { %7122 = vmatmul.mubr.bf16.vlgmr.msra.gmra.mxu0 %v3180_v9 }
0x1386   :  { %3574 = vmatprep.mubr.bf16.mxu0 %v8608_v0  ;;  %3543 = vmatpush1.bf16.msra.mxu0 %v7631_v36 }
0x13d7   :  { %v2584_v16 = vpop.xlane.xlu0 %2583 }
0x13d8   :  { %v2587_v17 = vmul.f32 0.03125, %v2584_v16 }
0x13da   :  { %v2589_v19 = vsub.f32 %v2579_v59, %v2587_v17 }
0x13db   :  { %v2586_v18 = vpop.xlane.xlu1 %2585 }
0x13dc   :  { %v2588_v44 = vmul.f32 0.03125, %v2586_v18  ;;  %v9384_v41 = vmul.f32 %v9088_v37, %v2589_v19 }
0x13de   :  { %v2590_v49 = vsub.f32 %v2580_v62, %v2588_v44  ;;  %v2593_v57 = vmul.f32 %v9384_v41, %v9384_v41  ;;  %v7636_v62 = vld [vmem:[#allocation19 + $0x64] ss:$8 sps:$4 sm:$0xff]  }
0x13df   :  { %3544 = vmatprep.subr.bf16.mxu0 %v7636_v62 }
0x13e0   :  { %v9390_v59 = vmul.f32 %v9088_v37, %v2590_v49  ;;  %3545 = vmatpush1.bf16.msra.mxu0 %v7634_v63  ;;  %v6365_v49 = vld [vmem:[#allocation13] ss:$0 sm:$0xff]  ;;  %v7660_v63 = vld [vmem:[#allocation17 + $0x10] sm:$0xff]  }
0x13e1   :  { %3546 = vmatprep.subr.bf16.mxu0 %v7639_v45  ;;  %v7662_v45 = vld [vmem:[#allocation17] sm:$0xff]  }
0x13e4   :  { %3547 = vmatpush1.bf16.msra.mxu0 %v7637_v51 }
0x13e5   :  { %3548 = vmatprep.subr.bf16.mxu0 %v7642_v7 }
0x1445   :  { %v3269_v35 = vpop.f32.mrf.mxu0 }
0x1446   :  { %v3270_v12 = vadd.f32 %v6395_v39, %v3269_v35  ;;  %v7656_v35 = vld [vmem:[#allocation17 + $0x30] sm:$0xff]  }
0x1447   :  { %v7123_v26 = vpop.f32.mrf.mxu0  ;;  %7128 = vmatpush3.bf16.msra.mxu1 %v7656_v35 }
0x1448   :  { %v3276_v48 = vadd.f32 %v3270_v12, %v9268_v10  ;;  %v2594_v10 = vmul.f32 %v9390_v59, %v9390_v59  ;;  %7129 = vmatprep.subr.bf16.mxu1 %v8609_v1 }
0x1449   :  { %v3272_v40 = vpop.f32.mrf.mxu0 }
0x144a   :  { %v3273_v47 = vadd.f32 %v6395_v39, %v3272_v40  ;;  %3280 = vadd.xlane.f32.xlu0 %v3276_v48 }
0x144b   :  { %v7124_v53 = vpop.f32.mrf.mxu0 }
0x144c   :  { %v3277_v58 = vadd.f32 %v3273_v47, %v9271_v22  ;;  %v7640_v22 = vld [vmem:[#allocation19 + $0x40] ss:$8 sps:$4 sm:$0xff]  }
0x144d   :  { %3549 = vmatpush1.bf16.msra.mxu0 %v7640_v22 }
0x144e   :  { %2595 = vadd.xlane.f32.xlu0 %v2593_v57  ;;  %3282 = vadd.xlane.f32.xlu1 %v3277_v58  ;;  %v7658_v57 = vld [vmem:[#allocation17 + $0x20] sm:$0xff]  }
0x144f   :  { %3550 = vmatprep.subr.bf16.mxu0 %v7645_v56 }
0x1451   :  { %3551 = vmatpush1.bf16.msra.mxu0 %v7643_v4 }
0x1452   :  { %2597 = vadd.xlane.f32.xlu1 %v2594_v10  ;;  %3552 = vmatprep.subr.bf16.mxu0 %v7648_v5 }
0x1455   :  { %3553 = vmatpush1.bf16.msra.mxu0 %v7646_v13 }
0x1456   :  { %3554 = vmatprep.subr.bf16.mxu0 %v7651_v2 }
0x1459   :  { %3555 = vmatpush1.bf16.msra.mxu0 %v7649_v3  ;;  %v6404_v3 = vld [vmem:[%s9796_s23] ss:$0 sm:$0xff] }
0x145a   :  { %3556 = vmatprep.subr.bf16.mxu0 %v7654_v8 }
0x145d   :  { %3557 = vmatpush1.bf16.msra.mxu0 %v7652_v24 }
0x145e   :  { %7185 = vmatprep.subr.bf16.mxu0 %v8609_v1 }
0x14d3   :  { %v3281_v20 = vpop.xlane.xlu0 %3280 }
0x14d4   :  { %v3284_v28 = vmul.f32 0.03125, %v3281_v20  ;;  %v6405_v20 = vld [vmem:[%s9797_s26] ss:$0 sm:$0xff] }
0x14d6   :  { %v3286_v29 = vsub.f32 %v3276_v48, %v3284_v28  ;;  %v7657_v48 = vld [vmem:[#allocation17 + $0x28] sm:$0xff]  }
0x14d7   :  { %v2596_v30 = vpop.xlane.xlu0 %2595  ;;  %v3283_v31 = vpop.xlane.xlu1 %3282  ;;  %7130 = vmatpush3.bf16.msra.mxu1 %v7657_v48 }
0x14d8   :  { %v2599_v33 = vmul.f32 0.03125, %v2596_v30  ;;  %v3285_v61 = vmul.f32 0.03125, %v3283_v31  ;;  %v3288_v6 = vmul.f32 %v9088_v37, %v3286_v29  ;;  %7131 = vmatprep.subr.bf16.mxu1 %v8609_v1 }
0x14da   :  { %v2601_v38 = vadd.f32 1e-05, %v2599_v33  ;;  %v3287_v9 = vsub.f32 %v3277_v58, %v3285_v61  ;;  %v3290_v16 = vmul.f32 %v3288_v6, %v3288_v6  ;;  %v6366_v58 = vld [vmem:[#allocation14] ss:$0 sm:$0xff]  ;;  %v3449_v33 = vld [vmem:[%s9798_s28] sm:$0x3] }
0x14db   :  { %v2598_v17 = vpop.xlane.xlu1 %2597  ;;  %7132 = vmatpush3.bf16.msra.mxu1 %v7658_v57 }
0x14dc   :  { %7903 = vrsqrt.f32 %v2601_v38  ;;  %v2600_v18 = vmul.f32 0.03125, %v2598_v17  ;;  %3292 = vadd.xlane.f32.xlu0 %v3290_v16  ;;  %v3289_v39 = vmul.f32 %v9088_v37, %v3287_v9  ;;  %7133 = vmatprep.subr.bf16.mxu1 %v8609_v1  ;;  %v3455_v38 = vrot.slane %v3449_v33, %v8926_v23 }
0x14dd   :  { %v3459_v9 = vrot.slane %v3449_v33, %v8936_v27 }
0x14de   :  { %v2602_v19 = vadd.f32 1e-05, %v2600_v18  ;;  %v3291_v44 = vmul.f32 %v3289_v39, %v3289_v39 }
0x14df   :  { %7134 = vmatpush3.bf16.msra.mxu1 %v7659_v25 }
0x14e0   :  { %7905 = vrsqrt.f32 %v2602_v19  ;;  %3294 = vadd.xlane.f32.xlu1 %v3291_v44  ;;  %7135 = vmatprep.subr.bf16.mxu1 %v8609_v1 }
0x14e3   :  { %7136 = vmatpush3.bf16.msra.mxu1 %v7660_v63 }
0x14e4   :  { %7137 = vmatprep.subr.bf16.mxu1 %v8609_v1 }
0x14e9   :  { %v7904_v12 = vpop.eup %7903 }
0x14ea   :  { %v2605_v26 = vmul.f32 %v7904_v12, %v9384_v41 }
0x14ec   :  { %v2613_v53 = vmul.f32 %v6365_v49, %v2605_v26  ;;  %v6406_v26 = vld [vmem:[%s9799_s8] ss:$0 sm:$0xff] }
0x14ed   :  { %v7906_v40 = vpop.eup %7905 }
0x14ee   :  { %v2606_v47 = vmul.f32 %v7906_v40, %v9390_v59  ;;  %v2621_v36 = vadd.f32 %v6366_v58, %v2613_v53  ;;  %v7661_v59 = vld [vmem:[#allocation17 + $0x8] sm:$0xff]  }
0x14ef   :  { %7138 = vmatpush3.bf16.msra.mxu1 %v7661_v59 }
0x14f0   :  { %v2614_v10 = vmul.f32 %v6365_v49, %v2606_v47  ;;  %7139 = vmatprep.subr.bf16.mxu1 %v8609_v1 }
0x14f2   :  { %v2622_v62 = vadd.f32 %v6366_v58, %v2614_v10 }
0x14f3   :  { %7140 = vmatpush3.bf16.msra.mxu1 %v7662_v45 }
0x14f4   :  { %v9403_v41 = vpack.c.bf16 %v2622_v62, %v2621_v36 }
0x14f6   :  { %3575 = vmatmul.mubr.bf16.vlgmr.msra.gmra.mxu0 %v9403_v41 }
0x14f7   :  { %7201 = vmatprep.mubr.msk.bf16.mxu0 %vm8610_vm10, %v8609_v1 }
0x1565   :  { %v3293_v51 = vpop.xlane.xlu0 %3292 }
0x1566   :  { %v3296_v22 = vmul.f32 0.03125, %v3293_v51 }
0x1568   :  { %v3298_v7 = vadd.f32 1e-05, %v3296_v22 }
0x1569   :  { %v3295_v56 = vpop.xlane.xlu1 %3294 }
0x156a   :  { %7907 = vrsqrt.f32 %v3298_v7  ;;  %v3297_v4 = vmul.f32 0.03125, %v3295_v56 }
0x156c   :  { %v3299_v5 = vadd.f32 1e-05, %v3297_v4 }
0x156e   :  { %7909 = vrsqrt.f32 %v3299_v5 }
0x1577   :  { %v7908_v13 = vpop.eup %7907 }
0x1578   :  { %v3302_v2 = vmul.f32 %v7908_v13, %v3288_v6 }
0x157a   :  { %v3310_v14 = vmul.f32 %v6404_v3, %v3302_v2 }
0x157b   :  { %v7910_v8 = vpop.eup %7909 }
0x157c   :  { %v3303_v24 = vmul.f32 %v7910_v8, %v3289_v39  ;;  %v9413_v29 = vadd.f32 %v6405_v20, %v3310_v14 }
0x157e   :  { %v3311_v28 = vmul.f32 %v6404_v3, %v3303_v24 }
0x1580   :  { %v9415_v30 = vadd.f32 %v6405_v20, %v3311_v28 }
0x1582   :  { %v3337_v31 = vpack.c.bf16 %v9415_v30, %v9413_v29 }
0x1584   :  { %7142 = vmatmul.mubr.bf16.vlgmr.msra.gmra.mxu1 %v3337_v31 }
0x15b6   :  { %v3576_v61 = vpop.f32.mrf.mxu0 }
0x15b7   :  { %v3577_v17 = vadd.f32 %v3576_v61, %v3455_v38 }
0x15b8   :  { %v3578_v6 = vpop.f32.mrf.mxu0 }
0x15b9   :  { %v3579_v19 = vadd.f32 %v3578_v6, %v3459_v9 }
0x15ba   :  { %v3580_v16 = vpop.f32.mrf.mxu0 }
0x15bb   :  { %v3581_v18 = vadd.f32 %v3580_v16, %v3455_v38 }
0x15bc   :  { %v3582_v39 = vpop.f32.mrf.mxu0 }
0x15bd   :  { %v3597_v44 = vpack.c.bf16 %v3581_v18, %v3577_v17  ;;  %v3583_v35 = vadd.f32 %v3582_v39, %v3459_v9 }
0x15bf   :  { %v3771_v12 = vpack.c.bf16 %v3583_v35, %v3579_v19  ;;  %7145 = vmatprep.subr.bf16.mxu1 %v3597_v44 }
0x15c0   :  { %7146 = vmatpush3.bf16.xpose.msra.mxu1 %v3597_v44 }
0x15c1   :  { %7155 = vmatprep.subr.bf16.mxu1 %v3771_v12 }
0x1644   :  { %v3426_v49 = vpop.f32.mrf.mxu1 }
0x1645   :  { %v3427_v48 = vadd.f32 %v6406_v26, %v3426_v49 }
0x1646   :  { %v7143_v40 = vpop.f32.mrf.mxu1 }
0x1647   :  { %v3587_v57 = vmul.f32 %v8951_v42, %v3427_v48  ;;  %v3585_v25 = vmul.f32 %v8942_v32, %v3427_v48  ;;  %v3589_v45 = vmul.f32 %v8954_v43, %v3427_v48  ;;  %v3591_v7 = vmul.f32 %v8966_v50, %v3427_v48 }
0x1648   :  { %v3429_v47 = vpop.f32.mrf.mxu1 }
0x1649   :  { %v3430_v53 = vadd.f32 %v6406_v26, %v3429_v47 }
0x164a   :  { %v7144_v58 = vpop.f32.mrf.mxu1 }
0x164b   :  { %v3588_v10 = vmul.f32 %v8951_v42, %v3430_v53  ;;  %v3586_v36 = vmul.f32 %v8942_v32, %v3430_v53  ;;  %v3590_v62 = vmul.f32 %v8954_v43, %v3430_v53  ;;  %v3592_v22 = vmul.f32 %v8966_v50, %v3430_v53 }
0x164d   :  { %v3593_v63 = vpack.c.bf16 %v3586_v36, %v3585_v25  ;;  %v3594_v59 = vpack.c.bf16 %v3588_v10, %v3587_v57  ;;  %v3595_v51 = vpack.c.bf16 %v3590_v62, %v3589_v45  ;;  %v3596_v56 = vpack.c.bf16 %v3592_v22, %v3591_v7 }
0x164f   :  { %7147 = vmatprep.mubr.bf16.mxu1 %v3593_v63 }
0x1650   :  { %7148 = vmatmul.mubr.bf16.vlgmr.msra.gmra.mxu1 %v3594_v59 }
0x1651   :  { %7156 = vmatpush3.bf16.msra.mxu1 %v3771_v12  ;;  %7151 = vmatprep.mubr.bf16.mxu1 %v3595_v51 }
0x1652   :  { %7165 = vmatprep.subr.bf16.mxu1 %v8609_v1 }
0x1658   :  { %7152 = vmatmul.mubr.bf16.gmra.mxu1 %v3596_v56 }
0x1710   :  { %v7149_v4 = vpop.f32.mrf.mxu1 }
0x1711   :  { %v3665_v13 = vmul.f32 0.35355338, %v7149_v4 }
0x1712   :  { %v3632_v5 = vpop.f32.mrf.mxu1 }
0x1713   :  { %v3663_v2 = vmul.f32 0.35355338, %v3632_v5  ;;  %v3673_v31 = vadd.f32 %v3665_v13, %v8996_v11 }
0x1714   :  { %v7150_v3 = vpop.f32.mrf.mxu1 }
0x1715   :  { %v3671_v8 = vadd.f32 %v3663_v2, %v8999_v15  ;;  %v3666_v24 = vmul.f32 0.35355338, %v7150_v3  ;;  %v3685_v17 = vsel %vm986_vm14, %v3673_v31, -inf }
0x1716   :  { %v3635_v14 = vpop.f32.mrf.mxu1 }
0x1717   :  { %v3664_v20 = vmul.f32 0.35355338, %v3635_v14  ;;  %v3679_v28 = vsel %vm986_vm14, %v3671_v8, -inf  ;;  %v3674_v6 = vadd.f32 %v3666_v24, %v9003_v21 }
0x1718   :  { %3680 = vmax.xlane.f32.xlu0 %v3679_v28  ;;  %v7153_v33 = vpop.f32.mrf.mxu1 }
0x1719   :  { %v3672_v61 = vadd.f32 %v3664_v20, %v9008_v34  ;;  %v3669_v9 = vmul.f32 0.35355338, %v7153_v33  ;;  %v3688_v35 = vsel %vm986_vm14, %v3674_v6, -inf }
0x171a   :  { %v3648_v38 = vpop.f32.mrf.mxu1 }
0x171b   :  { %v3667_v16 = vmul.f32 0.35355338, %v3648_v38  ;;  %v3682_v18 = vsel %vm986_vm14, %v3672_v61, -inf  ;;  %v3677_v48 = vadd.f32 %v3669_v9, %v9017_v52 }
0x171c   :  { %3686 = vmax.xlane.f32.xlu0 %v3685_v17  ;;  %3683 = vmax.xlane.f32.xlu1 %v3682_v18  ;;  %v7154_v39 = vpop.f32.mrf.mxu1 }
0x171d   :  { %v3675_v19 = vadd.f32 %v3667_v16, %v9014_v46  ;;  %v3670_v12 = vmul.f32 0.35355338, %v7154_v39  ;;  %v3697_v47 = vsel %vm986_vm14, %v3677_v48, -inf }
0x171e   :  { %v3651_v44 = vpop.f32.mrf.mxu1 }
0x171f   :  { %v3668_v26 = vmul.f32 0.35355338, %v3651_v44  ;;  %v3691_v49 = vsel %vm986_vm14, %v3675_v19, -inf  ;;  %v3678_v57 = vadd.f32 %v3670_v12, %v9024_v60 }
0x1720   :  { %3689 = vmax.xlane.f32.xlu1 %v3688_v35  ;;  %3692 = vmax.xlane.f32.xlu0 %v3691_v49 }
0x1721   :  { %v3676_v40 = vadd.f32 %v3668_v26, %v9020_v55  ;;  %v3700_v58 = vsel %vm986_vm14, %v3678_v57, -inf }
0x1723   :  { %v3694_v53 = vsel %vm986_vm14, %v3676_v40, -inf }
0x1724   :  { %3698 = vmax.xlane.f32.xlu0 %v3697_v47  ;;  %3695 = vmax.xlane.f32.xlu1 %v3694_v53 }
0x1728   :  { %3701 = vmax.xlane.f32.xlu1 %v3700_v58 }
0x17a1   :  { %v3681_v10 = vpop.xlane.xlu0 %3680 }
0x17a2   :  { %v3703_v25 = vsub.f32 %v3671_v8, %v3681_v10 }
0x17a4   :  { %v3711_v36 = vmul.f32 1.442695, %v3703_v25 }
0x17a5   :  { %v3687_v62 = vpop.xlane.xlu0 %3686  ;;  %v3684_v63 = vpop.xlane.xlu1 %3683 }
0x17a6   :  { %7911 = vpow2.f32 %v3711_v36  ;;  %v3705_v59 = vsub.f32 %v3673_v31, %v3687_v62  ;;  %v3704_v45 = vsub.f32 %v3672_v61, %v3684_v63 }
0x17a8   :  { %v3715_v51 = vmul.f32 1.442695, %v3705_v59  ;;  %v3713_v22 = vmul.f32 1.442695, %v3704_v45 }
0x17a9   :  { %v3690_v7 = vpop.xlane.xlu1 %3689  ;;  %v3693_v56 = vpop.xlane.xlu0 %3692 }
0x17aa   :  { %7913 = vpow2.f32 %v3715_v51  ;;  %v3706_v4 = vsub.f32 %v3674_v6, %v3690_v7  ;;  %v3707_v5 = vsub.f32 %v3675_v19, %v3693_v56 }
0x17ab   :  { %7915 = vpow2.f32 %v3713_v22 }
0x17ac   :  { %v3717_v13 = vmul.f32 1.442695, %v3706_v4  ;;  %v3719_v2 = vmul.f32 1.442695, %v3707_v5 }
0x17ad   :  { %v3699_v3 = vpop.xlane.xlu0 %3698  ;;  %v3696_v24 = vpop.xlane.xlu1 %3695 }
0x17ae   :  { %7917 = vpow2.f32 %v3717_v13  ;;  %v3709_v8 = vsub.f32 %v3677_v48, %v3699_v3  ;;  %v3708_v14 = vsub.f32 %v3676_v40, %v3696_v24  ;;  %v7663_v3 = vld [vmem:[#allocation20 + $0x38] sm:$0xff]  }
0x17af   :  { %7919 = vpow2.f32 %v3719_v2 }
0x17b0   :  { %v3723_v20 = vmul.f32 1.442695, %v3709_v8  ;;  %v3721_v28 = vmul.f32 1.442695, %v3708_v14 }
0x17b1   :  { %v3702_v31 = vpop.xlane.xlu1 %3701 }
0x17b2   :  { %7921 = vpow2.f32 %v3723_v20  ;;  %v3710_v33 = vsub.f32 %v3678_v57, %v3702_v31  ;;  %v7664_v31 = vld [vmem:[#allocation20 + $0x30] sm:$0xff]  }
0x17b3   :  { %v7912_v61 = vpop.eup %7911  ;;  %7923 = vpow2.f32 %v3721_v28 }
0x17b4   :  { %v3725_v38 = vmul.f32 1.442695, %v3710_v33  ;;  %v3727_v6 = vsel %vm986_vm14, %v7912_v61, 0.0 }
0x17b5   :  { %3728 = vadd.xlane.f32.xlu0 %v3727_v6 }
0x17b6   :  { %7925 = vpow2.f32 %v3725_v38 }
0x17b7   :  { %v7914_v9 = vpop.eup %7913 }
0x17b8   :  { %v7916_v16 = vpop.eup %7915  ;;  %v3733_v17 = vsel %vm986_vm14, %v7914_v9, 0.0 }
0x17b9   :  { %3734 = vadd.xlane.f32.xlu0 %v3733_v17  ;;  %v3730_v18 = vsel %vm986_vm14, %v7916_v16, 0.0  ;;  %v7666_v17 = vld [vmem:[#allocation20 + $0x20] sm:$0xff]  }
0x17ba   :  { %3731 = vadd.xlane.f32.xlu1 %v3730_v18  ;;  %v7667_v18 = vld [vmem:[#allocation20 + $0x18] sm:$0xff]  }
0x17bb   :  { %v7918_v39 = vpop.eup %7917 }
0x17bc   :  { %v7920_v19 = vpop.eup %7919  ;;  %v3736_v44 = vsel %vm986_vm14, %v7918_v39, 0.0 }
0x17bd   :  { %v3739_v35 = vsel %vm986_vm14, %v7920_v19, 0.0 }
0x17be   :  { %3740 = vadd.xlane.f32.xlu0 %v3739_v35  ;;  %3737 = vadd.xlane.f32.xlu1 %v3736_v44  ;;  %v7670_v44 = vld [vmem:[#allocation20] sm:$0xff]  }
0x17bf   :  { %v7922_v12 = vpop.eup %7921 }
0x17c0   :  { %v7924_v26 = vpop.eup %7923  ;;  %v3745_v49 = vsel %vm986_vm14, %v7922_v12, 0.0 }
0x17c1   :  { %v3742_v48 = vsel %vm986_vm14, %v7924_v26, 0.0 }
0x17c2   :  { %3746 = vadd.xlane.f32.xlu0 %v3745_v49  ;;  %3743 = vadd.xlane.f32.xlu1 %v3742_v48 }
0x17c3   :  { %v7926_v40 = vpop.eup %7925 }
0x17c4   :  { %v3748_v47 = vsel %vm986_vm14, %v7926_v40, 0.0 }
0x17c6   :  { %3749 = vadd.xlane.f32.xlu1 %v3748_v47 }
0x183e   :  { %v3729_v53 = vpop.xlane.xlu0 %3728 }
0x183f   :  { %7927 = vrcp.f32 %v3729_v53 }
0x1842   :  { %v3735_v57 = vpop.xlane.xlu0 %3734 }
0x1843   :  { %v3732_v58 = vpop.xlane.xlu1 %3731 }
0x1844   :  { %7929 = vrcp.f32 %v3732_v58 }
0x1845   :  { %7931 = vrcp.f32 %v3735_v57 }
0x1847   :  { %v3741_v10 = vpop.xlane.xlu0 %3740  ;;  %v3738_v25 = vpop.xlane.xlu1 %3737 }
0x1848   :  { %7933 = vrcp.f32 %v3738_v25 }
0x1849   :  { %7935 = vrcp.f32 %v3741_v10 }
0x184b   :  { %v3747_v36 = vpop.xlane.xlu0 %3746  ;;  %v3744_v62 = vpop.xlane.xlu1 %3743 }
0x184c   :  { %7937 = vrcp.f32 %v3744_v62  ;;  %v7928_v63 = vpop.eup %7927 }
0x184d   :  { %7939 = vrcp.f32 %v3747_v36  ;;  %v3759_v51 = vmul.f32 %v7928_v63, %v7912_v61 }
0x184f   :  { %v3750_v59 = vpop.xlane.xlu1 %3749 }
0x1850   :  { %7941 = vrcp.f32 %v3750_v59 }
0x1851   :  { %v7930_v45 = vpop.eup %7929 }
0x1852   :  { %v3760_v22 = vmul.f32 %v7930_v45, %v7916_v16  ;;  %v7932_v7 = vpop.eup %7931  ;;  %v7665_v16 = vld [vmem:[#allocation20 + $0x28] sm:$0xff]  }
0x1853   :  { %v3761_v5 = vmul.f32 %v7932_v7, %v7914_v9 }
0x1854   :  { %v3767_v56 = vpack.c.bf16 %v3760_v22, %v3759_v51 }
0x1855   :  { %v7934_v4 = vpop.eup %7933 }
0x1856   :  { %7157 = vmatprep.mubr.msk.bf16.mxu1 %vm986_vm14, %v3767_v56  ;;  %v3762_v13 = vmul.f32 %v7934_v4, %v7918_v39  ;;  %v7936_v2 = vpop.eup %7935  ;;  %v7668_v39 = vld [vmem:[#allocation20 + $0x10] sm:$0xff]  }
0x1857   :  { %v3763_v20 = vmul.f32 %v7936_v2, %v7920_v19  ;;  %v7669_v19 = vld [vmem:[#allocation20 + $0x8] sm:$0xff]  }
0x1858   :  { %v3768_v24 = vpack.c.bf16 %v3762_v13, %v3761_v5  ;;  %v6435_v13 = vld [vmem:[%s9800_s27] ss:$0 sm:$0xff] }
0x1859   :  { %v7938_v8 = vpop.eup %7937 }
0x185a   :  { %v7940_v14 = vpop.eup %7939  ;;  %7158 = vmatmul.mubr.msk.bf16.vlgmr.msra.gmra.mxu1 %vm986_vm14, %v3768_v24  ;;  %v3764_v28 = vmul.f32 %v7938_v8, %v7924_v26 }
0x185b   :  { %7166 = vmatpush3.bf16.msra.mxu1 %v7663_v3  ;;  %v3765_v38 = vmul.f32 %v7940_v14, %v7922_v12 }
0x185c   :  { %v3769_v61 = vpack.c.bf16 %v3764_v28, %v3763_v20  ;;  %7167 = vmatprep.subr.bf16.mxu1 %v8609_v1 }
0x185d   :  { %v7942_v33 = vpop.eup %7941 }
0x185e   :  { %v3766_v6 = vmul.f32 %v7942_v33, %v7926_v40  ;;  %7161 = vmatprep.mubr.msk.bf16.mxu1 %vm986_vm14, %v3769_v61  ;;  %v7671_v33 = vld [vmem:[#allocation23 + $0x38] sm:$0xff]  }
0x185f   :  { %7168 = vmatpush3.bf16.msra.mxu1 %v7664_v31  ;;  %7186 = vmatpush3.bf16.msra.mxu0 %v7671_v33 }
0x1860   :  { %v3770_v9 = vpack.c.bf16 %v3766_v6, %v3765_v38  ;;  %7169 = vmatprep.subr.bf16.mxu1 %v8609_v1  ;;  %7187 = vmatprep.subr.bf16.mxu0 %v8609_v1 }
0x1862   :  { %7162 = vmatmul.mubr.msk.bf16.gmra.mxu1 %vm986_vm14, %v3770_v9 }
0x1863   :  { %7181 = vmatprep.mubr.msk.bf16.mxu1 %vm8610_vm10, %v8609_v1  ;;  %7170 = vmatpush3.bf16.msra.mxu1 %v7665_v16 }
0x1864   :  { %7171 = vmatprep.subr.bf16.mxu1 %v8609_v1 }
0x1867   :  { %7172 = vmatpush3.bf16.msra.mxu1 %v7666_v17 }
0x1868   :  { %7173 = vmatprep.subr.bf16.mxu1 %v8609_v1 }
0x186b   :  { %7174 = vmatpush3.bf16.msra.mxu1 %v7667_v18 }
0x186c   :  { %7175 = vmatprep.subr.bf16.mxu1 %v8609_v1 }
0x186f   :  { %7176 = vmatpush3.bf16.msra.mxu1 %v7668_v39 }
0x1870   :  { %7177 = vmatprep.subr.bf16.mxu1 %v8609_v1 }
0x1873   :  { %7178 = vmatpush3.bf16.msra.mxu1 %v7669_v19 }
0x1874   :  { %7179 = vmatprep.subr.bf16.mxu1 %v8609_v1 }
0x1877   :  { %7180 = vmatpush3.bf16.msra.mxu1 %v7670_v44  ;;  %v7673_v44 = vld [vmem:[#allocation23 + $0x28] sm:$0xff]  }
0x1878   :  { %7205 = vmatprep.subr.bf16.mxu1 %v8609_v1 }
0x191a   :  { %v7159_v35 = vpop.f32.mrf.mxu1 }
0x191b   :  { %v3851_v53 = vmul.f32 %v7159_v35, %v8951_v42  ;;  %v7674_v35 = vld [vmem:[#allocation23 + $0x20] sm:$0xff]  }
0x191c   :  { %v3818_v12 = vpop.f32.mrf.mxu1 }
0x191d   :  { %v3849_v40 = vmul.f32 %v8942_v32, %v3818_v12  ;;  %v7675_v12 = vld [vmem:[#allocation23 + $0x18] sm:$0xff]  }
0x191e   :  { %v7160_v26 = vpop.f32.mrf.mxu1 }
0x191f   :  { %v3853_v25 = vadd.f32 %v3851_v53, %v3849_v40  ;;  %v3852_v36 = vmul.f32 %v7160_v26, %v8951_v42  ;;  %v7676_v26 = vld [vmem:[#allocation23 + $0x10] sm:$0xff]   ;;  %v7679_v40 = vld [vmem:[#allocation26 + $0x38] sm:$0xff]  }
0x1920   :  { %v3821_v49 = vpop.f32.mrf.mxu1  ;;  %v7681_v53 = vld [vmem:[#allocation26 + $0x28] sm:$0xff]  }
0x1921   :  { %v3850_v57 = vmul.f32 %v8942_v32, %v3821_v49  ;;  %v7677_v49 = vld [vmem:[#allocation23 + $0x8] sm:$0xff]  }
0x1922   :  { %v7163_v48 = vpop.f32.mrf.mxu1 }
0x1923   :  { %v3854_v63 = vadd.f32 %v3852_v36, %v3850_v57  ;;  %v3859_v51 = vmul.f32 %v7163_v48, %v8966_v50  ;;  %v7678_v48 = vld [vmem:[#allocation23] sm:$0xff]  }
0x1924   :  { %v3834_v47 = vpop.f32.mrf.mxu1  ;;  %v7682_v57 = vld [vmem:[#allocation26 + $0x20] sm:$0xff]  }
0x1925   :  { %v3855_v58 = vmul.f32 %v8954_v43, %v3834_v47  ;;  %v7680_v47 = vld [vmem:[#allocation26 + $0x30] sm:$0xff]  }
0x1926   :  { %v7164_v10 = vpop.f32.mrf.mxu1 }
0x1927   :  { %v3857_v59 = vadd.f32 %v3855_v58, %v3853_v25  ;;  %v3860_v22 = vmul.f32 %v7164_v10, %v8966_v50  ;;  %v7683_v58 = vld [vmem:[#allocation26 + $0x18] sm:$0xff]  }
0x1928   :  { %v3837_v62 = vpop.f32.mrf.mxu1 }
0x1929   :  { %v3856_v45 = vmul.f32 %v8954_v43, %v3837_v62  ;;  %v3861_v56 = vadd.f32 %v3859_v51, %v3857_v59 }
0x192b   :  { %v3858_v7 = vadd.f32 %v3856_v45, %v3854_v63 }
0x192d   :  { %v3862_v4 = vadd.f32 %v3860_v22, %v3858_v7  ;;  %v6444_v22 = vld [vmem:[%s9801_s21] ss:$0 sm:$0xff] }
0x192f   :  { %v3880_v5 = vpack.c.bf16 %v3862_v4, %v3861_v56 }
0x1931   :  { %7182 = vmatmul.mubr.bf16.vlgmr.msra.gmra.mxu1 %v3880_v5  ;;  %v6445_v5 = vld [vmem:[#allocation22] ss:$0 sm:$0xff] }
0x1932   :  { %7221 = vmatprep.mubr.msk.bf16.mxu1 %vm8610_vm10, %v8609_v1  ;;  %7206 = vmatpush3.bf16.msra.mxu1 %v7679_v40  ;;  %v7689_v40 = vld [vmem:[%s9792_s11 + $0x16c] ss:$12 sps:$4 sm:$0xff]  }
0x1933   :  { %7207 = vmatprep.subr.bf16.mxu1 %v8609_v1 }
0x1936   :  { %7208 = vmatpush3.bf16.msra.mxu1 %v7680_v47  ;;  %v7690_v47 = vld [vmem:[%s9792_s11 + $0x170] ss:$12 sps:$4 sm:$0xff]  }
0x1937   :  { %7209 = vmatprep.subr.bf16.mxu1 %v8609_v1 }
0x193a   :  { %7210 = vmatpush3.bf16.msra.mxu1 %v7681_v53 }
0x193b   :  { %7211 = vmatprep.subr.bf16.mxu1 %v8609_v1 }
0x193e   :  { %7212 = vmatpush3.bf16.msra.mxu1 %v7682_v57 }
0x193f   :  { %7213 = vmatprep.subr.bf16.mxu1 %v8609_v1 }
0x1942   :  { %7214 = vmatpush3.bf16.msra.mxu1 %v7683_v58 }
0x1943   :  { %7215 = vmatprep.subr.bf16.mxu1 %v8609_v1 }
0x19f1   :  { %v3969_v2 = vpop.f32.mrf.mxu1 }
0x19f2   :  { %v3970_v3 = vadd.f32 %v6435_v13, %v3969_v2 }
0x19f3   :  { %v7183_v24 = vpop.f32.mrf.mxu1 }
0x19f4   :  { %v3976_v8 = vadd.f32 %v3970_v3, %v9413_v29 }
0x19f5   :  { %v3972_v14 = vpop.f32.mrf.mxu1 }
0x19f6   :  { %v3973_v20 = vadd.f32 %v6435_v13, %v3972_v14  ;;  %3980 = vadd.xlane.f32.xlu0 %v3976_v8  ;;  %v7685_v14 = vld [vmem:[#allocation26 + $0x8] sm:$0xff]  }
0x19f7   :  { %v7184_v28 = vpop.f32.mrf.mxu1 }
0x19f8   :  { %v3977_v31 = vadd.f32 %v3973_v20, %v9415_v30  ;;  %v7672_v30 = vld [vmem:[#allocation23 + $0x30] sm:$0xff]   ;;  %v7686_v20 = vld [vmem:[#allocation26] sm:$0xff]   ;;  %v6446_v28 = vld [vmem:[#allocation25] ss:$0 sm:$0xff] }
0x19f9   :  { %7188 = vmatpush3.bf16.msra.mxu0 %v7672_v30 }
0x19fa   :  { %3982 = vadd.xlane.f32.xlu1 %v3977_v31  ;;  %7189 = vmatprep.subr.bf16.mxu0 %v8609_v1 }
0x19fd   :  { %7190 = vmatpush3.bf16.msra.mxu0 %v7673_v44 }
0x19fe   :  { %7191 = vmatprep.subr.bf16.mxu0 %v8609_v1 }
0x1a01   :  { %7192 = vmatpush3.bf16.msra.mxu0 %v7674_v35 }
0x1a02   :  { %7193 = vmatprep.subr.bf16.mxu0 %v8609_v1 }
0x1a05   :  { %7194 = vmatpush3.bf16.msra.mxu0 %v7675_v12 }
0x1a06   :  { %7195 = vmatprep.subr.bf16.mxu0 %v8609_v1 }
0x1a09   :  { %7196 = vmatpush3.bf16.msra.mxu0 %v7676_v26 }
0x1a0a   :  { %7197 = vmatprep.subr.bf16.mxu0 %v8609_v1 }
0x1a0d   :  { %7198 = vmatpush3.bf16.msra.mxu0 %v7677_v49 }
0x1a0e   :  { %7199 = vmatprep.subr.bf16.mxu0 %v8609_v1 }
0x1a11   :  { %7200 = vmatpush3.bf16.msra.mxu0 %v7678_v48  ;;  %v7687_v48 = vld [vmem:[%s9792_s11 + $0x168] ss:$12 sps:$4 sm:$0xff]  }
0x1a12   :  { %4472 = vmatprep.subr.bf16.mxu0 %v7689_v40  ;;  %v6465_v40 = vld [vmem:[#allocation31] ss:$0 sm:$0xff] }
0x1a7f   :  { %v3981_v61 = vpop.xlane.xlu0 %3980 }
0x1a80   :  { %v3984_v38 = vmul.f32 0.03125, %v3981_v61 }
0x1a82   :  { %v3986_v6 = vsub.f32 %v3976_v8, %v3984_v38  ;;  %v7684_v8 = vld [vmem:[#allocation26 + $0x10] sm:$0xff]  }
0x1a83   :  { %v3983_v9 = vpop.xlane.xlu1 %3982  ;;  %7216 = vmatpush3.bf16.msra.mxu1 %v7684_v8  ;;  %v7703_v8 = vld [vmem:[%s9792_s11 + $0x108] ss:$12 sps:$4 sm:$0xff]  }
0x1a84   :  { %v3985_v16 = vmul.f32 0.03125, %v3983_v9  ;;  %v3988_v17 = vmul.f32 %v9088_v37, %v3986_v6  ;;  %7217 = vmatprep.subr.bf16.mxu1 %v8609_v1 }
0x1a86   :  { %v3987_v18 = vsub.f32 %v3977_v31, %v3985_v16  ;;  %v3990_v29 = vmul.f32 %v3988_v17, %v3988_v17 }
0x1a87   :  { %7218 = vmatpush3.bf16.msra.mxu1 %v7685_v14  ;;  %v7706_v14 = vld [vmem:[%s9792_s11 + $0x110] ss:$12 sps:$4 sm:$0xff]  }
0x1a88   :  { %3992 = vadd.xlane.f32.xlu0 %v3990_v29  ;;  %v3989_v39 = vmul.f32 %v9088_v37, %v3987_v18  ;;  %7219 = vmatprep.subr.bf16.mxu1 %v8609_v1  ;;  %v6455_v29 = vld [vmem:[#allocation28] ss:$0 sm:$0xff] }
0x1a8a   :  { %v3991_v19 = vmul.f32 %v3989_v39, %v3989_v39 }
0x1a8b   :  { %7220 = vmatpush3.bf16.msra.mxu1 %v7686_v20  ;;  %v7709_v20 = vld [vmem:[%s9792_s11 + $0xf4] ss:$12 sps:$4 sm:$0xff]  }
0x1a8c   :  { %3994 = vadd.xlane.f32.xlu1 %v3991_v19  ;;  %7225 = vmatprep.subr.bf16.mxu1 %v8609_v1 }
0x1b11   :  { %v3993_v10 = vpop.xlane.xlu0 %3992 }
0x1b12   :  { %v3996_v25 = vmul.f32 0.03125, %v3993_v10 }
0x1b14   :  { %v3998_v36 = vadd.f32 1e-05, %v3996_v25 }
0x1b15   :  { %v3995_v62 = vpop.xlane.xlu1 %3994 }
0x1b16   :  { %7943 = vrsqrt.f32 %v3998_v36  ;;  %v3997_v63 = vmul.f32 0.03125, %v3995_v62 }
0x1b18   :  { %v3999_v59 = vadd.f32 1e-05, %v3997_v63 }
0x1b1a   :  { %7945 = vrsqrt.f32 %v3999_v59 }
0x1b23   :  { %v7944_v45 = vpop.eup %7943 }
0x1b24   :  { %v4002_v51 = vmul.f32 %v7944_v45, %v3988_v17 }
0x1b26   :  { %v4010_v4 = vmul.f32 %v6444_v22, %v4002_v51  ;;  %v7693_v51 = vld [vmem:[%s9792_s11 + $0x154] ss:$12 sps:$4 sm:$0xff]  }
0x1b27   :  { %v7946_v7 = vpop.eup %7945 }
0x1b28   :  { %v4003_v56 = vmul.f32 %v7946_v7, %v3989_v39  ;;  %v4018_v2 = vadd.f32 %v6445_v5, %v4010_v4  ;;  %v7694_v7 = vld [vmem:[%s9792_s11 + $0x158] ss:$12 sps:$4 sm:$0xff]  }
0x1b29   :  { %v7695_v4 = vld [vmem:[%s9792_s11 + $0x138] ss:$12 sps:$4 sm:$0xff]  }
0x1b2a   :  { %v4011_v13 = vmul.f32 %v6444_v22, %v4003_v56  ;;  %v7691_v22 = vld [vmem:[%s9792_s11 + $0x150] ss:$12 sps:$4 sm:$0xff]  }
0x1b2b   :  { %v7697_v56 = vld [vmem:[%s9792_s11 + $0x13c] ss:$12 sps:$4 sm:$0xff]  }
0x1b2c   :  { %v4019_v3 = vadd.f32 %v6445_v5, %v4011_v13  ;;  %v7698_v5 = vld [vmem:[%s9792_s11 + $0x140] ss:$12 sps:$4 sm:$0xff]  }
0x1b2d   :  { %v7699_v13 = vld [vmem:[%s9792_s11 + $0x120] ss:$12 sps:$4 sm:$0xff]  }
0x1b2e   :  { %v4037_v24 = vpack.c.bf16 %v4019_v3, %v4018_v2 }
0x1b30   :  { %7202 = vmatmul.mubr.bf16.vlgmr.msra.gmra.mxu0 %v4037_v24  ;;  %v7705_v24 = vld [vmem:[%s9792_s11 + $0x10c] ss:$12 sps:$4 sm:$0xff]  }
0x1b31   :  { %4504 = vmatprep.mubr.bf16.mxu0 %v8608_v0  ;;  %4473 = vmatpush1.bf16.msra.mxu0 %v7687_v48 }
0x1b32   :  { %4474 = vmatprep.subr.bf16.mxu0 %v7693_v51 }
0x1b35   :  { %4475 = vmatpush1.bf16.msra.mxu0 %v7691_v22 }
0x1b36   :  { %4476 = vmatprep.subr.bf16.mxu0 %v7697_v56 }
0x1b39   :  { %4477 = vmatpush1.bf16.msra.mxu0 %v7695_v4 }
0x1bf0   :  { %v4126_v31 = vpop.f32.mrf.mxu0 }
0x1bf1   :  { %v4127_v61 = vadd.f32 %v6446_v28, %v4126_v31  ;;  %v7710_v31 = vld [vmem:[%s9792_s11 + $0xf8] ss:$12 sps:$4 sm:$0xff]  }
0x1bf2   :  { %v7203_v33 = vpop.f32.mrf.mxu0 }
0x1bf3   :  { %v4133_v16 = vmax.f32 %v4127_v61, 0.0  ;;  %v7713_v33 = vld [vmem:[%s9792_s11 + $0xdc] ss:$12 sps:$4 sm:$0xff]   ;;  %v7711_v61 = vld [vmem:[%s9792_s11 + $0xd8] ss:$12 sps:$4 sm:$0xff]  }
0x1bf4   :  { %v4129_v38 = vpop.f32.mrf.mxu0 }
0x1bf5   :  { %v4130_v6 = vadd.f32 %v6446_v28, %v4129_v38  ;;  %v7707_v28 = vld [vmem:[%s9792_s11 + $0xf0] ss:$12 sps:$4 sm:$0xff]   ;;  %v7714_v38 = vld [vmem:[%s9792_s11 + $0xe0] ss:$12 sps:$4 sm:$0xff]  }
0x1bf6   :  { %v7204_v9 = vpop.f32.mrf.mxu0 }
0x1bf7   :  { %v4134_v17 = vmax.f32 %v4130_v6, 0.0  ;;  %v7717_v6 = vld [vmem:[%s9792_s11 + $0xc4] ss:$12 sps:$4 sm:$0xff]   ;;  %v7715_v9 = vld [vmem:[%s9792_s11 + $0xc0] ss:$12 sps:$4 sm:$0xff]  }
0x1bf9   :  { %v4152_v18 = vpack.c.bf16 %v4134_v17, %v4133_v16  ;;  %v7718_v16 = vld [vmem:[%s9792_s11 + $0xc8] ss:$12 sps:$4 sm:$0xff]  }
0x1bfb   :  { %7222 = vmatmul.mubr.bf16.vlgmr.msra.gmra.mxu1 %v4152_v18 }
0x1bfc   :  { %7241 = vmatprep.mubr.msk.bf16.mxu1 %vm8610_vm10, %v8609_v1  ;;  %7226 = vmatpush3.bf16.msra.mxu1 %v7690_v47 }
0x1bfd   :  { %7227 = vmatprep.subr.bf16.mxu1 %v8609_v1 }
0x1c00   :  { %7228 = vmatpush3.bf16.msra.mxu1 %v7694_v7 }
0x1c01   :  { %7229 = vmatprep.subr.bf16.mxu1 %v8609_v1 }
0x1c04   :  { %7230 = vmatpush3.bf16.msra.mxu1 %v7698_v5 }
0x1c05   :  { %7231 = vmatprep.subr.bf16.mxu1 %v8609_v1 }
0x1cbb   :  { %v4241_v39 = vpop.f32.mrf.mxu1 }
0x1cbc   :  { %v4242_v19 = vadd.f32 %v6455_v29, %v4241_v39 }
0x1cbd   :  { %v7223_v30 = vpop.f32.mrf.mxu1 }
0x1cbe   :  { %v4248_v44 = vadd.f32 %v4242_v19, %v4018_v2  ;;  %v7701_v2 = vld [vmem:[%s9792_s11 + $0x124] ss:$12 sps:$4 sm:$0xff]  }
0x1cbf   :  { %v4244_v35 = vpop.f32.mrf.mxu1  ;;  %4478 = vmatprep.subr.bf16.mxu0 %v7701_v2 }
0x1cc0   :  { %v4245_v12 = vadd.f32 %v6455_v29, %v4244_v35  ;;  %4252 = vadd.xlane.f32.xlu0 %v4248_v44  ;;  %4479 = vmatpush1.bf16.msra.mxu0 %v7699_v13 }
0x1cc1   :  { %v7224_v26 = vpop.f32.mrf.mxu1  ;;  %4480 = vmatprep.subr.bf16.mxu0 %v7705_v24 }
0x1cc2   :  { %v4249_v49 = vadd.f32 %v4245_v12, %v4019_v3  ;;  %v7702_v3 = vld [vmem:[%s9792_s11 + $0x128] ss:$12 sps:$4 sm:$0xff]   ;;  %v6464_v12 = vld [vmem:[#allocation29] ss:$0 sm:$0xff] }
0x1cc3   :  { %7232 = vmatpush3.bf16.msra.mxu1 %v7702_v3 }
0x1cc4   :  { %4254 = vadd.xlane.f32.xlu1 %v4249_v49  ;;  %7233 = vmatprep.subr.bf16.mxu1 %v8609_v1 }
0x1cc5   :  { %4481 = vmatpush1.bf16.msra.mxu0 %v7703_v8 }
0x1cc6   :  { %4482 = vmatprep.subr.bf16.mxu0 %v7709_v20 }
0x1cc7   :  { %7234 = vmatpush3.bf16.msra.mxu1 %v7706_v14 }
0x1cc8   :  { %7235 = vmatprep.subr.bf16.mxu1 %v8609_v1 }
0x1cc9   :  { %4483 = vmatpush1.bf16.msra.mxu0 %v7707_v28 }
0x1cca   :  { %4484 = vmatprep.subr.bf16.mxu0 %v7713_v33 }
0x1ccb   :  { %7236 = vmatpush3.bf16.msra.mxu1 %v7710_v31 }
0x1ccc   :  { %7237 = vmatprep.subr.bf16.mxu1 %v8609_v1 }
0x1ccd   :  { %4485 = vmatpush1.bf16.msra.mxu0 %v7711_v61 }
0x1cce   :  { %4486 = vmatprep.subr.bf16.mxu0 %v7717_v6 }
0x1ccf   :  { %7238 = vmatpush3.bf16.msra.mxu1 %v7714_v38 }
0x1cd0   :  { %7239 = vmatprep.subr.bf16.mxu1 %v8609_v1 }
0x1cd1   :  { %4487 = vmatpush1.bf16.msra.mxu0 %v7715_v9 }
0x1cd3   :  { %7240 = vmatpush3.bf16.msra.mxu1 %v7718_v16 }
0x1cd4   :  { %7285 = vmatprep.subr.bf16.mxu1 %v8609_v1 }
0x1d49   :  { %v4253_v53 = vpop.xlane.xlu0 %4252 }
0x1d4a   :  { %v4256_v57 = vmul.f32 0.03125, %v4253_v53 }
0x1d4c   :  { %v4258_v58 = vsub.f32 %v4248_v44, %v4256_v57 }
0x1d4d   :  { %v4255_v10 = vpop.xlane.xlu1 %4254 }
0x1d4e   :  { %v4257_v25 = vmul.f32 0.03125, %v4255_v10  ;;  %v9509_v36 = vmul.f32 %v9088_v37, %v4258_v58  ;;  %v6498_v10 = vld [vmem:[%s9794_s13 + $0x3] sm:$0x7] }
0x1d4f   :  { %v4340_v56 = vrot.slane %v6498_v10, %v9045_v54 }
0x1d50   :  { %v4259_v62 = vsub.f32 %v4249_v49, %v4257_v25  ;;  %v4262_v63 = vmul.f32 %v9509_v36, %v9509_v36  ;;  %v4332_v25 = vrot.slane %v6498_v10, %v8926_v23 }
0x1d52   :  { %4264 = vadd.xlane.f32.xlu0 %v4262_v63  ;;  %v9514_v59 = vmul.f32 %v9088_v37, %v4259_v62  ;;  %v4336_v63 = vrot.slane %v6498_v10, %v8936_v27 }
0x1d54   :  { %v4263_v45 = vmul.f32 %v9514_v59, %v9514_v59 }
0x1d56   :  { %4266 = vadd.xlane.f32.xlu1 %v4263_v45 }
0x1ddb   :  { %v4265_v17 = vpop.xlane.xlu0 %4264 }
0x1ddc   :  { %v4268_v18 = vmul.f32 0.03125, %v4265_v17 }
0x1dde   :  { %v4270_v29 = vadd.f32 1e-05, %v4268_v18 }
0x1ddf   :  { %v4267_v39 = vpop.xlane.xlu1 %4266 }
0x1de0   :  { %7947 = vrsqrt.f32 %v4270_v29  ;;  %v4269_v19 = vmul.f32 0.03125, %v4267_v39 }
0x1de2   :  { %v4271_v30 = vadd.f32 1e-05, %v4269_v19 }
0x1de4   :  { %7949 = vrsqrt.f32 %v4271_v30 }
0x1ded   :  { %v7948_v44 = vpop.eup %7947 }
0x1dee   :  { %v4274_v35 = vmul.f32 %v7948_v44, %v9509_v36 }
0x1df0   :  { %v4282_v48 = vmul.f32 %v6464_v12, %v4274_v35 }
0x1df1   :  { %v7950_v26 = vpop.eup %7949 }
0x1df2   :  { %v4275_v49 = vmul.f32 %v7950_v26, %v9514_v59  ;;  %v9548_v53 = vadd.f32 %v6465_v40, %v4282_v48 }
0x1df4   :  { %v4283_v47 = vmul.f32 %v6464_v12, %v4275_v49 }
0x1df6   :  { %v9550_v57 = vadd.f32 %v6465_v40, %v4283_v47 }
0x1df8   :  { %v4327_v58 = vpack.c.bf16 %v9550_v57, %v9548_v53 }
0x1dfa   :  { %4505 = vmatmul.mubr.bf16.vlgmr.msra.gmra.mxu0 %v4327_v58  ;;  %7242 = vmatmul.mubr.bf16.vlgmr.msra.gmra.mxu1 %v4327_v58 }
0x1dfb   :  { %7301 = vmatprep.mubr.msk.bf16.mxu1 %vm8610_vm10, %v8609_v1 }
0x1eba   :  { %v4506_v36 = vpop.f32.mrf.mxu0  ;;  %v4549_v62 = vpop.f32.mrf.mxu1 }
0x1ebb   :  { %v4507_v51 = vadd.f32 %v4506_v36, %v4332_v25  ;;  %v4550_v20 = vadd.f32 %v4549_v62, %v4340_v56 }
0x1ebc   :  { %v4508_v59 = vpop.f32.mrf.mxu0  ;;  %v7243_v45 = vpop.f32.mrf.mxu1 }
0x1ebd   :  { %v4509_v5 = vadd.f32 %v4508_v59, %v4336_v63  ;;  %v4556_v8 = vmul.f32 %v8942_v32, %v4507_v51  ;;  %v4558_v38 = vmul.f32 %v8951_v42, %v4507_v51  ;;  %v4560_v6 = vmul.f32 %v8954_v43, %v4507_v51 }
0x1ebe   :  { %v4510_v22 = vpop.f32.mrf.mxu0  ;;  %v4552_v7 = vpop.f32.mrf.mxu1  ;;  %v4562_v18 = vmul.f32 %v8966_v50, %v4507_v51 }
0x1ebf   :  { %v4511_v4 = vadd.f32 %v4510_v22, %v4332_v25  ;;  %v4553_v3 = vadd.f32 %v4552_v7, %v4340_v56 }
0x1ec0   :  { %v4512_v13 = vpop.f32.mrf.mxu0  ;;  %v7244_v2 = vpop.f32.mrf.mxu1 }
0x1ec1   :  { %v4513_v24 = vadd.f32 %v4512_v13, %v4336_v63  ;;  %v4557_v14 = vmul.f32 %v8942_v32, %v4511_v4  ;;  %v4742_v33 = vpack.c.bf16 %v4553_v3, %v4550_v20  ;;  %v4559_v61 = vmul.f32 %v8951_v42, %v4511_v4 }
0x1ec2   :  { %v4561_v54 = vmul.f32 %v8954_v43, %v4511_v4  ;;  %v4563_v17 = vmul.f32 %v8966_v50, %v4511_v4 }
0x1ec3   :  { %v4568_v28 = vpack.c.bf16 %v4513_v24, %v4509_v5  ;;  %v4564_v31 = vpack.c.bf16 %v4557_v14, %v4556_v8  ;;  %v4565_v9 = vpack.c.bf16 %v4559_v61, %v4558_v38 }
0x1ec4   :  { %v4566_v16 = vpack.c.bf16 %v4561_v54, %v4560_v6  ;;  %v4567_v29 = vpack.c.bf16 %v4563_v17, %v4562_v18 }
0x1ec5   :  { %7245 = vmatprep.subr.bf16.mxu0 %v4568_v28  ;;  %7247 = vmatprep.mubr.bf16.mxu0 %v4564_v31 }
0x1ec6   :  { %7246 = vmatpush3.bf16.xpose.msra.mxu0 %v4568_v28 }
0x1ec7   :  { %7255 = vmatprep.subr.bf16.mxu0 %v4742_v33 }
0x1ecd   :  { %7248 = vmatmul.mubr.bf16.vlgmr.msra.gmra.mxu0 %v4565_v9 }
0x1ece   :  { %7251 = vmatprep.mubr.bf16.mxu0 %v4566_v16  ;;  %7256 = vmatpush3.bf16.msra.mxu0 %v4742_v33 }
0x1ecf   :  { %7265 = vmatprep.subr.bf16.mxu0 %v8609_v1 }
0x1ed5   :  { %7252 = vmatmul.mubr.bf16.gmra.mxu0 %v4567_v29 }
0x1f8d   :  { %v7249_v39 = vpop.f32.mrf.mxu0 }
0x1f8e   :  { %v4636_v30 = vmul.f32 0.35355338, %v7249_v39 }
0x1f8f   :  { %v4603_v19 = vpop.f32.mrf.mxu0 }
0x1f90   :  { %v4634_v44 = vmul.f32 0.35355338, %v4603_v19  ;;  %v4644_v48 = vadd.f32 %v4636_v30, %v8996_v11 }
0x1f91   :  { %v7250_v35 = vpop.f32.mrf.mxu0 }
0x1f92   :  { %v4642_v12 = vadd.f32 %v4634_v44, %v8999_v15  ;;  %v4637_v26 = vmul.f32 0.35355338, %v7250_v35  ;;  %v4656_v59 = vsel %vm986_vm14, %v4644_v48, -inf }
0x1f93   :  { %v4606_v49 = vpop.f32.mrf.mxu0 }
0x1f94   :  { %v4635_v40 = vmul.f32 0.35355338, %v4606_v49  ;;  %v4650_v47 = vsel %vm986_vm14, %v4642_v12, -inf  ;;  %v4645_v25 = vadd.f32 %v4637_v26, %v9003_v21 }
0x1f95   :  { %4651 = vmax.xlane.f32.xlu0 %v4650_v47  ;;  %v7253_v58 = vpop.f32.mrf.mxu0 }
0x1f96   :  { %v4643_v10 = vadd.f32 %v4635_v40, %v9008_v34  ;;  %v4640_v62 = vmul.f32 0.35355338, %v7253_v58  ;;  %v4659_v56 = vsel %vm986_vm14, %v4645_v25, -inf }
0x1f97   :  { %v4619_v36 = vpop.f32.mrf.mxu0 }
0x1f98   :  { %v4638_v63 = vmul.f32 0.35355338, %v4619_v36  ;;  %v4653_v45 = vsel %vm986_vm14, %v4643_v10, -inf  ;;  %v4648_v4 = vadd.f32 %v4640_v62, %v9017_v52 }
0x1f99   :  { %4657 = vmax.xlane.f32.xlu0 %v4656_v59  ;;  %4654 = vmax.xlane.f32.xlu1 %v4653_v45  ;;  %v7254_v51 = vpop.f32.mrf.mxu0 }
0x1f9a   :  { %v4646_v22 = vadd.f32 %v4638_v63, %v9014_v46  ;;  %v4641_v5 = vmul.f32 0.35355338, %v7254_v51  ;;  %v4668_v8 = vsel %vm986_vm14, %v4648_v4, -inf }
0x1f9b   :  { %v4622_v7 = vpop.f32.mrf.mxu0 }
0x1f9c   :  { %v4639_v13 = vmul.f32 0.35355338, %v4622_v7  ;;  %v4662_v2 = vsel %vm986_vm14, %v4646_v22, -inf  ;;  %v4649_v24 = vadd.f32 %v4641_v5, %v9024_v60 }
0x1f9d   :  { %4660 = vmax.xlane.f32.xlu1 %v4659_v56  ;;  %4663 = vmax.xlane.f32.xlu0 %v4662_v2 }
0x1f9e   :  { %v4647_v3 = vadd.f32 %v4639_v13, %v9020_v55  ;;  %v4671_v20 = vsel %vm986_vm14, %v4649_v24, -inf }
0x1fa0   :  { %v4665_v14 = vsel %vm986_vm14, %v4647_v3, -inf }
0x1fa1   :  { %4669 = vmax.xlane.f32.xlu0 %v4668_v8  ;;  %4666 = vmax.xlane.f32.xlu1 %v4665_v14 }
0x1fa5   :  { %4672 = vmax.xlane.f32.xlu1 %v4671_v20 }
0x201e   :  { %v4652_v28 = vpop.xlane.xlu0 %4651 }
0x201f   :  { %v4674_v31 = vsub.f32 %v4642_v12, %v4652_v28 }
0x2021   :  { %v4682_v33 = vmul.f32 1.442695, %v4674_v31 }
0x2022   :  { %v4658_v61 = vpop.xlane.xlu0 %4657  ;;  %v4655_v54 = vpop.xlane.xlu1 %4654 }
0x2023   :  { %7951 = vpow2.f32 %v4682_v33  ;;  %v4676_v38 = vsub.f32 %v4644_v48, %v4658_v61  ;;  %v4675_v6 = vsub.f32 %v4643_v10, %v4655_v54 }
0x2025   :  { %v4686_v9 = vmul.f32 1.442695, %v4676_v38  ;;  %v4684_v16 = vmul.f32 1.442695, %v4675_v6 }
0x2026   :  { %v4661_v17 = vpop.xlane.xlu1 %4660  ;;  %v4664_v18 = vpop.xlane.xlu0 %4663 }
0x2027   :  { %7953 = vpow2.f32 %v4686_v9  ;;  %v4677_v29 = vsub.f32 %v4645_v25, %v4661_v17  ;;  %v4678_v39 = vsub.f32 %v4646_v22, %v4664_v18 }
0x2028   :  { %7955 = vpow2.f32 %v4684_v16 }
0x2029   :  { %v4688_v19 = vmul.f32 1.442695, %v4677_v29  ;;  %v4690_v30 = vmul.f32 1.442695, %v4678_v39 }
0x202a   :  { %v4670_v44 = vpop.xlane.xlu0 %4669  ;;  %v4667_v35 = vpop.xlane.xlu1 %4666 }
0x202b   :  { %7957 = vpow2.f32 %v4688_v19  ;;  %v4680_v12 = vsub.f32 %v4648_v4, %v4670_v44  ;;  %v4679_v26 = vsub.f32 %v4647_v3, %v4667_v35 }
0x202c   :  { %7959 = vpow2.f32 %v4690_v30  ;;  %v7719_v30 = vld [vmem:[#allocation16 + $0x78] sm:$0xff]  }
0x202d   :  { %v4694_v49 = vmul.f32 1.442695, %v4680_v12  ;;  %v4692_v40 = vmul.f32 1.442695, %v4679_v26 }
0x202e   :  { %v4673_v48 = vpop.xlane.xlu1 %4672 }
0x202f   :  { %7961 = vpow2.f32 %v4694_v49  ;;  %v4681_v47 = vsub.f32 %v4649_v24, %v4673_v48 }
0x2030   :  { %v7952_v58 = vpop.eup %7951  ;;  %7963 = vpow2.f32 %v4692_v40  ;;  %v7720_v40 = vld [vmem:[#allocation16 + $0x70] sm:$0xff]  }
0x2031   :  { %v4696_v10 = vmul.f32 1.442695, %v4681_v47  ;;  %v4698_v25 = vsel %vm986_vm14, %v7952_v58, 0.0 }
0x2032   :  { %4699 = vadd.xlane.f32.xlu0 %v4698_v25 }
0x2033   :  { %7965 = vpow2.f32 %v4696_v10 }
0x2034   :  { %v7954_v36 = vpop.eup %7953 }
0x2035   :  { %v7956_v62 = vpop.eup %7955  ;;  %v4704_v63 = vsel %vm986_vm14, %v7954_v36, 0.0 }
0x2036   :  { %4705 = vadd.xlane.f32.xlu0 %v4704_v63  ;;  %v4701_v59 = vsel %vm986_vm14, %v7956_v62, 0.0  ;;  %v7723_v63 = vld [vmem:[#allocation16 + $0x58] sm:$0xff]  }
0x2037   :  { %4702 = vadd.xlane.f32.xlu1 %v4701_v59  ;;  %v7724_v59 = vld [vmem:[#allocation16 + $0x50] sm:$0xff]  }
0x2038   :  { %v7958_v45 = vpop.eup %7957 }
0x2039   :  { %v7960_v51 = vpop.eup %7959  ;;  %v4707_v22 = vsel %vm986_vm14, %v7958_v45, 0.0 }
0x203a   :  { %v4710_v7 = vsel %vm986_vm14, %v7960_v51, 0.0 }
0x203b   :  { %4711 = vadd.xlane.f32.xlu0 %v4710_v7  ;;  %4708 = vadd.xlane.f32.xlu1 %v4707_v22  ;;  %v7729_v22 = vld [vmem:[#allocation19 + $0xf4] ss:$8 sps:$4 sm:$0xff]  }
0x203c   :  { %v7962_v56 = vpop.eup %7961 }
0x203d   :  { %v7964_v4 = vpop.eup %7963  ;;  %v4716_v5 = vsel %vm986_vm14, %v7962_v56, 0.0 }
0x203e   :  { %v4713_v13 = vsel %vm986_vm14, %v7964_v4, 0.0 }
0x203f   :  { %4717 = vadd.xlane.f32.xlu0 %v4716_v5  ;;  %4714 = vadd.xlane.f32.xlu1 %v4713_v13 }
0x2040   :  { %v7966_v2 = vpop.eup %7965 }
0x2041   :  { %v4719_v3 = vsel %vm986_vm14, %v7966_v2, 0.0 }
0x2043   :  { %4720 = vadd.xlane.f32.xlu1 %v4719_v3 }
0x20bb   :  { %v4700_v24 = vpop.xlane.xlu0 %4699 }
0x20bc   :  { %7967 = vrcp.f32 %v4700_v24 }
0x20bf   :  { %v4706_v8 = vpop.xlane.xlu0 %4705 }
0x20c0   :  { %v4703_v14 = vpop.xlane.xlu1 %4702 }
0x20c1   :  { %7969 = vrcp.f32 %v4703_v14 }
0x20c2   :  { %7971 = vrcp.f32 %v4706_v8 }
0x20c4   :  { %v4712_v20 = vpop.xlane.xlu0 %4711  ;;  %v4709_v28 = vpop.xlane.xlu1 %4708 }
0x20c5   :  { %7973 = vrcp.f32 %v4709_v28 }
0x20c6   :  { %7975 = vrcp.f32 %v4712_v20 }
0x20c8   :  { %v4718_v31 = vpop.xlane.xlu0 %4717  ;;  %v4715_v33 = vpop.xlane.xlu1 %4714 }
0x20c9   :  { %7977 = vrcp.f32 %v4715_v33  ;;  %v7968_v61 = vpop.eup %7967 }
0x20ca   :  { %7979 = vrcp.f32 %v4718_v31  ;;  %v4730_v6 = vmul.f32 %v7968_v61, %v7952_v58 }
0x20cc   :  { %v4721_v54 = vpop.xlane.xlu1 %4720 }
0x20cd   :  { %7981 = vrcp.f32 %v4721_v54 }
0x20ce   :  { %v7970_v38 = vpop.eup %7969 }
0x20cf   :  { %v4731_v9 = vmul.f32 %v7970_v38, %v7956_v62  ;;  %v7972_v16 = vpop.eup %7971  ;;  %v7722_v62 = vld [vmem:[#allocation16 + $0x60] sm:$0xff]  }
0x20d0   :  { %v4732_v29 = vmul.f32 %v7972_v16, %v7954_v36  ;;  %v7721_v36 = vld [vmem:[#allocation16 + $0x68] sm:$0xff]  }
0x20d1   :  { %v4738_v17 = vpack.c.bf16 %v4731_v9, %v4730_v6 }
0x20d2   :  { %v7974_v18 = vpop.eup %7973 }
0x20d3   :  { %7257 = vmatprep.mubr.msk.bf16.mxu0 %vm986_vm14, %v4738_v17  ;;  %v4733_v39 = vmul.f32 %v7974_v18, %v7958_v45  ;;  %v7976_v19 = vpop.eup %7975  ;;  %v7725_v45 = vld [vmem:[#allocation16 + $0x48] sm:$0xff]  }
0x20d4   :  { %v4734_v26 = vmul.f32 %v7976_v19, %v7960_v51  ;;  %v7726_v51 = vld [vmem:[#allocation16 + $0x40] sm:$0xff]  }
0x20d5   :  { %v4739_v44 = vpack.c.bf16 %v4733_v39, %v4732_v29  ;;  %v7727_v29 = vld [vmem:[#allocation19 + $0xf0] ss:$8 sps:$4 sm:$0xff]   ;;  %v7732_v19 = vld [vmem:[#allocation19 + $0xe4] ss:$8 sps:$4 sm:$0xff]  }
0x20d6   :  { %v7978_v35 = vpop.eup %7977 }
0x20d7   :  { %v7980_v12 = vpop.eup %7979  ;;  %7258 = vmatmul.mubr.msk.bf16.vlgmr.msra.gmra.mxu0 %vm986_vm14, %v4739_v44  ;;  %v4735_v49 = vmul.f32 %v7978_v35, %v7964_v4  ;;  %v7735_v44 = vld [vmem:[#allocation19 + $0xd4] ss:$8 sps:$4 sm:$0xff]   ;;  %v7733_v35 = vld [vmem:[#allocation19 + $0xd0] ss:$8 sps:$4 sm:$0xff]  }
0x20d8   :  { %7266 = vmatpush3.bf16.msra.mxu0 %v7719_v30  ;;  %v4736_v58 = vmul.f32 %v7980_v12, %v7962_v56  ;;  %v7730_v30 = vld [vmem:[#allocation19 + $0xe0] ss:$8 sps:$4 sm:$0xff]   ;;  %v7738_v12 = vld [vmem:[#allocation19 + $0xc4] ss:$8 sps:$4 sm:$0xff]  }
0x20d9   :  { %v4740_v47 = vpack.c.bf16 %v4735_v49, %v4734_v26  ;;  %7267 = vmatprep.subr.bf16.mxu0 %v8609_v1  ;;  %v7736_v26 = vld [vmem:[#allocation19 + $0xc0] ss:$8 sps:$4 sm:$0xff]   ;;  %v7741_v49 = vld [vmem:[#allocation19 + $0xb4] ss:$8 sps:$4 sm:$0xff]  }
0x20da   :  { %v7982_v48 = vpop.eup %7981 }
0x20db   :  { %v4737_v10 = vmul.f32 %v7982_v48, %v7966_v2  ;;  %7261 = vmatprep.mubr.msk.bf16.mxu0 %vm986_vm14, %v4740_v47  ;;  %v7744_v48 = vld [vmem:[#allocation19 + $0xa4] ss:$8 sps:$4 sm:$0xff]   ;;  %v7742_v47 = vld [vmem:[#allocation19 + $0xa0] ss:$8 sps:$4 sm:$0xff]  }
0x20dc   :  { %7268 = vmatpush3.bf16.msra.mxu0 %v7720_v40  ;;  %v7739_v40 = vld [vmem:[#allocation19 + $0xb0] ss:$8 sps:$4 sm:$0xff]  }
0x20dd   :  { %v4741_v25 = vpack.c.bf16 %v4737_v10, %v4736_v58  ;;  %7269 = vmatprep.subr.bf16.mxu0 %v8609_v1  ;;  %v7747_v58 = vld [vmem:[#allocation19 + $0x94] ss:$8 sps:$4 sm:$0xff]   ;;  %v7750_v10 = vld [vmem:[#allocation19 + $0x84] ss:$8 sps:$4 sm:$0xff]  }
0x20df   :  { %7262 = vmatmul.mubr.msk.bf16.gmra.mxu0 %vm986_vm14, %v4741_v25  ;;  %v7748_v25 = vld [vmem:[#allocation19 + $0x80] ss:$8 sps:$4 sm:$0xff]  }
0x20e0   :  { %7270 = vmatpush3.bf16.msra.mxu0 %v7721_v36  ;;  %7281 = vmatprep.mubr.msk.bf16.mxu0 %vm8610_vm10, %v8609_v1  ;;  %v7751_v36 = vld [vmem:[#allocation17 + $0x78] sm:$0xff]  }
0x20e1   :  { %7271 = vmatprep.subr.bf16.mxu0 %v8609_v1  ;;  %7286 = vmatpush3.bf16.msra.mxu1 %v7751_v36 }
0x20e2   :  { %7287 = vmatprep.subr.bf16.mxu1 %v8609_v1 }
0x20e4   :  { %7272 = vmatpush3.bf16.msra.mxu0 %v7722_v62  ;;  %v7752_v62 = vld [vmem:[#allocation17 + $0x70] sm:$0xff]  }
0x20e5   :  { %7273 = vmatprep.subr.bf16.mxu0 %v8609_v1  ;;  %7288 = vmatpush3.bf16.msra.mxu1 %v7752_v62 }
0x20e6   :  { %7289 = vmatprep.subr.bf16.mxu1 %v8609_v1 }
0x20e8   :  { %7274 = vmatpush3.bf16.msra.mxu0 %v7723_v63  ;;  %v7753_v63 = vld [vmem:[#allocation17 + $0x68] sm:$0xff]  }
0x20e9   :  { %7275 = vmatprep.subr.bf16.mxu0 %v8609_v1  ;;  %7290 = vmatpush3.bf16.msra.mxu1 %v7753_v63  ;;  %v6540_v63 = vld [vmem:[%s9797_s26 + $0x1] ss:$0 sm:$0xff] }
0x20ea   :  { %7291 = vmatprep.subr.bf16.mxu1 %v8609_v1 }
0x20ec   :  { %7276 = vmatpush3.bf16.msra.mxu0 %v7724_v59  ;;  %v7754_v59 = vld [vmem:[#allocation17 + $0x60] sm:$0xff]  }
0x20ed   :  { %7277 = vmatprep.subr.bf16.mxu0 %v8609_v1  ;;  %7292 = vmatpush3.bf16.msra.mxu1 %v7754_v59 }
0x20ee   :  { %7293 = vmatprep.subr.bf16.mxu1 %v8609_v1 }
0x20f0   :  { %7278 = vmatpush3.bf16.msra.mxu0 %v7725_v45  ;;  %v7755_v45 = vld [vmem:[#allocation17 + $0x58] sm:$0xff]  }
0x20f1   :  { %7279 = vmatprep.subr.bf16.mxu0 %v8609_v1  ;;  %7294 = vmatpush3.bf16.msra.mxu1 %v7755_v45 }
0x20f2   :  { %7295 = vmatprep.subr.bf16.mxu1 %v8609_v1 }
0x20f4   :  { %7280 = vmatpush3.bf16.msra.mxu0 %v7726_v51  ;;  %v7757_v51 = vld [vmem:[#allocation17 + $0x48] sm:$0xff]  }
0x20f5   :  { %5220 = vmatprep.subr.bf16.mxu0 %v7729_v22  ;;  %v7758_v22 = vld [vmem:[#allocation17 + $0x40] sm:$0xff]  }
0x2197   :  { %v7259_v7 = vpop.f32.mrf.mxu0 }
0x2198   :  { %v4822_v24 = vmul.f32 %v7259_v7, %v8951_v42  ;;  %v6528_v7 = vld [vmem:[%s9795_s4 + $0x1] ss:$0 sm:$0xff] }
0x2199   :  { %v4789_v56 = vpop.f32.mrf.mxu0 }
0x219a   :  { %v4820_v2 = vmul.f32 %v8942_v32, %v4789_v56 }
0x219b   :  { %v7260_v4 = vpop.f32.mrf.mxu0 }
0x219c   :  { %v4824_v28 = vadd.f32 %v4822_v24, %v4820_v2  ;;  %v4823_v31 = vmul.f32 %v7260_v4, %v8951_v42 }
0x219d   :  { %v4792_v5 = vpop.f32.mrf.mxu0 }
0x219e   :  { %v4821_v8 = vmul.f32 %v8942_v32, %v4792_v5 }
0x219f   :  { %v7263_v13 = vpop.f32.mrf.mxu0 }
0x21a0   :  { %v4825_v61 = vadd.f32 %v4823_v31, %v4821_v8  ;;  %v4830_v6 = vmul.f32 %v7263_v13, %v8966_v50 }
0x21a1   :  { %v4805_v3 = vpop.f32.mrf.mxu0 }
0x21a2   :  { %v4826_v14 = vmul.f32 %v8954_v43, %v4805_v3 }
0x21a3   :  { %v7264_v20 = vpop.f32.mrf.mxu0 }
0x21a4   :  { %v4828_v54 = vadd.f32 %v4826_v14, %v4824_v28  ;;  %v4831_v9 = vmul.f32 %v7264_v20, %v8966_v50  ;;  %v6551_v14 = vld [vmem:[%s9798_s28 + $0x2] sm:$0x3] }
0x21a5   :  { %v4808_v33 = vpop.f32.mrf.mxu0  ;;  %v5137_v20 = vrot.slane %v6551_v14, %v8936_v27  ;;  %v5133_v31 = vrot.slane %v6551_v14, %v8926_v23 }
0x21a6   :  { %v4827_v38 = vmul.f32 %v8954_v43, %v4808_v33  ;;  %v4832_v17 = vadd.f32 %v4830_v6, %v4828_v54 }
0x21a8   :  { %v4829_v16 = vadd.f32 %v4827_v38, %v4825_v61 }
0x21aa   :  { %v4833_v18 = vadd.f32 %v4831_v9, %v4829_v16 }
0x21ac   :  { %v4853_v39 = vpack.c.bf16 %v4833_v18, %v4832_v17 }
0x21ae   :  { %7282 = vmatmul.mubr.bf16.vlgmr.msra.gmra.mxu0 %v4853_v39 }
0x21af   :  { %5221 = vmatpush1.bf16.msra.mxu0 %v7727_v29  ;;  %5252 = vmatprep.mubr.bf16.mxu0 %v8608_v0  ;;  %v7745_v0 = vld [vmem:[#allocation19 + $0x90] ss:$8 sps:$4 sm:$0xff]  }
0x21b0   :  { %5222 = vmatprep.subr.bf16.mxu0 %v7732_v19 }
0x21b3   :  { %5223 = vmatpush1.bf16.msra.mxu0 %v7730_v30 }
0x21b4   :  { %5224 = vmatprep.subr.bf16.mxu0 %v7735_v44 }
0x21b7   :  { %5225 = vmatpush1.bf16.msra.mxu0 %v7733_v35 }
0x21b8   :  { %5226 = vmatprep.subr.bf16.mxu0 %v7738_v12 }
0x21bb   :  { %5227 = vmatpush1.bf16.msra.mxu0 %v7736_v26 }
0x21bc   :  { %5228 = vmatprep.subr.bf16.mxu0 %v7741_v49 }
0x21bf   :  { %5229 = vmatpush1.bf16.msra.mxu0 %v7739_v40 }
0x21c0   :  { %5230 = vmatprep.subr.bf16.mxu0 %v7744_v48 }
0x21c3   :  { %5231 = vmatpush1.bf16.msra.mxu0 %v7742_v47 }
0x21c4   :  { %5232 = vmatprep.subr.bf16.mxu0 %v7747_v58 }
0x21c7   :  { %5233 = vmatpush1.bf16.msra.mxu0 %v7745_v0 }
0x21c8   :  { %5234 = vmatprep.subr.bf16.mxu0 %v7750_v10  ;;  %v6539_v10 = vld [vmem:[%s9796_s23 + $0x1] ss:$0 sm:$0xff] }
0x21cb   :  { %5235 = vmatpush1.bf16.msra.mxu0 %v7748_v25 }
0x21cc   :  { %7345 = vmatprep.subr.bf16.mxu0 %v8609_v1 }
0x21ce   :  { %5253 = vmatmul.mubr.bf16.vlgmr.msra.gmra.mxu0 %v9403_v41  ;;  %v7756_v41 = vld [vmem:[#allocation17 + $0x50] sm:$0xff]  }
0x21cf   :  { %7361 = vmatprep.mubr.msk.bf16.mxu0 %vm8610_vm10, %v8609_v1  ;;  %7296 = vmatpush3.bf16.msra.mxu1 %v7756_v41 }
0x21d0   :  { %7297 = vmatprep.subr.bf16.mxu1 %v8609_v1 }
0x21d3   :  { %7298 = vmatpush3.bf16.msra.mxu1 %v7757_v51 }
0x21d4   :  { %7299 = vmatprep.subr.bf16.mxu1 %v8609_v1 }
0x21d7   :  { %7300 = vmatpush3.bf16.msra.mxu1 %v7758_v22  ;;  %v6542_v22 = vld [vmem:[%s9799_s8 + $0x1] ss:$0 sm:$0xff] }
0x226e   :  { %v4942_v56 = vpop.f32.mrf.mxu0 }
0x226f   :  { %v4943_v4 = vadd.f32 %v6528_v7, %v4942_v56 }
0x2270   :  { %v7283_v5 = vpop.f32.mrf.mxu0 }
0x2271   :  { %v4949_v13 = vadd.f32 %v4943_v4, %v9548_v53 }
0x2272   :  { %v4945_v2 = vpop.f32.mrf.mxu0 }
0x2273   :  { %v4946_v3 = vadd.f32 %v6528_v7, %v4945_v2  ;;  %4955 = vadd.xlane.f32.xlu0 %v4949_v13 }
0x2274   :  { %v7284_v24 = vpop.f32.mrf.mxu0 }
0x2275   :  { %v4950_v8 = vadd.f32 %v4946_v3, %v9550_v57 }
0x2277   :  { %4957 = vadd.xlane.f32.xlu1 %v4950_v8 }
0x228e   :  { %v5254_v28 = vpop.f32.mrf.mxu0 }
0x228f   :  { %v5255_v38 = vadd.f32 %v5254_v28, %v5133_v31 }
0x2290   :  { %v5256_v33 = vpop.f32.mrf.mxu0 }
0x2291   :  { %v5257_v61 = vadd.f32 %v5256_v33, %v5137_v20 }
0x2292   :  { %v5258_v54 = vpop.f32.mrf.mxu0 }
0x2293   :  { %v5259_v6 = vadd.f32 %v5258_v54, %v5133_v31 }
0x2294   :  { %v5260_v9 = vpop.f32.mrf.mxu0 }
0x2295   :  { %v5275_v53 = vpack.c.bf16 %v5259_v6, %v5255_v38  ;;  %v5261_v16 = vadd.f32 %v5260_v9, %v5137_v20 }
0x2297   :  { %v5449_v17 = vpack.c.bf16 %v5261_v16, %v5257_v61  ;;  %7305 = vmatprep.subr.bf16.mxu1 %v5275_v53 }
0x22fc   :  { %v4956_v18 = vpop.xlane.xlu0 %4955 }
0x22fd   :  { %v4959_v29 = vmul.f32 0.03125, %v4956_v18 }
0x22ff   :  { %v4961_v57 = vsub.f32 %v4949_v13, %v4959_v29 }
0x2300   :  { %v4958_v39 = vpop.xlane.xlu1 %4957 }
0x2301   :  { %v4963_v19 = vmul.f32 %v9088_v37, %v4961_v57  ;;  %v4960_v27 = vmul.f32 0.03125, %v4958_v39 }
0x2303   :  { %v4962_v30 = vsub.f32 %v4950_v8, %v4960_v27  ;;  %v4965_v23 = vmul.f32 %v4963_v19, %v4963_v19 }
0x2305   :  { %v4964_v44 = vmul.f32 %v9088_v37, %v4962_v30  ;;  %4967 = vadd.xlane.f32.xlu0 %v4965_v23 }
0x2307   :  { %v4966_v35 = vmul.f32 %v4964_v44, %v4964_v44 }
0x2309   :  { %4969 = vadd.xlane.f32.xlu1 %v4966_v35 }
0x238e   :  { %v4968_v12 = vpop.xlane.xlu0 %4967 }
0x238f   :  { %v4971_v26 = vmul.f32 0.03125, %v4968_v12 }
0x2391   :  { %v4973_v49 = vadd.f32 1e-05, %v4971_v26 }
0x2392   :  { %v4970_v40 = vpop.xlane.xlu1 %4969 }
0x2393   :  { %7983 = vrsqrt.f32 %v4973_v49  ;;  %v4972_v48 = vmul.f32 0.03125, %v4970_v40 }
0x2395   :  { %v4974_v47 = vadd.f32 1e-05, %v4972_v48 }
0x2397   :  { %7985 = vrsqrt.f32 %v4974_v47 }
0x23a0   :  { %v7984_v58 = vpop.eup %7983 }
0x23a1   :  { %v4977_v0 = vmul.f32 %v7984_v58, %v4963_v19 }
0x23a3   :  { %v4985_v62 = vmul.f32 %v6539_v10, %v4977_v0 }
0x23a4   :  { %v7986_v25 = vpop.eup %7985 }
0x23a5   :  { %v4978_v36 = vmul.f32 %v7986_v25, %v4964_v44  ;;  %v9636_v45 = vadd.f32 %v6540_v63, %v4985_v62 }
0x23a7   :  { %v4986_v59 = vmul.f32 %v6539_v10, %v4978_v36 }
0x23a9   :  { %v9638_v41 = vadd.f32 %v6540_v63, %v4986_v59 }
0x23ab   :  { %v5014_v51 = vpack.c.bf16 %v9638_v41, %v9636_v45 }
0x23ad   :  { %7302 = vmatmul.mubr.bf16.vlgmr.msra.gmra.mxu1 %v5014_v51 }
0x23ae   :  { %7306 = vmatpush3.bf16.xpose.msra.mxu1 %v5275_v53 }
0x23af   :  { %7315 = vmatprep.subr.bf16.mxu1 %v5449_v17 }
0x246d   :  { %v5103_v7 = vpop.f32.mrf.mxu1 }
0x246e   :  { %v5104_v56 = vadd.f32 %v6542_v22, %v5103_v7 }
0x246f   :  { %v7303_v4 = vpop.f32.mrf.mxu1 }
0x2470   :  { %v5265_v2 = vmul.f32 %v8951_v42, %v5104_v56  ;;  %v5263_v8 = vmul.f32 %v8942_v32, %v5104_v56  ;;  %v5267_v33 = vmul.f32 %v8954_v43, %v5104_v56  ;;  %v5269_v38 = vmul.f32 %v8966_v50, %v5104_v56 }
0x2471   :  { %v5106_v5 = vpop.f32.mrf.mxu1 }
0x2472   :  { %v5107_v13 = vadd.f32 %v6542_v22, %v5106_v5 }
0x2473   :  { %v7304_v3 = vpop.f32.mrf.mxu1 }
0x2474   :  { %v5266_v24 = vmul.f32 %v8951_v42, %v5107_v13  ;;  %v5264_v14 = vmul.f32 %v8942_v32, %v5107_v13  ;;  %v5268_v20 = vmul.f32 %v8954_v43, %v5107_v13  ;;  %v5270_v54 = vmul.f32 %v8966_v50, %v5107_v13 }
0x2476   :  { %v5271_v28 = vpack.c.bf16 %v5264_v14, %v5263_v8  ;;  %v5272_v31 = vpack.c.bf16 %v5266_v24, %v5265_v2  ;;  %v5273_v61 = vpack.c.bf16 %v5268_v20, %v5267_v33  ;;  %v5274_v6 = vpack.c.bf16 %v5270_v54, %v5269_v38 }
0x2478   :  { %7307 = vmatprep.mubr.bf16.mxu1 %v5271_v28 }
0x2479   :  { %7308 = vmatmul.mubr.bf16.vlgmr.msra.gmra.mxu1 %v5272_v31 }
0x247a   :  { %7316 = vmatpush3.bf16.msra.mxu1 %v5449_v17  ;;  %7311 = vmatprep.mubr.bf16.mxu1 %v5273_v61 }
0x247b   :  { %7325 = vmatprep.subr.bf16.mxu1 %v8609_v1 }
0x2481   :  { %7312 = vmatmul.mubr.bf16.gmra.mxu1 %v5274_v6 }
0x2539   :  { %v7309_v9 = vpop.f32.mrf.mxu1 }
0x253a   :  { %v5343_v16 = vmul.f32 0.35355338, %v7309_v9 }
0x253b   :  { %v5310_v53 = vpop.f32.mrf.mxu1 }
0x253c   :  { %v5341_v18 = vmul.f32 0.35355338, %v5310_v53  ;;  %v5351_v17 = vadd.f32 %v5343_v16, %v8996_v11 }
0x253d   :  { %v7310_v29 = vpop.f32.mrf.mxu1 }
0x253e   :  { %v5349_v57 = vadd.f32 %v5341_v18, %v8999_v15  ;;  %v5344_v39 = vmul.f32 0.35355338, %v7310_v29  ;;  %v5363_v40 = vsel %vm986_vm14, %v5351_v17, -inf }
0x253f   :  { %v5313_v19 = vpop.f32.mrf.mxu1 }
0x2540   :  { %v5342_v27 = vmul.f32 0.35355338, %v5313_v19  ;;  %v5357_v30 = vsel %vm986_vm14, %v5349_v57, -inf  ;;  %v5352_v35 = vadd.f32 %v5344_v39, %v9003_v21 }
0x2541   :  { %5358 = vmax.xlane.f32.xlu0 %v5357_v30  ;;  %v7313_v23 = vpop.f32.mrf.mxu1 }
0x2542   :  { %v5350_v44 = vadd.f32 %v5342_v27, %v9008_v34  ;;  %v5347_v26 = vmul.f32 0.35355338, %v7313_v23  ;;  %v5366_v58 = vsel %vm986_vm14, %v5352_v35, -inf }
0x2543   :  { %v5326_v12 = vpop.f32.mrf.mxu1 }
0x2544   :  { %v5345_v49 = vmul.f32 0.35355338, %v5326_v12  ;;  %v5360_v15 = vsel %vm986_vm14, %v5350_v44, -inf  ;;  %v5355_v0 = vadd.f32 %v5347_v26, %v9017_v52 }
0x2545   :  { %5364 = vmax.xlane.f32.xlu0 %v5363_v40  ;;  %5361 = vmax.xlane.f32.xlu1 %v5360_v15  ;;  %v7314_v48 = vpop.f32.mrf.mxu1 }
0x2546   :  { %v5353_v11 = vadd.f32 %v5345_v49, %v9014_v46  ;;  %v5348_v34 = vmul.f32 0.35355338, %v7314_v48  ;;  %v5375_v62 = vsel %vm986_vm14, %v5355_v0, -inf }
0x2547   :  { %v5329_v47 = vpop.f32.mrf.mxu1 }
0x2548   :  { %v5346_v10 = vmul.f32 0.35355338, %v5329_v47  ;;  %v5369_v21 = vsel %vm986_vm14, %v5353_v11, -inf  ;;  %v5356_v36 = vadd.f32 %v5348_v34, %v9024_v60 }
0x2549   :  { %5367 = vmax.xlane.f32.xlu1 %v5366_v58  ;;  %5370 = vmax.xlane.f32.xlu0 %v5369_v21 }
0x254a   :  { %v5354_v25 = vadd.f32 %v5346_v10, %v9020_v55  ;;  %v5378_v46 = vsel %vm986_vm14, %v5356_v36, -inf }
0x254c   :  { %v5372_v63 = vsel %vm986_vm14, %v5354_v25, -inf }
0x254d   :  { %5376 = vmax.xlane.f32.xlu0 %v5375_v62  ;;  %5373 = vmax.xlane.f32.xlu1 %v5372_v63 }
0x2551   :  { %5379 = vmax.xlane.f32.xlu1 %v5378_v46 }
0x25ca   :  { %v5359_v52 = vpop.xlane.xlu0 %5358 }
0x25cb   :  { %v5381_v59 = vsub.f32 %v5349_v57, %v5359_v52 }
0x25cd   :  { %v5389_v51 = vmul.f32 1.442695, %v5381_v59 }
0x25ce   :  { %v5365_v22 = vpop.xlane.xlu0 %5364  ;;  %v5362_v7 = vpop.xlane.xlu1 %5361 }
0x25cf   :  { %7987 = vpow2.f32 %v5389_v51  ;;  %v5383_v56 = vsub.f32 %v5351_v17, %v5365_v22  ;;  %v5382_v4 = vsub.f32 %v5350_v44, %v5362_v7  ;;  %v7759_v51 = vld [vmem:[#allocation20 + $0x78] sm:$0xff]  }
0x25d1   :  { %v5393_v55 = vmul.f32 1.442695, %v5383_v56  ;;  %v5391_v5 = vmul.f32 1.442695, %v5382_v4 }
0x25d2   :  { %v5368_v60 = vpop.xlane.xlu1 %5367  ;;  %v5371_v13 = vpop.xlane.xlu0 %5370 }
0x25d3   :  { %7989 = vpow2.f32 %v5393_v55  ;;  %v5384_v2 = vsub.f32 %v5352_v35, %v5368_v60  ;;  %v5385_v3 = vsub.f32 %v5353_v11, %v5371_v13 }
0x25d4   :  { %7991 = vpow2.f32 %v5391_v5  ;;  %v7760_v5 = vld [vmem:[#allocation20 + $0x70] sm:$0xff]  }
0x25d5   :  { %v5395_v24 = vmul.f32 1.442695, %v5384_v2  ;;  %v5397_v8 = vmul.f32 1.442695, %v5385_v3 }
0x25d6   :  { %v5377_v14 = vpop.xlane.xlu0 %5376  ;;  %v5374_v20 = vpop.xlane.xlu1 %5373 }
0x25d7   :  { %7993 = vpow2.f32 %v5395_v24  ;;  %v5387_v28 = vsub.f32 %v5355_v0, %v5377_v14  ;;  %v5386_v31 = vsub.f32 %v5354_v25, %v5374_v20  ;;  %v7762_v14 = vld [vmem:[#allocation20 + $0x60] sm:$0xff]   ;;  %v7763_v20 = vld [vmem:[#allocation20 + $0x58] sm:$0xff]  }
0x25d8   :  { %7995 = vpow2.f32 %v5397_v8  ;;  %v7761_v8 = vld [vmem:[#allocation20 + $0x68] sm:$0xff]  }
0x25d9   :  { %v5401_v33 = vmul.f32 1.442695, %v5387_v28  ;;  %v5399_v61 = vmul.f32 1.442695, %v5386_v31  ;;  %v7764_v28 = vld [vmem:[#allocation20 + $0x50] sm:$0xff]   ;;  %v7765_v31 = vld [vmem:[#allocation20 + $0x48] sm:$0xff]  }
0x25da   :  { %v5380_v54 = vpop.xlane.xlu1 %5379 }
0x25db   :  { %7997 = vpow2.f32 %v5401_v33  ;;  %v5388_v38 = vsub.f32 %v5356_v36, %v5380_v54  ;;  %v7766_v33 = vld [vmem:[#allocation20 + $0x40] sm:$0xff]  }
0x25dc   :  { %v7988_v6 = vpop.eup %7987  ;;  %7999 = vpow2.f32 %v5399_v61 }
0x25dd   :  { %v5403_v9 = vmul.f32 1.442695, %v5388_v38  ;;  %v5405_v53 = vsel %vm986_vm14, %v7988_v6, 0.0 }
0x25de   :  { %5406 = vadd.xlane.f32.xlu0 %v5405_v53 }
0x25df   :  { %8001 = vpow2.f32 %v5403_v9 }
0x25e0   :  { %v7990_v16 = vpop.eup %7989 }
0x25e1   :  { %v7992_v18 = vpop.eup %7991  ;;  %v5411_v29 = vsel %vm986_vm14, %v7990_v16, 0.0 }
0x25e2   :  { %5412 = vadd.xlane.f32.xlu0 %v5411_v29  ;;  %v5408_v57 = vsel %vm986_vm14, %v7992_v18, 0.0 }
0x25e3   :  { %5409 = vadd.xlane.f32.xlu1 %v5408_v57 }
0x25e4   :  { %v7994_v39 = vpop.eup %7993 }
0x25e5   :  { %v7996_v19 = vpop.eup %7995  ;;  %v5414_v17 = vsel %vm986_vm14, %v7994_v39, 0.0 }
0x25e6   :  { %v5417_v27 = vsel %vm986_vm14, %v7996_v19, 0.0 }
0x25e7   :  { %5418 = vadd.xlane.f32.xlu0 %v5417_v27  ;;  %5415 = vadd.xlane.f32.xlu1 %v5414_v17 }
0x25e8   :  { %v7998_v30 = vpop.eup %7997 }
0x25e9   :  { %v8000_v23 = vpop.eup %7999  ;;  %v5423_v44 = vsel %vm986_vm14, %v7998_v30, 0.0 }
0x25ea   :  { %v5420_v35 = vsel %vm986_vm14, %v8000_v23, 0.0 }
0x25eb   :  { %5424 = vadd.xlane.f32.xlu0 %v5423_v44  ;;  %5421 = vadd.xlane.f32.xlu1 %v5420_v35 }
0x25ec   :  { %v8002_v12 = vpop.eup %8001 }
0x25ed   :  { %v5426_v26 = vsel %vm986_vm14, %v8002_v12, 0.0 }
0x25ef   :  { %5427 = vadd.xlane.f32.xlu1 %v5426_v26 }
0x2667   :  { %v5407_v49 = vpop.xlane.xlu0 %5406 }
0x2668   :  { %8003 = vrcp.f32 %v5407_v49 }
0x266b   :  { %v5413_v40 = vpop.xlane.xlu0 %5412 }
0x266c   :  { %v5410_v15 = vpop.xlane.xlu1 %5409 }
0x266d   :  { %8005 = vrcp.f32 %v5410_v15  ;;  %v6573_v15 = vld [vmem:[%s9800_s27 + $0x1] ss:$0 sm:$0xff] }
0x266e   :  { %8007 = vrcp.f32 %v5413_v40 }
0x2670   :  { %v5419_v48 = vpop.xlane.xlu0 %5418  ;;  %v5416_v11 = vpop.xlane.xlu1 %5415 }
0x2671   :  { %8009 = vrcp.f32 %v5416_v11 }
0x2672   :  { %8011 = vrcp.f32 %v5419_v48 }
0x2674   :  { %v5425_v47 = vpop.xlane.xlu0 %5424  ;;  %v5422_v58 = vpop.xlane.xlu1 %5421 }
0x2675   :  { %8013 = vrcp.f32 %v5422_v58  ;;  %v8004_v0 = vpop.eup %8003 }
0x2676   :  { %8015 = vrcp.f32 %v5425_v47  ;;  %v5437_v21 = vmul.f32 %v8004_v0, %v7988_v6 }
0x2678   :  { %v5428_v34 = vpop.xlane.xlu1 %5427 }
0x2679   :  { %8017 = vrcp.f32 %v5428_v34  ;;  %v7767_v34 = vld [vmem:[#allocation23 + $0x78] sm:$0xff]  }
0x267a   :  { %v8006_v10 = vpop.eup %8005  ;;  %7346 = vmatpush3.bf16.msra.mxu0 %v7767_v34 }
0x267b   :  { %v5438_v25 = vmul.f32 %v8006_v10, %v7992_v18  ;;  %v8008_v36 = vpop.eup %8007  ;;  %7347 = vmatprep.subr.bf16.mxu0 %v8609_v1 }
0x267c   :  { %v5439_v46 = vmul.f32 %v8008_v36, %v7990_v16 }
0x267d   :  { %v5445_v62 = vpack.c.bf16 %v5438_v25, %v5437_v21 }
0x267e   :  { %v8010_v63 = vpop.eup %8009 }
0x267f   :  { %7317 = vmatprep.mubr.msk.bf16.mxu1 %vm986_vm14, %v5445_v62  ;;  %v5440_v52 = vmul.f32 %v8010_v63, %v7994_v39  ;;  %v8012_v59 = vpop.eup %8011 }
0x2680   :  { %v5441_v4 = vmul.f32 %v8012_v59, %v7996_v19 }
0x2681   :  { %v5446_v22 = vpack.c.bf16 %v5440_v52, %v5439_v46 }
0x2682   :  { %v8014_v7 = vpop.eup %8013 }
0x2683   :  { %v8016_v56 = vpop.eup %8015  ;;  %7318 = vmatmul.mubr.msk.bf16.vlgmr.msra.gmra.mxu1 %vm986_vm14, %v5446_v22  ;;  %v5442_v55 = vmul.f32 %v8014_v7, %v8000_v23  ;;  %v7770_v22 = vld [vmem:[#allocation23 + $0x60] sm:$0xff]   ;;  %v7771_v7 = vld [vmem:[#allocation23 + $0x58] sm:$0xff]  }
0x2684   :  { %7326 = vmatpush3.bf16.msra.mxu1 %v7759_v51  ;;  %v5443_v2 = vmul.f32 %v8016_v56, %v7998_v30  ;;  %v7769_v51 = vld [vmem:[#allocation23 + $0x68] sm:$0xff]   ;;  %v7772_v56 = vld [vmem:[#allocation23 + $0x50] sm:$0xff]  }
0x2685   :  { %v5447_v13 = vpack.c.bf16 %v5442_v55, %v5441_v4  ;;  %7327 = vmatprep.subr.bf16.mxu1 %v8609_v1  ;;  %v7773_v4 = vld [vmem:[#allocation23 + $0x48] sm:$0xff]   ;;  %v7774_v55 = vld [vmem:[#allocation23 + $0x40] sm:$0xff]  }
0x2686   :  { %v8018_v60 = vpop.eup %8017 }
0x2687   :  { %v5444_v3 = vmul.f32 %v8018_v60, %v8002_v12  ;;  %7321 = vmatprep.mubr.msk.bf16.mxu1 %vm986_vm14, %v5447_v13  ;;  %v7776_v60 = vld [vmem:[#allocation26 + $0x70] sm:$0xff]   ;;  %v7777_v13 = vld [vmem:[#allocation26 + $0x68] sm:$0xff]  }
0x2688   :  { %7328 = vmatpush3.bf16.msra.mxu1 %v7760_v5  ;;  %v7775_v5 = vld [vmem:[#allocation26 + $0x78] sm:$0xff]  }
0x2689   :  { %v5448_v24 = vpack.c.bf16 %v5444_v3, %v5443_v2  ;;  %7329 = vmatprep.subr.bf16.mxu1 %v8609_v1  ;;  %v7778_v2 = vld [vmem:[#allocation26 + $0x60] sm:$0xff]   ;;  %v7779_v3 = vld [vmem:[#allocation26 + $0x58] sm:$0xff]  }
0x268b   :  { %7322 = vmatmul.mubr.msk.bf16.gmra.mxu1 %vm986_vm14, %v5448_v24 }
0x268c   :  { %7341 = vmatprep.mubr.msk.bf16.mxu1 %vm8610_vm10, %v8609_v1  ;;  %7330 = vmatpush3.bf16.msra.mxu1 %v7761_v8 }
0x268d   :  { %7331 = vmatprep.subr.bf16.mxu1 %v8609_v1 }
0x2690   :  { %7332 = vmatpush3.bf16.msra.mxu1 %v7762_v14 }
0x2691   :  { %7333 = vmatprep.subr.bf16.mxu1 %v8609_v1 }
0x2694   :  { %7334 = vmatpush3.bf16.msra.mxu1 %v7763_v20 }
0x2695   :  { %7335 = vmatprep.subr.bf16.mxu1 %v8609_v1 }
0x2698   :  { %7336 = vmatpush3.bf16.msra.mxu1 %v7764_v28 }
0x2699   :  { %7337 = vmatprep.subr.bf16.mxu1 %v8609_v1 }
0x269c   :  { %7338 = vmatpush3.bf16.msra.mxu1 %v7765_v31 }
0x269d   :  { %7339 = vmatprep.subr.bf16.mxu1 %v8609_v1 }
0x26a0   :  { %7340 = vmatpush3.bf16.msra.mxu1 %v7766_v33 }
0x26a1   :  { %7365 = vmatprep.subr.bf16.mxu1 %v8609_v1 }
0x2743   :  { %v7319_v61 = vpop.f32.mrf.mxu1 }
0x2744   :  { %v5529_v18 = vmul.f32 %v7319_v61, %v8951_v42 }
0x2745   :  { %v5496_v54 = vpop.f32.mrf.mxu1 }
0x2746   :  { %v5527_v53 = vmul.f32 %v8942_v32, %v5496_v54  ;;  %v6583_v54 = vld [vmem:[%s9801_s21 + $0x1] ss:$0 sm:$0xff] }
0x2747   :  { %v7320_v38 = vpop.f32.mrf.mxu1 }
0x2748   :  { %v5531_v19 = vadd.f32 %v5529_v18, %v5527_v53  ;;  %v5530_v17 = vmul.f32 %v7320_v38, %v8951_v42  ;;  %v6584_v53 = vld [vmem:[#allocation22 + $0x1] ss:$0 sm:$0xff] }
0x2749   :  { %v5499_v6 = vpop.f32.mrf.mxu1 }
0x274a   :  { %v5528_v29 = vmul.f32 %v8942_v32, %v5499_v6 }
0x274b   :  { %v7323_v9 = vpop.f32.mrf.mxu1 }
0x274c   :  { %v5532_v30 = vadd.f32 %v5530_v17, %v5528_v29  ;;  %v5537_v35 = vmul.f32 %v7323_v9, %v8966_v50  ;;  %v7782_v17 = vld [vmem:[#allocation26 + $0x40] sm:$0xff]  }
0x274d   :  { %v5512_v16 = vpop.f32.mrf.mxu1 }
0x274e   :  { %v5533_v57 = vmul.f32 %v8954_v43, %v5512_v16 }
0x274f   :  { %v7324_v39 = vpop.f32.mrf.mxu1 }
0x2750   :  { %v5535_v23 = vadd.f32 %v5533_v57, %v5531_v19  ;;  %v5538_v12 = vmul.f32 %v7324_v39, %v8966_v50  ;;  %v7780_v39 = vld [vmem:[#allocation26 + $0x50] sm:$0xff]   ;;  %v7781_v19 = vld [vmem:[#allocation26 + $0x48] sm:$0xff]  }
0x2751   :  { %v5515_v27 = vpop.f32.mrf.mxu1 }
0x2752   :  { %v5534_v44 = vmul.f32 %v8954_v43, %v5515_v27  ;;  %v5539_v49 = vadd.f32 %v5537_v35, %v5535_v23  ;;  %v6585_v27 = vld [vmem:[#allocation25 + $0x1] ss:$0 sm:$0xff] }
0x2754   :  { %v5536_v26 = vadd.f32 %v5534_v44, %v5532_v30 }
0x2756   :  { %v5540_v40 = vadd.f32 %v5538_v12, %v5536_v26 }
0x2758   :  { %v5560_v32 = vpack.c.bf16 %v5540_v40, %v5539_v49 }
0x275a   :  { %7342 = vmatmul.mubr.bf16.vlgmr.msra.gmra.mxu1 %v5560_v32 }
0x275b   :  { %7381 = vmatprep.mubr.msk.bf16.mxu1 %vm8610_vm10, %v8609_v1  ;;  %7366 = vmatpush3.bf16.msra.mxu1 %v7775_v5 }
0x275c   :  { %7367 = vmatprep.subr.bf16.mxu1 %v8609_v1 }
0x275f   :  { %7368 = vmatpush3.bf16.msra.mxu1 %v7776_v60  ;;  %v6604_v60 = vld [vmem:[#allocation31 + $0x1] ss:$0 sm:$0xff] }
0x2760   :  { %7369 = vmatprep.subr.bf16.mxu1 %v8609_v1 }
0x2763   :  { %7370 = vmatpush3.bf16.msra.mxu1 %v7777_v13 }
0x2764   :  { %7371 = vmatprep.subr.bf16.mxu1 %v8609_v1 }
0x2767   :  { %7372 = vmatpush3.bf16.msra.mxu1 %v7778_v2 }
0x2768   :  { %7373 = vmatprep.subr.bf16.mxu1 %v8609_v1 }
0x276b   :  { %7374 = vmatpush3.bf16.msra.mxu1 %v7779_v3 }
0x276c   :  { %7375 = vmatprep.subr.bf16.mxu1 %v8609_v1 }
0x276f   :  { %7376 = vmatpush3.bf16.msra.mxu1 %v7780_v39  ;;  %v7787_v39 = vld [vmem:[#allocation35 + $0x18] sm:$0xff]  }
0x2770   :  { %7377 = vmatprep.subr.bf16.mxu1 %v8609_v1 }
0x2773   :  { %7378 = vmatpush3.bf16.msra.mxu1 %v7781_v19  ;;  %v7788_v19 = vld [vmem:[#allocation35 + $0x10] sm:$0xff]  }
0x2774   :  { %7379 = vmatprep.subr.bf16.mxu1 %v8609_v1 }
0x2777   :  { %7380 = vmatpush3.bf16.msra.mxu1 %v7782_v17  ;;  %v7790_v17 = vld [vmem:[#allocation35] sm:$0xff]  }
0x281a   :  { %v5649_v48 = vpop.f32.mrf.mxu1 }
0x281b   :  { %v5650_v42 = vadd.f32 %v6573_v15, %v5649_v48 }
0x281c   :  { %v7343_v11 = vpop.f32.mrf.mxu1 }
0x281d   :  { %v5656_v47 = vadd.f32 %v5650_v42, %v9636_v45 }
0x281e   :  { %v5652_v58 = vpop.f32.mrf.mxu1 }
0x281f   :  { %v5653_v43 = vadd.f32 %v6573_v15, %v5652_v58  ;;  %5662 = vadd.xlane.f32.xlu0 %v5656_v47  ;;  %v6594_v15 = vld [vmem:[#allocation28 + $0x1] ss:$0 sm:$0xff] }
0x2820   :  { %v7344_v0 = vpop.f32.mrf.mxu1 }
0x2821   :  { %v5657_v50 = vadd.f32 %v5653_v43, %v9638_v41  ;;  %v7768_v41 = vld [vmem:[#allocation23 + $0x70] sm:$0xff]  }
0x2822   :  { %7348 = vmatpush3.bf16.msra.mxu0 %v7768_v41 }
0x2823   :  { %5664 = vadd.xlane.f32.xlu1 %v5657_v50  ;;  %7349 = vmatprep.subr.bf16.mxu0 %v8609_v1 }
0x2826   :  { %7350 = vmatpush3.bf16.msra.mxu0 %v7769_v51 }
0x2827   :  { %7351 = vmatprep.subr.bf16.mxu0 %v8609_v1 }
0x282a   :  { %7352 = vmatpush3.bf16.msra.mxu0 %v7770_v22 }
0x282b   :  { %7353 = vmatprep.subr.bf16.mxu0 %v8609_v1 }
0x282e   :  { %7354 = vmatpush3.bf16.msra.mxu0 %v7771_v7 }
0x282f   :  { %7355 = vmatprep.subr.bf16.mxu0 %v8609_v1 }
0x2832   :  { %7356 = vmatpush3.bf16.msra.mxu0 %v7772_v56 }
0x2833   :  { %7357 = vmatprep.subr.bf16.mxu0 %v8609_v1 }
0x2836   :  { %7358 = vmatpush3.bf16.msra.mxu0 %v7773_v4 }
0x2837   :  { %7359 = vmatprep.subr.bf16.mxu0 %v8609_v1 }
0x283a   :  { %7360 = vmatpush3.bf16.msra.mxu0 %v7774_v55  ;;  %v6603_v55 = vld [vmem:[#allocation29 + $0x1] ss:$0 sm:$0xff] }
0x283b   :  { %7385 = vmatprep.subr.bf16.mxu0 %v8609_v1 }
0x28a8   :  { %v5663_v10 = vpop.xlane.xlu0 %5662 }
0x28a9   :  { %v5666_v21 = vmul.f32 0.03125, %v5663_v10 }
0x28ab   :  { %v5668_v25 = vsub.f32 %v5656_v47, %v5666_v21 }
0x28ac   :  { %v5665_v36 = vpop.xlane.xlu1 %5664 }
0x28ad   :  { %v5670_v62 = vmul.f32 %v9088_v37, %v5668_v25  ;;  %v5667_v63 = vmul.f32 0.03125, %v5665_v36 }
0x28af   :  { %v5669_v46 = vsub.f32 %v5657_v50, %v5667_v63  ;;  %v5672_v45 = vmul.f32 %v5670_v62, %v5670_v62 }
0x28b1   :  { %v5671_v52 = vmul.f32 %v9088_v37, %v5669_v46  ;;  %5674 = vadd.xlane.f32.xlu0 %v5672_v45 }
0x28b3   :  { %v5673_v59 = vmul.f32 %v5671_v52, %v5671_v52 }
0x28b5   :  { %5676 = vadd.xlane.f32.xlu1 %v5673_v59 }
0x293a   :  { %v5675_v24 = vpop.xlane.xlu0 %5674 }
0x293b   :  { %v5678_v8 = vmul.f32 0.03125, %v5675_v24 }
0x293d   :  { %v5680_v14 = vadd.f32 1e-05, %v5678_v8 }
0x293e   :  { %v5677_v20 = vpop.xlane.xlu1 %5676 }
0x293f   :  { %8019 = vrsqrt.f32 %v5680_v14  ;;  %v5679_v28 = vmul.f32 0.03125, %v5677_v20  ;;  %v7783_v20 = vld [vmem:[#allocation35 + $0x38] sm:$0xff]  }
0x2941   :  { %v5681_v31 = vadd.f32 1e-05, %v5679_v28 }
0x2943   :  { %8021 = vrsqrt.f32 %v5681_v31 }
0x294c   :  { %v8020_v33 = vpop.eup %8019 }
0x294d   :  { %v5684_v61 = vmul.f32 %v8020_v33, %v5670_v62 }
0x294f   :  { %v5692_v9 = vmul.f32 %v6583_v54, %v5684_v61 }
0x2950   :  { %v8022_v38 = vpop.eup %8021 }
0x2951   :  { %v5685_v6 = vmul.f32 %v8022_v38, %v5671_v52  ;;  %v5700_v18 = vadd.f32 %v6584_v53, %v5692_v9 }
0x2953   :  { %v5693_v16 = vmul.f32 %v6583_v54, %v5685_v6 }
0x2955   :  { %v5701_v29 = vadd.f32 %v6584_v53, %v5693_v16 }
0x2957   :  { %v5721_v57 = vpack.c.bf16 %v5701_v29, %v5700_v18 }
0x2959   :  { %7362 = vmatmul.mubr.bf16.vlgmr.msra.gmra.mxu0 %v5721_v57  ;;  %v7786_v57 = vld [vmem:[#allocation35 + $0x20] sm:$0xff]  }
0x295a   :  { %7401 = vmatprep.mubr.msk.bf16.mxu0 %vm8610_vm10, %v8609_v1  ;;  %7386 = vmatpush3.bf16.msra.mxu0 %v7783_v20 }
0x295b   :  { %7387 = vmatprep.subr.bf16.mxu0 %v8609_v1 }
0x2a19   :  { %v5810_v30 = vpop.f32.mrf.mxu0 }
0x2a1a   :  { %v5811_v44 = vadd.f32 %v6585_v27, %v5810_v30 }
0x2a1b   :  { %v7363_v23 = vpop.f32.mrf.mxu0 }
0x2a1c   :  { %v5817_v49 = vmax.f32 %v5811_v44, 0.0 }
0x2a1d   :  { %v5813_v35 = vpop.f32.mrf.mxu0 }
0x2a1e   :  { %v5814_v12 = vadd.f32 %v6585_v27, %v5813_v35 }
0x2a1f   :  { %v7364_v26 = vpop.f32.mrf.mxu0 }
0x2a20   :  { %v5818_v40 = vmax.f32 %v5814_v12, 0.0 }
0x2a22   :  { %v5838_v32 = vpack.c.bf16 %v5818_v40, %v5817_v49  ;;  %v6605_v40 = vld [vmem:[#allocation32] ss:$0 sm:$0xff] }
0x2a24   :  { %7382 = vmatmul.mubr.bf16.vlgmr.msra.gmra.mxu1 %v5838_v32 }
0x2ae4   :  { %v5927_v48 = vpop.f32.mrf.mxu1 }
0x2ae5   :  { %v5928_v42 = vadd.f32 %v6594_v15, %v5927_v48 }
0x2ae6   :  { %v7383_v11 = vpop.f32.mrf.mxu1 }
0x2ae7   :  { %v5934_v47 = vadd.f32 %v5928_v42, %v5700_v18  ;;  %v7784_v18 = vld [vmem:[#allocation35 + $0x30] sm:$0xff]   ;;  %v6606_v42 = vld [vmem:[#allocation34] ss:$0 sm:$0xff] }
0x2ae8   :  { %v5930_v58 = vpop.f32.mrf.mxu1  ;;  %7388 = vmatpush3.bf16.msra.mxu0 %v7784_v18 }
0x2ae9   :  { %v5931_v43 = vadd.f32 %v6594_v15, %v5930_v58  ;;  %5940 = vadd.xlane.f32.xlu0 %v5934_v47  ;;  %7389 = vmatprep.subr.bf16.mxu0 %v8609_v1 }
0x2aea   :  { %v7384_v0 = vpop.f32.mrf.mxu1 }
0x2aeb   :  { %v5935_v50 = vadd.f32 %v5931_v43, %v5701_v29  ;;  %v7785_v29 = vld [vmem:[#allocation35 + $0x28] sm:$0xff]   ;;  %v6607_v43 = vld [vmem:[#allocation37] ss:$0 sm:$0xff] }
0x2aec   :  { %7390 = vmatpush3.bf16.msra.mxu0 %v7785_v29 }
0x2aed   :  { %5942 = vadd.xlane.f32.xlu1 %v5935_v50  ;;  %7391 = vmatprep.subr.bf16.mxu0 %v8609_v1 }
0x2af0   :  { %7392 = vmatpush3.bf16.msra.mxu0 %v7786_v57 }
0x2af1   :  { %7393 = vmatprep.subr.bf16.mxu0 %v8609_v1 }
0x2af4   :  { %7394 = vmatpush3.bf16.msra.mxu0 %v7787_v39 }
0x2af5   :  { %7395 = vmatprep.subr.bf16.mxu0 %v8609_v1 }
0x2af8   :  { %7396 = vmatpush3.bf16.msra.mxu0 %v7788_v19 }
0x2af9   :  { %7397 = vmatprep.subr.bf16.mxu0 %v8609_v1 }
0x2b72   :  { %v5941_v34 = vpop.xlane.xlu0 %5940 }
0x2b73   :  { %v5944_v10 = vmul.f32 0.03125, %v5941_v34 }
0x2b75   :  { %v5946_v21 = vsub.f32 %v5934_v47, %v5944_v10 }
0x2b76   :  { %v5943_v25 = vpop.xlane.xlu1 %5942 }
0x2b77   :  { %v5948_v36 = vmul.f32 %v9088_v37, %v5946_v21  ;;  %v5945_v62 = vmul.f32 0.03125, %v5943_v25 }
0x2b79   :  { %v5947_v63 = vsub.f32 %v5935_v50, %v5945_v62  ;;  %v5950_v46 = vmul.f32 %v5948_v36, %v5948_v36 }
0x2b7b   :  { %v5949_v45 = vmul.f32 %v9088_v37, %v5947_v63  ;;  %5952 = vadd.xlane.f32.xlu0 %v5950_v46 }
0x2b7d   :  { %v5951_v52 = vmul.f32 %v5949_v45, %v5949_v45 }
0x2b7f   :  { %5954 = vadd.xlane.f32.xlu1 %v5951_v52 }
0x2c04   :  { %v5953_v59 = vpop.xlane.xlu0 %5952 }
0x2c05   :  { %v5956_v41 = vmul.f32 0.03125, %v5953_v59 }
0x2c07   :  { %v5958_v51 = vadd.f32 1e-05, %v5956_v41 }
0x2c08   :  { %v5955_v22 = vpop.xlane.xlu1 %5954 }
0x2c09   :  { %8023 = vrsqrt.f32 %v5958_v51  ;;  %v5957_v7 = vmul.f32 0.03125, %v5955_v22 }
0x2c0b   :  { %v5959_v56 = vadd.f32 1e-05, %v5957_v7 }
0x2c0d   :  { %8025 = vrsqrt.f32 %v5959_v56 }
0x2c16   :  { %v8024_v4 = vpop.eup %8023 }
0x2c17   :  { %v5962_v5 = vmul.f32 %v8024_v4, %v5948_v36 }
0x2c19   :  { %v5970_v13 = vmul.f32 %v6603_v55, %v5962_v5 }
0x2c1a   :  { %v8026_v2 = vpop.eup %8025 }
0x2c1b   :  { %v5978_v3 = vadd.f32 %v6604_v60, %v5970_v13  ;;  %v5963_v24 = vmul.f32 %v8026_v2, %v5949_v45 }
0x2c1d   :  { %5982 = vadd.xlane.f32.xlu0 %v5978_v3  ;;  %v5971_v8 = vmul.f32 %v6603_v55, %v5963_v24 }
0x2c1f   :  { %v5979_v14 = vadd.f32 %v6604_v60, %v5971_v8 }
0x2c21   :  { %5984 = vadd.xlane.f32.xlu1 %v5979_v14 }
0x2ca6   :  { %v5983_v28 = vpop.xlane.xlu0 %5982 }
0x2ca7   :  { %v5986_v31 = vmul.f32 0.03125, %v5983_v28 }
0x2ca9   :  { %v5988_v33 = vsub.f32 %v5978_v3, %v5986_v31 }
0x2caa   :  { %v5985_v61 = vpop.xlane.xlu1 %5984 }
0x2cab   :  { %v5990_v54 = vmul.f32 %v9088_v37, %v5988_v33  ;;  %v5987_v38 = vmul.f32 0.03125, %v5985_v61 }
0x2cad   :  { %v5989_v6 = vsub.f32 %v5979_v14, %v5987_v38  ;;  %v5992_v9 = vmul.f32 %v5990_v54, %v5990_v54 }
0x2caf   :  { %v5991_v53 = vmul.f32 %v9088_v37, %v5989_v6  ;;  %5994 = vadd.xlane.f32.xlu0 %v5992_v9  ;;  %v7789_v37 = vld [vmem:[#allocation35 + $0x8] sm:$0xff]  }
0x2cb0   :  { %7398 = vmatpush3.bf16.msra.mxu0 %v7789_v37 }
0x2cb1   :  { %v5993_v16 = vmul.f32 %v5991_v53, %v5991_v53  ;;  %7399 = vmatprep.subr.bf16.mxu0 %v8609_v1 }
0x2cb3   :  { %5996 = vadd.xlane.f32.xlu1 %v5993_v16 }
0x2cb4   :  { %7400 = vmatpush3.bf16.msra.mxu0 %v7790_v17 }
0x2d38   :  { %v5995_v27 = vpop.xlane.xlu0 %5994 }
0x2d39   :  { %v5998_v30 = vmul.f32 0.03125, %v5995_v27 }
0x2d3b   :  { %v6000_v23 = vadd.f32 1e-05, %v5998_v30 }
0x2d3c   :  { %v5997_v44 = vpop.xlane.xlu1 %5996 }
0x2d3d   :  { %8027 = vrsqrt.f32 %v6000_v23  ;;  %v5999_v35 = vmul.f32 0.03125, %v5997_v44 }
0x2d3f   :  { %v6001_v12 = vadd.f32 1e-05, %v5999_v35 }
0x2d41   :  { %8029 = vrsqrt.f32 %v6001_v12 }
0x2d4a   :  { %v8028_v26 = vpop.eup %8027 }
0x2d4b   :  { %v6004_v49 = vmul.f32 %v8028_v26, %v5990_v54 }
0x2d4d   :  { %v6012_v48 = vmul.f32 %v6605_v40, %v6004_v49 }
0x2d4e   :  { %v8030_v32 = vpop.eup %8029 }
0x2d4f   :  { %v6005_v15 = vmul.f32 %v8030_v32, %v5991_v53  ;;  %v6020_v47 = vadd.f32 %v6606_v42, %v6012_v48 }
0x2d51   :  { %v6013_v11 = vmul.f32 %v6605_v40, %v6005_v15 }
0x2d53   :  { %v6021_v58 = vadd.f32 %v6606_v42, %v6013_v11 }
0x2d55   :  { %v6039_v1 = vpack.c.bf16 %v6021_v58, %v6020_v47 }
0x2d57   :  { %7402 = vmatmul.mubr.bf16.vlgmr.msra.gmra.mxu0 %v6039_v1 }
0x2e17   :  { %v6128_v0 = vpop.f32.mrf.mxu0 }
0x2e18   :  { %v6129_v50 = vadd.f32 %v6607_v43, %v6128_v0 }
0x2e19   :  { %v7403_v34 = vpop.f32.mrf.mxu0 }
0x2e1a   :  { %6135 = vst [vmem:[#allocation38] sm:$0xff] %v6129_v50 }
0x2e1b   :  { %v6131_v10 = vpop.f32.mrf.mxu0 }
0x2e1c   :  { %v6132_v21 = vadd.f32 %v6607_v43, %v6131_v10 }
0x2e1d   :  { %v7404_v25 = vpop.f32.mrf.mxu0 }
0x2e1e   :  { %6136 = vst [vmem:[#allocation38 + $0x8] sm:$0xff] %v6132_v21 }
0x2e1f   :  { %8504 = shalt.err (!%p8501_p7)
}
0x2e20   :  { %6148 = dma.vmem_to_hbm [thread:$0]  %s6143_s29, 256, %s8821_s9, [#allocation4], %s8600_s12, %s8600_s12, %s8601_s15  }
0x2e21   :  { %8537 = dma.done.wait [#allocation4], 256  }
0x2e22   :  { %8538 = vsyncadd [#allocation4], 4294967040 }
0x2e23   :  { %6152 = vsyncpa [#allocation3], 1 }
0x2e24   :  { %6153 = vsyncpa [#allocation6], 1 }
0x2e25   :  { %6154 = vsyncpa [#allocation9], 1 }
0x2e26   :  { %6155 = vsyncpa [#allocation12], 1 }
0x2e27   :  { %6156 = vsyncpa [#allocation15], 1 }
0x2e28   :  { %6157 = vsyncpa [#allocation18], 1 }
0x2e29   :  { %6158 = vsyncpa [#allocation21], 1 }
0x2e2a   :  { %6159 = vsyncpa [#allocation24], 1 }
0x2e2b   :  { %6160 = vsyncpa [#allocation27], 1 }
0x2e2c   :  { %6161 = vsyncpa [#allocation30], 1 }
0x2e2d   :  { %6162 = vsyncpa [#allocation33], 1 }
0x2e2e   :  { %6163 = vsyncpa [#allocation36], 1 }
0x2e2f   :  { %6164 = vsyncpa [#allocation4], 1 }

</bundles_post_ra>
